<compile_context>
chip_gen: v5e
topology: v5e:2x2
jax: 0.10.0
libtpu: 0.0.40
codegen_flags: <defaults>
</compile_context>

<pallas_src>
import jax
import jax.numpy as jnp
from jax.experimental import pallas as pl
from jax.experimental.pallas import tpu as pltpu


def _pick_row_tile(rows, max_tile=2048):
    """Largest multiple-of-16 divisor of `rows` <= max_tile, preferring >= 2 grid
    steps so the (parallel) row axis can shard across TensorCores on v7x."""
    if rows <= 16:
        return rows
    cap = min(max_tile, rows // 2)
    cap = max(16, (cap // 16) * 16)
    for t in range(cap, 15, -16):
        if rows % t == 0:
            return t
    return rows


def _full_spec(shape):
    zeros = (0,) * len(shape)
    return pl.BlockSpec(shape, lambda i, _z=zeros: _z)


# ---------------------------------------------------------------------------
# Fused Conv1d(stride==k) + MaxPool1d(2,2) + BatchNorm1d(eval) + ReLU block.
# Input rows are contiguous (even-window | odd-window) im2col rows; w0/w1 are
# the zero-padded even/odd weight matrices, so the pooled conv is
# max(a @ w0, a @ w1) with no slicing or gathers anywhere.
# ---------------------------------------------------------------------------
def _conv_block_kernel(a_ref, w0_ref, w1_ref, s_ref, sh_ref, o_ref):
    a = a_ref[...]
    y0 = jnp.dot(a, w0_ref[...], preferred_element_type=jnp.float32)
    y1 = jnp.dot(a, w1_ref[...], preferred_element_type=jnp.float32)
    y = jnp.maximum(y0, y1) * s_ref[...] + sh_ref[...]   # pool + (bias+BN) folded
    o_ref[...] = jnp.maximum(y, 0.0).astype(o_ref.dtype)


def _conv_block(a, w0, w1, scale, shift, *, row_tile):
    rows, width = a.shape
    c_out = w0.shape[1]
    assert rows % row_tile == 0
    grid = (rows // row_tile,)
    return pl.pallas_call(
        _conv_block_kernel,
        out_shape=jax.ShapeDtypeStruct((rows, c_out), jnp.bfloat16),
        grid_spec=pltpu.PrefetchScalarGridSpec(
            num_scalar_prefetch=0,
            grid=grid,
            in_specs=[
                pl.BlockSpec((row_tile, width), lambda i: (i, 0)),
                pl.BlockSpec((width, c_out), lambda i: (0, 0)),
                pl.BlockSpec((width, c_out), lambda i: (0, 0)),
                pl.BlockSpec((1, c_out), lambda i: (0, 0)),
                pl.BlockSpec((1, c_out), lambda i: (0, 0)),
            ],
            out_specs=pl.BlockSpec((row_tile, c_out), lambda i: (i, 0)),
        ),
        compiler_params=pltpu.CompilerParams(dimension_semantics=("parallel",)),
    )(a, w0, w1, scale, shift)


# ---------------------------------------------------------------------------
# Fused tail: conv3 + pool + BN + ReLU, conv4 + pool + BN + ReLU, flatten, and
# the 5-layer MLP head, all in one kernel (grid=(1,), everything fits in VMEM).
# a3t_ref is the conv3 im2col grouped by conv4 tap u (residue mod 6), so
# conv4 is a per-tap accumulation with no in-kernel reshape or strided access.
# ---------------------------------------------------------------------------
def _tail_kernel(a3t_ref, w30_ref, w31_ref, s3_ref, sh3_ref,
                 w4t_ref, s4_ref, sh4_ref,
                 wf1_ref, bf1_ref, wf2_ref, bf2_ref, wf3_ref, bf3_ref,
                 wf4_ref, bf4_ref, wp_ref, bp_ref,
                 o_ref, flat_ref):
    rows = a3t_ref.shape[1]                 # B * 8 (batch * final time steps)
    c_out = w4t_ref.shape[2]                # 64
    feat = wf1_ref.shape[0]                 # 512
    t_final = feat // c_out                 # 8
    batch = rows // t_final

    w30 = w30_ref[...]
    w31 = w31_ref[...]
    s3, sh3 = s3_ref[...], sh3_ref[...]

    y_even = jnp.zeros((rows, c_out), jnp.float32)
    y_odd = jnp.zeros((rows, c_out), jnp.float32)
    for u in range(6):                      # conv4 tap / conv3 residue class
        a = a3t_ref[u]                                          # (rows, 640) bf16
        c0 = jnp.dot(a, w30, preferred_element_type=jnp.float32)
        c1 = jnp.dot(a, w31, preferred_element_type=jnp.float32)
        h3u = jnp.maximum(jnp.maximum(c0, c1) * s3 + sh3, 0.0)  # conv3+pool+bn+relu
        h3u = h3u.astype(jnp.bfloat16)
        p = jnp.dot(h3u, w4t_ref[u % 3], preferred_element_type=jnp.float32)
        if u < 3:
            y_even = y_even + p
        else:
            y_odd = y_odd + p
    h4 = jnp.maximum(jnp.maximum(y_even, y_odd) * s4_ref[...] + sh4_ref[...], 0.0)

    # Flatten (B*8, 64) -> (B, 512), time-major (fc1 columns are pre-permuted).
    for b in range(batch):
        for t in range(t_final):
            r = b * t_final + t
            flat_ref[pl.ds(b, 1), pl.ds(t * c_out, c_out)] = h4[r:r + 1, :]

    h = flat_ref[...]
    h = jnp.maximum(jnp.dot(h, wf1_ref[...], preferred_element_type=jnp.float32) + bf1_ref[...], 0.0)
    h = jnp.maximum(jnp.dot(h, wf2_ref[...], preferred_element_type=jnp.float32) + bf2_ref[...], 0.0)
    h = jnp.maximum(jnp.dot(h, wf3_ref[...], preferred_element_type=jnp.float32) + bf3_ref[...], 0.0)
    h = jnp.maximum(jnp.dot(h, wf4_ref[...], preferred_element_type=jnp.float32) + bf4_ref[...], 0.0)
    o_ref[...] = jnp.dot(h, wp_ref[...], preferred_element_type=jnp.float32) + bp_ref[...]


def _tail(a3t, cp):
    _, rows, _ = a3t.shape
    c_out = cp["w4_taps"].shape[2]
    feat = cp["fc1_w"].shape[0]
    batch = rows * c_out // feat
    args = [a3t, cp["w3_0"], cp["w3_1"], cp["s3"], cp["sh3"],
            cp["w4_taps"], cp["s4"], cp["sh4"],
            cp["fc1_w"], cp["fc1_b"], cp["fc2_w"], cp["fc2_b"],
            cp["fc3_w"], cp["fc3_b"], cp["fc4_w"], cp["fc4_b"],
            cp["pred_w"], cp["pred_b"]]
    return pl.pallas_call(
        _tail_kernel,
        out_shape=jax.ShapeDtypeStruct((batch, 1), jnp.float32),
        grid_spec=pltpu.PrefetchScalarGridSpec(
            num_scalar_prefetch=0,
            grid=(1,),
            in_specs=[_full_spec(a.shape) for a in args],
            out_specs=pl.BlockSpec((batch, 1), lambda i: (0, 0)),
            scratch_shapes=[pltpu.VMEM((batch, feat), jnp.float32)],
        ),
        compiler_params=pltpu.CompilerParams(dimension_semantics=("arbitrary",)),
    )(*args)


# ---------------------------------------------------------------------------
# Full forward pass (matches SourceCNN.forward, eval-mode BN)
# ---------------------------------------------------------------------------
def source_cnn_forward(x, cp):
    """x: (B, 3, L) float32 NCW (like PyTorch).  Returns (B, 1) float32."""
    B, c_in, L = x.shape
    # The 512-feature flatten pins the shape chain L -> L/10 -> ... -> L/6000 = 8.
    assert L % 6000 == 0 and (L // 6000) * 64 == cp["fc1_w"].shape[0], (
        "SourceCNN requires an input length that flattens to 512 features (L=48000)")

    # Single NCW->NWC transpose; everything downstream is a free reshape.
    xt = jnp.transpose(x, (0, 2, 1)).astype(jnp.bfloat16)        # (B, L, C_in)
    a1 = xt.reshape(B * (L // 10), 10 * c_in)                    # conv1 im2col rows
    h1 = _conv_block(a1, cp["w1_0"], cp["w1_1"], cp["s1"], cp["sh1"],
                     row_tile=_pick_row_tile(B * (L // 10)))

    a2 = h1.reshape(B * (L // 100), 640)                         # conv2 im2col rows
    h2 = _conv_block(a2, cp["w2_0"], cp["w2_1"], cp["s2"], cp["sh2"],
                     row_tile=_pick_row_tile(B * (L // 100)))

    # conv3 + conv4 + flatten + MLP fused into one kernel: group conv3's im2col
    # rows by conv4 tap (residue mod 6) -> (6, B*8, 640).
    a3t = jnp.transpose(h2.reshape(B * (L // 6000), 6, 640), (1, 0, 2))
    return _tail(a3t, cp)


# ---------------------------------------------------------------------------
# Parameters: raw (PyTorch-like) init + one-time kernel-layout preprocessing
# ---------------------------------------------------------------------------
def init_params(key):
    raw = {}
    keys = iter(jax.random.split(key, 64))

    def conv(name, cout, cin, k):
        bound = 1.0 / float(cin * k) ** 0.5
        raw[name + "_w"] = jax.random.uniform(next(keys), (cout, cin, k), jnp.float32, -bound, bound)
        raw[name + "_b"] = jax.random.uniform(next(keys), (cout,), jnp.float32, -bound, bound)

    def bn(name, c):
        raw[name + "_gamma"] = 1.0 + 0.1 * jax.random.normal(next(keys), (c,), jnp.float32)
        raw[name + "_beta"] = 0.1 * jax.random.normal(next(keys), (c,), jnp.float32)
        raw[name + "_mean"] = 0.1 * jax.random.normal(next(keys), (c,), jnp.float32)
        raw[name + "_var"] = 1.0 + 0.1 * jax.random.uniform(next(keys), (c,), jnp.float32)

    def fc(name, cout, cin):
        bound = 1.0 / float(cin) ** 0.5
        raw[name + "_w"] = jax.random.uniform(next(keys), (cout, cin), jnp.float32, -bound, bound)
        raw[name + "_b"] = jax.random.uniform(next(keys), (cout,), jnp.float32, -bound, bound)

    conv("c1", 64, 3, 5);  bn("bn1", 64)
    conv("c2", 64, 64, 5); bn("bn2", 64)
    conv("c3", 64, 64, 5); bn("bn3", 64)
    conv("c4", 64, 64, 3); bn("bn4", 64)
    fc("fc1", 256, 512)
    fc("fc2", 128, 256)
    fc("fc3", 64, 128)
    fc("fc4", 32, 64)
    fc("pred", 1, 32)
    return raw


def prepare_params(raw, eps=1e-5):
    """One-time preprocessing: time-major conv weight matrices zero-padded into
    (even, odd) window pairs, conv bias folded into eval-mode BN scale/shift,
    per-tap conv4 weights, and the fc1 column permutation (channel-major PyTorch
    flatten -> our time-major NWC flatten)."""
    f32, bf16 = jnp.float32, jnp.bfloat16
    cp = {}

    def conv_pair(name, w):
        c_out, c_in, k = w.shape
        wm = jnp.transpose(w, (2, 1, 0)).reshape(k * c_in, c_out)    # time-major
        z = jnp.zeros_like(wm)
        cp[name + "_0"] = jnp.concatenate([wm, z], axis=0).astype(bf16)   # even window
        cp[name + "_1"] = jnp.concatenate([z, wm], axis=0).astype(bf16)   # odd window

    def bn_fold(idx, bias):
        g, b = raw[f"bn{idx}_gamma"], raw[f"bn{idx}_beta"]
        m, v = raw[f"bn{idx}_mean"], raw[f"bn{idx}_var"]
        scale = g / jnp.sqrt(v + eps)
        shift = b - m * scale + bias * scale       # bias folded post-max (exact)
        cp[f"s{idx}"] = scale.reshape(1, -1).astype(f32)
        cp[f"sh{idx}"] = shift.reshape(1, -1).astype(f32)

    conv_pair("w1", raw["c1_w"]); bn_fold(1, raw["c1_b"])
    conv_pair("w2", raw["c2_w"]); bn_fold(2, raw["c2_b"])
    conv_pair("w3", raw["c3_w"]); bn_fold(3, raw["c3_b"])
    cp["w4_taps"] = jnp.transpose(raw["c4_w"], (2, 1, 0)).astype(bf16)   # (k, C_in, C_out)
    bn_fold(4, raw["c4_b"])

    c_out, t_final = 64, 8
    w1 = raw["fc1_w"]                              # (256, 512), columns = c*8 + t
    cp["fc1_w"] = jnp.transpose(w1.reshape(w1.shape[0], c_out, t_final),
                                (2, 1, 0)).reshape(c_out * t_final, w1.shape[0]).astype(f32)
    cp["fc1_b"] = raw["fc1_b"].reshape(1, -1).astype(f32)
    for n in ("fc2", "fc3", "fc4", "pred"):
        cp[n + "_w"] = jnp.transpose(raw[n + "_w"]).astype(f32)
        cp[n + "_b"] = raw[n + "_b"].reshape(1, -1).astype(f32)
    return cp


if __name__ == "__main__":
    key = jax.random.PRNGKey(0)
    pkey, xkey = jax.random.split(key)
    raw = init_params(pkey)
    cp = prepare_params(raw)
    # SourceCNN hard-requires 512 flattened features into fc1, which pins the
    # input length: 48000 -> 9600 -> 4800 -> 960 -> 480 -> 96 -> 48 -> 16 -> 8
    # time steps, 64 channels * 8 = 512.  Batch kept small (2).
    x = jax.random.normal(xkey, (2, 3, 48000), jnp.float32)
    fwd = jax.jit(source_cnn_forward)
    out = jax.block_until_ready(fwd(x, cp))
    assert out.shape == (2, 1) and bool(jnp.all(jnp.isfinite(out)))
    print("KERNEL_OK")
</pallas_src>

<mosaic_0001>
module attributes {stable_mosaic.version = 11 : i64} {
  func.func @_conv_block_kernel(%arg0: i32, %arg1: memref<1920x30xbf16, #tpu.memory_space<vmem>>, %arg2: memref<30x64xbf16, #tpu.memory_space<vmem>>, %arg3: memref<30x64xbf16, #tpu.memory_space<vmem>>, %arg4: memref<1x64xf32, #tpu.memory_space<vmem>>, %arg5: memref<1x64xf32, #tpu.memory_space<vmem>>, %arg6: memref<1920x64xbf16, #tpu.memory_space<vmem>>) attributes {dimension_semantics = [#tpu.dimension_semantics<parallel>], iteration_bounds = array<i64: 5>, scalar_prefetch = 0 : i64, scratch_operands = 0 : i64, tpu.core_type = #tpu.core_type<tc>, window_params = [{transform_indices = @transform_0, window_bounds = array<i64: 1920, 30>}, {pipeline_mode = #tpu.pipeline_mode<synchronous>, transform_indices = @transform_1, window_bounds = array<i64: 30, 64>}, {pipeline_mode = #tpu.pipeline_mode<synchronous>, transform_indices = @transform_2, window_bounds = array<i64: 30, 64>}, {pipeline_mode = #tpu.pipeline_mode<synchronous>, transform_indices = @transform_3, window_bounds = array<i64: 1, 64>}, {pipeline_mode = #tpu.pipeline_mode<synchronous>, transform_indices = @transform_4, window_bounds = array<i64: 1, 64>}, {transform_indices = @transform_5, window_bounds = array<i64: 1920, 64>}]} {
    %c0 = arith.constant 0 : index
    %c0_0 = arith.constant 0 : index
    %0 = vector.load %arg1[%c0, %c0_0] : memref<1920x30xbf16, #tpu.memory_space<vmem>>, vector<1920x30xbf16>
    %c0_1 = arith.constant 0 : index
    %c0_2 = arith.constant 0 : index
    %1 = vector.load %arg2[%c0_1, %c0_2] : memref<30x64xbf16, #tpu.memory_space<vmem>>, vector<30x64xbf16>
    %cst = arith.constant dense<0.000000e+00> : vector<1920x64xf32>
    %2 = tpu.matmul %0, %1, %cst {dimension_numbers = #tpu.dot_dimension_numbers<[1], [0], [0], [1], [0, 0, 1, 1], [], []>} : vector<1920x30xbf16>, vector<30x64xbf16>, vector<1920x64xf32> -> vector<1920x64xf32>
    %c0_3 = arith.constant 0 : index
    %c0_4 = arith.constant 0 : index
    %3 = vector.load %arg3[%c0_3, %c0_4] : memref<30x64xbf16, #tpu.memory_space<vmem>>, vector<30x64xbf16>
    %cst_5 = arith.constant dense<0.000000e+00> : vector<1920x64xf32>
    %4 = tpu.matmul %0, %3, %cst_5 {dimension_numbers = #tpu.dot_dimension_numbers<[1], [0], [0], [1], [0, 0, 1, 1], [], []>} : vector<1920x30xbf16>, vector<30x64xbf16>, vector<1920x64xf32> -> vector<1920x64xf32>
    %5 = arith.maximumf %2, %4 : vector<1920x64xf32>
    %c0_6 = arith.constant 0 : index
    %c0_7 = arith.constant 0 : index
    %6 = vector.load %arg4[%c0_6, %c0_7] : memref<1x64xf32, #tpu.memory_space<vmem>>, vector<1x64xf32>
    %7 = vector.broadcast %6 : vector<1x64xf32> to vector<1920x64xf32>
    %8 = arith.mulf %5, %7 : vector<1920x64xf32>
    %c0_8 = arith.constant 0 : index
    %c0_9 = arith.constant 0 : index
    %9 = vector.load %arg5[%c0_8, %c0_9] : memref<1x64xf32, #tpu.memory_space<vmem>>, vector<1x64xf32>
    %10 = vector.broadcast %9 : vector<1x64xf32> to vector<1920x64xf32>
    %11 = arith.addf %8, %10 : vector<1920x64xf32>
    %cst_10 = arith.constant 0.000000e+00 : f32
    %12 = vector.broadcast %cst_10 : f32 to vector<1920x64xf32>
    %13 = arith.maximumf %11, %12 : vector<1920x64xf32>
    %14 = arith.truncf %13 : vector<1920x64xf32> to vector<1920x64xbf16>
    %c0_11 = arith.constant 0 : index
    %c0_12 = arith.constant 0 : index
    %15 = vector.load %arg6[%c0_11, %c0_12] : memref<1920x64xbf16, #tpu.memory_space<vmem>>, vector<1920x64xbf16>
    tpu.vector_store %arg6[%c0_11, %c0_12], %14 {strides = array<i32>} : memref<1920x64xbf16, #tpu.memory_space<vmem>>, vector<1920x64xbf16>,
    return
  }
  func.func @transform_0(%arg0: i32) -> (i32, i32) {
    %c0_i32 = arith.constant 0 : i32
    %c0_i32_0 = arith.constant 0 : i32
    return %arg0, %c0_i32 : i32, i32
  }
  func.func @transform_1(%arg0: i32) -> (i32, i32) {
    %c0_i32 = arith.constant 0 : i32
    %c0_i32_0 = arith.constant 0 : i32
    %c0_i32_1 = arith.constant 0 : i32
    return %c0_i32, %c0_i32_0 : i32, i32
  }
  func.func @transform_2(%arg0: i32) -> (i32, i32) {
    %c0_i32 = arith.constant 0 : i32
    %c0_i32_0 = arith.constant 0 : i32
    %c0_i32_1 = arith.constant 0 : i32
    return %c0_i32, %c0_i32_0 : i32, i32
  }
  func.func @transform_3(%arg0: i32) -> (i32, i32) {
    %c0_i32 = arith.constant 0 : i32
    %c0_i32_0 = arith.constant 0 : i32
    %c0_i32_1 = arith.constant 0 : i32
    return %c0_i32, %c0_i32_0 : i32, i32
  }
  func.func @transform_4(%arg0: i32) -> (i32, i32) {
    %c0_i32 = arith.constant 0 : i32
    %c0_i32_0 = arith.constant 0 : i32
    %c0_i32_1 = arith.constant 0 : i32
    return %c0_i32, %c0_i32_0 : i32, i32
  }
  func.func @transform_5(%arg0: i32) -> (i32, i32) {
    %c0_i32 = arith.constant 0 : i32
    %c0_i32_0 = arith.constant 0 : i32
    return %arg0, %c0_i32 : i32, i32
  }
}

module attributes {stable_mosaic.version = 11 : i64} {
  func.func @_conv_block_kernel(%arg0: i32, %arg1: memref<480x640xbf16, #tpu.memory_space<vmem>>, %arg2: memref<640x64xbf16, #tpu.memory_space<vmem>>, %arg3: memref<640x64xbf16, #tpu.memory_space<vmem>>, %arg4: memref<1x64xf32, #tpu.memory_space<vmem>>, %arg5: memref<1x64xf32, #tpu.memory_space<vmem>>, %arg6: memref<480x64xbf16, #tpu.memory_space<vmem>>) attributes {dimension_semantics = [#tpu.dimension_semantics<parallel>], iteration_bounds = array<i64: 2>, scalar_prefetch = 0 : i64, scratch_operands = 0 : i64, tpu.core_type = #tpu.core_type<tc>, window_params = [{transform_indices = @transform_0, window_bounds = array<i64: 480, 640>}, {pipeline_mode = #tpu.pipeline_mode<synchronous>, transform_indices = @transform_1, window_bounds = array<i64: 640, 64>}, {pipeline_mode = #tpu.pipeline_mode<synchronous>, transform_indices = @transform_2, window_bounds = array<i64: 640, 64>}, {pipeline_mode = #tpu.pipeline_mode<synchronous>, transform_indices = @transform_3, window_bounds = array<i64: 1, 64>}, {pipeline_mode = #tpu.pipeline_mode<synchronous>, transform_indices = @transform_4, window_bounds = array<i64: 1, 64>}, {transform_indices = @transform_5, window_bounds = array<i64: 480, 64>}]} {
    %c0 = arith.constant 0 : index
    %c0_0 = arith.constant 0 : index
    %0 = vector.load %arg1[%c0, %c0_0] : memref<480x640xbf16, #tpu.memory_space<vmem>>, vector<480x640xbf16>
    %c0_1 = arith.constant 0 : index
    %c0_2 = arith.constant 0 : index
    %1 = vector.load %arg2[%c0_1, %c0_2] : memref<640x64xbf16, #tpu.memory_space<vmem>>, vector<640x64xbf16>
    %cst = arith.constant dense<0.000000e+00> : vector<480x64xf32>
    %2 = tpu.matmul %0, %1, %cst {dimension_numbers = #tpu.dot_dimension_numbers<[1], [0], [0], [1], [0, 0, 1, 1], [], []>} : vector<480x640xbf16>, vector<640x64xbf16>, vector<480x64xf32> -> vector<480x64xf32>
    %c0_3 = arith.constant 0 : index
    %c0_4 = arith.constant 0 : index
    %3 = vector.load %arg3[%c0_3, %c0_4] : memref<640x64xbf16, #tpu.memory_space<vmem>>, vector<640x64xbf16>
    %cst_5 = arith.constant dense<0.000000e+00> : vector<480x64xf32>
    %4 = tpu.matmul %0, %3, %cst_5 {dimension_numbers = #tpu.dot_dimension_numbers<[1], [0], [0], [1], [0, 0, 1, 1], [], []>} : vector<480x640xbf16>, vector<640x64xbf16>, vector<480x64xf32> -> vector<480x64xf32>
    %5 = arith.maximumf %2, %4 : vector<480x64xf32>
    %c0_6 = arith.constant 0 : index
    %c0_7 = arith.constant 0 : index
    %6 = vector.load %arg4[%c0_6, %c0_7] : memref<1x64xf32, #tpu.memory_space<vmem>>, vector<1x64xf32>
    %7 = vector.broadcast %6 : vector<1x64xf32> to vector<480x64xf32>
    %8 = arith.mulf %5, %7 : vector<480x64xf32>
    %c0_8 = arith.constant 0 : index
    %c0_9 = arith.constant 0 : index
    %9 = vector.load %arg5[%c0_8, %c0_9] : memref<1x64xf32, #tpu.memory_space<vmem>>, vector<1x64xf32>
    %10 = vector.broadcast %9 : vector<1x64xf32> to vector<480x64xf32>
    %11 = arith.addf %8, %10 : vector<480x64xf32>
    %cst_10 = arith.constant 0.000000e+00 : f32
    %12 = vector.broadcast %cst_10 : f32 to vector<480x64xf32>
    %13 = arith.maximumf %11, %12 : vector<480x64xf32>
    %14 = arith.truncf %13 : vector<480x64xf32> to vector<480x64xbf16>
    %c0_11 = arith.constant 0 : index
    %c0_12 = arith.constant 0 : index
    %15 = vector.load %arg6[%c0_11, %c0_12] : memref<480x64xbf16, #tpu.memory_space<vmem>>, vector<480x64xbf16>
    tpu.vector_store %arg6[%c0_11, %c0_12], %14 {strides = array<i32>} : memref<480x64xbf16, #tpu.memory_space<vmem>>, vector<480x64xbf16>,
    return
  }
  func.func @transform_0(%arg0: i32) -> (i32, i32) {
    %c0_i32 = arith.constant 0 : i32
    %c0_i32_0 = arith.constant 0 : i32
    return %arg0, %c0_i32 : i32, i32
  }
  func.func @transform_1(%arg0: i32) -> (i32, i32) {
    %c0_i32 = arith.constant 0 : i32
    %c0_i32_0 = arith.constant 0 : i32
    %c0_i32_1 = arith.constant 0 : i32
    return %c0_i32, %c0_i32_0 : i32, i32
  }
  func.func @transform_2(%arg0: i32) -> (i32, i32) {
    %c0_i32 = arith.constant 0 : i32
    %c0_i32_0 = arith.constant 0 : i32
    %c0_i32_1 = arith.constant 0 : i32
    return %c0_i32, %c0_i32_0 : i32, i32
  }
  func.func @transform_3(%arg0: i32) -> (i32, i32) {
    %c0_i32 = arith.constant 0 : i32
    %c0_i32_0 = arith.constant 0 : i32
    %c0_i32_1 = arith.constant 0 : i32
    return %c0_i32, %c0_i32_0 : i32, i32
  }
  func.func @transform_4(%arg0: i32) -> (i32, i32) {
    %c0_i32 = arith.constant 0 : i32
    %c0_i32_0 = arith.constant 0 : i32
    %c0_i32_1 = arith.constant 0 : i32
    return %c0_i32, %c0_i32_0 : i32, i32
  }
  func.func @transform_5(%arg0: i32) -> (i32, i32) {
    %c0_i32 = arith.constant 0 : i32
    %c0_i32_0 = arith.constant 0 : i32
    return %arg0, %c0_i32 : i32, i32
  }
}

module attributes {stable_mosaic.version = 11 : i64} {
  func.func @_tail_kernel(%arg0: i32, %arg1: memref<6x16x640xbf16, #tpu.memory_space<vmem>>, %arg2: memref<640x64xbf16, #tpu.memory_space<vmem>>, %arg3: memref<640x64xbf16, #tpu.memory_space<vmem>>, %arg4: memref<1x64xf32, #tpu.memory_space<vmem>>, %arg5: memref<1x64xf32, #tpu.memory_space<vmem>>, %arg6: memref<3x64x64xbf16, #tpu.memory_space<vmem>>, %arg7: memref<1x64xf32, #tpu.memory_space<vmem>>, %arg8: memref<1x64xf32, #tpu.memory_space<vmem>>, %arg9: memref<512x256xf32, #tpu.memory_space<vmem>>, %arg10: memref<1x256xf32, #tpu.memory_space<vmem>>, %arg11: memref<256x128xf32, #tpu.memory_space<vmem>>, %arg12: memref<1x128xf32, #tpu.memory_space<vmem>>, %arg13: memref<128x64xf32, #tpu.memory_space<vmem>>, %arg14: memref<1x64xf32, #tpu.memory_space<vmem>>, %arg15: memref<64x32xf32, #tpu.memory_space<vmem>>, %arg16: memref<1x32xf32, #tpu.memory_space<vmem>>, %arg17: memref<32x1xf32, #tpu.memory_space<vmem>>, %arg18: memref<1x1xf32, #tpu.memory_space<vmem>>, %arg19: memref<2x1xf32, #tpu.memory_space<vmem>>, %arg20: memref<2x512xf32, #tpu.memory_space<vmem>>) attributes {dimension_semantics = [#tpu.dimension_semantics<arbitrary>], iteration_bounds = array<i64: 1>, scalar_prefetch = 0 : i64, scratch_operands = 1 : i64, tpu.core_type = #tpu.core_type<tc>, window_params = [{pipeline_mode = #tpu.pipeline_mode<synchronous>, transform_indices = @transform_0, window_bounds = array<i64: 6, 16, 640>}, {pipeline_mode = #tpu.pipeline_mode<synchronous>, transform_indices = @transform_1, window_bounds = array<i64: 640, 64>}, {pipeline_mode = #tpu.pipeline_mode<synchronous>, transform_indices = @transform_2, window_bounds = array<i64: 640, 64>}, {pipeline_mode = #tpu.pipeline_mode<synchronous>, transform_indices = @transform_3, window_bounds = array<i64: 1, 64>}, {pipeline_mode = #tpu.pipeline_mode<synchronous>, transform_indices = @transform_4, window_bounds = array<i64: 1, 64>}, {pipeline_mode = #tpu.pipeline_mode<synchronous>, transform_indices = @transform_5, window_bounds = array<i64: 3, 64, 64>}, {pipeline_mode = #tpu.pipeline_mode<synchronous>, transform_indices = @transform_6, window_bounds = array<i64: 1, 64>}, {pipeline_mode = #tpu.pipeline_mode<synchronous>, transform_indices = @transform_7, window_bounds = array<i64: 1, 64>}, {pipeline_mode = #tpu.pipeline_mode<synchronous>, transform_indices = @transform_8, window_bounds = array<i64: 512, 256>}, {pipeline_mode = #tpu.pipeline_mode<synchronous>, transform_indices = @transform_9, window_bounds = array<i64: 1, 256>}, {pipeline_mode = #tpu.pipeline_mode<synchronous>, transform_indices = @transform_10, window_bounds = array<i64: 256, 128>}, {pipeline_mode = #tpu.pipeline_mode<synchronous>, transform_indices = @transform_11, window_bounds = array<i64: 1, 128>}, {pipeline_mode = #tpu.pipeline_mode<synchronous>, transform_indices = @transform_12, window_bounds = array<i64: 128, 64>}, {pipeline_mode = #tpu.pipeline_mode<synchronous>, transform_indices = @transform_13, window_bounds = array<i64: 1, 64>}, {pipeline_mode = #tpu.pipeline_mode<synchronous>, transform_indices = @transform_14, window_bounds = array<i64: 64, 32>}, {pipeline_mode = #tpu.pipeline_mode<synchronous>, transform_indices = @transform_15, window_bounds = array<i64: 1, 32>}, {pipeline_mode = #tpu.pipeline_mode<synchronous>, transform_indices = @transform_16, window_bounds = array<i64: 32, 1>}, {pipeline_mode = #tpu.pipeline_mode<synchronous>, transform_indices = @transform_17, window_bounds = array<i64: 1, 1>}, {pipeline_mode = #tpu.pipeline_mode<synchronous>, transform_indices = @transform_18, window_bounds = array<i64: 2, 1>}]} {
    %c0 = arith.constant 0 : index
    %c0_0 = arith.constant 0 : index
    %0 = vector.load %arg2[%c0, %c0_0] : memref<640x64xbf16, #tpu.memory_space<vmem>>, vector<640x64xbf16>
    %c0_1 = arith.constant 0 : index
    %c0_2 = arith.constant 0 : index
    %1 = vector.load %arg3[%c0_1, %c0_2] : memref<640x64xbf16, #tpu.memory_space<vmem>>, vector<640x64xbf16>
    %c0_3 = arith.constant 0 : index
    %c0_4 = arith.constant 0 : index
    %2 = vector.load %arg4[%c0_3, %c0_4] : memref<1x64xf32, #tpu.memory_space<vmem>>, vector<1x64xf32>
    %c0_5 = arith.constant 0 : index
    %c0_6 = arith.constant 0 : index
    %3 = vector.load %arg5[%c0_5, %c0_6] : memref<1x64xf32, #tpu.memory_space<vmem>>, vector<1x64xf32>
    %cst = arith.constant 0.000000e+00 : f32
    %4 = vector.broadcast %cst : f32 to vector<16x64xf32>
    %cst_7 = arith.constant 0.000000e+00 : f32
    %5 = vector.broadcast %cst_7 : f32 to vector<16x64xf32>
    %c0_8 = arith.constant 0 : index
    %c0_9 = arith.constant 0 : index
    %c0_10 = arith.constant 0 : index
    %6 = vector.load %arg1[%c0_8, %c0_9, %c0_10] : memref<6x16x640xbf16, #tpu.memory_space<vmem>>, vector<1x16x640xbf16>
    %7 = vector.shape_cast %6 : vector<1x16x640xbf16> to vector<16x640xbf16>
    %cst_11 = arith.constant dense<0.000000e+00> : vector<16x64xf32>
    %8 = tpu.matmul %7, %0, %cst_11 {dimension_numbers = #tpu.dot_dimension_numbers<[1], [0], [0], [1], [0, 0, 1, 1], [], []>} : vector<16x640xbf16>, vector<640x64xbf16>, vector<16x64xf32> -> vector<16x64xf32>
    %cst_12 = arith.constant dense<0.000000e+00> : vector<16x64xf32>
    %9 = tpu.matmul %7, %1, %cst_12 {dimension_numbers = #tpu.dot_dimension_numbers<[1], [0], [0], [1], [0, 0, 1, 1], [], []>} : vector<16x640xbf16>, vector<640x64xbf16>, vector<16x64xf32> -> vector<16x64xf32>
    %10 = arith.maximumf %8, %9 : vector<16x64xf32>
    %11 = vector.broadcast %2 : vector<1x64xf32> to vector<16x64xf32>
    %12 = arith.mulf %10, %11 : vector<16x64xf32>
    %13 = vector.broadcast %3 : vector<1x64xf32> to vector<16x64xf32>
    %14 = arith.addf %12, %13 : vector<16x64xf32>
    %cst_13 = arith.constant 0.000000e+00 : f32
    %15 = vector.broadcast %cst_13 : f32 to vector<16x64xf32>
    %16 = arith.maximumf %14, %15 : vector<16x64xf32>
    %17 = arith.truncf %16 : vector<16x64xf32> to vector<16x64xbf16>
    %c0_14 = arith.constant 0 : index
    %c0_15 = arith.constant 0 : index
    %c0_16 = arith.constant 0 : index
    %18 = vector.load %arg6[%c0_14, %c0_15, %c0_16] : memref<3x64x64xbf16, #tpu.memory_space<vmem>>, vector<1x64x64xbf16>
    %19 = vector.shape_cast %18 : vector<1x64x64xbf16> to vector<64x64xbf16>
    %cst_17 = arith.constant dense<0.000000e+00> : vector<16x64xf32>
    %20 = tpu.matmul %17, %19, %cst_17 {dimension_numbers = #tpu.dot_dimension_numbers<[1], [0], [0], [1], [0, 0, 1, 1], [], []>} : vector<16x64xbf16>, vector<64x64xbf16>, vector<16x64xf32> -> vector<16x64xf32>
    %21 = arith.addf %4, %20 : vector<16x64xf32>
    %c1 = arith.constant 1 : index
    %c0_18 = arith.constant 0 : index
    %c0_19 = arith.constant 0 : index
    %22 = vector.load %arg1[%c1, %c0_18, %c0_19] : memref<6x16x640xbf16, #tpu.memory_space<vmem>>, vector<1x16x640xbf16>
    %23 = vector.shape_cast %22 : vector<1x16x640xbf16> to vector<16x640xbf16>
    %cst_20 = arith.constant dense<0.000000e+00> : vector<16x64xf32>
    %24 = tpu.matmul %23, %0, %cst_20 {dimension_numbers = #tpu.dot_dimension_numbers<[1], [0], [0], [1], [0, 0, 1, 1], [], []>} : vector<16x640xbf16>, vector<640x64xbf16>, vector<16x64xf32> -> vector<16x64xf32>
    %cst_21 = arith.constant dense<0.000000e+00> : vector<16x64xf32>
    %25 = tpu.matmul %23, %1, %cst_21 {dimension_numbers = #tpu.dot_dimension_numbers<[1], [0], [0], [1], [0, 0, 1, 1], [], []>} : vector<16x640xbf16>, vector<640x64xbf16>, vector<16x64xf32> -> vector<16x64xf32>
    %26 = arith.maximumf %24, %25 : vector<16x64xf32>
    %27 = vector.broadcast %2 : vector<1x64xf32> to vector<16x64xf32>
    %28 = arith.mulf %26, %27 : vector<16x64xf32>
    %29 = vector.broadcast %3 : vector<1x64xf32> to vector<16x64xf32>
    %30 = arith.addf %28, %29 : vector<16x64xf32>
    %cst_22 = arith.constant 0.000000e+00 : f32
    %31 = vector.broadcast %cst_22 : f32 to vector<16x64xf32>
    %32 = arith.maximumf %30, %31 : vector<16x64xf32>
    %33 = arith.truncf %32 : vector<16x64xf32> to vector<16x64xbf16>
    %c1_23 = arith.constant 1 : index
    %c0_24 = arith.constant 0 : index
    %c0_25 = arith.constant 0 : index
    %34 = vector.load %arg6[%c1_23, %c0_24, %c0_25] : memref<3x64x64xbf16, #tpu.memory_space<vmem>>, vector<1x64x64xbf16>
    %35 = vector.shape_cast %34 : vector<1x64x64xbf16> to vector<64x64xbf16>
    %cst_26 = arith.constant dense<0.000000e+00> : vector<16x64xf32>
    %36 = tpu.matmul %33, %35, %cst_26 {dimension_numbers = #tpu.dot_dimension_numbers<[1], [0], [0], [1], [0, 0, 1, 1], [], []>} : vector<16x64xbf16>, vector<64x64xbf16>, vector<16x64xf32> -> vector<16x64xf32>
    %37 = arith.addf %21, %36 : vector<16x64xf32>
    %c2 = arith.constant 2 : index
    %c0_27 = arith.constant 0 : index
    %c0_28 = arith.constant 0 : index
    %38 = vector.load %arg1[%c2, %c0_27, %c0_28] : memref<6x16x640xbf16, #tpu.memory_space<vmem>>, vector<1x16x640xbf16>
    %39 = vector.shape_cast %38 : vector<1x16x640xbf16> to vector<16x640xbf16>
    %cst_29 = arith.constant dense<0.000000e+00> : vector<16x64xf32>
    %40 = tpu.matmul %39, %0, %cst_29 {dimension_numbers = #tpu.dot_dimension_numbers<[1], [0], [0], [1], [0, 0, 1, 1], [], []>} : vector<16x640xbf16>, vector<640x64xbf16>, vector<16x64xf32> -> vector<16x64xf32>
    %cst_30 = arith.constant dense<0.000000e+00> : vector<16x64xf32>
    %41 = tpu.matmul %39, %1, %cst_30 {dimension_numbers = #tpu.dot_dimension_numbers<[1], [0], [0], [1], [0, 0, 1, 1], [], []>} : vector<16x640xbf16>, vector<640x64xbf16>, vector<16x64xf32> -> vector<16x64xf32>
    %42 = arith.maximumf %40, %41 : vector<16x64xf32>
    %43 = vector.broadcast %2 : vector<1x64xf32> to vector<16x64xf32>
    %44 = arith.mulf %42, %43 : vector<16x64xf32>
    %45 = vector.broadcast %3 : vector<1x64xf32> to vector<16x64xf32>
    %46 = arith.addf %44, %45 : vector<16x64xf32>
    %cst_31 = arith.constant 0.000000e+00 : f32
    %47 = vector.broadcast %cst_31 : f32 to vector<16x64xf32>
    %48 = arith.maximumf %46, %47 : vector<16x64xf32>
    %49 = arith.truncf %48 : vector<16x64xf32> to vector<16x64xbf16>
    %c2_32 = arith.constant 2 : index
    %c0_33 = arith.constant 0 : index
    %c0_34 = arith.constant 0 : index
    %50 = vector.load %arg6[%c2_32, %c0_33, %c0_34] : memref<3x64x64xbf16, #tpu.memory_space<vmem>>, vector<1x64x64xbf16>
    %51 = vector.shape_cast %50 : vector<1x64x64xbf16> to vector<64x64xbf16>
    %cst_35 = arith.constant dense<0.000000e+00> : vector<16x64xf32>
    %52 = tpu.matmul %49, %51, %cst_35 {dimension_numbers = #tpu.dot_dimension_numbers<[1], [0], [0], [1], [0, 0, 1, 1], [], []>} : vector<16x64xbf16>, vector<64x64xbf16>, vector<16x64xf32> -> vector<16x64xf32>
    %53 = arith.addf %37, %52 : vector<16x64xf32>
    %c3 = arith.constant 3 : index
    %c0_36 = arith.constant 0 : index
    %c0_37 = arith.constant 0 : index
    %54 = vector.load %arg1[%c3, %c0_36, %c0_37] : memref<6x16x640xbf16, #tpu.memory_space<vmem>>, vector<1x16x640xbf16>
    %55 = vector.shape_cast %54 : vector<1x16x640xbf16> to vector<16x640xbf16>
    %cst_38 = arith.constant dense<0.000000e+00> : vector<16x64xf32>
    %56 = tpu.matmul %55, %0, %cst_38 {dimension_numbers = #tpu.dot_dimension_numbers<[1], [0], [0], [1], [0, 0, 1, 1], [], []>} : vector<16x640xbf16>, vector<640x64xbf16>, vector<16x64xf32> -> vector<16x64xf32>
    %cst_39 = arith.constant dense<0.000000e+00> : vector<16x64xf32>
    %57 = tpu.matmul %55, %1, %cst_39 {dimension_numbers = #tpu.dot_dimension_numbers<[1], [0], [0], [1], [0, 0, 1, 1], [], []>} : vector<16x640xbf16>, vector<640x64xbf16>, vector<16x64xf32> -> vector<16x64xf32>
    %58 = arith.maximumf %56, %57 : vector<16x64xf32>
    %59 = vector.broadcast %2 : vector<1x64xf32> to vector<16x64xf32>
    %60 = arith.mulf %58, %59 : vector<16x64xf32>
    %61 = vector.broadcast %3 : vector<1x64xf32> to vector<16x64xf32>
    %62 = arith.addf %60, %61 : vector<16x64xf32>
    %cst_40 = arith.constant 0.000000e+00 : f32
    %63 = vector.broadcast %cst_40 : f32 to vector<16x64xf32>
    %64 = arith.maximumf %62, %63 : vector<16x64xf32>
    %65 = arith.truncf %64 : vector<16x64xf32> to vector<16x64xbf16>
    %c0_41 = arith.constant 0 : index
    %c0_42 = arith.constant 0 : index
    %c0_43 = arith.constant 0 : index
    %66 = vector.load %arg6[%c0_41, %c0_42, %c0_43] : memref<3x64x64xbf16, #tpu.memory_space<vmem>>, vector<1x64x64xbf16>
    %67 = vector.shape_cast %66 : vector<1x64x64xbf16> to vector<64x64xbf16>
    %cst_44 = arith.constant dense<0.000000e+00> : vector<16x64xf32>
    %68 = tpu.matmul %65, %67, %cst_44 {dimension_numbers = #tpu.dot_dimension_numbers<[1], [0], [0], [1], [0, 0, 1, 1], [], []>} : vector<16x64xbf16>, vector<64x64xbf16>, vector<16x64xf32> -> vector<16x64xf32>
    %69 = arith.addf %5, %68 : vector<16x64xf32>
    %c4 = arith.constant 4 : index
    %c0_45 = arith.constant 0 : index
    %c0_46 = arith.constant 0 : index
    %70 = vector.load %arg1[%c4, %c0_45, %c0_46] : memref<6x16x640xbf16, #tpu.memory_space<vmem>>, vector<1x16x640xbf16>
    %71 = vector.shape_cast %70 : vector<1x16x640xbf16> to vector<16x640xbf16>
    %cst_47 = arith.constant dense<0.000000e+00> : vector<16x64xf32>
    %72 = tpu.matmul %71, %0, %cst_47 {dimension_numbers = #tpu.dot_dimension_numbers<[1], [0], [0], [1], [0, 0, 1, 1], [], []>} : vector<16x640xbf16>, vector<640x64xbf16>, vector<16x64xf32> -> vector<16x64xf32>
    %cst_48 = arith.constant dense<0.000000e+00> : vector<16x64xf32>
    %73 = tpu.matmul %71, %1, %cst_48 {dimension_numbers = #tpu.dot_dimension_numbers<[1], [0], [0], [1], [0, 0, 1, 1], [], []>} : vector<16x640xbf16>, vector<640x64xbf16>, vector<16x64xf32> -> vector<16x64xf32>
    %74 = arith.maximumf %72, %73 : vector<16x64xf32>
    %75 = vector.broadcast %2 : vector<1x64xf32> to vector<16x64xf32>
    %76 = arith.mulf %74, %75 : vector<16x64xf32>
    %77 = vector.broadcast %3 : vector<1x64xf32> to vector<16x64xf32>
    %78 = arith.addf %76, %77 : vector<16x64xf32>
    %cst_49 = arith.constant 0.000000e+00 : f32
    %79 = vector.broadcast %cst_49 : f32 to vector<16x64xf32>
    %80 = arith.maximumf %78, %79 : vector<16x64xf32>
    %81 = arith.truncf %80 : vector<16x64xf32> to vector<16x64xbf16>
    %c1_50 = arith.constant 1 : index
    %c0_51 = arith.constant 0 : index
    %c0_52 = arith.constant 0 : index
    %82 = vector.load %arg6[%c1_50, %c0_51, %c0_52] : memref<3x64x64xbf16, #tpu.memory_space<vmem>>, vector<1x64x64xbf16>
    %83 = vector.shape_cast %82 : vector<1x64x64xbf16> to vector<64x64xbf16>
    %cst_53 = arith.constant dense<0.000000e+00> : vector<16x64xf32>
    %84 = tpu.matmul %81, %83, %cst_53 {dimension_numbers = #tpu.dot_dimension_numbers<[1], [0], [0], [1], [0, 0, 1, 1], [], []>} : vector<16x64xbf16>, vector<64x64xbf16>, vector<16x64xf32> -> vector<16x64xf32>
    %85 = arith.addf %69, %84 : vector<16x64xf32>
    %c5 = arith.constant 5 : index
    %c0_54 = arith.constant 0 : index
    %c0_55 = arith.constant 0 : index
    %86 = vector.load %arg1[%c5, %c0_54, %c0_55] : memref<6x16x640xbf16, #tpu.memory_space<vmem>>, vector<1x16x640xbf16>
    %87 = vector.shape_cast %86 : vector<1x16x640xbf16> to vector<16x640xbf16>
    %cst_56 = arith.constant dense<0.000000e+00> : vector<16x64xf32>
    %88 = tpu.matmul %87, %0, %cst_56 {dimension_numbers = #tpu.dot_dimension_numbers<[1], [0], [0], [1], [0, 0, 1, 1], [], []>} : vector<16x640xbf16>, vector<640x64xbf16>, vector<16x64xf32> -> vector<16x64xf32>
    %cst_57 = arith.constant dense<0.000000e+00> : vector<16x64xf32>
    %89 = tpu.matmul %87, %1, %cst_57 {dimension_numbers = #tpu.dot_dimension_numbers<[1], [0], [0], [1], [0, 0, 1, 1], [], []>} : vector<16x640xbf16>, vector<640x64xbf16>, vector<16x64xf32> -> vector<16x64xf32>
    %90 = arith.maximumf %88, %89 : vector<16x64xf32>
    %91 = vector.broadcast %2 : vector<1x64xf32> to vector<16x64xf32>
    %92 = arith.mulf %90, %91 : vector<16x64xf32>
    %93 = vector.broadcast %3 : vector<1x64xf32> to vector<16x64xf32>
    %94 = arith.addf %92, %93 : vector<16x64xf32>
    %cst_58 = arith.constant 0.000000e+00 : f32
    %95 = vector.broadcast %cst_58 : f32 to vector<16x64xf32>
    %96 = arith.maximumf %94, %95 : vector<16x64xf32>
    %97 = arith.truncf %96 : vector<16x64xf32> to vector<16x64xbf16>
    %c2_59 = arith.constant 2 : index
    %c0_60 = arith.constant 0 : index
    %c0_61 = arith.constant 0 : index
    %98 = vector.load %arg6[%c2_59, %c0_60, %c0_61] : memref<3x64x64xbf16, #tpu.memory_space<vmem>>, vector<1x64x64xbf16>
    %99 = vector.shape_cast %98 : vector<1x64x64xbf16> to vector<64x64xbf16>
    %cst_62 = arith.constant dense<0.000000e+00> : vector<16x64xf32>
    %100 = tpu.matmul %97, %99, %cst_62 {dimension_numbers = #tpu.dot_dimension_numbers<[1], [0], [0], [1], [0, 0, 1, 1], [], []>} : vector<16x64xbf16>, vector<64x64xbf16>, vector<16x64xf32> -> vector<16x64xf32>
    %101 = arith.addf %85, %100 : vector<16x64xf32>
    %102 = arith.maximumf %53, %101 : vector<16x64xf32>
    %c0_63 = arith.constant 0 : index
    %c0_64 = arith.constant 0 : index
    %103 = vector.load %arg7[%c0_63, %c0_64] : memref<1x64xf32, #tpu.memory_space<vmem>>, vector<1x64xf32>
    %104 = vector.broadcast %103 : vector<1x64xf32> to vector<16x64xf32>
    %105 = arith.mulf %102, %104 : vector<16x64xf32>
    %c0_65 = arith.constant 0 : index
    %c0_66 = arith.constant 0 : index
    %106 = vector.load %arg8[%c0_65, %c0_66] : memref<1x64xf32, #tpu.memory_space<vmem>>, vector<1x64xf32>
    %107 = vector.broadcast %106 : vector<1x64xf32> to vector<16x64xf32>
    %108 = arith.addf %105, %107 : vector<16x64xf32>
    %cst_67 = arith.constant 0.000000e+00 : f32
    %109 = vector.broadcast %cst_67 : f32 to vector<16x64xf32>
    %110 = arith.maximumf %108, %109 : vector<16x64xf32>
    %111 = vector.extract_strided_slice %110 {offsets = [0, 0], sizes = [1, 64], strides = [1, 1]} : vector<16x64xf32> to vector<1x64xf32>
    %c0_68 = arith.constant 0 : index
    %c0_69 = arith.constant 0 : index
    %112 = vector.load %arg20[%c0_68, %c0_69] : memref<2x512xf32, #tpu.memory_space<vmem>>, vector<1x64xf32>
    tpu.vector_store %arg20[%c0_68, %c0_69], %111 {strides = array<i32>} : memref<2x512xf32, #tpu.memory_space<vmem>>, vector<1x64xf32>,
    %113 = vector.extract_strided_slice %110 {offsets = [1, 0], sizes = [1, 64], strides = [1, 1]} : vector<16x64xf32> to vector<1x64xf32>
    %c0_70 = arith.constant 0 : index
    %c64 = arith.constant 64 : index
    %114 = vector.load %arg20[%c0_70, %c64] : memref<2x512xf32, #tpu.memory_space<vmem>>, vector<1x64xf32>
    tpu.vector_store %arg20[%c0_70, %c64], %113 {strides = array<i32>} : memref<2x512xf32, #tpu.memory_space<vmem>>, vector<1x64xf32>,
    %115 = vector.extract_strided_slice %110 {offsets = [2, 0], sizes = [1, 64], strides = [1, 1]} : vector<16x64xf32> to vector<1x64xf32>
    %c0_71 = arith.constant 0 : index
    %c128 = arith.constant 128 : index
    %116 = vector.load %arg20[%c0_71, %c128] : memref<2x512xf32, #tpu.memory_space<vmem>>, vector<1x64xf32>
    tpu.vector_store %arg20[%c0_71, %c128], %115 {strides = array<i32>} : memref<2x512xf32, #tpu.memory_space<vmem>>, vector<1x64xf32>,
    %117 = vector.extract_strided_slice %110 {offsets = [3, 0], sizes = [1, 64], strides = [1, 1]} : vector<16x64xf32> to vector<1x64xf32>
    %c0_72 = arith.constant 0 : index
    %c192 = arith.constant 192 : index
    %118 = vector.load %arg20[%c0_72, %c192] : memref<2x512xf32, #tpu.memory_space<vmem>>, vector<1x64xf32>
    tpu.vector_store %arg20[%c0_72, %c192], %117 {strides = array<i32>} : memref<2x512xf32, #tpu.memory_space<vmem>>, vector<1x64xf32>,
    %119 = vector.extract_strided_slice %110 {offsets = [4, 0], sizes = [1, 64], strides = [1, 1]} : vector<16x64xf32> to vector<1x64xf32>
    %c0_73 = arith.constant 0 : index
    %c256 = arith.constant 256 : index
    %120 = vector.load %arg20[%c0_73, %c256] : memref<2x512xf32, #tpu.memory_space<vmem>>, vector<1x64xf32>
    tpu.vector_store %arg20[%c0_73, %c256], %119 {strides = array<i32>} : memref<2x512xf32, #tpu.memory_space<vmem>>, vector<1x64xf32>,
    %121 = vector.extract_strided_slice %110 {offsets = [5, 0], sizes = [1, 64], strides = [1, 1]} : vector<16x64xf32> to vector<1x64xf32>
    %c0_74 = arith.constant 0 : index
    %c320 = arith.constant 320 : index
    %122 = vector.load %arg20[%c0_74, %c320] : memref<2x512xf32, #tpu.memory_space<vmem>>, vector<1x64xf32>
    tpu.vector_store %arg20[%c0_74, %c320], %121 {strides = array<i32>} : memref<2x512xf32, #tpu.memory_space<vmem>>, vector<1x64xf32>,
    %123 = vector.extract_strided_slice %110 {offsets = [6, 0], sizes = [1, 64], strides = [1, 1]} : vector<16x64xf32> to vector<1x64xf32>
    %c0_75 = arith.constant 0 : index
    %c384 = arith.constant 384 : index
    %124 = vector.load %arg20[%c0_75, %c384] : memref<2x512xf32, #tpu.memory_space<vmem>>, vector<1x64xf32>
    tpu.vector_store %arg20[%c0_75, %c384], %123 {strides = array<i32>} : memref<2x512xf32, #tpu.memory_space<vmem>>, vector<1x64xf32>,
    %125 = vector.extract_strided_slice %110 {offsets = [7, 0], sizes = [1, 64], strides = [1, 1]} : vector<16x64xf32> to vector<1x64xf32>
    %c0_76 = arith.constant 0 : index
    %c448 = arith.constant 448 : index
    %126 = vector.load %arg20[%c0_76, %c448] : memref<2x512xf32, #tpu.memory_space<vmem>>, vector<1x64xf32>
    tpu.vector_store %arg20[%c0_76, %c448], %125 {strides = array<i32>} : memref<2x512xf32, #tpu.memory_space<vmem>>, vector<1x64xf32>,
    %127 = vector.extract_strided_slice %110 {offsets = [8, 0], sizes = [1, 64], strides = [1, 1]} : vector<16x64xf32> to vector<1x64xf32>
    %c1_77 = arith.constant 1 : index
    %c0_78 = arith.constant 0 : index
    %128 = vector.load %arg20[%c1_77, %c0_78] : memref<2x512xf32, #tpu.memory_space<vmem>>, vector<1x64xf32>
    tpu.vector_store %arg20[%c1_77, %c0_78], %127 {strides = array<i32>} : memref<2x512xf32, #tpu.memory_space<vmem>>, vector<1x64xf32>,
    %129 = vector.extract_strided_slice %110 {offsets = [9, 0], sizes = [1, 64], strides = [1, 1]} : vector<16x64xf32> to vector<1x64xf32>
    %c1_79 = arith.constant 1 : index
    %c64_80 = arith.constant 64 : index
    %130 = vector.load %arg20[%c1_79, %c64_80] : memref<2x512xf32, #tpu.memory_space<vmem>>, vector<1x64xf32>
    tpu.vector_store %arg20[%c1_79, %c64_80], %129 {strides = array<i32>} : memref<2x512xf32, #tpu.memory_space<vmem>>, vector<1x64xf32>,
    %131 = vector.extract_strided_slice %110 {offsets = [10, 0], sizes = [1, 64], strides = [1, 1]} : vector<16x64xf32> to vector<1x64xf32>
    %c1_81 = arith.constant 1 : index
    %c128_82 = arith.constant 128 : index
    %132 = vector.load %arg20[%c1_81, %c128_82] : memref<2x512xf32, #tpu.memory_space<vmem>>, vector<1x64xf32>
    tpu.vector_store %arg20[%c1_81, %c128_82], %131 {strides = array<i32>} : memref<2x512xf32, #tpu.memory_space<vmem>>, vector<1x64xf32>,
    %133 = vector.extract_strided_slice %110 {offsets = [11, 0], sizes = [1, 64], strides = [1, 1]} : vector<16x64xf32> to vector<1x64xf32>
    %c1_83 = arith.constant 1 : index
    %c192_84 = arith.constant 192 : index
    %134 = vector.load %arg20[%c1_83, %c192_84] : memref<2x512xf32, #tpu.memory_space<vmem>>, vector<1x64xf32>
    tpu.vector_store %arg20[%c1_83, %c192_84], %133 {strides = array<i32>} : memref<2x512xf32, #tpu.memory_space<vmem>>, vector<1x64xf32>,
    %135 = vector.extract_strided_slice %110 {offsets = [12, 0], sizes = [1, 64], strides = [1, 1]} : vector<16x64xf32> to vector<1x64xf32>
    %c1_85 = arith.constant 1 : index
    %c256_86 = arith.constant 256 : index
    %136 = vector.load %arg20[%c1_85, %c256_86] : memref<2x512xf32, #tpu.memory_space<vmem>>, vector<1x64xf32>
    tpu.vector_store %arg20[%c1_85, %c256_86], %135 {strides = array<i32>} : memref<2x512xf32, #tpu.memory_space<vmem>>, vector<1x64xf32>,
    %137 = vector.extract_strided_slice %110 {offsets = [13, 0], sizes = [1, 64], strides = [1, 1]} : vector<16x64xf32> to vector<1x64xf32>
    %c1_87 = arith.constant 1 : index
    %c320_88 = arith.constant 320 : index
    %138 = vector.load %arg20[%c1_87, %c320_88] : memref<2x512xf32, #tpu.memory_space<vmem>>, vector<1x64xf32>
    tpu.vector_store %arg20[%c1_87, %c320_88], %137 {strides = array<i32>} : memref<2x512xf32, #tpu.memory_space<vmem>>, vector<1x64xf32>,
    %139 = vector.extract_strided_slice %110 {offsets = [14, 0], sizes = [1, 64], strides = [1, 1]} : vector<16x64xf32> to vector<1x64xf32>
    %c1_89 = arith.constant 1 : index
    %c384_90 = arith.constant 384 : index
    %140 = vector.load %arg20[%c1_89, %c384_90] : memref<2x512xf32, #tpu.memory_space<vmem>>, vector<1x64xf32>
    tpu.vector_store %arg20[%c1_89, %c384_90], %139 {strides = array<i32>} : memref<2x512xf32, #tpu.memory_space<vmem>>, vector<1x64xf32>,
    %141 = vector.extract_strided_slice %110 {offsets = [15, 0], sizes = [1, 64], strides = [1, 1]} : vector<16x64xf32> to vector<1x64xf32>
    %c1_91 = arith.constant 1 : index
    %c448_92 = arith.constant 448 : index
    %142 = vector.load %arg20[%c1_91, %c448_92] : memref<2x512xf32, #tpu.memory_space<vmem>>, vector<1x64xf32>
    tpu.vector_store %arg20[%c1_91, %c448_92], %141 {strides = array<i32>} : memref<2x512xf32, #tpu.memory_space<vmem>>, vector<1x64xf32>,
    %c0_93 = arith.constant 0 : index
    %c0_94 = arith.constant 0 : index
    %143 = vector.load %arg20[%c0_93, %c0_94] : memref<2x512xf32, #tpu.memory_space<vmem>>, vector<2x512xf32>
    %c0_95 = arith.constant 0 : index
    %c0_96 = arith.constant 0 : index
    %144 = vector.load %arg9[%c0_95, %c0_96] : memref<512x256xf32, #tpu.memory_space<vmem>>, vector<512x256xf32>
    %cst_97 = arith.constant dense<0.000000e+00> : vector<2x256xf32>
    %145 = tpu.matmul %143, %144, %cst_97 {dimension_numbers = #tpu.dot_dimension_numbers<[1], [0], [0], [1], [0, 0, 1, 1], [], []>} : vector<2x512xf32>, vector<512x256xf32>, vector<2x256xf32> -> vector<2x256xf32>
    %c0_98 = arith.constant 0 : index
    %c0_99 = arith.constant 0 : index
    %146 = vector.load %arg10[%c0_98, %c0_99] : memref<1x256xf32, #tpu.memory_space<vmem>>, vector<1x256xf32>
    %147 = vector.broadcast %146 : vector<1x256xf32> to vector<2x256xf32>
    %148 = arith.addf %145, %147 : vector<2x256xf32>
    %cst_100 = arith.constant 0.000000e+00 : f32
    %149 = vector.broadcast %cst_100 : f32 to vector<2x256xf32>
    %150 = arith.maximumf %148, %149 : vector<2x256xf32>
    %c0_101 = arith.constant 0 : index
    %c0_102 = arith.constant 0 : index
    %151 = vector.load %arg11[%c0_101, %c0_102] : memref<256x128xf32, #tpu.memory_space<vmem>>, vector<256x128xf32>
    %cst_103 = arith.constant dense<0.000000e+00> : vector<2x128xf32>
    %152 = tpu.matmul %150, %151, %cst_103 {dimension_numbers = #tpu.dot_dimension_numbers<[1], [0], [0], [1], [0, 0, 1, 1], [], []>} : vector<2x256xf32>, vector<256x128xf32>, vector<2x128xf32> -> vector<2x128xf32>
    %c0_104 = arith.constant 0 : index
    %c0_105 = arith.constant 0 : index
    %153 = vector.load %arg12[%c0_104, %c0_105] : memref<1x128xf32, #tpu.memory_space<vmem>>, vector<1x128xf32>
    %154 = vector.broadcast %153 : vector<1x128xf32> to vector<2x128xf32>
    %155 = arith.addf %152, %154 : vector<2x128xf32>
    %cst_106 = arith.constant 0.000000e+00 : f32
    %156 = vector.broadcast %cst_106 : f32 to vector<2x128xf32>
    %157 = arith.maximumf %155, %156 : vector<2x128xf32>
    %c0_107 = arith.constant 0 : index
    %c0_108 = arith.constant 0 : index
    %158 = vector.load %arg13[%c0_107, %c0_108] : memref<128x64xf32, #tpu.memory_space<vmem>>, vector<128x64xf32>
    %cst_109 = arith.constant dense<0.000000e+00> : vector<2x64xf32>
    %159 = tpu.matmul %157, %158, %cst_109 {dimension_numbers = #tpu.dot_dimension_numbers<[1], [0], [0], [1], [0, 0, 1, 1], [], []>} : vector<2x128xf32>, vector<128x64xf32>, vector<2x64xf32> -> vector<2x64xf32>
    %c0_110 = arith.constant 0 : index
    %c0_111 = arith.constant 0 : index
    %160 = vector.load %arg14[%c0_110, %c0_111] : memref<1x64xf32, #tpu.memory_space<vmem>>, vector<1x64xf32>
    %161 = vector.broadcast %160 : vector<1x64xf32> to vector<2x64xf32>
    %162 = arith.addf %159, %161 : vector<2x64xf32>
    %cst_112 = arith.constant 0.000000e+00 : f32
    %163 = vector.broadcast %cst_112 : f32 to vector<2x64xf32>
    %164 = arith.maximumf %162, %163 : vector<2x64xf32>
    %c0_113 = arith.constant 0 : index
    %c0_114 = arith.constant 0 : index
    %165 = vector.load %arg15[%c0_113, %c0_114] : memref<64x32xf32, #tpu.memory_space<vmem>>, vector<64x32xf32>
    %cst_115 = arith.constant dense<0.000000e+00> : vector<2x32xf32>
    %166 = tpu.matmul %164, %165, %cst_115 {dimension_numbers = #tpu.dot_dimension_numbers<[1], [0], [0], [1], [0, 0, 1, 1], [], []>} : vector<2x64xf32>, vector<64x32xf32>, vector<2x32xf32> -> vector<2x32xf32>
    %c0_116 = arith.constant 0 : index
    %c0_117 = arith.constant 0 : index
    %167 = vector.load %arg16[%c0_116, %c0_117] : memref<1x32xf32, #tpu.memory_space<vmem>>, vector<1x32xf32>
    %168 = vector.broadcast %167 : vector<1x32xf32> to vector<2x32xf32>
    %169 = arith.addf %166, %168 : vector<2x32xf32>
    %cst_118 = arith.constant 0.000000e+00 : f32
    %170 = vector.broadcast %cst_118 : f32 to vector<2x32xf32>
    %171 = arith.maximumf %169, %170 : vector<2x32xf32>
    %c0_119 = arith.constant 0 : index
    %c0_120 = arith.constant 0 : index
    %172 = vector.load %arg17[%c0_119, %c0_120] : memref<32x1xf32, #tpu.memory_space<vmem>>, vector<32x1xf32>
    %cst_121 = arith.constant dense<0.000000e+00> : vector<2x1xf32>
    %173 = tpu.matmul %171, %172, %cst_121 {dimension_numbers = #tpu.dot_dimension_numbers<[1], [0], [0], [1], [0, 0, 1, 1], [], []>} : vector<2x32xf32>, vector<32x1xf32>, vector<2x1xf32> -> vector<2x1xf32>
    %c0_122 = arith.constant 0 : index
    %c0_123 = arith.constant 0 : index
    %174 = vector.load %arg18[%c0_122, %c0_123] : memref<1x1xf32, #tpu.memory_space<vmem>>, vector<1x1xf32>
    %175 = vector.broadcast %174 : vector<1x1xf32> to vector<2x1xf32>
    %176 = arith.addf %173, %175 : vector<2x1xf32>
    %c0_124 = arith.constant 0 : index
    %c0_125 = arith.constant 0 : index
    %177 = vector.load %arg19[%c0_124, %c0_125] : memref<2x1xf32, #tpu.memory_space<vmem>>, vector<2x1xf32>
    tpu.vector_store %arg19[%c0_124, %c0_125], %176 {strides = array<i32>} : memref<2x1xf32, #tpu.memory_space<vmem>>, vector<2x1xf32>,
    return
  }
  func.func @transform_0(%arg0: i32) -> (i32, i32, i32) {
    %c0_i32 = arith.constant 0 : i32
    %c0_i32_0 = arith.constant 0 : i32
    %c0_i32_1 = arith.constant 0 : i32
    %c0_i32_2 = arith.constant 0 : i32
    return %c0_i32, %c0_i32_0, %c0_i32_1 : i32, i32, i32
  }
  func.func @transform_1(%arg0: i32) -> (i32, i32) {
    %c0_i32 = arith.constant 0 : i32
    %c0_i32_0 = arith.constant 0 : i32
    %c0_i32_1 = arith.constant 0 : i32
    return %c0_i32, %c0_i32_0 : i32, i32
  }
  func.func @transform_2(%arg0: i32) -> (i32, i32) {
    %c0_i32 = arith.constant 0 : i32
    %c0_i32_0 = arith.constant 0 : i32
    %c0_i32_1 = arith.constant 0 : i32
    return %c0_i32, %c0_i32_0 : i32, i32
  }
  func.func @transform_3(%arg0: i32) -> (i32, i32) {
    %c0_i32 = arith.constant 0 : i32
    %c0_i32_0 = arith.constant 0 : i32
    %c0_i32_1 = arith.constant 0 : i32
    return %c0_i32, %c0_i32_0 : i32, i32
  }
  func.func @transform_4(%arg0: i32) -> (i32, i32) {
    %c0_i32 = arith.constant 0 : i32
    %c0_i32_0 = arith.constant 0 : i32
    %c0_i32_1 = arith.constant 0 : i32
    return %c0_i32, %c0_i32_0 : i32, i32
  }
  func.func @transform_5(%arg0: i32) -> (i32, i32, i32) {
    %c0_i32 = arith.constant 0 : i32
    %c0_i32_0 = arith.constant 0 : i32
    %c0_i32_1 = arith.constant 0 : i32
    %c0_i32_2 = arith.constant 0 : i32
    return %c0_i32, %c0_i32_0, %c0_i32_1 : i32, i32, i32
  }
  func.func @transform_6(%arg0: i32) -> (i32, i32) {
    %c0_i32 = arith.constant 0 : i32
    %c0_i32_0 = arith.constant 0 : i32
    %c0_i32_1 = arith.constant 0 : i32
    return %c0_i32, %c0_i32_0 : i32, i32
  }
  func.func @transform_7(%arg0: i32) -> (i32, i32) {
    %c0_i32 = arith.constant 0 : i32
    %c0_i32_0 = arith.constant 0 : i32
    %c0_i32_1 = arith.constant 0 : i32
    return %c0_i32, %c0_i32_0 : i32, i32
  }
  func.func @transform_8(%arg0: i32) -> (i32, i32) {
    %c0_i32 = arith.constant 0 : i32
    %c0_i32_0 = arith.constant 0 : i32
    %c0_i32_1 = arith.constant 0 : i32
    return %c0_i32, %c0_i32_0 : i32, i32
  }
  func.func @transform_9(%arg0: i32) -> (i32, i32) {
    %c0_i32 = arith.constant 0 : i32
    %c0_i32_0 = arith.constant 0 : i32
    %c0_i32_1 = arith.constant 0 : i32
    return %c0_i32, %c0_i32_0 : i32, i32
  }
  func.func @transform_10(%arg0: i32) -> (i32, i32) {
    %c0_i32 = arith.constant 0 : i32
    %c0_i32_0 = arith.constant 0 : i32
    %c0_i32_1 = arith.constant 0 : i32
    return %c0_i32, %c0_i32_0 : i32, i32
  }
  func.func @transform_11(%arg0: i32) -> (i32, i32) {
    %c0_i32 = arith.constant 0 : i32
    %c0_i32_0 = arith.constant 0 : i32
    %c0_i32_1 = arith.constant 0 : i32
    return %c0_i32, %c0_i32_0 : i32, i32
  }
  func.func @transform_12(%arg0: i32) -> (i32, i32) {
    %c0_i32 = arith.constant 0 : i32
    %c0_i32_0 = arith.constant 0 : i32
    %c0_i32_1 = arith.constant 0 : i32
    return %c0_i32, %c0_i32_0 : i32, i32
  }
  func.func @transform_13(%arg0: i32) -> (i32, i32) {
    %c0_i32 = arith.constant 0 : i32
    %c0_i32_0 = arith.constant 0 : i32
    %c0_i32_1 = arith.constant 0 : i32
    return %c0_i32, %c0_i32_0 : i32, i32
  }
  func.func @transform_14(%arg0: i32) -> (i32, i32) {
    %c0_i32 = arith.constant 0 : i32
    %c0_i32_0 = arith.constant 0 : i32
    %c0_i32_1 = arith.constant 0 : i32
    return %c0_i32, %c0_i32_0 : i32, i32
  }
  func.func @transform_15(%arg0: i32) -> (i32, i32) {
    %c0_i32 = arith.constant 0 : i32
    %c0_i32_0 = arith.constant 0 : i32
    %c0_i32_1 = arith.constant 0 : i32
    return %c0_i32, %c0_i32_0 : i32, i32
  }
  func.func @transform_16(%arg0: i32) -> (i32, i32) {
    %c0_i32 = arith.constant 0 : i32
    %c0_i32_0 = arith.constant 0 : i32
    %c0_i32_1 = arith.constant 0 : i32
    return %c0_i32, %c0_i32_0 : i32, i32
  }
  func.func @transform_17(%arg0: i32) -> (i32, i32) {
    %c0_i32 = arith.constant 0 : i32
    %c0_i32_0 = arith.constant 0 : i32
    %c0_i32_1 = arith.constant 0 : i32
    return %c0_i32, %c0_i32_0 : i32, i32
  }
  func.func @transform_18(%arg0: i32) -> (i32, i32) {
    %c0_i32 = arith.constant 0 : i32
    %c0_i32_0 = arith.constant 0 : i32
    %c0_i32_1 = arith.constant 0 : i32
    return %c0_i32, %c0_i32_0 : i32, i32
  }
}

</mosaic_0001>

<bundles_post_ra>
// kernel: source_cnn_forward.3
= control target key start
LH: loop header
LB: loop body
LE: loop exit
PB: predicated region body
PF: predicated region fallthrough
CT: control target
= control target key end

     0   :  { %s5119_s18 = smov 0   ;;  %s6535_s0 = inlined_call_operand.vmem [shape: bf16[9600,30], index: 0, kind: input, shape index: {}]   ;;  %s6536_s1 = inlined_call_operand.vmem [shape: bf16[30,64], index: 1, kind: input, shape index: {}]   ;;  %s6537_s2 = inlined_call_operand.vmem [shape: bf16[30,64], index: 2, kind: input, shape index: {}]   ;;  %s6538_s3 = inlined_call_operand.vmem [shape: f32[1,64], index: 3, kind: input, shape index: {}]   ;;  %s6539_s4 = inlined_call_operand.vmem [shape: f32[1,64], index: 4, kind: input, shape index: {}]   ;;  %s6540_s5 = inlined_call_operand.vmem [shape: bf16[9600,64], index: 5, kind: output, shape index: {}]  }
   0x1 LB: > { %s4190_s19 = sadd.s32 4294967295, %s5087_s18   ;;  %p4194_p0 = scmp.ge.s32.totalorder %s5087_s18, 1  ;;  %s5087_s18 = sphi %s5119_s18, %s15_s18  }
   0x2   : > { %p188_p1 = scmp.lt.s32.totalorder %s5087_s18, 6 }
   0x4   : > { %p189_p2 = pnand %p4194_p0, %p188_p1 }
   0x5   : > { %s216_s28 = smul.u32 (!%p189_p2), 240, %s4190_s19 }
   0x6   : > { %192 = sbr.rel (%p189_p2) target bundleno = 1118 (0x45e), region = 40 }
   0x7   : > { %p217_p3 = scmp.lt.s32.totalorder (!%p189_p2), %s216_s28, 1199 }
   0xb   : > { %v4683_v0 = vld [vmem:[%s6536_s1 + $0x8] sm:$0xf]  ;;  %v5056_v1 = vld [vmem:[%s6536_s1 + $0x8] sm:$0x70]  ;;  %vm1445_vm0 = vcmask 1046528   ;;  %v5055_v8 = vld [vmem:[%s6536_s1] sm:$0xff] }
   0xc   : > { %v4684_v2 = vor.u32 %v5056_v1, %v4683_v0  ;;  %v4811_v3 = vld [vmem:[%s6537_s2 + $0x8] sm:$0xf]  ;;  %v5058_v4 = vld [vmem:[%s6537_s2 + $0x8] sm:$0x70]  ;;  %v5057_v9 = vld [vmem:[%s6537_s2] sm:$0xff]  ;;  %s6542_s28 = smov (!%p217_p3, %s216_s28), 1199 }
   0xd   : > { %v4812_v5 = vor.u32 %v5058_v4, %v4811_v3  ;;  %s4195_s8 = sshll.u32 %s6542_s28, 2  ;;  %vm1084_vm1 = vcmask 244736   ;;  %v5208_v29 = vld [vmem:[%s6538_s3] ss:$0 sm:$0xff]  ;;  %vm3893_vm2 = vcmask 519168  }
   0xe   : > { %v1447_v6 = vsel %vm1445_vm0, %v4684_v2, 0  ;;  %s5153_s11 = scalar_lea.vmem %s6535_s0, %s4195_s8  ;;  %v5213_v32 = vld [vmem:[%s6539_s4] ss:$0 sm:$0xff]  ;;  %s5226_s19 = scalar_lea.vmem %s6540_s5, %s4195_s8 }
   0xf   : > { %1455 = vmatpush.bf16.msra.mxu0 %v1447_v6  ;;  %5059 = vmatpush.bf16.msra.mxu2 %v1447_v6  ;;  %v2074_v7 = vsel %vm1445_vm0, %v4812_v5, 0  ;;  %v4935_v10 = vld [vmem:[%s5153_s11] sm:$0xff]  ;;  %v4936_v12 = vld [vmem:[%s5153_s11 + $0x8] sm:$0xff]  ;;  %v4937_v14 = vld [vmem:[%s5153_s11 + $0x10] sm:$0xff] }
  0x10   : > { %2082 = vmatpush.bf16.msra.mxu1 %v2074_v7  ;;  %5061 = vmatpush.bf16.msra.mxu3 %v2074_v7  ;;  %v4995_v11 = vld [vmem:[%s5153_s11 + $0x1e0] sm:$0xff]  ;;  %v4996_v13 = vld [vmem:[%s5153_s11 + $0x1e8] sm:$0xff]  ;;  %v4997_v15 = vld [vmem:[%s5153_s11 + $0x1f0] sm:$0xff] }
  0x11   : > { %v4938_v16 = vld [vmem:[%s5153_s11 + $0x18] sm:$0xff]  ;;  %v4939_v18 = vld [vmem:[%s5153_s11 + $0x20] sm:$0xff]  ;;  %v4940_v20 = vld [vmem:[%s5153_s11 + $0x28] sm:$0xff] }
  0x12   : > { %v4998_v17 = vld [vmem:[%s5153_s11 + $0x1f8] sm:$0xff]  ;;  %v4999_v19 = vld [vmem:[%s5153_s11 + $0x200] sm:$0xff]  ;;  %v5000_v21 = vld [vmem:[%s5153_s11 + $0x208] sm:$0xff] }
  0x13   : > { %1456 = vmatpush.bf16.msra.mxu0 %v5055_v8  ;;  %5060 = vmatpush.bf16.msra.mxu2 %v5055_v8  ;;  %v4941_v22 = vld [vmem:[%s5153_s11 + $0x30] sm:$0xff]  ;;  %v4942_v24 = vld [vmem:[%s5153_s11 + $0x38] sm:$0xff]  ;;  %v4943_v26 = vld [vmem:[%s5153_s11 + $0x40] sm:$0xff] }
  0x14   : > { %2083 = vmatpush.bf16.msra.mxu1 %v5057_v9  ;;  %5062 = vmatpush.bf16.msra.mxu3 %v5057_v9  ;;  %v5001_v23 = vld [vmem:[%s5153_s11 + $0x210] sm:$0xff]  ;;  %v5002_v25 = vld [vmem:[%s5153_s11 + $0x218] sm:$0xff]  ;;  %v5003_v27 = vld [vmem:[%s5153_s11 + $0x220] sm:$0xff] }
  0x15   : > { %v4944_v50 = vld [vmem:[%s5153_s11 + $0x48] sm:$0xff] }
  0x16   : > { %4685 = vmatmul.msk.bf16.vlgmr.msra.gmra.mxu0 %vm1084_vm1, %v4935_v10  ;;  %4745 = vmatmul.msk.bf16.vlgmr.msra.gmra.mxu2 %vm1084_vm1, %v4995_v11  ;;  %v5004_v51 = vld [vmem:[%s5153_s11 + $0x228] sm:$0xff] }
  0x17   : > { %4813 = vmatmul.msk.bf16.vlgmr.msra.gmra.mxu1 %vm1084_vm1, %v4935_v10  ;;  %4873 = vmatmul.msk.bf16.vlgmr.msra.gmra.mxu3 %vm1084_vm1, %v4995_v11 }
  0x26   : > { %4686 = vmatmul.msk.bf16.gmra.mxu0 %vm1084_vm1, %v4936_v12  ;;  %4746 = vmatmul.msk.bf16.gmra.mxu2 %vm1084_vm1, %v4996_v13 }
  0x27   : > { %4814 = vmatmul.msk.bf16.gmra.mxu1 %vm1084_vm1, %v4936_v12  ;;  %4874 = vmatmul.msk.bf16.gmra.mxu3 %vm1084_vm1, %v4996_v13 }
  0x36   : > { %4687 = vmatmul.msk.bf16.gmra.mxu0 %vm1084_vm1, %v4937_v14  ;;  %4747 = vmatmul.msk.bf16.gmra.mxu2 %vm1084_vm1, %v4997_v15 }
  0x37   : > { %4815 = vmatmul.msk.bf16.gmra.mxu1 %vm1084_vm1, %v4937_v14  ;;  %4875 = vmatmul.msk.bf16.gmra.mxu3 %vm1084_vm1, %v4997_v15 }
  0x46   : > { %4688 = vmatmul.msk.bf16.gmra.mxu0 %vm1084_vm1, %v4938_v16  ;;  %4748 = vmatmul.msk.bf16.gmra.mxu2 %vm1084_vm1, %v4998_v17 }
  0x47   : > { %4816 = vmatmul.msk.bf16.gmra.mxu1 %vm1084_vm1, %v4938_v16  ;;  %4876 = vmatmul.msk.bf16.gmra.mxu3 %vm1084_vm1, %v4998_v17  ;;  %v4945_v16 = vld [vmem:[%s5153_s11 + $0x50] sm:$0xff] }
  0x48   : > { %v5005_v17 = vld [vmem:[%s5153_s11 + $0x230] sm:$0xff] }
  0x56   : > { %4689 = vmatmul.msk.bf16.gmra.mxu0 %vm1084_vm1, %v4939_v18  ;;  %4749 = vmatmul.msk.bf16.gmra.mxu2 %vm1084_vm1, %v4999_v19 }
  0x57   : > { %4817 = vmatmul.msk.bf16.gmra.mxu1 %vm1084_vm1, %v4939_v18  ;;  %4877 = vmatmul.msk.bf16.gmra.mxu3 %vm1084_vm1, %v4999_v19 }
  0x66   : > { %4690 = vmatmul.msk.bf16.gmra.mxu0 %vm1084_vm1, %v4940_v20  ;;  %4750 = vmatmul.msk.bf16.gmra.mxu2 %vm1084_vm1, %v5000_v21 }
  0x67   : > { %4818 = vmatmul.msk.bf16.gmra.mxu1 %vm1084_vm1, %v4940_v20  ;;  %4878 = vmatmul.msk.bf16.gmra.mxu3 %vm1084_vm1, %v5000_v21 }
  0x76   : > { %4691 = vmatmul.msk.bf16.gmra.mxu0 %vm1084_vm1, %v4941_v22  ;;  %4751 = vmatmul.msk.bf16.gmra.mxu2 %vm1084_vm1, %v5001_v23 }
  0x77   : > { %4819 = vmatmul.msk.bf16.gmra.mxu1 %vm1084_vm1, %v4941_v22  ;;  %4879 = vmatmul.msk.bf16.gmra.mxu3 %vm1084_vm1, %v5001_v23 }
  0x86   : > { %4692 = vmatmul.msk.bf16.gmra.mxu0 %vm1084_vm1, %v4942_v24  ;;  %4752 = vmatmul.msk.bf16.gmra.mxu2 %vm1084_vm1, %v5002_v25 }
  0x87   : > { %4820 = vmatmul.msk.bf16.gmra.mxu1 %vm1084_vm1, %v4942_v24  ;;  %4880 = vmatmul.msk.bf16.gmra.mxu3 %vm1084_vm1, %v5002_v25 }
  0x93   : > { %v1458_v28 = vpop.f32.mrf.mxu0 }
  0x94   : > { %v2085_v30 = vpop.f32.mrf.mxu1 }
  0x95   : > { %v2685_v31 = vmax.f32 %v1458_v28, %v2085_v30 }
  0x96   : > { %4693 = vmatmul.msk.bf16.gmra.mxu0 %vm1084_vm1, %v4943_v26  ;;  %4753 = vmatmul.msk.bf16.gmra.mxu2 %vm1084_vm1, %v5003_v27 }
  0x97   : > { %v2929_v33 = vmul.f32 %v5208_v29, %v2685_v31  ;;  %4821 = vmatmul.msk.bf16.gmra.mxu1 %vm1084_vm1, %v4943_v26  ;;  %4881 = vmatmul.msk.bf16.gmra.mxu3 %vm1084_vm1, %v5003_v27 }
  0x99   : > { %v3173_v34 = vadd.f32 %v5213_v32, %v2929_v33  ;;  %v1758_v35 = vpop.f32.mrf.mxu2 }
  0x9a   : > { %v2385_v36 = vpop.f32.mrf.mxu3 }
  0x9b   : > { %v3413_v37 = vmax.f32 %v3173_v34, 0.0  ;;  %v2805_v38 = vmax.f32 %v1758_v35, %v2385_v36  ;;  %v1460_v39 = vpop.f32.mrf.mxu0 }
  0x9c   : > { %v2087_v40 = vpop.f32.mrf.mxu1 }
  0x9d   : > { %v3653_v41 = vpack.c.bf16 %v3413_v37, %v3413_v37  ;;  %v3049_v42 = vmul.f32 %v5208_v29, %v2805_v38  ;;  %v2686_v43 = vmax.f32 %v1460_v39, %v2087_v40 }
  0x9f   : > { %3894 = vst.msk [vmem:[%s5226_s19] sm:$0xf] %vm3893_vm2, %v3653_v41  ;;  %v3293_v44 = vadd.f32 %v5213_v32, %v3049_v42  ;;  %v2930_v45 = vmul.f32 %v5208_v29, %v2686_v43 }
  0xa1   : > { %v3533_v46 = vmax.f32 %v3293_v44, 0.0  ;;  %v3174_v47 = vadd.f32 %v5213_v32, %v2930_v45  ;;  %v1760_v48 = vpop.f32.mrf.mxu2 }
  0xa2   : > { %v2387_v49 = vpop.f32.mrf.mxu3 }
  0xa3   : > { %v3773_v52 = vpack.c.bf16 %v3533_v46, %v3533_v46  ;;  %v3414_v53 = vmax.f32 %v3174_v47, 0.0  ;;  %v2806_v54 = vmax.f32 %v1760_v48, %v2387_v49  ;;  %v1463_v55 = vpop.f32.mrf.mxu0  ;;  %v4946_v48 = vld [vmem:[%s5153_s11 + $0x58] sm:$0xff] }
  0xa4   : > { %v2090_v56 = vpop.f32.mrf.mxu1  ;;  %v5006_v49 = vld [vmem:[%s5153_s11 + $0x238] sm:$0xff] }
  0xa5   : > { %4014 = vst.msk [vmem:[%s5226_s19 + $0x1e0] sm:$0xf] %vm3893_vm2, %v3773_v52  ;;  %v3654_v57 = vpack.c.bf16 %v3414_v53, %v3414_v53  ;;  %v3050_v58 = vmul.f32 %v5208_v29, %v2806_v54  ;;  %v2687_v59 = vmax.f32 %v1463_v55, %v2090_v56 }
  0xa6   : > { %4694 = vmatmul.msk.bf16.gmra.mxu0 %vm1084_vm1, %v4944_v50  ;;  %4754 = vmatmul.msk.bf16.gmra.mxu2 %vm1084_vm1, %v5004_v51 }
  0xa7   : > { %3895 = vst.msk [vmem:[%s5226_s19 + $0x4] sm:$0xf] %vm3893_vm2, %v3654_v57  ;;  %v3294_v60 = vadd.f32 %v5213_v32, %v3050_v58  ;;  %v2931_v61 = vmul.f32 %v5208_v29, %v2687_v59  ;;  %4822 = vmatmul.msk.bf16.gmra.mxu1 %vm1084_vm1, %v4944_v50  ;;  %4882 = vmatmul.msk.bf16.gmra.mxu3 %vm1084_vm1, %v5004_v51 }
  0xa9   : > { %v3534_v62 = vmax.f32 %v3294_v60, 0.0  ;;  %v3175_v63 = vadd.f32 %v5213_v32, %v2931_v61  ;;  %v1763_v0 = vpop.f32.mrf.mxu2 }
  0xaa   : > { %v2390_v1 = vpop.f32.mrf.mxu3 }
  0xab   : > { %v3774_v2 = vpack.c.bf16 %v3534_v62, %v3534_v62  ;;  %v3415_v3 = vmax.f32 %v3175_v63, 0.0  ;;  %v2807_v4 = vmax.f32 %v1763_v0, %v2390_v1  ;;  %v1465_v5 = vpop.f32.mrf.mxu0 }
  0xac   : > { %v2092_v6 = vpop.f32.mrf.mxu1 }
  0xad   : > { %4015 = vst.msk [vmem:[%s5226_s19 + $0x1e4] sm:$0xf] %vm3893_vm2, %v3774_v2  ;;  %v3655_v7 = vpack.c.bf16 %v3415_v3, %v3415_v3  ;;  %v3051_v8 = vmul.f32 %v5208_v29, %v2807_v4  ;;  %v2688_v9 = vmax.f32 %v1465_v5, %v2092_v6 }
  0xaf   : > { %3896 = vst.msk [vmem:[%s5226_s19 + $0x8] sm:$0xf] %vm3893_vm2, %v3655_v7  ;;  %v3295_v10 = vadd.f32 %v5213_v32, %v3051_v8  ;;  %v2932_v11 = vmul.f32 %v5208_v29, %v2688_v9 }
  0xb1   : > { %v3535_v12 = vmax.f32 %v3295_v10, 0.0  ;;  %v3176_v13 = vadd.f32 %v5213_v32, %v2932_v11  ;;  %v1765_v14 = vpop.f32.mrf.mxu2 }
  0xb2   : > { %v2392_v15 = vpop.f32.mrf.mxu3 }
  0xb3   : > { %v3775_v18 = vpack.c.bf16 %v3535_v12, %v3535_v12  ;;  %v3416_v19 = vmax.f32 %v3176_v13, 0.0  ;;  %v2808_v20 = vmax.f32 %v1765_v14, %v2392_v15  ;;  %v1468_v21 = vpop.f32.mrf.mxu0  ;;  %v4947_v14 = vld [vmem:[%s5153_s11 + $0x60] sm:$0xff] }
  0xb4   : > { %v2095_v22 = vpop.f32.mrf.mxu1  ;;  %v5007_v15 = vld [vmem:[%s5153_s11 + $0x240] sm:$0xff] }
  0xb5   : > { %4016 = vst.msk [vmem:[%s5226_s19 + $0x1e8] sm:$0xf] %vm3893_vm2, %v3775_v18  ;;  %v3656_v23 = vpack.c.bf16 %v3416_v19, %v3416_v19  ;;  %v3052_v24 = vmul.f32 %v5208_v29, %v2808_v20  ;;  %v2689_v25 = vmax.f32 %v1468_v21, %v2095_v22 }
  0xb6   : > { %4695 = vmatmul.msk.bf16.gmra.mxu0 %vm1084_vm1, %v4945_v16  ;;  %4755 = vmatmul.msk.bf16.gmra.mxu2 %vm1084_vm1, %v5005_v17 }
  0xb7   : > { %3897 = vst.msk [vmem:[%s5226_s19 + $0xc] sm:$0xf] %vm3893_vm2, %v3656_v23  ;;  %v3296_v26 = vadd.f32 %v5213_v32, %v3052_v24  ;;  %v2933_v27 = vmul.f32 %v5208_v29, %v2689_v25  ;;  %4823 = vmatmul.msk.bf16.gmra.mxu1 %vm1084_vm1, %v4945_v16  ;;  %4883 = vmatmul.msk.bf16.gmra.mxu3 %vm1084_vm1, %v5005_v17 }
  0xb9   : > { %v3536_v28 = vmax.f32 %v3296_v26, 0.0  ;;  %v3177_v30 = vadd.f32 %v5213_v32, %v2933_v27  ;;  %v1768_v31 = vpop.f32.mrf.mxu2 }
  0xba   : > { %v2395_v33 = vpop.f32.mrf.mxu3 }
  0xbb   : > { %v3776_v34 = vpack.c.bf16 %v3536_v28, %v3536_v28  ;;  %v3417_v35 = vmax.f32 %v3177_v30, 0.0  ;;  %v2809_v36 = vmax.f32 %v1768_v31, %v2395_v33  ;;  %v1470_v37 = vpop.f32.mrf.mxu0 }
  0xbc   : > { %v2097_v38 = vpop.f32.mrf.mxu1 }
  0xbd   : > { %4017 = vst.msk [vmem:[%s5226_s19 + $0x1ec] sm:$0xf] %vm3893_vm2, %v3776_v34  ;;  %v3657_v39 = vpack.c.bf16 %v3417_v35, %v3417_v35  ;;  %v3053_v40 = vmul.f32 %v5208_v29, %v2809_v36  ;;  %v2690_v41 = vmax.f32 %v1470_v37, %v2097_v38 }
  0xbf   : > { %3898 = vst.msk [vmem:[%s5226_s19 + $0x10] sm:$0xf] %vm3893_vm2, %v3657_v39  ;;  %v3297_v42 = vadd.f32 %v5213_v32, %v3053_v40  ;;  %v2934_v43 = vmul.f32 %v5208_v29, %v2690_v41 }
  0xc1   : > { %v3537_v44 = vmax.f32 %v3297_v42, 0.0  ;;  %v3178_v45 = vadd.f32 %v5213_v32, %v2934_v43  ;;  %v1770_v46 = vpop.f32.mrf.mxu2 }
  0xc2   : > { %v2397_v47 = vpop.f32.mrf.mxu3 }
  0xc3   : > { %v3777_v50 = vpack.c.bf16 %v3537_v44, %v3537_v44  ;;  %v3418_v51 = vmax.f32 %v3178_v45, 0.0  ;;  %v2810_v52 = vmax.f32 %v1770_v46, %v2397_v47  ;;  %v1473_v53 = vpop.f32.mrf.mxu0  ;;  %v4948_v46 = vld [vmem:[%s5153_s11 + $0x68] sm:$0xff] }
  0xc4   : > { %v2100_v54 = vpop.f32.mrf.mxu1  ;;  %v5008_v47 = vld [vmem:[%s5153_s11 + $0x248] sm:$0xff] }
  0xc5   : > { %4018 = vst.msk [vmem:[%s5226_s19 + $0x1f0] sm:$0xf] %vm3893_vm2, %v3777_v50  ;;  %v3658_v55 = vpack.c.bf16 %v3418_v51, %v3418_v51  ;;  %v3054_v56 = vmul.f32 %v5208_v29, %v2810_v52  ;;  %v2691_v57 = vmax.f32 %v1473_v53, %v2100_v54 }
  0xc6   : > { %4696 = vmatmul.msk.bf16.gmra.mxu0 %vm1084_vm1, %v4946_v48  ;;  %4756 = vmatmul.msk.bf16.gmra.mxu2 %vm1084_vm1, %v5006_v49 }
  0xc7   : > { %3899 = vst.msk [vmem:[%s5226_s19 + $0x14] sm:$0xf] %vm3893_vm2, %v3658_v55  ;;  %v3298_v58 = vadd.f32 %v5213_v32, %v3054_v56  ;;  %v2935_v59 = vmul.f32 %v5208_v29, %v2691_v57  ;;  %4824 = vmatmul.msk.bf16.gmra.mxu1 %vm1084_vm1, %v4946_v48  ;;  %4884 = vmatmul.msk.bf16.gmra.mxu3 %vm1084_vm1, %v5006_v49 }
  0xc9   : > { %v3538_v60 = vmax.f32 %v3298_v58, 0.0  ;;  %v3179_v61 = vadd.f32 %v5213_v32, %v2935_v59  ;;  %v1773_v62 = vpop.f32.mrf.mxu2 }
  0xca   : > { %v2400_v63 = vpop.f32.mrf.mxu3 }
  0xcb   : > { %v3778_v0 = vpack.c.bf16 %v3538_v60, %v3538_v60  ;;  %v3419_v1 = vmax.f32 %v3179_v61, 0.0  ;;  %v2811_v2 = vmax.f32 %v1773_v62, %v2400_v63  ;;  %v1475_v3 = vpop.f32.mrf.mxu0 }
  0xcc   : > { %v2102_v4 = vpop.f32.mrf.mxu1 }
  0xcd   : > { %4019 = vst.msk [vmem:[%s5226_s19 + $0x1f4] sm:$0xf] %vm3893_vm2, %v3778_v0  ;;  %v3659_v5 = vpack.c.bf16 %v3419_v1, %v3419_v1  ;;  %v3055_v6 = vmul.f32 %v5208_v29, %v2811_v2  ;;  %v2692_v7 = vmax.f32 %v1475_v3, %v2102_v4 }
  0xcf   : > { %3900 = vst.msk [vmem:[%s5226_s19 + $0x18] sm:$0xf] %vm3893_vm2, %v3659_v5  ;;  %v3299_v8 = vadd.f32 %v5213_v32, %v3055_v6  ;;  %v2936_v9 = vmul.f32 %v5208_v29, %v2692_v7 }
  0xd1   : > { %v3539_v10 = vmax.f32 %v3299_v8, 0.0  ;;  %v3180_v11 = vadd.f32 %v5213_v32, %v2936_v9  ;;  %v1775_v12 = vpop.f32.mrf.mxu2 }
  0xd2   : > { %v2402_v13 = vpop.f32.mrf.mxu3 }
  0xd3   : > { %v3779_v16 = vpack.c.bf16 %v3539_v10, %v3539_v10  ;;  %v3420_v17 = vmax.f32 %v3180_v11, 0.0  ;;  %v2812_v18 = vmax.f32 %v1775_v12, %v2402_v13  ;;  %v1478_v19 = vpop.f32.mrf.mxu0  ;;  %v4949_v12 = vld [vmem:[%s5153_s11 + $0x70] sm:$0xff] }
  0xd4   : > { %v2105_v20 = vpop.f32.mrf.mxu1  ;;  %v5009_v13 = vld [vmem:[%s5153_s11 + $0x250] sm:$0xff] }
  0xd5   : > { %4020 = vst.msk [vmem:[%s5226_s19 + $0x1f8] sm:$0xf] %vm3893_vm2, %v3779_v16  ;;  %v3660_v21 = vpack.c.bf16 %v3420_v17, %v3420_v17  ;;  %v3056_v22 = vmul.f32 %v5208_v29, %v2812_v18  ;;  %v2693_v23 = vmax.f32 %v1478_v19, %v2105_v20 }
  0xd6   : > { %4697 = vmatmul.msk.bf16.gmra.mxu0 %vm1084_vm1, %v4947_v14  ;;  %4757 = vmatmul.msk.bf16.gmra.mxu2 %vm1084_vm1, %v5007_v15 }
  0xd7   : > { %3901 = vst.msk [vmem:[%s5226_s19 + $0x1c] sm:$0xf] %vm3893_vm2, %v3660_v21  ;;  %v3300_v24 = vadd.f32 %v5213_v32, %v3056_v22  ;;  %v2937_v25 = vmul.f32 %v5208_v29, %v2693_v23  ;;  %4825 = vmatmul.msk.bf16.gmra.mxu1 %vm1084_vm1, %v4947_v14  ;;  %4885 = vmatmul.msk.bf16.gmra.mxu3 %vm1084_vm1, %v5007_v15 }
  0xd9   : > { %v3540_v26 = vmax.f32 %v3300_v24, 0.0  ;;  %v3181_v27 = vadd.f32 %v5213_v32, %v2937_v25  ;;  %v1778_v28 = vpop.f32.mrf.mxu2 }
  0xda   : > { %v2405_v30 = vpop.f32.mrf.mxu3 }
  0xdb   : > { %v3780_v31 = vpack.c.bf16 %v3540_v26, %v3540_v26  ;;  %v3421_v33 = vmax.f32 %v3181_v27, 0.0  ;;  %v2813_v34 = vmax.f32 %v1778_v28, %v2405_v30  ;;  %v1480_v35 = vpop.f32.mrf.mxu0 }
  0xdc   : > { %v2107_v36 = vpop.f32.mrf.mxu1 }
  0xdd   : > { %4021 = vst.msk [vmem:[%s5226_s19 + $0x1fc] sm:$0xf] %vm3893_vm2, %v3780_v31  ;;  %v3661_v37 = vpack.c.bf16 %v3421_v33, %v3421_v33  ;;  %v3057_v38 = vmul.f32 %v5208_v29, %v2813_v34  ;;  %v2694_v39 = vmax.f32 %v1480_v35, %v2107_v36 }
  0xdf   : > { %3902 = vst.msk [vmem:[%s5226_s19 + $0x20] sm:$0xf] %vm3893_vm2, %v3661_v37  ;;  %v3301_v40 = vadd.f32 %v5213_v32, %v3057_v38  ;;  %v2938_v41 = vmul.f32 %v5208_v29, %v2694_v39 }
  0xe1   : > { %v3541_v42 = vmax.f32 %v3301_v40, 0.0  ;;  %v3182_v43 = vadd.f32 %v5213_v32, %v2938_v41  ;;  %v1780_v44 = vpop.f32.mrf.mxu2 }
  0xe2   : > { %v2407_v45 = vpop.f32.mrf.mxu3 }
  0xe3   : > { %v3781_v48 = vpack.c.bf16 %v3541_v42, %v3541_v42  ;;  %v3422_v49 = vmax.f32 %v3182_v43, 0.0  ;;  %v2814_v50 = vmax.f32 %v1780_v44, %v2407_v45  ;;  %v1483_v51 = vpop.f32.mrf.mxu0  ;;  %v4950_v44 = vld [vmem:[%s5153_s11 + $0x78] sm:$0xff] }
  0xe4   : > { %v2110_v52 = vpop.f32.mrf.mxu1  ;;  %v5010_v45 = vld [vmem:[%s5153_s11 + $0x258] sm:$0xff] }
  0xe5   : > { %4022 = vst.msk [vmem:[%s5226_s19 + $0x200] sm:$0xf] %vm3893_vm2, %v3781_v48  ;;  %v3662_v53 = vpack.c.bf16 %v3422_v49, %v3422_v49  ;;  %v3058_v54 = vmul.f32 %v5208_v29, %v2814_v50  ;;  %v2695_v55 = vmax.f32 %v1483_v51, %v2110_v52 }
  0xe6   : > { %4698 = vmatmul.msk.bf16.gmra.mxu0 %vm1084_vm1, %v4948_v46  ;;  %4758 = vmatmul.msk.bf16.gmra.mxu2 %vm1084_vm1, %v5008_v47 }
  0xe7   : > { %3903 = vst.msk [vmem:[%s5226_s19 + $0x24] sm:$0xf] %vm3893_vm2, %v3662_v53  ;;  %v3302_v56 = vadd.f32 %v5213_v32, %v3058_v54  ;;  %v2939_v57 = vmul.f32 %v5208_v29, %v2695_v55  ;;  %4826 = vmatmul.msk.bf16.gmra.mxu1 %vm1084_vm1, %v4948_v46  ;;  %4886 = vmatmul.msk.bf16.gmra.mxu3 %vm1084_vm1, %v5008_v47 }
  0xe9   : > { %v3542_v58 = vmax.f32 %v3302_v56, 0.0  ;;  %v3183_v59 = vadd.f32 %v5213_v32, %v2939_v57  ;;  %v1783_v60 = vpop.f32.mrf.mxu2 }
  0xea   : > { %v2410_v61 = vpop.f32.mrf.mxu3 }
  0xeb   : > { %v3782_v62 = vpack.c.bf16 %v3542_v58, %v3542_v58  ;;  %v3423_v63 = vmax.f32 %v3183_v59, 0.0  ;;  %v2815_v0 = vmax.f32 %v1783_v60, %v2410_v61  ;;  %v1485_v1 = vpop.f32.mrf.mxu0 }
  0xec   : > { %v2112_v2 = vpop.f32.mrf.mxu1 }
  0xed   : > { %4023 = vst.msk [vmem:[%s5226_s19 + $0x204] sm:$0xf] %vm3893_vm2, %v3782_v62  ;;  %v3663_v3 = vpack.c.bf16 %v3423_v63, %v3423_v63  ;;  %v3059_v4 = vmul.f32 %v5208_v29, %v2815_v0  ;;  %v2696_v5 = vmax.f32 %v1485_v1, %v2112_v2 }
  0xef   : > { %3904 = vst.msk [vmem:[%s5226_s19 + $0x28] sm:$0xf] %vm3893_vm2, %v3663_v3  ;;  %v3303_v6 = vadd.f32 %v5213_v32, %v3059_v4  ;;  %v2940_v7 = vmul.f32 %v5208_v29, %v2696_v5 }
  0xf1   : > { %v3543_v8 = vmax.f32 %v3303_v6, 0.0  ;;  %v3184_v9 = vadd.f32 %v5213_v32, %v2940_v7  ;;  %v1785_v10 = vpop.f32.mrf.mxu2 }
  0xf2   : > { %v2412_v11 = vpop.f32.mrf.mxu3 }
  0xf3   : > { %v3783_v14 = vpack.c.bf16 %v3543_v8, %v3543_v8  ;;  %v3424_v15 = vmax.f32 %v3184_v9, 0.0  ;;  %v2816_v16 = vmax.f32 %v1785_v10, %v2412_v11  ;;  %v1488_v17 = vpop.f32.mrf.mxu0  ;;  %v4951_v10 = vld [vmem:[%s5153_s11 + $0x80] sm:$0xff] }
  0xf4   : > { %v2115_v18 = vpop.f32.mrf.mxu1  ;;  %v5011_v11 = vld [vmem:[%s5153_s11 + $0x260] sm:$0xff] }
  0xf5   : > { %4024 = vst.msk [vmem:[%s5226_s19 + $0x208] sm:$0xf] %vm3893_vm2, %v3783_v14  ;;  %v3664_v19 = vpack.c.bf16 %v3424_v15, %v3424_v15  ;;  %v3060_v20 = vmul.f32 %v5208_v29, %v2816_v16  ;;  %v2697_v21 = vmax.f32 %v1488_v17, %v2115_v18 }
  0xf6   : > { %4699 = vmatmul.msk.bf16.gmra.mxu0 %vm1084_vm1, %v4949_v12  ;;  %4759 = vmatmul.msk.bf16.gmra.mxu2 %vm1084_vm1, %v5009_v13 }
  0xf7   : > { %3905 = vst.msk [vmem:[%s5226_s19 + $0x2c] sm:$0xf] %vm3893_vm2, %v3664_v19  ;;  %v3304_v22 = vadd.f32 %v5213_v32, %v3060_v20  ;;  %v2941_v23 = vmul.f32 %v5208_v29, %v2697_v21  ;;  %4827 = vmatmul.msk.bf16.gmra.mxu1 %vm1084_vm1, %v4949_v12  ;;  %4887 = vmatmul.msk.bf16.gmra.mxu3 %vm1084_vm1, %v5009_v13 }
  0xf9   : > { %v3544_v24 = vmax.f32 %v3304_v22, 0.0  ;;  %v3185_v25 = vadd.f32 %v5213_v32, %v2941_v23  ;;  %v1788_v26 = vpop.f32.mrf.mxu2 }
  0xfa   : > { %v2415_v27 = vpop.f32.mrf.mxu3 }
  0xfb   : > { %v3784_v28 = vpack.c.bf16 %v3544_v24, %v3544_v24  ;;  %v3425_v30 = vmax.f32 %v3185_v25, 0.0  ;;  %v2817_v31 = vmax.f32 %v1788_v26, %v2415_v27  ;;  %v1490_v33 = vpop.f32.mrf.mxu0 }
  0xfc   : > { %v2117_v34 = vpop.f32.mrf.mxu1 }
  0xfd   : > { %4025 = vst.msk [vmem:[%s5226_s19 + $0x20c] sm:$0xf] %vm3893_vm2, %v3784_v28  ;;  %v3665_v35 = vpack.c.bf16 %v3425_v30, %v3425_v30  ;;  %v3061_v36 = vmul.f32 %v5208_v29, %v2817_v31  ;;  %v2698_v37 = vmax.f32 %v1490_v33, %v2117_v34 }
  0xff   : > { %3906 = vst.msk [vmem:[%s5226_s19 + $0x30] sm:$0xf] %vm3893_vm2, %v3665_v35  ;;  %v3305_v38 = vadd.f32 %v5213_v32, %v3061_v36  ;;  %v2942_v39 = vmul.f32 %v5208_v29, %v2698_v37 }
 0x101   : > { %v3545_v40 = vmax.f32 %v3305_v38, 0.0  ;;  %v3186_v41 = vadd.f32 %v5213_v32, %v2942_v39  ;;  %v1790_v42 = vpop.f32.mrf.mxu2 }
 0x102   : > { %v2417_v43 = vpop.f32.mrf.mxu3 }
 0x103   : > { %v3785_v46 = vpack.c.bf16 %v3545_v40, %v3545_v40  ;;  %v3426_v47 = vmax.f32 %v3186_v41, 0.0  ;;  %v2818_v48 = vmax.f32 %v1790_v42, %v2417_v43  ;;  %v1493_v49 = vpop.f32.mrf.mxu0  ;;  %v4952_v42 = vld [vmem:[%s5153_s11 + $0x88] sm:$0xff] }
 0x104   : > { %v2120_v50 = vpop.f32.mrf.mxu1  ;;  %v5012_v43 = vld [vmem:[%s5153_s11 + $0x268] sm:$0xff] }
 0x105   : > { %4026 = vst.msk [vmem:[%s5226_s19 + $0x210] sm:$0xf] %vm3893_vm2, %v3785_v46  ;;  %v3666_v51 = vpack.c.bf16 %v3426_v47, %v3426_v47  ;;  %v3062_v52 = vmul.f32 %v5208_v29, %v2818_v48  ;;  %v2699_v53 = vmax.f32 %v1493_v49, %v2120_v50 }
 0x106   : > { %4700 = vmatmul.msk.bf16.gmra.mxu0 %vm1084_vm1, %v4950_v44  ;;  %4760 = vmatmul.msk.bf16.gmra.mxu2 %vm1084_vm1, %v5010_v45 }
 0x107   : > { %3907 = vst.msk [vmem:[%s5226_s19 + $0x34] sm:$0xf] %vm3893_vm2, %v3666_v51  ;;  %v3306_v54 = vadd.f32 %v5213_v32, %v3062_v52  ;;  %v2943_v55 = vmul.f32 %v5208_v29, %v2699_v53  ;;  %4828 = vmatmul.msk.bf16.gmra.mxu1 %vm1084_vm1, %v4950_v44  ;;  %4888 = vmatmul.msk.bf16.gmra.mxu3 %vm1084_vm1, %v5010_v45 }
 0x109   : > { %v3546_v56 = vmax.f32 %v3306_v54, 0.0  ;;  %v3187_v57 = vadd.f32 %v5213_v32, %v2943_v55  ;;  %v1793_v58 = vpop.f32.mrf.mxu2 }
 0x10a   : > { %v2420_v59 = vpop.f32.mrf.mxu3 }
 0x10b   : > { %v3786_v60 = vpack.c.bf16 %v3546_v56, %v3546_v56  ;;  %v3427_v61 = vmax.f32 %v3187_v57, 0.0  ;;  %v2819_v62 = vmax.f32 %v1793_v58, %v2420_v59  ;;  %v1495_v63 = vpop.f32.mrf.mxu0 }
 0x10c   : > { %v2122_v0 = vpop.f32.mrf.mxu1 }
 0x10d   : > { %4027 = vst.msk [vmem:[%s5226_s19 + $0x214] sm:$0xf] %vm3893_vm2, %v3786_v60  ;;  %v3667_v1 = vpack.c.bf16 %v3427_v61, %v3427_v61  ;;  %v3063_v2 = vmul.f32 %v5208_v29, %v2819_v62  ;;  %v2700_v3 = vmax.f32 %v1495_v63, %v2122_v0 }
 0x10f   : > { %3908 = vst.msk [vmem:[%s5226_s19 + $0x38] sm:$0xf] %vm3893_vm2, %v3667_v1  ;;  %v3307_v4 = vadd.f32 %v5213_v32, %v3063_v2  ;;  %v2944_v5 = vmul.f32 %v5208_v29, %v2700_v3 }
 0x111   : > { %v3547_v6 = vmax.f32 %v3307_v4, 0.0  ;;  %v3188_v7 = vadd.f32 %v5213_v32, %v2944_v5  ;;  %v1795_v8 = vpop.f32.mrf.mxu2 }
 0x112   : > { %v2422_v9 = vpop.f32.mrf.mxu3 }
 0x113   : > { %v3787_v12 = vpack.c.bf16 %v3547_v6, %v3547_v6  ;;  %v3428_v13 = vmax.f32 %v3188_v7, 0.0  ;;  %v2820_v14 = vmax.f32 %v1795_v8, %v2422_v9  ;;  %v1498_v15 = vpop.f32.mrf.mxu0  ;;  %v4953_v8 = vld [vmem:[%s5153_s11 + $0x90] sm:$0xff] }
 0x114   : > { %v2125_v16 = vpop.f32.mrf.mxu1  ;;  %v5013_v9 = vld [vmem:[%s5153_s11 + $0x270] sm:$0xff] }
 0x115   : > { %4028 = vst.msk [vmem:[%s5226_s19 + $0x218] sm:$0xf] %vm3893_vm2, %v3787_v12  ;;  %v3668_v17 = vpack.c.bf16 %v3428_v13, %v3428_v13  ;;  %v3064_v18 = vmul.f32 %v5208_v29, %v2820_v14  ;;  %v2701_v19 = vmax.f32 %v1498_v15, %v2125_v16 }
 0x116   : > { %4701 = vmatmul.msk.bf16.gmra.mxu0 %vm1084_vm1, %v4951_v10  ;;  %4761 = vmatmul.msk.bf16.gmra.mxu2 %vm1084_vm1, %v5011_v11 }
 0x117   : > { %3909 = vst.msk [vmem:[%s5226_s19 + $0x3c] sm:$0xf] %vm3893_vm2, %v3668_v17  ;;  %v3308_v20 = vadd.f32 %v5213_v32, %v3064_v18  ;;  %v2945_v21 = vmul.f32 %v5208_v29, %v2701_v19  ;;  %4829 = vmatmul.msk.bf16.gmra.mxu1 %vm1084_vm1, %v4951_v10  ;;  %4889 = vmatmul.msk.bf16.gmra.mxu3 %vm1084_vm1, %v5011_v11 }
 0x119   : > { %v3548_v22 = vmax.f32 %v3308_v20, 0.0  ;;  %v3189_v23 = vadd.f32 %v5213_v32, %v2945_v21  ;;  %v1798_v24 = vpop.f32.mrf.mxu2 }
 0x11a   : > { %v2425_v25 = vpop.f32.mrf.mxu3 }
 0x11b   : > { %v3788_v26 = vpack.c.bf16 %v3548_v22, %v3548_v22  ;;  %v3429_v27 = vmax.f32 %v3189_v23, 0.0  ;;  %v2821_v28 = vmax.f32 %v1798_v24, %v2425_v25  ;;  %v1500_v30 = vpop.f32.mrf.mxu0 }
 0x11c   : > { %v2127_v31 = vpop.f32.mrf.mxu1 }
 0x11d   : > { %4029 = vst.msk [vmem:[%s5226_s19 + $0x21c] sm:$0xf] %vm3893_vm2, %v3788_v26  ;;  %v3669_v33 = vpack.c.bf16 %v3429_v27, %v3429_v27  ;;  %v3065_v34 = vmul.f32 %v5208_v29, %v2821_v28  ;;  %v2702_v35 = vmax.f32 %v1500_v30, %v2127_v31 }
 0x11f   : > { %3910 = vst.msk [vmem:[%s5226_s19 + $0x40] sm:$0xf] %vm3893_vm2, %v3669_v33  ;;  %v3309_v36 = vadd.f32 %v5213_v32, %v3065_v34  ;;  %v2946_v37 = vmul.f32 %v5208_v29, %v2702_v35 }
 0x121   : > { %v3549_v38 = vmax.f32 %v3309_v36, 0.0  ;;  %v3190_v39 = vadd.f32 %v5213_v32, %v2946_v37  ;;  %v1800_v40 = vpop.f32.mrf.mxu2 }
 0x122   : > { %v2427_v41 = vpop.f32.mrf.mxu3 }
 0x123   : > { %v3789_v44 = vpack.c.bf16 %v3549_v38, %v3549_v38  ;;  %v3430_v45 = vmax.f32 %v3190_v39, 0.0  ;;  %v2822_v46 = vmax.f32 %v1800_v40, %v2427_v41  ;;  %v1503_v47 = vpop.f32.mrf.mxu0  ;;  %v4954_v40 = vld [vmem:[%s5153_s11 + $0x98] sm:$0xff] }
 0x124   : > { %v2130_v48 = vpop.f32.mrf.mxu1  ;;  %v5014_v41 = vld [vmem:[%s5153_s11 + $0x278] sm:$0xff] }
 0x125   : > { %4030 = vst.msk [vmem:[%s5226_s19 + $0x220] sm:$0xf] %vm3893_vm2, %v3789_v44  ;;  %v3670_v49 = vpack.c.bf16 %v3430_v45, %v3430_v45  ;;  %v3066_v50 = vmul.f32 %v5208_v29, %v2822_v46  ;;  %v2703_v51 = vmax.f32 %v1503_v47, %v2130_v48 }
 0x126   : > { %4702 = vmatmul.msk.bf16.gmra.mxu0 %vm1084_vm1, %v4952_v42  ;;  %4762 = vmatmul.msk.bf16.gmra.mxu2 %vm1084_vm1, %v5012_v43 }
 0x127   : > { %3911 = vst.msk [vmem:[%s5226_s19 + $0x44] sm:$0xf] %vm3893_vm2, %v3670_v49  ;;  %v3310_v52 = vadd.f32 %v5213_v32, %v3066_v50  ;;  %v2947_v53 = vmul.f32 %v5208_v29, %v2703_v51  ;;  %4830 = vmatmul.msk.bf16.gmra.mxu1 %vm1084_vm1, %v4952_v42  ;;  %4890 = vmatmul.msk.bf16.gmra.mxu3 %vm1084_vm1, %v5012_v43 }
 0x129   : > { %v3550_v54 = vmax.f32 %v3310_v52, 0.0  ;;  %v3191_v55 = vadd.f32 %v5213_v32, %v2947_v53  ;;  %v1803_v56 = vpop.f32.mrf.mxu2 }
 0x12a   : > { %v2430_v57 = vpop.f32.mrf.mxu3 }
 0x12b   : > { %v3790_v58 = vpack.c.bf16 %v3550_v54, %v3550_v54  ;;  %v3431_v59 = vmax.f32 %v3191_v55, 0.0  ;;  %v2823_v60 = vmax.f32 %v1803_v56, %v2430_v57  ;;  %v1505_v61 = vpop.f32.mrf.mxu0 }
 0x12c   : > { %v2132_v62 = vpop.f32.mrf.mxu1 }
 0x12d   : > { %4031 = vst.msk [vmem:[%s5226_s19 + $0x224] sm:$0xf] %vm3893_vm2, %v3790_v58  ;;  %v3671_v63 = vpack.c.bf16 %v3431_v59, %v3431_v59  ;;  %v3067_v0 = vmul.f32 %v5208_v29, %v2823_v60  ;;  %v2704_v1 = vmax.f32 %v1505_v61, %v2132_v62 }
 0x12f   : > { %3912 = vst.msk [vmem:[%s5226_s19 + $0x48] sm:$0xf] %vm3893_vm2, %v3671_v63  ;;  %v3311_v2 = vadd.f32 %v5213_v32, %v3067_v0  ;;  %v2948_v3 = vmul.f32 %v5208_v29, %v2704_v1 }
 0x131   : > { %v3551_v4 = vmax.f32 %v3311_v2, 0.0  ;;  %v3192_v5 = vadd.f32 %v5213_v32, %v2948_v3  ;;  %v1805_v6 = vpop.f32.mrf.mxu2 }
 0x132   : > { %v2432_v7 = vpop.f32.mrf.mxu3 }
 0x133   : > { %v3791_v10 = vpack.c.bf16 %v3551_v4, %v3551_v4  ;;  %v3432_v11 = vmax.f32 %v3192_v5, 0.0  ;;  %v2824_v12 = vmax.f32 %v1805_v6, %v2432_v7  ;;  %v1508_v13 = vpop.f32.mrf.mxu0  ;;  %v4955_v6 = vld [vmem:[%s5153_s11 + $0xa0] sm:$0xff] }
 0x134   : > { %v2135_v14 = vpop.f32.mrf.mxu1  ;;  %v5015_v7 = vld [vmem:[%s5153_s11 + $0x280] sm:$0xff] }
 0x135   : > { %4032 = vst.msk [vmem:[%s5226_s19 + $0x228] sm:$0xf] %vm3893_vm2, %v3791_v10  ;;  %v3672_v15 = vpack.c.bf16 %v3432_v11, %v3432_v11  ;;  %v3068_v16 = vmul.f32 %v5208_v29, %v2824_v12  ;;  %v2705_v17 = vmax.f32 %v1508_v13, %v2135_v14 }
 0x136   : > { %4703 = vmatmul.msk.bf16.gmra.mxu0 %vm1084_vm1, %v4953_v8  ;;  %4763 = vmatmul.msk.bf16.gmra.mxu2 %vm1084_vm1, %v5013_v9 }
 0x137   : > { %3913 = vst.msk [vmem:[%s5226_s19 + $0x4c] sm:$0xf] %vm3893_vm2, %v3672_v15  ;;  %v3312_v18 = vadd.f32 %v5213_v32, %v3068_v16  ;;  %v2949_v19 = vmul.f32 %v5208_v29, %v2705_v17  ;;  %4831 = vmatmul.msk.bf16.gmra.mxu1 %vm1084_vm1, %v4953_v8  ;;  %4891 = vmatmul.msk.bf16.gmra.mxu3 %vm1084_vm1, %v5013_v9 }
 0x139   : > { %v3552_v20 = vmax.f32 %v3312_v18, 0.0  ;;  %v3193_v21 = vadd.f32 %v5213_v32, %v2949_v19  ;;  %v1808_v22 = vpop.f32.mrf.mxu2 }
 0x13a   : > { %v2435_v23 = vpop.f32.mrf.mxu3 }
 0x13b   : > { %v3792_v24 = vpack.c.bf16 %v3552_v20, %v3552_v20  ;;  %v3433_v25 = vmax.f32 %v3193_v21, 0.0  ;;  %v2825_v26 = vmax.f32 %v1808_v22, %v2435_v23  ;;  %v1510_v27 = vpop.f32.mrf.mxu0 }
 0x13c   : > { %v2137_v28 = vpop.f32.mrf.mxu1 }
 0x13d   : > { %4033 = vst.msk [vmem:[%s5226_s19 + $0x22c] sm:$0xf] %vm3893_vm2, %v3792_v24  ;;  %v3673_v30 = vpack.c.bf16 %v3433_v25, %v3433_v25  ;;  %v3069_v31 = vmul.f32 %v5208_v29, %v2825_v26  ;;  %v2706_v33 = vmax.f32 %v1510_v27, %v2137_v28 }
 0x13f   : > { %3914 = vst.msk [vmem:[%s5226_s19 + $0x50] sm:$0xf] %vm3893_vm2, %v3673_v30  ;;  %v3313_v34 = vadd.f32 %v5213_v32, %v3069_v31  ;;  %v2950_v35 = vmul.f32 %v5208_v29, %v2706_v33 }
 0x141   : > { %v3553_v36 = vmax.f32 %v3313_v34, 0.0  ;;  %v3194_v37 = vadd.f32 %v5213_v32, %v2950_v35  ;;  %v1810_v38 = vpop.f32.mrf.mxu2 }
 0x142   : > { %v2437_v39 = vpop.f32.mrf.mxu3 }
 0x143   : > { %v3793_v42 = vpack.c.bf16 %v3553_v36, %v3553_v36  ;;  %v3434_v43 = vmax.f32 %v3194_v37, 0.0  ;;  %v2826_v44 = vmax.f32 %v1810_v38, %v2437_v39  ;;  %v1513_v45 = vpop.f32.mrf.mxu0  ;;  %v4956_v38 = vld [vmem:[%s5153_s11 + $0xa8] sm:$0xff] }
 0x144   : > { %v2140_v46 = vpop.f32.mrf.mxu1  ;;  %v5016_v39 = vld [vmem:[%s5153_s11 + $0x288] sm:$0xff] }
 0x145   : > { %4034 = vst.msk [vmem:[%s5226_s19 + $0x230] sm:$0xf] %vm3893_vm2, %v3793_v42  ;;  %v3674_v47 = vpack.c.bf16 %v3434_v43, %v3434_v43  ;;  %v3070_v48 = vmul.f32 %v5208_v29, %v2826_v44  ;;  %v2707_v49 = vmax.f32 %v1513_v45, %v2140_v46 }
 0x146   : > { %4704 = vmatmul.msk.bf16.gmra.mxu0 %vm1084_vm1, %v4954_v40  ;;  %4764 = vmatmul.msk.bf16.gmra.mxu2 %vm1084_vm1, %v5014_v41 }
 0x147   : > { %3915 = vst.msk [vmem:[%s5226_s19 + $0x54] sm:$0xf] %vm3893_vm2, %v3674_v47  ;;  %v3314_v50 = vadd.f32 %v5213_v32, %v3070_v48  ;;  %v2951_v51 = vmul.f32 %v5208_v29, %v2707_v49  ;;  %4832 = vmatmul.msk.bf16.gmra.mxu1 %vm1084_vm1, %v4954_v40  ;;  %4892 = vmatmul.msk.bf16.gmra.mxu3 %vm1084_vm1, %v5014_v41 }
 0x149   : > { %v3554_v52 = vmax.f32 %v3314_v50, 0.0  ;;  %v3195_v53 = vadd.f32 %v5213_v32, %v2951_v51  ;;  %v1813_v54 = vpop.f32.mrf.mxu2 }
 0x14a   : > { %v2440_v55 = vpop.f32.mrf.mxu3 }
 0x14b   : > { %v3794_v56 = vpack.c.bf16 %v3554_v52, %v3554_v52  ;;  %v3435_v57 = vmax.f32 %v3195_v53, 0.0  ;;  %v2827_v58 = vmax.f32 %v1813_v54, %v2440_v55  ;;  %v1515_v59 = vpop.f32.mrf.mxu0 }
 0x14c   : > { %v2142_v60 = vpop.f32.mrf.mxu1 }
 0x14d   : > { %4035 = vst.msk [vmem:[%s5226_s19 + $0x234] sm:$0xf] %vm3893_vm2, %v3794_v56  ;;  %v3675_v61 = vpack.c.bf16 %v3435_v57, %v3435_v57  ;;  %v3071_v62 = vmul.f32 %v5208_v29, %v2827_v58  ;;  %v2708_v63 = vmax.f32 %v1515_v59, %v2142_v60  ;;  %v5517_v59 = vld [vmem:[%s6538_s3] ss:$0 sm:$0xff] }
 0x14f   : > { %3916 = vst.msk [vmem:[%s5226_s19 + $0x58] sm:$0xf] %vm3893_vm2, %v3675_v61  ;;  %v3315_v0 = vadd.f32 %v5213_v32, %v3071_v62  ;;  %v2952_v1 = vmul.f32 %v5208_v29, %v2708_v63  ;;  %v5525_v61 = vld [vmem:[%s6539_s4] ss:$0 sm:$0xff] }
 0x151   : > { %v3555_v2 = vmax.f32 %v3315_v0, 0.0  ;;  %v3196_v3 = vadd.f32 %v5213_v32, %v2952_v1  ;;  %v1815_v4 = vpop.f32.mrf.mxu2 }
 0x152   : > { %v2442_v5 = vpop.f32.mrf.mxu3 }
 0x153   : > { %v3795_v8 = vpack.c.bf16 %v3555_v2, %v3555_v2  ;;  %v3436_v9 = vmax.f32 %v3196_v3, 0.0  ;;  %v2828_v10 = vmax.f32 %v1815_v4, %v2442_v5  ;;  %v1518_v11 = vpop.f32.mrf.mxu0  ;;  %v4957_v4 = vld [vmem:[%s5153_s11 + $0xb0] sm:$0xff] }
 0x154   : > { %v2145_v12 = vpop.f32.mrf.mxu1  ;;  %v5017_v5 = vld [vmem:[%s5153_s11 + $0x290] sm:$0xff] }
 0x155   : > { %4036 = vst.msk [vmem:[%s5226_s19 + $0x238] sm:$0xf] %vm3893_vm2, %v3795_v8  ;;  %v3676_v13 = vpack.c.bf16 %v3436_v9, %v3436_v9  ;;  %v3072_v14 = vmul.f32 %v5208_v29, %v2828_v10  ;;  %v2709_v15 = vmax.f32 %v1518_v11, %v2145_v12 }
 0x156   : > { %4705 = vmatmul.msk.bf16.gmra.mxu0 %vm1084_vm1, %v4955_v6  ;;  %4765 = vmatmul.msk.bf16.gmra.mxu2 %vm1084_vm1, %v5015_v7 }
 0x157   : > { %3917 = vst.msk [vmem:[%s5226_s19 + $0x5c] sm:$0xf] %vm3893_vm2, %v3676_v13  ;;  %v3316_v16 = vadd.f32 %v5213_v32, %v3072_v14  ;;  %v2953_v17 = vmul.f32 %v5208_v29, %v2709_v15  ;;  %4833 = vmatmul.msk.bf16.gmra.mxu1 %vm1084_vm1, %v4955_v6  ;;  %4893 = vmatmul.msk.bf16.gmra.mxu3 %vm1084_vm1, %v5015_v7 }
 0x159   : > { %v3556_v18 = vmax.f32 %v3316_v16, 0.0  ;;  %v3197_v19 = vadd.f32 %v5213_v32, %v2953_v17  ;;  %v1818_v20 = vpop.f32.mrf.mxu2 }
 0x15a   : > { %v2445_v21 = vpop.f32.mrf.mxu3 }
 0x15b   : > { %v3796_v22 = vpack.c.bf16 %v3556_v18, %v3556_v18  ;;  %v3437_v23 = vmax.f32 %v3197_v19, 0.0  ;;  %v2829_v24 = vmax.f32 %v1818_v20, %v2445_v21  ;;  %v1520_v25 = vpop.f32.mrf.mxu0 }
 0x15c   : > { %v2147_v26 = vpop.f32.mrf.mxu1 }
 0x15d   : > { %4037 = vst.msk [vmem:[%s5226_s19 + $0x23c] sm:$0xf] %vm3893_vm2, %v3796_v22  ;;  %v3677_v27 = vpack.c.bf16 %v3437_v23, %v3437_v23  ;;  %v3073_v28 = vmul.f32 %v5208_v29, %v2829_v24  ;;  %v2710_v30 = vmax.f32 %v1520_v25, %v2147_v26 }
 0x15f   : > { %3918 = vst.msk [vmem:[%s5226_s19 + $0x60] sm:$0xf] %vm3893_vm2, %v3677_v27  ;;  %v3317_v31 = vadd.f32 %v5213_v32, %v3073_v28  ;;  %v2954_v33 = vmul.f32 %v5208_v29, %v2710_v30 }
 0x161   : > { %v3557_v34 = vmax.f32 %v3317_v31, 0.0  ;;  %v3198_v35 = vadd.f32 %v5213_v32, %v2954_v33  ;;  %v1820_v36 = vpop.f32.mrf.mxu2 }
 0x162   : > { %v2447_v37 = vpop.f32.mrf.mxu3 }
 0x163   : > { %v3797_v40 = vpack.c.bf16 %v3557_v34, %v3557_v34  ;;  %v3438_v41 = vmax.f32 %v3198_v35, 0.0  ;;  %v2830_v42 = vmax.f32 %v1820_v36, %v2447_v37  ;;  %v1523_v43 = vpop.f32.mrf.mxu0  ;;  %v4958_v36 = vld [vmem:[%s5153_s11 + $0xb8] sm:$0xff] }
 0x164   : > { %v2150_v44 = vpop.f32.mrf.mxu1  ;;  %v5018_v37 = vld [vmem:[%s5153_s11 + $0x298] sm:$0xff] }
 0x165   : > { %4038 = vst.msk [vmem:[%s5226_s19 + $0x240] sm:$0xf] %vm3893_vm2, %v3797_v40  ;;  %v3678_v45 = vpack.c.bf16 %v3438_v41, %v3438_v41  ;;  %v3074_v46 = vmul.f32 %v5208_v29, %v2830_v42  ;;  %v2711_v47 = vmax.f32 %v1523_v43, %v2150_v44 }
 0x166   : > { %4706 = vmatmul.msk.bf16.gmra.mxu0 %vm1084_vm1, %v4956_v38  ;;  %4766 = vmatmul.msk.bf16.gmra.mxu2 %vm1084_vm1, %v5016_v39 }
 0x167   : > { %3919 = vst.msk [vmem:[%s5226_s19 + $0x64] sm:$0xf] %vm3893_vm2, %v3678_v45  ;;  %v3318_v48 = vadd.f32 %v5213_v32, %v3074_v46  ;;  %v2955_v49 = vmul.f32 %v5208_v29, %v2711_v47  ;;  %4834 = vmatmul.msk.bf16.gmra.mxu1 %vm1084_vm1, %v4956_v38  ;;  %4894 = vmatmul.msk.bf16.gmra.mxu3 %vm1084_vm1, %v5016_v39 }
 0x169   : > { %v3558_v50 = vmax.f32 %v3318_v48, 0.0  ;;  %v3199_v51 = vadd.f32 %v5213_v32, %v2955_v49  ;;  %v1823_v52 = vpop.f32.mrf.mxu2 }
 0x16a   : > { %v2450_v53 = vpop.f32.mrf.mxu3 }
 0x16b   : > { %v3798_v54 = vpack.c.bf16 %v3558_v50, %v3558_v50  ;;  %v3439_v55 = vmax.f32 %v3199_v51, 0.0  ;;  %v2831_v56 = vmax.f32 %v1823_v52, %v2450_v53  ;;  %v1525_v57 = vpop.f32.mrf.mxu0 }
 0x16c   : > { %v2152_v58 = vpop.f32.mrf.mxu1 }
 0x16d   : > { %4039 = vst.msk [vmem:[%s5226_s19 + $0x244] sm:$0xf] %vm3893_vm2, %v3798_v54  ;;  %v3679_v29 = vpack.c.bf16 %v3439_v55, %v3439_v55  ;;  %v3075_v60 = vmul.f32 %v5517_v59, %v2831_v56  ;;  %v2712_v32 = vmax.f32 %v1525_v57, %v2152_v58 }
 0x16f   : > { %3920 = vst.msk [vmem:[%s5226_s19 + $0x68] sm:$0xf] %vm3893_vm2, %v3679_v29  ;;  %v3319_v62 = vadd.f32 %v5525_v61, %v3075_v60  ;;  %v2956_v63 = vmul.f32 %v5517_v59, %v2712_v32 }
 0x171   : > { %v3559_v0 = vmax.f32 %v3319_v62, 0.0  ;;  %v3200_v1 = vadd.f32 %v5525_v61, %v2956_v63  ;;  %v1825_v2 = vpop.f32.mrf.mxu2 }
 0x172   : > { %v2452_v3 = vpop.f32.mrf.mxu3 }
 0x173   : > { %v3799_v6 = vpack.c.bf16 %v3559_v0, %v3559_v0  ;;  %v3440_v7 = vmax.f32 %v3200_v1, 0.0  ;;  %v2832_v8 = vmax.f32 %v1825_v2, %v2452_v3  ;;  %v1528_v9 = vpop.f32.mrf.mxu0  ;;  %v4959_v2 = vld [vmem:[%s5153_s11 + $0xc0] sm:$0xff] }
 0x174   : > { %v2155_v10 = vpop.f32.mrf.mxu1  ;;  %v5019_v3 = vld [vmem:[%s5153_s11 + $0x2a0] sm:$0xff] }
 0x175   : > { %4040 = vst.msk [vmem:[%s5226_s19 + $0x248] sm:$0xf] %vm3893_vm2, %v3799_v6  ;;  %v3680_v11 = vpack.c.bf16 %v3440_v7, %v3440_v7  ;;  %v3076_v12 = vmul.f32 %v5517_v59, %v2832_v8  ;;  %v2713_v13 = vmax.f32 %v1528_v9, %v2155_v10 }
 0x176   : > { %4707 = vmatmul.msk.bf16.gmra.mxu0 %vm1084_vm1, %v4957_v4  ;;  %4767 = vmatmul.msk.bf16.gmra.mxu2 %vm1084_vm1, %v5017_v5 }
 0x177   : > { %3921 = vst.msk [vmem:[%s5226_s19 + $0x6c] sm:$0xf] %vm3893_vm2, %v3680_v11  ;;  %v3320_v14 = vadd.f32 %v5525_v61, %v3076_v12  ;;  %v2957_v15 = vmul.f32 %v5517_v59, %v2713_v13  ;;  %4835 = vmatmul.msk.bf16.gmra.mxu1 %vm1084_vm1, %v4957_v4  ;;  %4895 = vmatmul.msk.bf16.gmra.mxu3 %vm1084_vm1, %v5017_v5 }
 0x179   : > { %v3560_v16 = vmax.f32 %v3320_v14, 0.0  ;;  %v3201_v17 = vadd.f32 %v5525_v61, %v2957_v15  ;;  %v1828_v18 = vpop.f32.mrf.mxu2 }
 0x17a   : > { %v2455_v19 = vpop.f32.mrf.mxu3 }
 0x17b   : > { %v3800_v20 = vpack.c.bf16 %v3560_v16, %v3560_v16  ;;  %v3441_v21 = vmax.f32 %v3201_v17, 0.0  ;;  %v2833_v22 = vmax.f32 %v1828_v18, %v2455_v19  ;;  %v1530_v23 = vpop.f32.mrf.mxu0 }
 0x17c   : > { %v2157_v24 = vpop.f32.mrf.mxu1 }
 0x17d   : > { %4041 = vst.msk [vmem:[%s5226_s19 + $0x24c] sm:$0xf] %vm3893_vm2, %v3800_v20  ;;  %v3681_v25 = vpack.c.bf16 %v3441_v21, %v3441_v21  ;;  %v3077_v26 = vmul.f32 %v5517_v59, %v2833_v22  ;;  %v2714_v27 = vmax.f32 %v1530_v23, %v2157_v24 }
 0x17f   : > { %3922 = vst.msk [vmem:[%s5226_s19 + $0x70] sm:$0xf] %vm3893_vm2, %v3681_v25  ;;  %v3321_v28 = vadd.f32 %v5525_v61, %v3077_v26  ;;  %v2958_v30 = vmul.f32 %v5517_v59, %v2714_v27 }
 0x181   : > { %v3561_v31 = vmax.f32 %v3321_v28, 0.0  ;;  %v3202_v33 = vadd.f32 %v5525_v61, %v2958_v30  ;;  %v1830_v34 = vpop.f32.mrf.mxu2 }
 0x182   : > { %v2457_v35 = vpop.f32.mrf.mxu3 }
 0x183   : > { %v3801_v38 = vpack.c.bf16 %v3561_v31, %v3561_v31  ;;  %v3442_v39 = vmax.f32 %v3202_v33, 0.0  ;;  %v2834_v40 = vmax.f32 %v1830_v34, %v2457_v35  ;;  %v1533_v41 = vpop.f32.mrf.mxu0  ;;  %v4960_v34 = vld [vmem:[%s5153_s11 + $0xc8] sm:$0xff] }
 0x184   : > { %v2160_v42 = vpop.f32.mrf.mxu1  ;;  %v5020_v35 = vld [vmem:[%s5153_s11 + $0x2a8] sm:$0xff] }
 0x185   : > { %4042 = vst.msk [vmem:[%s5226_s19 + $0x250] sm:$0xf] %vm3893_vm2, %v3801_v38  ;;  %v3682_v43 = vpack.c.bf16 %v3442_v39, %v3442_v39  ;;  %v3078_v44 = vmul.f32 %v5517_v59, %v2834_v40  ;;  %v2715_v45 = vmax.f32 %v1533_v41, %v2160_v42 }
 0x186   : > { %4708 = vmatmul.msk.bf16.gmra.mxu0 %vm1084_vm1, %v4958_v36  ;;  %4768 = vmatmul.msk.bf16.gmra.mxu2 %vm1084_vm1, %v5018_v37 }
 0x187   : > { %3923 = vst.msk [vmem:[%s5226_s19 + $0x74] sm:$0xf] %vm3893_vm2, %v3682_v43  ;;  %v3322_v46 = vadd.f32 %v5525_v61, %v3078_v44  ;;  %v2959_v47 = vmul.f32 %v5517_v59, %v2715_v45  ;;  %4836 = vmatmul.msk.bf16.gmra.mxu1 %vm1084_vm1, %v4958_v36  ;;  %4896 = vmatmul.msk.bf16.gmra.mxu3 %vm1084_vm1, %v5018_v37 }
 0x189   : > { %v3562_v48 = vmax.f32 %v3322_v46, 0.0  ;;  %v3203_v49 = vadd.f32 %v5525_v61, %v2959_v47  ;;  %v1833_v50 = vpop.f32.mrf.mxu2 }
 0x18a   : > { %v2460_v51 = vpop.f32.mrf.mxu3 }
 0x18b   : > { %v3802_v52 = vpack.c.bf16 %v3562_v48, %v3562_v48  ;;  %v3443_v53 = vmax.f32 %v3203_v49, 0.0  ;;  %v2835_v54 = vmax.f32 %v1833_v50, %v2460_v51  ;;  %v1535_v55 = vpop.f32.mrf.mxu0 }
 0x18c   : > { %v2162_v56 = vpop.f32.mrf.mxu1 }
 0x18d   : > { %4043 = vst.msk [vmem:[%s5226_s19 + $0x254] sm:$0xf] %vm3893_vm2, %v3802_v52  ;;  %v3683_v57 = vpack.c.bf16 %v3443_v53, %v3443_v53  ;;  %v3079_v58 = vmul.f32 %v5517_v59, %v2835_v54  ;;  %v2716_v29 = vmax.f32 %v1535_v55, %v2162_v56 }
 0x18f   : > { %3924 = vst.msk [vmem:[%s5226_s19 + $0x78] sm:$0xf] %vm3893_vm2, %v3683_v57  ;;  %v3323_v60 = vadd.f32 %v5525_v61, %v3079_v58  ;;  %v2960_v32 = vmul.f32 %v5517_v59, %v2716_v29 }
 0x191   : > { %v3563_v62 = vmax.f32 %v3323_v60, 0.0  ;;  %v3204_v63 = vadd.f32 %v5525_v61, %v2960_v32  ;;  %v1835_v0 = vpop.f32.mrf.mxu2 }
 0x192   : > { %v2462_v1 = vpop.f32.mrf.mxu3 }
 0x193   : > { %v3803_v4 = vpack.c.bf16 %v3563_v62, %v3563_v62  ;;  %v3444_v5 = vmax.f32 %v3204_v63, 0.0  ;;  %v2836_v6 = vmax.f32 %v1835_v0, %v2462_v1  ;;  %v1538_v7 = vpop.f32.mrf.mxu0  ;;  %v4961_v0 = vld [vmem:[%s5153_s11 + $0xd0] sm:$0xff] }
 0x194   : > { %v2165_v8 = vpop.f32.mrf.mxu1  ;;  %v5021_v1 = vld [vmem:[%s5153_s11 + $0x2b0] sm:$0xff] }
 0x195   : > { %4044 = vst.msk [vmem:[%s5226_s19 + $0x258] sm:$0xf] %vm3893_vm2, %v3803_v4  ;;  %v3684_v9 = vpack.c.bf16 %v3444_v5, %v3444_v5  ;;  %v3080_v10 = vmul.f32 %v5517_v59, %v2836_v6  ;;  %v2717_v11 = vmax.f32 %v1538_v7, %v2165_v8 }
 0x196   : > { %4709 = vmatmul.msk.bf16.gmra.mxu0 %vm1084_vm1, %v4959_v2  ;;  %4769 = vmatmul.msk.bf16.gmra.mxu2 %vm1084_vm1, %v5019_v3 }
 0x197   : > { %3925 = vst.msk [vmem:[%s5226_s19 + $0x7c] sm:$0xf] %vm3893_vm2, %v3684_v9  ;;  %v3324_v12 = vadd.f32 %v5525_v61, %v3080_v10  ;;  %v2961_v13 = vmul.f32 %v5517_v59, %v2717_v11  ;;  %4837 = vmatmul.msk.bf16.gmra.mxu1 %vm1084_vm1, %v4959_v2  ;;  %4897 = vmatmul.msk.bf16.gmra.mxu3 %vm1084_vm1, %v5019_v3 }
 0x199   : > { %v3564_v14 = vmax.f32 %v3324_v12, 0.0  ;;  %v3205_v15 = vadd.f32 %v5525_v61, %v2961_v13  ;;  %v1838_v16 = vpop.f32.mrf.mxu2 }
 0x19a   : > { %v2465_v17 = vpop.f32.mrf.mxu3 }
 0x19b   : > { %v3804_v18 = vpack.c.bf16 %v3564_v14, %v3564_v14  ;;  %v3445_v19 = vmax.f32 %v3205_v15, 0.0  ;;  %v2837_v20 = vmax.f32 %v1838_v16, %v2465_v17  ;;  %v1540_v21 = vpop.f32.mrf.mxu0 }
 0x19c   : > { %v2167_v22 = vpop.f32.mrf.mxu1 }
 0x19d   : > { %4045 = vst.msk [vmem:[%s5226_s19 + $0x25c] sm:$0xf] %vm3893_vm2, %v3804_v18  ;;  %v3685_v23 = vpack.c.bf16 %v3445_v19, %v3445_v19  ;;  %v3081_v24 = vmul.f32 %v5517_v59, %v2837_v20  ;;  %v2718_v25 = vmax.f32 %v1540_v21, %v2167_v22 }
 0x19f   : > { %3926 = vst.msk [vmem:[%s5226_s19 + $0x80] sm:$0xf] %vm3893_vm2, %v3685_v23  ;;  %v3325_v26 = vadd.f32 %v5525_v61, %v3081_v24  ;;  %v2962_v27 = vmul.f32 %v5517_v59, %v2718_v25 }
 0x1a1   : > { %v3565_v28 = vmax.f32 %v3325_v26, 0.0  ;;  %v3206_v30 = vadd.f32 %v5525_v61, %v2962_v27  ;;  %v1840_v31 = vpop.f32.mrf.mxu2 }
 0x1a2   : > { %v2467_v33 = vpop.f32.mrf.mxu3 }
 0x1a3   : > { %v3805_v36 = vpack.c.bf16 %v3565_v28, %v3565_v28  ;;  %v3446_v37 = vmax.f32 %v3206_v30, 0.0  ;;  %v2838_v38 = vmax.f32 %v1840_v31, %v2467_v33  ;;  %v1543_v39 = vpop.f32.mrf.mxu0  ;;  %v4962_v31 = vld [vmem:[%s5153_s11 + $0xd8] sm:$0xff] }
 0x1a4   : > { %v2170_v40 = vpop.f32.mrf.mxu1  ;;  %v5022_v33 = vld [vmem:[%s5153_s11 + $0x2b8] sm:$0xff] }
 0x1a5   : > { %4046 = vst.msk [vmem:[%s5226_s19 + $0x260] sm:$0xf] %vm3893_vm2, %v3805_v36  ;;  %v3686_v41 = vpack.c.bf16 %v3446_v37, %v3446_v37  ;;  %v3082_v42 = vmul.f32 %v5517_v59, %v2838_v38  ;;  %v2719_v43 = vmax.f32 %v1543_v39, %v2170_v40 }
 0x1a6   : > { %4710 = vmatmul.msk.bf16.gmra.mxu0 %vm1084_vm1, %v4960_v34  ;;  %4770 = vmatmul.msk.bf16.gmra.mxu2 %vm1084_vm1, %v5020_v35 }
 0x1a7   : > { %3927 = vst.msk [vmem:[%s5226_s19 + $0x84] sm:$0xf] %vm3893_vm2, %v3686_v41  ;;  %v3326_v44 = vadd.f32 %v5525_v61, %v3082_v42  ;;  %v2963_v45 = vmul.f32 %v5517_v59, %v2719_v43  ;;  %4838 = vmatmul.msk.bf16.gmra.mxu1 %vm1084_vm1, %v4960_v34  ;;  %4898 = vmatmul.msk.bf16.gmra.mxu3 %vm1084_vm1, %v5020_v35 }
 0x1a9   : > { %v3566_v46 = vmax.f32 %v3326_v44, 0.0  ;;  %v3207_v47 = vadd.f32 %v5525_v61, %v2963_v45  ;;  %v1843_v48 = vpop.f32.mrf.mxu2 }
 0x1aa   : > { %v2470_v49 = vpop.f32.mrf.mxu3 }
 0x1ab   : > { %v3806_v50 = vpack.c.bf16 %v3566_v46, %v3566_v46  ;;  %v3447_v51 = vmax.f32 %v3207_v47, 0.0  ;;  %v2839_v52 = vmax.f32 %v1843_v48, %v2470_v49  ;;  %v1545_v53 = vpop.f32.mrf.mxu0 }
 0x1ac   : > { %v2172_v54 = vpop.f32.mrf.mxu1 }
 0x1ad   : > { %4047 = vst.msk [vmem:[%s5226_s19 + $0x264] sm:$0xf] %vm3893_vm2, %v3806_v50  ;;  %v3687_v55 = vpack.c.bf16 %v3447_v51, %v3447_v51  ;;  %v3083_v56 = vmul.f32 %v5517_v59, %v2839_v52  ;;  %v2720_v57 = vmax.f32 %v1545_v53, %v2172_v54 }
 0x1af   : > { %3928 = vst.msk [vmem:[%s5226_s19 + $0x88] sm:$0xf] %vm3893_vm2, %v3687_v55  ;;  %v3327_v58 = vadd.f32 %v5525_v61, %v3083_v56  ;;  %v2964_v29 = vmul.f32 %v5517_v59, %v2720_v57 }
 0x1b1   : > { %v3567_v60 = vmax.f32 %v3327_v58, 0.0  ;;  %v3208_v32 = vadd.f32 %v5525_v61, %v2964_v29  ;;  %v1845_v62 = vpop.f32.mrf.mxu2 }
 0x1b2   : > { %v2472_v63 = vpop.f32.mrf.mxu3 }
 0x1b3   : > { %v3807_v2 = vpack.c.bf16 %v3567_v60, %v3567_v60  ;;  %v3448_v3 = vmax.f32 %v3208_v32, 0.0  ;;  %v2840_v4 = vmax.f32 %v1845_v62, %v2472_v63  ;;  %v1548_v5 = vpop.f32.mrf.mxu0  ;;  %v4963_v62 = vld [vmem:[%s5153_s11 + $0xe0] sm:$0xff] }
 0x1b4   : > { %v2175_v6 = vpop.f32.mrf.mxu1  ;;  %v5023_v63 = vld [vmem:[%s5153_s11 + $0x2c0] sm:$0xff] }
 0x1b5   : > { %4048 = vst.msk [vmem:[%s5226_s19 + $0x268] sm:$0xf] %vm3893_vm2, %v3807_v2  ;;  %v3688_v7 = vpack.c.bf16 %v3448_v3, %v3448_v3  ;;  %v3084_v8 = vmul.f32 %v5517_v59, %v2840_v4  ;;  %v2721_v9 = vmax.f32 %v1548_v5, %v2175_v6 }
 0x1b6   : > { %4711 = vmatmul.msk.bf16.gmra.mxu0 %vm1084_vm1, %v4961_v0  ;;  %4771 = vmatmul.msk.bf16.gmra.mxu2 %vm1084_vm1, %v5021_v1 }
 0x1b7   : > { %3929 = vst.msk [vmem:[%s5226_s19 + $0x8c] sm:$0xf] %vm3893_vm2, %v3688_v7  ;;  %v3328_v10 = vadd.f32 %v5525_v61, %v3084_v8  ;;  %v2965_v11 = vmul.f32 %v5517_v59, %v2721_v9  ;;  %4839 = vmatmul.msk.bf16.gmra.mxu1 %vm1084_vm1, %v4961_v0  ;;  %4899 = vmatmul.msk.bf16.gmra.mxu3 %vm1084_vm1, %v5021_v1 }
 0x1b9   : > { %v3568_v12 = vmax.f32 %v3328_v10, 0.0  ;;  %v3209_v13 = vadd.f32 %v5525_v61, %v2965_v11  ;;  %v1848_v14 = vpop.f32.mrf.mxu2 }
 0x1ba   : > { %v2475_v15 = vpop.f32.mrf.mxu3 }
 0x1bb   : > { %v3808_v16 = vpack.c.bf16 %v3568_v12, %v3568_v12  ;;  %v3449_v17 = vmax.f32 %v3209_v13, 0.0  ;;  %v2841_v18 = vmax.f32 %v1848_v14, %v2475_v15  ;;  %v1550_v19 = vpop.f32.mrf.mxu0 }
 0x1bc   : > { %v2177_v20 = vpop.f32.mrf.mxu1 }
 0x1bd   : > { %4049 = vst.msk [vmem:[%s5226_s19 + $0x26c] sm:$0xf] %vm3893_vm2, %v3808_v16  ;;  %v3689_v21 = vpack.c.bf16 %v3449_v17, %v3449_v17  ;;  %v3085_v22 = vmul.f32 %v5517_v59, %v2841_v18  ;;  %v2722_v23 = vmax.f32 %v1550_v19, %v2177_v20 }
 0x1bf   : > { %3930 = vst.msk [vmem:[%s5226_s19 + $0x90] sm:$0xf] %vm3893_vm2, %v3689_v21  ;;  %v3329_v24 = vadd.f32 %v5525_v61, %v3085_v22  ;;  %v2966_v25 = vmul.f32 %v5517_v59, %v2722_v23 }
 0x1c1   : > { %v3569_v26 = vmax.f32 %v3329_v24, 0.0  ;;  %v3210_v27 = vadd.f32 %v5525_v61, %v2966_v25  ;;  %v1850_v28 = vpop.f32.mrf.mxu2 }
 0x1c2   : > { %v2477_v30 = vpop.f32.mrf.mxu3 }
 0x1c3   : > { %v3809_v34 = vpack.c.bf16 %v3569_v26, %v3569_v26  ;;  %v3450_v35 = vmax.f32 %v3210_v27, 0.0  ;;  %v2842_v36 = vmax.f32 %v1850_v28, %v2477_v30  ;;  %v1553_v37 = vpop.f32.mrf.mxu0  ;;  %v4964_v28 = vld [vmem:[%s5153_s11 + $0xe8] sm:$0xff] }
 0x1c4   : > { %v2180_v38 = vpop.f32.mrf.mxu1  ;;  %v5024_v30 = vld [vmem:[%s5153_s11 + $0x2c8] sm:$0xff] }
 0x1c5   : > { %4050 = vst.msk [vmem:[%s5226_s19 + $0x270] sm:$0xf] %vm3893_vm2, %v3809_v34  ;;  %v3690_v39 = vpack.c.bf16 %v3450_v35, %v3450_v35  ;;  %v3086_v40 = vmul.f32 %v5517_v59, %v2842_v36  ;;  %v2723_v41 = vmax.f32 %v1553_v37, %v2180_v38 }
 0x1c6   : > { %4712 = vmatmul.msk.bf16.gmra.mxu0 %vm1084_vm1, %v4962_v31  ;;  %4772 = vmatmul.msk.bf16.gmra.mxu2 %vm1084_vm1, %v5022_v33 }
 0x1c7   : > { %3931 = vst.msk [vmem:[%s5226_s19 + $0x94] sm:$0xf] %vm3893_vm2, %v3690_v39  ;;  %v3330_v42 = vadd.f32 %v5525_v61, %v3086_v40  ;;  %v2967_v43 = vmul.f32 %v5517_v59, %v2723_v41  ;;  %4840 = vmatmul.msk.bf16.gmra.mxu1 %vm1084_vm1, %v4962_v31  ;;  %4900 = vmatmul.msk.bf16.gmra.mxu3 %vm1084_vm1, %v5022_v33 }
 0x1c9   : > { %v3570_v44 = vmax.f32 %v3330_v42, 0.0  ;;  %v3211_v45 = vadd.f32 %v5525_v61, %v2967_v43  ;;  %v1853_v46 = vpop.f32.mrf.mxu2 }
 0x1ca   : > { %v2480_v47 = vpop.f32.mrf.mxu3 }
 0x1cb   : > { %v3810_v48 = vpack.c.bf16 %v3570_v44, %v3570_v44  ;;  %v3451_v49 = vmax.f32 %v3211_v45, 0.0  ;;  %v2843_v50 = vmax.f32 %v1853_v46, %v2480_v47  ;;  %v1555_v51 = vpop.f32.mrf.mxu0 }
 0x1cc   : > { %v2182_v52 = vpop.f32.mrf.mxu1 }
 0x1cd   : > { %4051 = vst.msk [vmem:[%s5226_s19 + $0x274] sm:$0xf] %vm3893_vm2, %v3810_v48  ;;  %v3691_v53 = vpack.c.bf16 %v3451_v49, %v3451_v49  ;;  %v3087_v54 = vmul.f32 %v5517_v59, %v2843_v50  ;;  %v2724_v55 = vmax.f32 %v1555_v51, %v2182_v52 }
 0x1cf   : > { %3932 = vst.msk [vmem:[%s5226_s19 + $0x98] sm:$0xf] %vm3893_vm2, %v3691_v53  ;;  %v3331_v56 = vadd.f32 %v5525_v61, %v3087_v54  ;;  %v2968_v57 = vmul.f32 %v5517_v59, %v2724_v55 }
 0x1d1   : > { %v3571_v58 = vmax.f32 %v3331_v56, 0.0  ;;  %v3212_v29 = vadd.f32 %v5525_v61, %v2968_v57  ;;  %v1855_v60 = vpop.f32.mrf.mxu2 }
 0x1d2   : > { %v2482_v32 = vpop.f32.mrf.mxu3 }
 0x1d3   : > { %v3811_v0 = vpack.c.bf16 %v3571_v58, %v3571_v58  ;;  %v3452_v1 = vmax.f32 %v3212_v29, 0.0  ;;  %v2844_v2 = vmax.f32 %v1855_v60, %v2482_v32  ;;  %v1558_v3 = vpop.f32.mrf.mxu0  ;;  %v4965_v60 = vld [vmem:[%s5153_s11 + $0xf0] sm:$0xff] }
 0x1d4   : > { %v2185_v4 = vpop.f32.mrf.mxu1  ;;  %v5025_v32 = vld [vmem:[%s5153_s11 + $0x2d0] sm:$0xff] }
 0x1d5   : > { %4052 = vst.msk [vmem:[%s5226_s19 + $0x278] sm:$0xf] %vm3893_vm2, %v3811_v0  ;;  %v3692_v5 = vpack.c.bf16 %v3452_v1, %v3452_v1  ;;  %v3088_v6 = vmul.f32 %v5517_v59, %v2844_v2  ;;  %v2725_v7 = vmax.f32 %v1558_v3, %v2185_v4 }
 0x1d6   : > { %4713 = vmatmul.msk.bf16.gmra.mxu0 %vm1084_vm1, %v4963_v62  ;;  %4773 = vmatmul.msk.bf16.gmra.mxu2 %vm1084_vm1, %v5023_v63 }
 0x1d7   : > { %3933 = vst.msk [vmem:[%s5226_s19 + $0x9c] sm:$0xf] %vm3893_vm2, %v3692_v5  ;;  %v3332_v8 = vadd.f32 %v5525_v61, %v3088_v6  ;;  %v2969_v9 = vmul.f32 %v5517_v59, %v2725_v7  ;;  %4841 = vmatmul.msk.bf16.gmra.mxu1 %vm1084_vm1, %v4963_v62  ;;  %4901 = vmatmul.msk.bf16.gmra.mxu3 %vm1084_vm1, %v5023_v63 }
 0x1d9   : > { %v3572_v10 = vmax.f32 %v3332_v8, 0.0  ;;  %v3213_v11 = vadd.f32 %v5525_v61, %v2969_v9  ;;  %v1858_v12 = vpop.f32.mrf.mxu2 }
 0x1da   : > { %v2485_v13 = vpop.f32.mrf.mxu3 }
 0x1db   : > { %v3812_v14 = vpack.c.bf16 %v3572_v10, %v3572_v10  ;;  %v3453_v15 = vmax.f32 %v3213_v11, 0.0  ;;  %v2845_v16 = vmax.f32 %v1858_v12, %v2485_v13  ;;  %v1560_v17 = vpop.f32.mrf.mxu0 }
 0x1dc   : > { %v2187_v18 = vpop.f32.mrf.mxu1 }
 0x1dd   : > { %4053 = vst.msk [vmem:[%s5226_s19 + $0x27c] sm:$0xf] %vm3893_vm2, %v3812_v14  ;;  %v3693_v19 = vpack.c.bf16 %v3453_v15, %v3453_v15  ;;  %v3089_v20 = vmul.f32 %v5517_v59, %v2845_v16  ;;  %v2726_v21 = vmax.f32 %v1560_v17, %v2187_v18 }
 0x1df   : > { %3934 = vst.msk [vmem:[%s5226_s19 + $0xa0] sm:$0xf] %vm3893_vm2, %v3693_v19  ;;  %v3333_v22 = vadd.f32 %v5525_v61, %v3089_v20  ;;  %v2970_v23 = vmul.f32 %v5517_v59, %v2726_v21 }
 0x1e1   : > { %v3573_v24 = vmax.f32 %v3333_v22, 0.0  ;;  %v3214_v25 = vadd.f32 %v5525_v61, %v2970_v23  ;;  %v1860_v26 = vpop.f32.mrf.mxu2 }
 0x1e2   : > { %v2487_v27 = vpop.f32.mrf.mxu3 }
 0x1e3   : > { %v3813_v31 = vpack.c.bf16 %v3573_v24, %v3573_v24  ;;  %v3454_v33 = vmax.f32 %v3214_v25, 0.0  ;;  %v2846_v34 = vmax.f32 %v1860_v26, %v2487_v27  ;;  %v1563_v35 = vpop.f32.mrf.mxu0  ;;  %v4966_v26 = vld [vmem:[%s5153_s11 + $0xf8] sm:$0xff] }
 0x1e4   : > { %v2190_v36 = vpop.f32.mrf.mxu1  ;;  %v5026_v27 = vld [vmem:[%s5153_s11 + $0x2d8] sm:$0xff] }
 0x1e5   : > { %4054 = vst.msk [vmem:[%s5226_s19 + $0x280] sm:$0xf] %vm3893_vm2, %v3813_v31  ;;  %v3694_v37 = vpack.c.bf16 %v3454_v33, %v3454_v33  ;;  %v3090_v38 = vmul.f32 %v5517_v59, %v2846_v34  ;;  %v2727_v39 = vmax.f32 %v1563_v35, %v2190_v36 }
 0x1e6   : > { %4714 = vmatmul.msk.bf16.gmra.mxu0 %vm1084_vm1, %v4964_v28  ;;  %4774 = vmatmul.msk.bf16.gmra.mxu2 %vm1084_vm1, %v5024_v30 }
 0x1e7   : > { %3935 = vst.msk [vmem:[%s5226_s19 + $0xa4] sm:$0xf] %vm3893_vm2, %v3694_v37  ;;  %v3334_v40 = vadd.f32 %v5525_v61, %v3090_v38  ;;  %v2971_v41 = vmul.f32 %v5517_v59, %v2727_v39  ;;  %4842 = vmatmul.msk.bf16.gmra.mxu1 %vm1084_vm1, %v4964_v28  ;;  %4902 = vmatmul.msk.bf16.gmra.mxu3 %vm1084_vm1, %v5024_v30 }
 0x1e9   : > { %v3574_v42 = vmax.f32 %v3334_v40, 0.0  ;;  %v3215_v43 = vadd.f32 %v5525_v61, %v2971_v41  ;;  %v1863_v44 = vpop.f32.mrf.mxu2 }
 0x1ea   : > { %v2490_v45 = vpop.f32.mrf.mxu3 }
 0x1eb   : > { %v3814_v46 = vpack.c.bf16 %v3574_v42, %v3574_v42  ;;  %v3455_v47 = vmax.f32 %v3215_v43, 0.0  ;;  %v2847_v48 = vmax.f32 %v1863_v44, %v2490_v45  ;;  %v1565_v49 = vpop.f32.mrf.mxu0 }
 0x1ec   : > { %v2192_v50 = vpop.f32.mrf.mxu1 }
 0x1ed   : > { %4055 = vst.msk [vmem:[%s5226_s19 + $0x284] sm:$0xf] %vm3893_vm2, %v3814_v46  ;;  %v3695_v51 = vpack.c.bf16 %v3455_v47, %v3455_v47  ;;  %v3091_v52 = vmul.f32 %v5517_v59, %v2847_v48  ;;  %v2728_v53 = vmax.f32 %v1565_v49, %v2192_v50 }
 0x1ef   : > { %3936 = vst.msk [vmem:[%s5226_s19 + $0xa8] sm:$0xf] %vm3893_vm2, %v3695_v51  ;;  %v3335_v54 = vadd.f32 %v5525_v61, %v3091_v52  ;;  %v2972_v55 = vmul.f32 %v5517_v59, %v2728_v53 }
 0x1f1   : > { %v3575_v56 = vmax.f32 %v3335_v54, 0.0  ;;  %v3216_v57 = vadd.f32 %v5525_v61, %v2972_v55  ;;  %v1865_v58 = vpop.f32.mrf.mxu2 }
 0x1f2   : > { %v2492_v29 = vpop.f32.mrf.mxu3 }
 0x1f3   : > { %v3815_v62 = vpack.c.bf16 %v3575_v56, %v3575_v56  ;;  %v3456_v63 = vmax.f32 %v3216_v57, 0.0  ;;  %v2848_v0 = vmax.f32 %v1865_v58, %v2492_v29  ;;  %v1568_v1 = vpop.f32.mrf.mxu0  ;;  %v4967_v58 = vld [vmem:[%s5153_s11 + $0x100] sm:$0xff] }
 0x1f4   : > { %v2195_v2 = vpop.f32.mrf.mxu1  ;;  %v5027_v29 = vld [vmem:[%s5153_s11 + $0x2e0] sm:$0xff] }
 0x1f5   : > { %4056 = vst.msk [vmem:[%s5226_s19 + $0x288] sm:$0xf] %vm3893_vm2, %v3815_v62  ;;  %v3696_v3 = vpack.c.bf16 %v3456_v63, %v3456_v63  ;;  %v3092_v4 = vmul.f32 %v5517_v59, %v2848_v0  ;;  %v2729_v5 = vmax.f32 %v1568_v1, %v2195_v2 }
 0x1f6   : > { %4715 = vmatmul.msk.bf16.gmra.mxu0 %vm1084_vm1, %v4965_v60  ;;  %4775 = vmatmul.msk.bf16.gmra.mxu2 %vm1084_vm1, %v5025_v32 }
 0x1f7   : > { %3937 = vst.msk [vmem:[%s5226_s19 + $0xac] sm:$0xf] %vm3893_vm2, %v3696_v3  ;;  %v3336_v6 = vadd.f32 %v5525_v61, %v3092_v4  ;;  %v2973_v7 = vmul.f32 %v5517_v59, %v2729_v5  ;;  %4843 = vmatmul.msk.bf16.gmra.mxu1 %vm1084_vm1, %v4965_v60  ;;  %4903 = vmatmul.msk.bf16.gmra.mxu3 %vm1084_vm1, %v5025_v32 }
 0x1f9   : > { %v3576_v8 = vmax.f32 %v3336_v6, 0.0  ;;  %v3217_v9 = vadd.f32 %v5525_v61, %v2973_v7  ;;  %v1868_v10 = vpop.f32.mrf.mxu2 }
 0x1fa   : > { %v2495_v11 = vpop.f32.mrf.mxu3 }
 0x1fb   : > { %v3816_v12 = vpack.c.bf16 %v3576_v8, %v3576_v8  ;;  %v3457_v13 = vmax.f32 %v3217_v9, 0.0  ;;  %v2849_v14 = vmax.f32 %v1868_v10, %v2495_v11  ;;  %v1570_v15 = vpop.f32.mrf.mxu0 }
 0x1fc   : > { %v2197_v16 = vpop.f32.mrf.mxu1 }
 0x1fd   : > { %4057 = vst.msk [vmem:[%s5226_s19 + $0x28c] sm:$0xf] %vm3893_vm2, %v3816_v12  ;;  %v3697_v17 = vpack.c.bf16 %v3457_v13, %v3457_v13  ;;  %v3093_v18 = vmul.f32 %v5517_v59, %v2849_v14  ;;  %v2730_v19 = vmax.f32 %v1570_v15, %v2197_v16 }
 0x1ff   : > { %3938 = vst.msk [vmem:[%s5226_s19 + $0xb0] sm:$0xf] %vm3893_vm2, %v3697_v17  ;;  %v3337_v20 = vadd.f32 %v5525_v61, %v3093_v18  ;;  %v2974_v21 = vmul.f32 %v5517_v59, %v2730_v19 }
 0x201   : > { %v3577_v22 = vmax.f32 %v3337_v20, 0.0  ;;  %v3218_v23 = vadd.f32 %v5525_v61, %v2974_v21  ;;  %v1870_v24 = vpop.f32.mrf.mxu2 }
 0x202   : > { %v2497_v25 = vpop.f32.mrf.mxu3 }
 0x203   : > { %v3817_v28 = vpack.c.bf16 %v3577_v22, %v3577_v22  ;;  %v3458_v30 = vmax.f32 %v3218_v23, 0.0  ;;  %v2850_v31 = vmax.f32 %v1870_v24, %v2497_v25  ;;  %v1573_v33 = vpop.f32.mrf.mxu0  ;;  %v4968_v24 = vld [vmem:[%s5153_s11 + $0x108] sm:$0xff] }
 0x204   : > { %v2200_v34 = vpop.f32.mrf.mxu1  ;;  %v5028_v25 = vld [vmem:[%s5153_s11 + $0x2e8] sm:$0xff] }
 0x205   : > { %4058 = vst.msk [vmem:[%s5226_s19 + $0x290] sm:$0xf] %vm3893_vm2, %v3817_v28  ;;  %v3698_v35 = vpack.c.bf16 %v3458_v30, %v3458_v30  ;;  %v3094_v36 = vmul.f32 %v5517_v59, %v2850_v31  ;;  %v2731_v37 = vmax.f32 %v1573_v33, %v2200_v34 }
 0x206   : > { %4716 = vmatmul.msk.bf16.gmra.mxu0 %vm1084_vm1, %v4966_v26  ;;  %4776 = vmatmul.msk.bf16.gmra.mxu2 %vm1084_vm1, %v5026_v27 }
 0x207   : > { %3939 = vst.msk [vmem:[%s5226_s19 + $0xb4] sm:$0xf] %vm3893_vm2, %v3698_v35  ;;  %v3338_v38 = vadd.f32 %v5525_v61, %v3094_v36  ;;  %v2975_v39 = vmul.f32 %v5517_v59, %v2731_v37  ;;  %4844 = vmatmul.msk.bf16.gmra.mxu1 %vm1084_vm1, %v4966_v26  ;;  %4904 = vmatmul.msk.bf16.gmra.mxu3 %vm1084_vm1, %v5026_v27 }
 0x209   : > { %v3578_v40 = vmax.f32 %v3338_v38, 0.0  ;;  %v3219_v41 = vadd.f32 %v5525_v61, %v2975_v39  ;;  %v1873_v42 = vpop.f32.mrf.mxu2 }
 0x20a   : > { %v2500_v43 = vpop.f32.mrf.mxu3 }
 0x20b   : > { %v3818_v44 = vpack.c.bf16 %v3578_v40, %v3578_v40  ;;  %v3459_v45 = vmax.f32 %v3219_v41, 0.0  ;;  %v2851_v46 = vmax.f32 %v1873_v42, %v2500_v43  ;;  %v1575_v47 = vpop.f32.mrf.mxu0 }
 0x20c   : > { %v2202_v48 = vpop.f32.mrf.mxu1 }
 0x20d   : > { %4059 = vst.msk [vmem:[%s5226_s19 + $0x294] sm:$0xf] %vm3893_vm2, %v3818_v44  ;;  %v3699_v49 = vpack.c.bf16 %v3459_v45, %v3459_v45  ;;  %v3095_v50 = vmul.f32 %v5517_v59, %v2851_v46  ;;  %v2732_v51 = vmax.f32 %v1575_v47, %v2202_v48 }
 0x20f   : > { %3940 = vst.msk [vmem:[%s5226_s19 + $0xb8] sm:$0xf] %vm3893_vm2, %v3699_v49  ;;  %v3339_v52 = vadd.f32 %v5525_v61, %v3095_v50  ;;  %v2976_v53 = vmul.f32 %v5517_v59, %v2732_v51 }
 0x211   : > { %v3579_v54 = vmax.f32 %v3339_v52, 0.0  ;;  %v3220_v55 = vadd.f32 %v5525_v61, %v2976_v53  ;;  %v1875_v56 = vpop.f32.mrf.mxu2 }
 0x212   : > { %v2502_v57 = vpop.f32.mrf.mxu3 }
 0x213   : > { %v3819_v60 = vpack.c.bf16 %v3579_v54, %v3579_v54  ;;  %v3460_v32 = vmax.f32 %v3220_v55, 0.0  ;;  %v2852_v62 = vmax.f32 %v1875_v56, %v2502_v57  ;;  %v1578_v63 = vpop.f32.mrf.mxu0  ;;  %v4969_v56 = vld [vmem:[%s5153_s11 + $0x110] sm:$0xff] }
 0x214   : > { %v2205_v0 = vpop.f32.mrf.mxu1  ;;  %v5029_v57 = vld [vmem:[%s5153_s11 + $0x2f0] sm:$0xff] }
 0x215   : > { %4060 = vst.msk [vmem:[%s5226_s19 + $0x298] sm:$0xf] %vm3893_vm2, %v3819_v60  ;;  %v3700_v1 = vpack.c.bf16 %v3460_v32, %v3460_v32  ;;  %v3096_v2 = vmul.f32 %v5517_v59, %v2852_v62  ;;  %v2733_v3 = vmax.f32 %v1578_v63, %v2205_v0 }
 0x216   : > { %4717 = vmatmul.msk.bf16.gmra.mxu0 %vm1084_vm1, %v4967_v58  ;;  %4777 = vmatmul.msk.bf16.gmra.mxu2 %vm1084_vm1, %v5027_v29 }
 0x217   : > { %3941 = vst.msk [vmem:[%s5226_s19 + $0xbc] sm:$0xf] %vm3893_vm2, %v3700_v1  ;;  %v3340_v4 = vadd.f32 %v5525_v61, %v3096_v2  ;;  %v2977_v5 = vmul.f32 %v5517_v59, %v2733_v3  ;;  %4845 = vmatmul.msk.bf16.gmra.mxu1 %vm1084_vm1, %v4967_v58  ;;  %4905 = vmatmul.msk.bf16.gmra.mxu3 %vm1084_vm1, %v5027_v29 }
 0x219   : > { %v3580_v6 = vmax.f32 %v3340_v4, 0.0  ;;  %v3221_v7 = vadd.f32 %v5525_v61, %v2977_v5  ;;  %v1878_v8 = vpop.f32.mrf.mxu2 }
 0x21a   : > { %v2505_v9 = vpop.f32.mrf.mxu3 }
 0x21b   : > { %v3820_v10 = vpack.c.bf16 %v3580_v6, %v3580_v6  ;;  %v3461_v11 = vmax.f32 %v3221_v7, 0.0  ;;  %v2853_v12 = vmax.f32 %v1878_v8, %v2505_v9  ;;  %v1580_v13 = vpop.f32.mrf.mxu0 }
 0x21c   : > { %v2207_v14 = vpop.f32.mrf.mxu1 }
 0x21d   : > { %4061 = vst.msk [vmem:[%s5226_s19 + $0x29c] sm:$0xf] %vm3893_vm2, %v3820_v10  ;;  %v3701_v15 = vpack.c.bf16 %v3461_v11, %v3461_v11  ;;  %v3097_v16 = vmul.f32 %v5517_v59, %v2853_v12  ;;  %v2734_v17 = vmax.f32 %v1580_v13, %v2207_v14 }
 0x21f   : > { %3942 = vst.msk [vmem:[%s5226_s19 + $0xc0] sm:$0xf] %vm3893_vm2, %v3701_v15  ;;  %v3341_v18 = vadd.f32 %v5525_v61, %v3097_v16  ;;  %v2978_v19 = vmul.f32 %v5517_v59, %v2734_v17 }
 0x221   : > { %v3581_v20 = vmax.f32 %v3341_v18, 0.0  ;;  %v3222_v21 = vadd.f32 %v5525_v61, %v2978_v19  ;;  %v1880_v22 = vpop.f32.mrf.mxu2 }
 0x222   : > { %v2507_v23 = vpop.f32.mrf.mxu3 }
 0x223   : > { %v3821_v26 = vpack.c.bf16 %v3581_v20, %v3581_v20  ;;  %v3462_v27 = vmax.f32 %v3222_v21, 0.0  ;;  %v2854_v28 = vmax.f32 %v1880_v22, %v2507_v23  ;;  %v1583_v30 = vpop.f32.mrf.mxu0  ;;  %v4970_v22 = vld [vmem:[%s5153_s11 + $0x118] sm:$0xff] }
 0x224   : > { %v2210_v31 = vpop.f32.mrf.mxu1  ;;  %v5030_v23 = vld [vmem:[%s5153_s11 + $0x2f8] sm:$0xff] }
 0x225   : > { %4062 = vst.msk [vmem:[%s5226_s19 + $0x2a0] sm:$0xf] %vm3893_vm2, %v3821_v26  ;;  %v3702_v33 = vpack.c.bf16 %v3462_v27, %v3462_v27  ;;  %v3098_v34 = vmul.f32 %v5517_v59, %v2854_v28  ;;  %v2735_v35 = vmax.f32 %v1583_v30, %v2210_v31 }
 0x226   : > { %4718 = vmatmul.msk.bf16.gmra.mxu0 %vm1084_vm1, %v4968_v24  ;;  %4778 = vmatmul.msk.bf16.gmra.mxu2 %vm1084_vm1, %v5028_v25 }
 0x227   : > { %3943 = vst.msk [vmem:[%s5226_s19 + $0xc4] sm:$0xf] %vm3893_vm2, %v3702_v33  ;;  %v3342_v36 = vadd.f32 %v5525_v61, %v3098_v34  ;;  %v2979_v37 = vmul.f32 %v5517_v59, %v2735_v35  ;;  %4846 = vmatmul.msk.bf16.gmra.mxu1 %vm1084_vm1, %v4968_v24  ;;  %4906 = vmatmul.msk.bf16.gmra.mxu3 %vm1084_vm1, %v5028_v25  ;;  %v5833_v33 = vld [vmem:[%s6539_s4] ss:$0 sm:$0xff] }
 0x229   : > { %v3582_v38 = vmax.f32 %v3342_v36, 0.0  ;;  %v3223_v39 = vadd.f32 %v5525_v61, %v2979_v37  ;;  %v1883_v40 = vpop.f32.mrf.mxu2 }
 0x22a   : > { %v2510_v41 = vpop.f32.mrf.mxu3 }
 0x22b   : > { %v3822_v42 = vpack.c.bf16 %v3582_v38, %v3582_v38  ;;  %v3463_v43 = vmax.f32 %v3223_v39, 0.0  ;;  %v2855_v44 = vmax.f32 %v1883_v40, %v2510_v41  ;;  %v1585_v45 = vpop.f32.mrf.mxu0 }
 0x22c   : > { %v2212_v46 = vpop.f32.mrf.mxu1 }
 0x22d   : > { %4063 = vst.msk [vmem:[%s5226_s19 + $0x2a4] sm:$0xf] %vm3893_vm2, %v3822_v42  ;;  %v3703_v47 = vpack.c.bf16 %v3463_v43, %v3463_v43  ;;  %v3099_v48 = vmul.f32 %v5517_v59, %v2855_v44  ;;  %v2736_v49 = vmax.f32 %v1585_v45, %v2212_v46 }
 0x22f   : > { %3944 = vst.msk [vmem:[%s5226_s19 + $0xc8] sm:$0xf] %vm3893_vm2, %v3703_v47  ;;  %v3343_v50 = vadd.f32 %v5525_v61, %v3099_v48  ;;  %v2980_v51 = vmul.f32 %v5517_v59, %v2736_v49 }
 0x231   : > { %v3583_v52 = vmax.f32 %v3343_v50, 0.0  ;;  %v3224_v53 = vadd.f32 %v5525_v61, %v2980_v51  ;;  %v1885_v54 = vpop.f32.mrf.mxu2 }
 0x232   : > { %v2512_v55 = vpop.f32.mrf.mxu3 }
 0x233   : > { %v3823_v58 = vpack.c.bf16 %v3583_v52, %v3583_v52  ;;  %v3464_v29 = vmax.f32 %v3224_v53, 0.0  ;;  %v2856_v60 = vmax.f32 %v1885_v54, %v2512_v55  ;;  %v1588_v32 = vpop.f32.mrf.mxu0  ;;  %v4971_v54 = vld [vmem:[%s5153_s11 + $0x120] sm:$0xff] }
 0x234   : > { %v2215_v62 = vpop.f32.mrf.mxu1  ;;  %v5031_v55 = vld [vmem:[%s5153_s11 + $0x300] sm:$0xff] }
 0x235   : > { %4064 = vst.msk [vmem:[%s5226_s19 + $0x2a8] sm:$0xf] %vm3893_vm2, %v3823_v58  ;;  %v3704_v63 = vpack.c.bf16 %v3464_v29, %v3464_v29  ;;  %v3100_v0 = vmul.f32 %v5517_v59, %v2856_v60  ;;  %v2737_v1 = vmax.f32 %v1588_v32, %v2215_v62 }
 0x236   : > { %4719 = vmatmul.msk.bf16.gmra.mxu0 %vm1084_vm1, %v4969_v56  ;;  %4779 = vmatmul.msk.bf16.gmra.mxu2 %vm1084_vm1, %v5029_v57 }
 0x237   : > { %3945 = vst.msk [vmem:[%s5226_s19 + $0xcc] sm:$0xf] %vm3893_vm2, %v3704_v63  ;;  %v3344_v2 = vadd.f32 %v5525_v61, %v3100_v0  ;;  %v2981_v3 = vmul.f32 %v5517_v59, %v2737_v1  ;;  %4847 = vmatmul.msk.bf16.gmra.mxu1 %vm1084_vm1, %v4969_v56  ;;  %4907 = vmatmul.msk.bf16.gmra.mxu3 %vm1084_vm1, %v5029_v57 }
 0x239   : > { %v3584_v4 = vmax.f32 %v3344_v2, 0.0  ;;  %v3225_v5 = vadd.f32 %v5525_v61, %v2981_v3  ;;  %v1888_v6 = vpop.f32.mrf.mxu2 }
 0x23a   : > { %v2515_v7 = vpop.f32.mrf.mxu3 }
 0x23b   : > { %v3824_v8 = vpack.c.bf16 %v3584_v4, %v3584_v4  ;;  %v3465_v9 = vmax.f32 %v3225_v5, 0.0  ;;  %v2857_v10 = vmax.f32 %v1888_v6, %v2515_v7  ;;  %v1590_v11 = vpop.f32.mrf.mxu0 }
 0x23c   : > { %v2217_v12 = vpop.f32.mrf.mxu1 }
 0x23d   : > { %4065 = vst.msk [vmem:[%s5226_s19 + $0x2ac] sm:$0xf] %vm3893_vm2, %v3824_v8  ;;  %v3705_v13 = vpack.c.bf16 %v3465_v9, %v3465_v9  ;;  %v3101_v14 = vmul.f32 %v5517_v59, %v2857_v10  ;;  %v2738_v15 = vmax.f32 %v1590_v11, %v2217_v12 }
 0x23f   : > { %3946 = vst.msk [vmem:[%s5226_s19 + $0xd0] sm:$0xf] %vm3893_vm2, %v3705_v13  ;;  %v3345_v16 = vadd.f32 %v5525_v61, %v3101_v14  ;;  %v2982_v17 = vmul.f32 %v5517_v59, %v2738_v15  ;;  %v5823_v59 = vld [vmem:[%s6538_s3] ss:$0 sm:$0xff] }
 0x241   : > { %v3585_v18 = vmax.f32 %v3345_v16, 0.0  ;;  %v3226_v19 = vadd.f32 %v5525_v61, %v2982_v17  ;;  %v1890_v20 = vpop.f32.mrf.mxu2 }
 0x242   : > { %v2517_v21 = vpop.f32.mrf.mxu3 }
 0x243   : > { %v3825_v24 = vpack.c.bf16 %v3585_v18, %v3585_v18  ;;  %v3466_v25 = vmax.f32 %v3226_v19, 0.0  ;;  %v2858_v26 = vmax.f32 %v1890_v20, %v2517_v21  ;;  %v1593_v27 = vpop.f32.mrf.mxu0  ;;  %v4972_v20 = vld [vmem:[%s5153_s11 + $0x128] sm:$0xff] }
 0x244   : > { %v2220_v28 = vpop.f32.mrf.mxu1  ;;  %v5032_v21 = vld [vmem:[%s5153_s11 + $0x308] sm:$0xff] }
 0x245   : > { %4066 = vst.msk [vmem:[%s5226_s19 + $0x2b0] sm:$0xf] %vm3893_vm2, %v3825_v24  ;;  %v3706_v30 = vpack.c.bf16 %v3466_v25, %v3466_v25  ;;  %v3102_v61 = vmul.f32 %v5823_v59, %v2858_v26  ;;  %v2739_v31 = vmax.f32 %v1593_v27, %v2220_v28 }
 0x246   : > { %4720 = vmatmul.msk.bf16.gmra.mxu0 %vm1084_vm1, %v4970_v22  ;;  %4780 = vmatmul.msk.bf16.gmra.mxu2 %vm1084_vm1, %v5030_v23 }
 0x247   : > { %3947 = vst.msk [vmem:[%s5226_s19 + $0xd4] sm:$0xf] %vm3893_vm2, %v3706_v30  ;;  %v3346_v34 = vadd.f32 %v5833_v33, %v3102_v61  ;;  %v2983_v35 = vmul.f32 %v5823_v59, %v2739_v31  ;;  %4848 = vmatmul.msk.bf16.gmra.mxu1 %vm1084_vm1, %v4970_v22  ;;  %4908 = vmatmul.msk.bf16.gmra.mxu3 %vm1084_vm1, %v5030_v23 }
 0x249   : > { %v3586_v36 = vmax.f32 %v3346_v34, 0.0  ;;  %v3227_v37 = vadd.f32 %v5833_v33, %v2983_v35  ;;  %v1893_v38 = vpop.f32.mrf.mxu2 }
 0x24a   : > { %v2520_v39 = vpop.f32.mrf.mxu3 }
 0x24b   : > { %v3826_v40 = vpack.c.bf16 %v3586_v36, %v3586_v36  ;;  %v3467_v41 = vmax.f32 %v3227_v37, 0.0  ;;  %v2859_v42 = vmax.f32 %v1893_v38, %v2520_v39  ;;  %v1595_v43 = vpop.f32.mrf.mxu0 }
 0x24c   : > { %v2222_v44 = vpop.f32.mrf.mxu1 }
 0x24d   : > { %4067 = vst.msk [vmem:[%s5226_s19 + $0x2b4] sm:$0xf] %vm3893_vm2, %v3826_v40  ;;  %v3707_v45 = vpack.c.bf16 %v3467_v41, %v3467_v41  ;;  %v3103_v46 = vmul.f32 %v5823_v59, %v2859_v42  ;;  %v2740_v47 = vmax.f32 %v1595_v43, %v2222_v44 }
 0x24f   : > { %3948 = vst.msk [vmem:[%s5226_s19 + $0xd8] sm:$0xf] %vm3893_vm2, %v3707_v45  ;;  %v3347_v48 = vadd.f32 %v5833_v33, %v3103_v46  ;;  %v2984_v49 = vmul.f32 %v5823_v59, %v2740_v47 }
 0x251   : > { %v3587_v50 = vmax.f32 %v3347_v48, 0.0  ;;  %v3228_v51 = vadd.f32 %v5833_v33, %v2984_v49  ;;  %v1895_v52 = vpop.f32.mrf.mxu2 }
 0x252   : > { %v2522_v53 = vpop.f32.mrf.mxu3 }
 0x253   : > { %v3827_v56 = vpack.c.bf16 %v3587_v50, %v3587_v50  ;;  %v3468_v57 = vmax.f32 %v3228_v51, 0.0  ;;  %v2860_v58 = vmax.f32 %v1895_v52, %v2522_v53  ;;  %v1598_v29 = vpop.f32.mrf.mxu0  ;;  %v4973_v52 = vld [vmem:[%s5153_s11 + $0x130] sm:$0xff] }
 0x254   : > { %v2225_v60 = vpop.f32.mrf.mxu1  ;;  %v5033_v53 = vld [vmem:[%s5153_s11 + $0x310] sm:$0xff] }
 0x255   : > { %4068 = vst.msk [vmem:[%s5226_s19 + $0x2b8] sm:$0xf] %vm3893_vm2, %v3827_v56  ;;  %v3708_v32 = vpack.c.bf16 %v3468_v57, %v3468_v57  ;;  %v3104_v62 = vmul.f32 %v5823_v59, %v2860_v58  ;;  %v2741_v63 = vmax.f32 %v1598_v29, %v2225_v60 }
 0x256   : > { %4721 = vmatmul.msk.bf16.gmra.mxu0 %vm1084_vm1, %v4971_v54  ;;  %4781 = vmatmul.msk.bf16.gmra.mxu2 %vm1084_vm1, %v5031_v55 }
 0x257   : > { %3949 = vst.msk [vmem:[%s5226_s19 + $0xdc] sm:$0xf] %vm3893_vm2, %v3708_v32  ;;  %v3348_v0 = vadd.f32 %v5833_v33, %v3104_v62  ;;  %v2985_v1 = vmul.f32 %v5823_v59, %v2741_v63  ;;  %4849 = vmatmul.msk.bf16.gmra.mxu1 %vm1084_vm1, %v4971_v54  ;;  %4909 = vmatmul.msk.bf16.gmra.mxu3 %vm1084_vm1, %v5031_v55 }
 0x259   : > { %v3588_v2 = vmax.f32 %v3348_v0, 0.0  ;;  %v3229_v3 = vadd.f32 %v5833_v33, %v2985_v1  ;;  %v1898_v4 = vpop.f32.mrf.mxu2 }
 0x25a   : > { %v2525_v5 = vpop.f32.mrf.mxu3 }
 0x25b   : > { %v3828_v6 = vpack.c.bf16 %v3588_v2, %v3588_v2  ;;  %v3469_v7 = vmax.f32 %v3229_v3, 0.0  ;;  %v2861_v8 = vmax.f32 %v1898_v4, %v2525_v5  ;;  %v1600_v9 = vpop.f32.mrf.mxu0 }
 0x25c   : > { %v2227_v10 = vpop.f32.mrf.mxu1 }
 0x25d   : > { %4069 = vst.msk [vmem:[%s5226_s19 + $0x2bc] sm:$0xf] %vm3893_vm2, %v3828_v6  ;;  %v3709_v11 = vpack.c.bf16 %v3469_v7, %v3469_v7  ;;  %v3105_v12 = vmul.f32 %v5823_v59, %v2861_v8  ;;  %v2742_v13 = vmax.f32 %v1600_v9, %v2227_v10 }
 0x25f   : > { %3950 = vst.msk [vmem:[%s5226_s19 + $0xe0] sm:$0xf] %vm3893_vm2, %v3709_v11  ;;  %v3349_v14 = vadd.f32 %v5833_v33, %v3105_v12  ;;  %v2986_v15 = vmul.f32 %v5823_v59, %v2742_v13 }
 0x261   : > { %v3589_v16 = vmax.f32 %v3349_v14, 0.0  ;;  %v3230_v17 = vadd.f32 %v5833_v33, %v2986_v15  ;;  %v1900_v18 = vpop.f32.mrf.mxu2 }
 0x262   : > { %v2527_v19 = vpop.f32.mrf.mxu3 }
 0x263   : > { %v3829_v22 = vpack.c.bf16 %v3589_v16, %v3589_v16  ;;  %v3470_v23 = vmax.f32 %v3230_v17, 0.0  ;;  %v2862_v24 = vmax.f32 %v1900_v18, %v2527_v19  ;;  %v1603_v25 = vpop.f32.mrf.mxu0  ;;  %v4974_v18 = vld [vmem:[%s5153_s11 + $0x138] sm:$0xff] }
 0x264   : > { %v2230_v26 = vpop.f32.mrf.mxu1  ;;  %v5034_v19 = vld [vmem:[%s5153_s11 + $0x318] sm:$0xff] }
 0x265   : > { %4070 = vst.msk [vmem:[%s5226_s19 + $0x2c0] sm:$0xf] %vm3893_vm2, %v3829_v22  ;;  %v3710_v27 = vpack.c.bf16 %v3470_v23, %v3470_v23  ;;  %v3106_v28 = vmul.f32 %v5823_v59, %v2862_v24  ;;  %v2743_v30 = vmax.f32 %v1603_v25, %v2230_v26 }
 0x266   : > { %4722 = vmatmul.msk.bf16.gmra.mxu0 %vm1084_vm1, %v4972_v20  ;;  %4782 = vmatmul.msk.bf16.gmra.mxu2 %vm1084_vm1, %v5032_v21 }
 0x267   : > { %3951 = vst.msk [vmem:[%s5226_s19 + $0xe4] sm:$0xf] %vm3893_vm2, %v3710_v27  ;;  %v3350_v61 = vadd.f32 %v5833_v33, %v3106_v28  ;;  %v2987_v31 = vmul.f32 %v5823_v59, %v2743_v30  ;;  %4850 = vmatmul.msk.bf16.gmra.mxu1 %vm1084_vm1, %v4972_v20  ;;  %4910 = vmatmul.msk.bf16.gmra.mxu3 %vm1084_vm1, %v5032_v21 }
 0x269   : > { %v3590_v34 = vmax.f32 %v3350_v61, 0.0  ;;  %v3231_v35 = vadd.f32 %v5833_v33, %v2987_v31  ;;  %v1903_v36 = vpop.f32.mrf.mxu2 }
 0x26a   : > { %v2530_v37 = vpop.f32.mrf.mxu3 }
 0x26b   : > { %v3830_v38 = vpack.c.bf16 %v3590_v34, %v3590_v34  ;;  %v3471_v39 = vmax.f32 %v3231_v35, 0.0  ;;  %v2863_v40 = vmax.f32 %v1903_v36, %v2530_v37  ;;  %v1605_v41 = vpop.f32.mrf.mxu0 }
 0x26c   : > { %v2232_v42 = vpop.f32.mrf.mxu1 }
 0x26d   : > { %4071 = vst.msk [vmem:[%s5226_s19 + $0x2c4] sm:$0xf] %vm3893_vm2, %v3830_v38  ;;  %v3711_v43 = vpack.c.bf16 %v3471_v39, %v3471_v39  ;;  %v3107_v44 = vmul.f32 %v5823_v59, %v2863_v40  ;;  %v2744_v45 = vmax.f32 %v1605_v41, %v2232_v42 }
 0x26f   : > { %3952 = vst.msk [vmem:[%s5226_s19 + $0xe8] sm:$0xf] %vm3893_vm2, %v3711_v43  ;;  %v3351_v46 = vadd.f32 %v5833_v33, %v3107_v44  ;;  %v2988_v47 = vmul.f32 %v5823_v59, %v2744_v45 }
 0x271   : > { %v3591_v48 = vmax.f32 %v3351_v46, 0.0  ;;  %v3232_v49 = vadd.f32 %v5833_v33, %v2988_v47  ;;  %v1905_v50 = vpop.f32.mrf.mxu2 }
 0x272   : > { %v2532_v51 = vpop.f32.mrf.mxu3 }
 0x273   : > { %v3831_v54 = vpack.c.bf16 %v3591_v48, %v3591_v48  ;;  %v3472_v55 = vmax.f32 %v3232_v49, 0.0  ;;  %v2864_v56 = vmax.f32 %v1905_v50, %v2532_v51  ;;  %v1608_v57 = vpop.f32.mrf.mxu0  ;;  %v4975_v50 = vld [vmem:[%s5153_s11 + $0x140] sm:$0xff] }
 0x274   : > { %v2235_v58 = vpop.f32.mrf.mxu1  ;;  %v5035_v51 = vld [vmem:[%s5153_s11 + $0x320] sm:$0xff] }
 0x275   : > { %4072 = vst.msk [vmem:[%s5226_s19 + $0x2c8] sm:$0xf] %vm3893_vm2, %v3831_v54  ;;  %v3712_v29 = vpack.c.bf16 %v3472_v55, %v3472_v55  ;;  %v3108_v60 = vmul.f32 %v5823_v59, %v2864_v56  ;;  %v2745_v32 = vmax.f32 %v1608_v57, %v2235_v58 }
 0x276   : > { %4723 = vmatmul.msk.bf16.gmra.mxu0 %vm1084_vm1, %v4973_v52  ;;  %4783 = vmatmul.msk.bf16.gmra.mxu2 %vm1084_vm1, %v5033_v53 }
 0x277   : > { %3953 = vst.msk [vmem:[%s5226_s19 + $0xec] sm:$0xf] %vm3893_vm2, %v3712_v29  ;;  %v3352_v62 = vadd.f32 %v5833_v33, %v3108_v60  ;;  %v2989_v63 = vmul.f32 %v5823_v59, %v2745_v32  ;;  %4851 = vmatmul.msk.bf16.gmra.mxu1 %vm1084_vm1, %v4973_v52  ;;  %4911 = vmatmul.msk.bf16.gmra.mxu3 %vm1084_vm1, %v5033_v53 }
 0x279   : > { %v3592_v0 = vmax.f32 %v3352_v62, 0.0  ;;  %v3233_v1 = vadd.f32 %v5833_v33, %v2989_v63  ;;  %v1908_v2 = vpop.f32.mrf.mxu2 }
 0x27a   : > { %v2535_v3 = vpop.f32.mrf.mxu3 }
 0x27b   : > { %v3832_v4 = vpack.c.bf16 %v3592_v0, %v3592_v0  ;;  %v3473_v5 = vmax.f32 %v3233_v1, 0.0  ;;  %v2865_v6 = vmax.f32 %v1908_v2, %v2535_v3  ;;  %v1610_v7 = vpop.f32.mrf.mxu0 }
 0x27c   : > { %v2237_v8 = vpop.f32.mrf.mxu1 }
 0x27d   : > { %4073 = vst.msk [vmem:[%s5226_s19 + $0x2cc] sm:$0xf] %vm3893_vm2, %v3832_v4  ;;  %v3713_v9 = vpack.c.bf16 %v3473_v5, %v3473_v5  ;;  %v3109_v10 = vmul.f32 %v5823_v59, %v2865_v6  ;;  %v2746_v11 = vmax.f32 %v1610_v7, %v2237_v8 }
 0x27f   : > { %3954 = vst.msk [vmem:[%s5226_s19 + $0xf0] sm:$0xf] %vm3893_vm2, %v3713_v9  ;;  %v3353_v12 = vadd.f32 %v5833_v33, %v3109_v10  ;;  %v2990_v13 = vmul.f32 %v5823_v59, %v2746_v11 }
 0x281   : > { %v3593_v14 = vmax.f32 %v3353_v12, 0.0  ;;  %v3234_v15 = vadd.f32 %v5833_v33, %v2990_v13  ;;  %v1910_v16 = vpop.f32.mrf.mxu2 }
 0x282   : > { %v2537_v17 = vpop.f32.mrf.mxu3 }
 0x283   : > { %v3833_v20 = vpack.c.bf16 %v3593_v14, %v3593_v14  ;;  %v3474_v21 = vmax.f32 %v3234_v15, 0.0  ;;  %v2866_v22 = vmax.f32 %v1910_v16, %v2537_v17  ;;  %v1613_v23 = vpop.f32.mrf.mxu0  ;;  %v4976_v16 = vld [vmem:[%s5153_s11 + $0x148] sm:$0xff] }
 0x284   : > { %v2240_v24 = vpop.f32.mrf.mxu1  ;;  %v5036_v17 = vld [vmem:[%s5153_s11 + $0x328] sm:$0xff] }
 0x285   : > { %4074 = vst.msk [vmem:[%s5226_s19 + $0x2d0] sm:$0xf] %vm3893_vm2, %v3833_v20  ;;  %v3714_v25 = vpack.c.bf16 %v3474_v21, %v3474_v21  ;;  %v3110_v26 = vmul.f32 %v5823_v59, %v2866_v22  ;;  %v2747_v27 = vmax.f32 %v1613_v23, %v2240_v24 }
 0x286   : > { %4724 = vmatmul.msk.bf16.gmra.mxu0 %vm1084_vm1, %v4974_v18  ;;  %4784 = vmatmul.msk.bf16.gmra.mxu2 %vm1084_vm1, %v5034_v19 }
 0x287   : > { %3955 = vst.msk [vmem:[%s5226_s19 + $0xf4] sm:$0xf] %vm3893_vm2, %v3714_v25  ;;  %v3354_v28 = vadd.f32 %v5833_v33, %v3110_v26  ;;  %v2991_v30 = vmul.f32 %v5823_v59, %v2747_v27  ;;  %4852 = vmatmul.msk.bf16.gmra.mxu1 %vm1084_vm1, %v4974_v18  ;;  %4912 = vmatmul.msk.bf16.gmra.mxu3 %vm1084_vm1, %v5034_v19 }
 0x289   : > { %v3594_v61 = vmax.f32 %v3354_v28, 0.0  ;;  %v3235_v31 = vadd.f32 %v5833_v33, %v2991_v30  ;;  %v1913_v34 = vpop.f32.mrf.mxu2 }
 0x28a   : > { %v2540_v35 = vpop.f32.mrf.mxu3 }
 0x28b   : > { %v3834_v36 = vpack.c.bf16 %v3594_v61, %v3594_v61  ;;  %v3475_v37 = vmax.f32 %v3235_v31, 0.0  ;;  %v2867_v38 = vmax.f32 %v1913_v34, %v2540_v35  ;;  %v1615_v39 = vpop.f32.mrf.mxu0 }
 0x28c   : > { %v2242_v40 = vpop.f32.mrf.mxu1 }
 0x28d   : > { %4075 = vst.msk [vmem:[%s5226_s19 + $0x2d4] sm:$0xf] %vm3893_vm2, %v3834_v36  ;;  %v3715_v41 = vpack.c.bf16 %v3475_v37, %v3475_v37  ;;  %v3111_v42 = vmul.f32 %v5823_v59, %v2867_v38  ;;  %v2748_v43 = vmax.f32 %v1615_v39, %v2242_v40 }
 0x28f   : > { %3956 = vst.msk [vmem:[%s5226_s19 + $0xf8] sm:$0xf] %vm3893_vm2, %v3715_v41  ;;  %v3355_v44 = vadd.f32 %v5833_v33, %v3111_v42  ;;  %v2992_v45 = vmul.f32 %v5823_v59, %v2748_v43 }
 0x291   : > { %v3595_v46 = vmax.f32 %v3355_v44, 0.0  ;;  %v3236_v47 = vadd.f32 %v5833_v33, %v2992_v45  ;;  %v1915_v48 = vpop.f32.mrf.mxu2 }
 0x292   : > { %v2542_v49 = vpop.f32.mrf.mxu3 }
 0x293   : > { %v3835_v52 = vpack.c.bf16 %v3595_v46, %v3595_v46  ;;  %v3476_v53 = vmax.f32 %v3236_v47, 0.0  ;;  %v2868_v54 = vmax.f32 %v1915_v48, %v2542_v49  ;;  %v1618_v55 = vpop.f32.mrf.mxu0  ;;  %v4977_v48 = vld [vmem:[%s5153_s11 + $0x150] sm:$0xff] }
 0x294   : > { %v2245_v56 = vpop.f32.mrf.mxu1  ;;  %v5037_v49 = vld [vmem:[%s5153_s11 + $0x330] sm:$0xff] }
 0x295   : > { %4076 = vst.msk [vmem:[%s5226_s19 + $0x2d8] sm:$0xf] %vm3893_vm2, %v3835_v52  ;;  %v3716_v57 = vpack.c.bf16 %v3476_v53, %v3476_v53  ;;  %v3112_v58 = vmul.f32 %v5823_v59, %v2868_v54  ;;  %v2749_v29 = vmax.f32 %v1618_v55, %v2245_v56 }
 0x296   : > { %4725 = vmatmul.msk.bf16.gmra.mxu0 %vm1084_vm1, %v4975_v50  ;;  %4785 = vmatmul.msk.bf16.gmra.mxu2 %vm1084_vm1, %v5035_v51 }
 0x297   : > { %3957 = vst.msk [vmem:[%s5226_s19 + $0xfc] sm:$0xf] %vm3893_vm2, %v3716_v57  ;;  %v3356_v60 = vadd.f32 %v5833_v33, %v3112_v58  ;;  %v2993_v32 = vmul.f32 %v5823_v59, %v2749_v29  ;;  %4853 = vmatmul.msk.bf16.gmra.mxu1 %vm1084_vm1, %v4975_v50  ;;  %4913 = vmatmul.msk.bf16.gmra.mxu3 %vm1084_vm1, %v5035_v51 }
 0x299   : > { %v3596_v62 = vmax.f32 %v3356_v60, 0.0  ;;  %v3237_v63 = vadd.f32 %v5833_v33, %v2993_v32  ;;  %v1918_v0 = vpop.f32.mrf.mxu2 }
 0x29a   : > { %v2545_v1 = vpop.f32.mrf.mxu3 }
 0x29b   : > { %v3836_v2 = vpack.c.bf16 %v3596_v62, %v3596_v62  ;;  %v3477_v3 = vmax.f32 %v3237_v63, 0.0  ;;  %v2869_v4 = vmax.f32 %v1918_v0, %v2545_v1  ;;  %v1620_v5 = vpop.f32.mrf.mxu0 }
 0x29c   : > { %v2247_v6 = vpop.f32.mrf.mxu1 }
 0x29d   : > { %4077 = vst.msk [vmem:[%s5226_s19 + $0x2dc] sm:$0xf] %vm3893_vm2, %v3836_v2  ;;  %v3717_v7 = vpack.c.bf16 %v3477_v3, %v3477_v3  ;;  %v3113_v8 = vmul.f32 %v5823_v59, %v2869_v4  ;;  %v2750_v9 = vmax.f32 %v1620_v5, %v2247_v6 }
 0x29f   : > { %3958 = vst.msk [vmem:[%s5226_s19 + $0x100] sm:$0xf] %vm3893_vm2, %v3717_v7  ;;  %v3357_v10 = vadd.f32 %v5833_v33, %v3113_v8  ;;  %v2994_v11 = vmul.f32 %v5823_v59, %v2750_v9 }
 0x2a1   : > { %v3597_v12 = vmax.f32 %v3357_v10, 0.0  ;;  %v3238_v13 = vadd.f32 %v5833_v33, %v2994_v11  ;;  %v1920_v14 = vpop.f32.mrf.mxu2 }
 0x2a2   : > { %v2547_v15 = vpop.f32.mrf.mxu3 }
 0x2a3   : > { %v3837_v18 = vpack.c.bf16 %v3597_v12, %v3597_v12  ;;  %v3478_v19 = vmax.f32 %v3238_v13, 0.0  ;;  %v2870_v20 = vmax.f32 %v1920_v14, %v2547_v15  ;;  %v1623_v21 = vpop.f32.mrf.mxu0  ;;  %v4978_v14 = vld [vmem:[%s5153_s11 + $0x158] sm:$0xff] }
 0x2a4   : > { %v2250_v22 = vpop.f32.mrf.mxu1  ;;  %v5038_v15 = vld [vmem:[%s5153_s11 + $0x338] sm:$0xff] }
 0x2a5   : > { %4078 = vst.msk [vmem:[%s5226_s19 + $0x2e0] sm:$0xf] %vm3893_vm2, %v3837_v18  ;;  %v3718_v23 = vpack.c.bf16 %v3478_v19, %v3478_v19  ;;  %v3114_v24 = vmul.f32 %v5823_v59, %v2870_v20  ;;  %v2751_v25 = vmax.f32 %v1623_v21, %v2250_v22 }
 0x2a6   : > { %4726 = vmatmul.msk.bf16.gmra.mxu0 %vm1084_vm1, %v4976_v16  ;;  %4786 = vmatmul.msk.bf16.gmra.mxu2 %vm1084_vm1, %v5036_v17 }
 0x2a7   : > { %3959 = vst.msk [vmem:[%s5226_s19 + $0x104] sm:$0xf] %vm3893_vm2, %v3718_v23  ;;  %v3358_v26 = vadd.f32 %v5833_v33, %v3114_v24  ;;  %v2995_v27 = vmul.f32 %v5823_v59, %v2751_v25  ;;  %4854 = vmatmul.msk.bf16.gmra.mxu1 %vm1084_vm1, %v4976_v16  ;;  %4914 = vmatmul.msk.bf16.gmra.mxu3 %vm1084_vm1, %v5036_v17 }
 0x2a9   : > { %v3598_v28 = vmax.f32 %v3358_v26, 0.0  ;;  %v3239_v30 = vadd.f32 %v5833_v33, %v2995_v27  ;;  %v1923_v61 = vpop.f32.mrf.mxu2 }
 0x2aa   : > { %v2550_v31 = vpop.f32.mrf.mxu3 }
 0x2ab   : > { %v3838_v34 = vpack.c.bf16 %v3598_v28, %v3598_v28  ;;  %v3479_v35 = vmax.f32 %v3239_v30, 0.0  ;;  %v2871_v36 = vmax.f32 %v1923_v61, %v2550_v31  ;;  %v1625_v37 = vpop.f32.mrf.mxu0 }
 0x2ac   : > { %v2252_v38 = vpop.f32.mrf.mxu1 }
 0x2ad   : > { %4079 = vst.msk [vmem:[%s5226_s19 + $0x2e4] sm:$0xf] %vm3893_vm2, %v3838_v34  ;;  %v3719_v39 = vpack.c.bf16 %v3479_v35, %v3479_v35  ;;  %v3115_v40 = vmul.f32 %v5823_v59, %v2871_v36  ;;  %v2752_v41 = vmax.f32 %v1625_v37, %v2252_v38 }
 0x2af   : > { %3960 = vst.msk [vmem:[%s5226_s19 + $0x108] sm:$0xf] %vm3893_vm2, %v3719_v39  ;;  %v3359_v42 = vadd.f32 %v5833_v33, %v3115_v40  ;;  %v2996_v43 = vmul.f32 %v5823_v59, %v2752_v41 }
 0x2b1   : > { %v3599_v44 = vmax.f32 %v3359_v42, 0.0  ;;  %v3240_v45 = vadd.f32 %v5833_v33, %v2996_v43  ;;  %v1925_v46 = vpop.f32.mrf.mxu2 }
 0x2b2   : > { %v2552_v47 = vpop.f32.mrf.mxu3 }
 0x2b3   : > { %v3839_v50 = vpack.c.bf16 %v3599_v44, %v3599_v44  ;;  %v3480_v51 = vmax.f32 %v3240_v45, 0.0  ;;  %v2872_v52 = vmax.f32 %v1925_v46, %v2552_v47  ;;  %v1628_v53 = vpop.f32.mrf.mxu0  ;;  %v4979_v46 = vld [vmem:[%s5153_s11 + $0x160] sm:$0xff] }
 0x2b4   : > { %v2255_v54 = vpop.f32.mrf.mxu1  ;;  %v5039_v47 = vld [vmem:[%s5153_s11 + $0x340] sm:$0xff] }
 0x2b5   : > { %4080 = vst.msk [vmem:[%s5226_s19 + $0x2e8] sm:$0xf] %vm3893_vm2, %v3839_v50  ;;  %v3720_v55 = vpack.c.bf16 %v3480_v51, %v3480_v51  ;;  %v3116_v56 = vmul.f32 %v5823_v59, %v2872_v52  ;;  %v2753_v57 = vmax.f32 %v1628_v53, %v2255_v54 }
 0x2b6   : > { %4727 = vmatmul.msk.bf16.gmra.mxu0 %vm1084_vm1, %v4977_v48  ;;  %4787 = vmatmul.msk.bf16.gmra.mxu2 %vm1084_vm1, %v5037_v49 }
 0x2b7   : > { %3961 = vst.msk [vmem:[%s5226_s19 + $0x10c] sm:$0xf] %vm3893_vm2, %v3720_v55  ;;  %v3360_v58 = vadd.f32 %v5833_v33, %v3116_v56  ;;  %v2997_v29 = vmul.f32 %v5823_v59, %v2753_v57  ;;  %4855 = vmatmul.msk.bf16.gmra.mxu1 %vm1084_vm1, %v4977_v48  ;;  %4915 = vmatmul.msk.bf16.gmra.mxu3 %vm1084_vm1, %v5037_v49 }
 0x2b9   : > { %v3600_v60 = vmax.f32 %v3360_v58, 0.0  ;;  %v3241_v32 = vadd.f32 %v5833_v33, %v2997_v29  ;;  %v1928_v62 = vpop.f32.mrf.mxu2 }
 0x2ba   : > { %v2555_v63 = vpop.f32.mrf.mxu3 }
 0x2bb   : > { %v3840_v0 = vpack.c.bf16 %v3600_v60, %v3600_v60  ;;  %v3481_v1 = vmax.f32 %v3241_v32, 0.0  ;;  %v2873_v2 = vmax.f32 %v1928_v62, %v2555_v63  ;;  %v1630_v3 = vpop.f32.mrf.mxu0 }
 0x2bc   : > { %v2257_v4 = vpop.f32.mrf.mxu1 }
 0x2bd   : > { %4081 = vst.msk [vmem:[%s5226_s19 + $0x2ec] sm:$0xf] %vm3893_vm2, %v3840_v0  ;;  %v3721_v5 = vpack.c.bf16 %v3481_v1, %v3481_v1  ;;  %v3117_v6 = vmul.f32 %v5823_v59, %v2873_v2  ;;  %v2754_v7 = vmax.f32 %v1630_v3, %v2257_v4 }
 0x2bf   : > { %3962 = vst.msk [vmem:[%s5226_s19 + $0x110] sm:$0xf] %vm3893_vm2, %v3721_v5  ;;  %v3361_v8 = vadd.f32 %v5833_v33, %v3117_v6  ;;  %v2998_v9 = vmul.f32 %v5823_v59, %v2754_v7 }
 0x2c1   : > { %v3601_v10 = vmax.f32 %v3361_v8, 0.0  ;;  %v3242_v11 = vadd.f32 %v5833_v33, %v2998_v9  ;;  %v1930_v12 = vpop.f32.mrf.mxu2 }
 0x2c2   : > { %v2557_v13 = vpop.f32.mrf.mxu3 }
 0x2c3   : > { %v3841_v16 = vpack.c.bf16 %v3601_v10, %v3601_v10  ;;  %v3482_v17 = vmax.f32 %v3242_v11, 0.0  ;;  %v2874_v18 = vmax.f32 %v1930_v12, %v2557_v13  ;;  %v1633_v19 = vpop.f32.mrf.mxu0  ;;  %v4980_v12 = vld [vmem:[%s5153_s11 + $0x168] sm:$0xff] }
 0x2c4   : > { %v2260_v20 = vpop.f32.mrf.mxu1  ;;  %v5040_v13 = vld [vmem:[%s5153_s11 + $0x348] sm:$0xff] }
 0x2c5   : > { %4082 = vst.msk [vmem:[%s5226_s19 + $0x2f0] sm:$0xf] %vm3893_vm2, %v3841_v16  ;;  %v3722_v21 = vpack.c.bf16 %v3482_v17, %v3482_v17  ;;  %v3118_v22 = vmul.f32 %v5823_v59, %v2874_v18  ;;  %v2755_v23 = vmax.f32 %v1633_v19, %v2260_v20 }
 0x2c6   : > { %4728 = vmatmul.msk.bf16.gmra.mxu0 %vm1084_vm1, %v4978_v14  ;;  %4788 = vmatmul.msk.bf16.gmra.mxu2 %vm1084_vm1, %v5038_v15 }
 0x2c7   : > { %3963 = vst.msk [vmem:[%s5226_s19 + $0x114] sm:$0xf] %vm3893_vm2, %v3722_v21  ;;  %v3362_v24 = vadd.f32 %v5833_v33, %v3118_v22  ;;  %v2999_v25 = vmul.f32 %v5823_v59, %v2755_v23  ;;  %4856 = vmatmul.msk.bf16.gmra.mxu1 %vm1084_vm1, %v4978_v14  ;;  %4916 = vmatmul.msk.bf16.gmra.mxu3 %vm1084_vm1, %v5038_v15 }
 0x2c9   : > { %v3602_v26 = vmax.f32 %v3362_v24, 0.0  ;;  %v3243_v27 = vadd.f32 %v5833_v33, %v2999_v25  ;;  %v1933_v28 = vpop.f32.mrf.mxu2 }
 0x2ca   : > { %v2560_v30 = vpop.f32.mrf.mxu3 }
 0x2cb   : > { %v3842_v61 = vpack.c.bf16 %v3602_v26, %v3602_v26  ;;  %v3483_v31 = vmax.f32 %v3243_v27, 0.0  ;;  %v2875_v34 = vmax.f32 %v1933_v28, %v2560_v30  ;;  %v1635_v35 = vpop.f32.mrf.mxu0 }
 0x2cc   : > { %v2262_v36 = vpop.f32.mrf.mxu1 }
 0x2cd   : > { %4083 = vst.msk [vmem:[%s5226_s19 + $0x2f4] sm:$0xf] %vm3893_vm2, %v3842_v61  ;;  %v3723_v37 = vpack.c.bf16 %v3483_v31, %v3483_v31  ;;  %v3119_v38 = vmul.f32 %v5823_v59, %v2875_v34  ;;  %v2756_v39 = vmax.f32 %v1635_v35, %v2262_v36 }
 0x2cf   : > { %3964 = vst.msk [vmem:[%s5226_s19 + $0x118] sm:$0xf] %vm3893_vm2, %v3723_v37  ;;  %v3363_v40 = vadd.f32 %v5833_v33, %v3119_v38  ;;  %v3000_v41 = vmul.f32 %v5823_v59, %v2756_v39 }
 0x2d1   : > { %v3603_v42 = vmax.f32 %v3363_v40, 0.0  ;;  %v3244_v43 = vadd.f32 %v5833_v33, %v3000_v41  ;;  %v1935_v44 = vpop.f32.mrf.mxu2 }
 0x2d2   : > { %v2562_v45 = vpop.f32.mrf.mxu3 }
 0x2d3   : > { %v3843_v48 = vpack.c.bf16 %v3603_v42, %v3603_v42  ;;  %v3484_v49 = vmax.f32 %v3244_v43, 0.0  ;;  %v2876_v50 = vmax.f32 %v1935_v44, %v2562_v45  ;;  %v1638_v51 = vpop.f32.mrf.mxu0  ;;  %v4981_v44 = vld [vmem:[%s5153_s11 + $0x170] sm:$0xff] }
 0x2d4   : > { %v2265_v52 = vpop.f32.mrf.mxu1  ;;  %v5041_v45 = vld [vmem:[%s5153_s11 + $0x350] sm:$0xff] }
 0x2d5   : > { %4084 = vst.msk [vmem:[%s5226_s19 + $0x2f8] sm:$0xf] %vm3893_vm2, %v3843_v48  ;;  %v3724_v53 = vpack.c.bf16 %v3484_v49, %v3484_v49  ;;  %v3120_v54 = vmul.f32 %v5823_v59, %v2876_v50  ;;  %v2757_v55 = vmax.f32 %v1638_v51, %v2265_v52 }
 0x2d6   : > { %4729 = vmatmul.msk.bf16.gmra.mxu0 %vm1084_vm1, %v4979_v46  ;;  %4789 = vmatmul.msk.bf16.gmra.mxu2 %vm1084_vm1, %v5039_v47 }
 0x2d7   : > { %3965 = vst.msk [vmem:[%s5226_s19 + $0x11c] sm:$0xf] %vm3893_vm2, %v3724_v53  ;;  %v3364_v56 = vadd.f32 %v5833_v33, %v3120_v54  ;;  %v3001_v57 = vmul.f32 %v5823_v59, %v2757_v55  ;;  %4857 = vmatmul.msk.bf16.gmra.mxu1 %vm1084_vm1, %v4979_v46  ;;  %4917 = vmatmul.msk.bf16.gmra.mxu3 %vm1084_vm1, %v5039_v47 }
 0x2d9   : > { %v3604_v58 = vmax.f32 %v3364_v56, 0.0  ;;  %v3245_v29 = vadd.f32 %v5833_v33, %v3001_v57  ;;  %v1938_v60 = vpop.f32.mrf.mxu2 }
 0x2da   : > { %v2565_v32 = vpop.f32.mrf.mxu3 }
 0x2db   : > { %v3844_v62 = vpack.c.bf16 %v3604_v58, %v3604_v58  ;;  %v3485_v63 = vmax.f32 %v3245_v29, 0.0  ;;  %v2877_v0 = vmax.f32 %v1938_v60, %v2565_v32  ;;  %v1640_v1 = vpop.f32.mrf.mxu0 }
 0x2dc   : > { %v2267_v2 = vpop.f32.mrf.mxu1 }
 0x2dd   : > { %4085 = vst.msk [vmem:[%s5226_s19 + $0x2fc] sm:$0xf] %vm3893_vm2, %v3844_v62  ;;  %v3725_v3 = vpack.c.bf16 %v3485_v63, %v3485_v63  ;;  %v3121_v4 = vmul.f32 %v5823_v59, %v2877_v0  ;;  %v2758_v5 = vmax.f32 %v1640_v1, %v2267_v2 }
 0x2df   : > { %3966 = vst.msk [vmem:[%s5226_s19 + $0x120] sm:$0xf] %vm3893_vm2, %v3725_v3  ;;  %v3365_v6 = vadd.f32 %v5833_v33, %v3121_v4  ;;  %v3002_v7 = vmul.f32 %v5823_v59, %v2758_v5 }
 0x2e1   : > { %v3605_v8 = vmax.f32 %v3365_v6, 0.0  ;;  %v3246_v9 = vadd.f32 %v5833_v33, %v3002_v7  ;;  %v1940_v10 = vpop.f32.mrf.mxu2 }
 0x2e2   : > { %v2567_v11 = vpop.f32.mrf.mxu3 }
 0x2e3   : > { %v3845_v14 = vpack.c.bf16 %v3605_v8, %v3605_v8  ;;  %v3486_v15 = vmax.f32 %v3246_v9, 0.0  ;;  %v2878_v16 = vmax.f32 %v1940_v10, %v2567_v11  ;;  %v1643_v17 = vpop.f32.mrf.mxu0  ;;  %v4982_v10 = vld [vmem:[%s5153_s11 + $0x178] sm:$0xff] }
 0x2e4   : > { %v2270_v18 = vpop.f32.mrf.mxu1  ;;  %v5042_v11 = vld [vmem:[%s5153_s11 + $0x358] sm:$0xff] }
 0x2e5   : > { %4086 = vst.msk [vmem:[%s5226_s19 + $0x300] sm:$0xf] %vm3893_vm2, %v3845_v14  ;;  %v3726_v19 = vpack.c.bf16 %v3486_v15, %v3486_v15  ;;  %v3122_v20 = vmul.f32 %v5823_v59, %v2878_v16  ;;  %v2759_v21 = vmax.f32 %v1643_v17, %v2270_v18 }
 0x2e6   : > { %4730 = vmatmul.msk.bf16.gmra.mxu0 %vm1084_vm1, %v4980_v12  ;;  %4790 = vmatmul.msk.bf16.gmra.mxu2 %vm1084_vm1, %v5040_v13 }
 0x2e7   : > { %3967 = vst.msk [vmem:[%s5226_s19 + $0x124] sm:$0xf] %vm3893_vm2, %v3726_v19  ;;  %v3366_v22 = vadd.f32 %v5833_v33, %v3122_v20  ;;  %v3003_v23 = vmul.f32 %v5823_v59, %v2759_v21  ;;  %4858 = vmatmul.msk.bf16.gmra.mxu1 %vm1084_vm1, %v4980_v12  ;;  %4918 = vmatmul.msk.bf16.gmra.mxu3 %vm1084_vm1, %v5040_v13 }
 0x2e9   : > { %v3606_v24 = vmax.f32 %v3366_v22, 0.0  ;;  %v3247_v25 = vadd.f32 %v5833_v33, %v3003_v23  ;;  %v1943_v26 = vpop.f32.mrf.mxu2 }
 0x2ea   : > { %v2570_v27 = vpop.f32.mrf.mxu3 }
 0x2eb   : > { %v3846_v28 = vpack.c.bf16 %v3606_v24, %v3606_v24  ;;  %v3487_v30 = vmax.f32 %v3247_v25, 0.0  ;;  %v2879_v61 = vmax.f32 %v1943_v26, %v2570_v27  ;;  %v1645_v31 = vpop.f32.mrf.mxu0 }
 0x2ec   : > { %v2272_v34 = vpop.f32.mrf.mxu1 }
 0x2ed   : > { %4087 = vst.msk [vmem:[%s5226_s19 + $0x304] sm:$0xf] %vm3893_vm2, %v3846_v28  ;;  %v3727_v35 = vpack.c.bf16 %v3487_v30, %v3487_v30  ;;  %v3123_v36 = vmul.f32 %v5823_v59, %v2879_v61  ;;  %v2760_v37 = vmax.f32 %v1645_v31, %v2272_v34 }
 0x2ef   : > { %3968 = vst.msk [vmem:[%s5226_s19 + $0x128] sm:$0xf] %vm3893_vm2, %v3727_v35  ;;  %v3367_v38 = vadd.f32 %v5833_v33, %v3123_v36  ;;  %v3004_v39 = vmul.f32 %v5823_v59, %v2760_v37 }
 0x2f1   : > { %v3607_v40 = vmax.f32 %v3367_v38, 0.0  ;;  %v3248_v41 = vadd.f32 %v5833_v33, %v3004_v39  ;;  %v1945_v42 = vpop.f32.mrf.mxu2 }
 0x2f2   : > { %v2572_v43 = vpop.f32.mrf.mxu3 }
 0x2f3   : > { %v3847_v46 = vpack.c.bf16 %v3607_v40, %v3607_v40  ;;  %v3488_v47 = vmax.f32 %v3248_v41, 0.0  ;;  %v2880_v48 = vmax.f32 %v1945_v42, %v2572_v43  ;;  %v1648_v49 = vpop.f32.mrf.mxu0  ;;  %v4983_v42 = vld [vmem:[%s5153_s11 + $0x180] sm:$0xff] }
 0x2f4   : > { %v2275_v50 = vpop.f32.mrf.mxu1  ;;  %v5043_v43 = vld [vmem:[%s5153_s11 + $0x360] sm:$0xff] }
 0x2f5   : > { %4088 = vst.msk [vmem:[%s5226_s19 + $0x308] sm:$0xf] %vm3893_vm2, %v3847_v46  ;;  %v3728_v51 = vpack.c.bf16 %v3488_v47, %v3488_v47  ;;  %v3124_v52 = vmul.f32 %v5823_v59, %v2880_v48  ;;  %v2761_v53 = vmax.f32 %v1648_v49, %v2275_v50 }
 0x2f6   : > { %4731 = vmatmul.msk.bf16.gmra.mxu0 %vm1084_vm1, %v4981_v44  ;;  %4791 = vmatmul.msk.bf16.gmra.mxu2 %vm1084_vm1, %v5041_v45 }
 0x2f7   : > { %3969 = vst.msk [vmem:[%s5226_s19 + $0x12c] sm:$0xf] %vm3893_vm2, %v3728_v51  ;;  %v3368_v54 = vadd.f32 %v5833_v33, %v3124_v52  ;;  %v3005_v55 = vmul.f32 %v5823_v59, %v2761_v53  ;;  %4859 = vmatmul.msk.bf16.gmra.mxu1 %vm1084_vm1, %v4981_v44  ;;  %4919 = vmatmul.msk.bf16.gmra.mxu3 %vm1084_vm1, %v5041_v45 }
 0x2f9   : > { %v3608_v56 = vmax.f32 %v3368_v54, 0.0  ;;  %v3249_v57 = vadd.f32 %v5833_v33, %v3005_v55  ;;  %v1948_v58 = vpop.f32.mrf.mxu2 }
 0x2fa   : > { %v2575_v29 = vpop.f32.mrf.mxu3 }
 0x2fb   : > { %v3848_v60 = vpack.c.bf16 %v3608_v56, %v3608_v56  ;;  %v3489_v32 = vmax.f32 %v3249_v57, 0.0  ;;  %v2881_v62 = vmax.f32 %v1948_v58, %v2575_v29  ;;  %v1650_v63 = vpop.f32.mrf.mxu0 }
 0x2fc   : > { %v2277_v0 = vpop.f32.mrf.mxu1 }
 0x2fd   : > { %4089 = vst.msk [vmem:[%s5226_s19 + $0x30c] sm:$0xf] %vm3893_vm2, %v3848_v60  ;;  %v3729_v1 = vpack.c.bf16 %v3489_v32, %v3489_v32  ;;  %v3125_v2 = vmul.f32 %v5823_v59, %v2881_v62  ;;  %v2762_v3 = vmax.f32 %v1650_v63, %v2277_v0  ;;  %v6131_v63 = vld [vmem:[%s6538_s3] ss:$0 sm:$0xff] }
 0x2ff   : > { %3970 = vst.msk [vmem:[%s5226_s19 + $0x130] sm:$0xf] %vm3893_vm2, %v3729_v1  ;;  %v3369_v4 = vadd.f32 %v5833_v33, %v3125_v2  ;;  %v3006_v5 = vmul.f32 %v5823_v59, %v2762_v3  ;;  %v6139_v1 = vld [vmem:[%s6539_s4] ss:$0 sm:$0xff] }
 0x301   : > { %v3609_v6 = vmax.f32 %v3369_v4, 0.0  ;;  %v3250_v7 = vadd.f32 %v5833_v33, %v3006_v5  ;;  %v1950_v8 = vpop.f32.mrf.mxu2 }
 0x302   : > { %v2577_v9 = vpop.f32.mrf.mxu3 }
 0x303   : > { %v3849_v12 = vpack.c.bf16 %v3609_v6, %v3609_v6  ;;  %v3490_v13 = vmax.f32 %v3250_v7, 0.0  ;;  %v2882_v14 = vmax.f32 %v1950_v8, %v2577_v9  ;;  %v1653_v15 = vpop.f32.mrf.mxu0  ;;  %v4984_v8 = vld [vmem:[%s5153_s11 + $0x188] sm:$0xff] }
 0x304   : > { %v2280_v16 = vpop.f32.mrf.mxu1  ;;  %v5044_v9 = vld [vmem:[%s5153_s11 + $0x368] sm:$0xff] }
 0x305   : > { %4090 = vst.msk [vmem:[%s5226_s19 + $0x310] sm:$0xf] %vm3893_vm2, %v3849_v12  ;;  %v3730_v17 = vpack.c.bf16 %v3490_v13, %v3490_v13  ;;  %v3126_v18 = vmul.f32 %v5823_v59, %v2882_v14  ;;  %v2763_v19 = vmax.f32 %v1653_v15, %v2280_v16 }
 0x306   : > { %4732 = vmatmul.msk.bf16.gmra.mxu0 %vm1084_vm1, %v4982_v10  ;;  %4792 = vmatmul.msk.bf16.gmra.mxu2 %vm1084_vm1, %v5042_v11 }
 0x307   : > { %3971 = vst.msk [vmem:[%s5226_s19 + $0x134] sm:$0xf] %vm3893_vm2, %v3730_v17  ;;  %v3370_v20 = vadd.f32 %v5833_v33, %v3126_v18  ;;  %v3007_v21 = vmul.f32 %v5823_v59, %v2763_v19  ;;  %4860 = vmatmul.msk.bf16.gmra.mxu1 %vm1084_vm1, %v4982_v10  ;;  %4920 = vmatmul.msk.bf16.gmra.mxu3 %vm1084_vm1, %v5042_v11 }
 0x309   : > { %v3610_v22 = vmax.f32 %v3370_v20, 0.0  ;;  %v3251_v23 = vadd.f32 %v5833_v33, %v3007_v21  ;;  %v1953_v24 = vpop.f32.mrf.mxu2 }
 0x30a   : > { %v2580_v25 = vpop.f32.mrf.mxu3 }
 0x30b   : > { %v3850_v26 = vpack.c.bf16 %v3610_v22, %v3610_v22  ;;  %v3491_v27 = vmax.f32 %v3251_v23, 0.0  ;;  %v2883_v28 = vmax.f32 %v1953_v24, %v2580_v25  ;;  %v1655_v30 = vpop.f32.mrf.mxu0 }
 0x30c   : > { %v2282_v61 = vpop.f32.mrf.mxu1 }
 0x30d   : > { %4091 = vst.msk [vmem:[%s5226_s19 + $0x314] sm:$0xf] %vm3893_vm2, %v3850_v26  ;;  %v3731_v31 = vpack.c.bf16 %v3491_v27, %v3491_v27  ;;  %v3127_v34 = vmul.f32 %v5823_v59, %v2883_v28  ;;  %v2764_v35 = vmax.f32 %v1655_v30, %v2282_v61 }
 0x30f   : > { %3972 = vst.msk [vmem:[%s5226_s19 + $0x138] sm:$0xf] %vm3893_vm2, %v3731_v31  ;;  %v3371_v36 = vadd.f32 %v5833_v33, %v3127_v34  ;;  %v3008_v37 = vmul.f32 %v5823_v59, %v2764_v35 }
 0x311   : > { %v3611_v38 = vmax.f32 %v3371_v36, 0.0  ;;  %v3252_v39 = vadd.f32 %v5833_v33, %v3008_v37  ;;  %v1955_v40 = vpop.f32.mrf.mxu2 }
 0x312   : > { %v2582_v41 = vpop.f32.mrf.mxu3 }
 0x313   : > { %v3851_v44 = vpack.c.bf16 %v3611_v38, %v3611_v38  ;;  %v3492_v45 = vmax.f32 %v3252_v39, 0.0  ;;  %v2884_v46 = vmax.f32 %v1955_v40, %v2582_v41  ;;  %v1658_v47 = vpop.f32.mrf.mxu0  ;;  %v4985_v40 = vld [vmem:[%s5153_s11 + $0x190] sm:$0xff] }
 0x314   : > { %v2285_v48 = vpop.f32.mrf.mxu1  ;;  %v5045_v41 = vld [vmem:[%s5153_s11 + $0x370] sm:$0xff] }
 0x315   : > { %4092 = vst.msk [vmem:[%s5226_s19 + $0x318] sm:$0xf] %vm3893_vm2, %v3851_v44  ;;  %v3732_v49 = vpack.c.bf16 %v3492_v45, %v3492_v45  ;;  %v3128_v50 = vmul.f32 %v5823_v59, %v2884_v46  ;;  %v2765_v51 = vmax.f32 %v1658_v47, %v2285_v48 }
 0x316   : > { %4733 = vmatmul.msk.bf16.gmra.mxu0 %vm1084_vm1, %v4983_v42  ;;  %4793 = vmatmul.msk.bf16.gmra.mxu2 %vm1084_vm1, %v5043_v43 }
 0x317   : > { %3973 = vst.msk [vmem:[%s5226_s19 + $0x13c] sm:$0xf] %vm3893_vm2, %v3732_v49  ;;  %v3372_v52 = vadd.f32 %v5833_v33, %v3128_v50  ;;  %v3009_v53 = vmul.f32 %v5823_v59, %v2765_v51  ;;  %4861 = vmatmul.msk.bf16.gmra.mxu1 %vm1084_vm1, %v4983_v42  ;;  %4921 = vmatmul.msk.bf16.gmra.mxu3 %vm1084_vm1, %v5043_v43 }
 0x319   : > { %v3612_v54 = vmax.f32 %v3372_v52, 0.0  ;;  %v3253_v55 = vadd.f32 %v5833_v33, %v3009_v53  ;;  %v1958_v56 = vpop.f32.mrf.mxu2 }
 0x31a   : > { %v2585_v57 = vpop.f32.mrf.mxu3 }
 0x31b   : > { %v3852_v58 = vpack.c.bf16 %v3612_v54, %v3612_v54  ;;  %v3493_v29 = vmax.f32 %v3253_v55, 0.0  ;;  %v2885_v60 = vmax.f32 %v1958_v56, %v2585_v57  ;;  %v1660_v32 = vpop.f32.mrf.mxu0 }
 0x31c   : > { %v2287_v62 = vpop.f32.mrf.mxu1 }
 0x31d   : > { %4093 = vst.msk [vmem:[%s5226_s19 + $0x31c] sm:$0xf] %vm3893_vm2, %v3852_v58  ;;  %v3733_v59 = vpack.c.bf16 %v3493_v29, %v3493_v29  ;;  %v3129_v0 = vmul.f32 %v6131_v63, %v2885_v60  ;;  %v2766_v33 = vmax.f32 %v1660_v32, %v2287_v62 }
 0x31f   : > { %3974 = vst.msk [vmem:[%s5226_s19 + $0x140] sm:$0xf] %vm3893_vm2, %v3733_v59  ;;  %v3373_v2 = vadd.f32 %v6139_v1, %v3129_v0  ;;  %v3010_v3 = vmul.f32 %v6131_v63, %v2766_v33 }
 0x321   : > { %v3613_v4 = vmax.f32 %v3373_v2, 0.0  ;;  %v3254_v5 = vadd.f32 %v6139_v1, %v3010_v3  ;;  %v1960_v6 = vpop.f32.mrf.mxu2 }
 0x322   : > { %v2587_v7 = vpop.f32.mrf.mxu3 }
 0x323   : > { %v3853_v10 = vpack.c.bf16 %v3613_v4, %v3613_v4  ;;  %v3494_v11 = vmax.f32 %v3254_v5, 0.0  ;;  %v2886_v12 = vmax.f32 %v1960_v6, %v2587_v7  ;;  %v1663_v13 = vpop.f32.mrf.mxu0  ;;  %v4986_v6 = vld [vmem:[%s5153_s11 + $0x198] sm:$0xff] }
 0x324   : > { %v2290_v14 = vpop.f32.mrf.mxu1  ;;  %v5046_v7 = vld [vmem:[%s5153_s11 + $0x378] sm:$0xff] }
 0x325   : > { %4094 = vst.msk [vmem:[%s5226_s19 + $0x320] sm:$0xf] %vm3893_vm2, %v3853_v10  ;;  %v3734_v15 = vpack.c.bf16 %v3494_v11, %v3494_v11  ;;  %v3130_v16 = vmul.f32 %v6131_v63, %v2886_v12  ;;  %v2767_v17 = vmax.f32 %v1663_v13, %v2290_v14 }
 0x326   : > { %4734 = vmatmul.msk.bf16.gmra.mxu0 %vm1084_vm1, %v4984_v8  ;;  %4794 = vmatmul.msk.bf16.gmra.mxu2 %vm1084_vm1, %v5044_v9 }
 0x327   : > { %3975 = vst.msk [vmem:[%s5226_s19 + $0x144] sm:$0xf] %vm3893_vm2, %v3734_v15  ;;  %v3374_v18 = vadd.f32 %v6139_v1, %v3130_v16  ;;  %v3011_v19 = vmul.f32 %v6131_v63, %v2767_v17  ;;  %4862 = vmatmul.msk.bf16.gmra.mxu1 %vm1084_vm1, %v4984_v8  ;;  %4922 = vmatmul.msk.bf16.gmra.mxu3 %vm1084_vm1, %v5044_v9 }
 0x329   : > { %v3614_v20 = vmax.f32 %v3374_v18, 0.0  ;;  %v3255_v21 = vadd.f32 %v6139_v1, %v3011_v19  ;;  %v1963_v22 = vpop.f32.mrf.mxu2 }
 0x32a   : > { %v2590_v23 = vpop.f32.mrf.mxu3 }
 0x32b   : > { %v3854_v24 = vpack.c.bf16 %v3614_v20, %v3614_v20  ;;  %v3495_v25 = vmax.f32 %v3255_v21, 0.0  ;;  %v2887_v26 = vmax.f32 %v1963_v22, %v2590_v23  ;;  %v1665_v27 = vpop.f32.mrf.mxu0 }
 0x32c   : > { %v2292_v28 = vpop.f32.mrf.mxu1 }
 0x32d   : > { %4095 = vst.msk [vmem:[%s5226_s19 + $0x324] sm:$0xf] %vm3893_vm2, %v3854_v24  ;;  %v3735_v30 = vpack.c.bf16 %v3495_v25, %v3495_v25  ;;  %v3131_v61 = vmul.f32 %v6131_v63, %v2887_v26  ;;  %v2768_v31 = vmax.f32 %v1665_v27, %v2292_v28 }
 0x32f   : > { %3976 = vst.msk [vmem:[%s5226_s19 + $0x148] sm:$0xf] %vm3893_vm2, %v3735_v30  ;;  %v3375_v34 = vadd.f32 %v6139_v1, %v3131_v61  ;;  %v3012_v35 = vmul.f32 %v6131_v63, %v2768_v31 }
 0x331   : > { %v3615_v36 = vmax.f32 %v3375_v34, 0.0  ;;  %v3256_v37 = vadd.f32 %v6139_v1, %v3012_v35  ;;  %v1965_v38 = vpop.f32.mrf.mxu2 }
 0x332   : > { %v2592_v39 = vpop.f32.mrf.mxu3 }
 0x333   : > { %v3855_v42 = vpack.c.bf16 %v3615_v36, %v3615_v36  ;;  %v3496_v43 = vmax.f32 %v3256_v37, 0.0  ;;  %v2888_v44 = vmax.f32 %v1965_v38, %v2592_v39  ;;  %v1668_v45 = vpop.f32.mrf.mxu0  ;;  %v4987_v38 = vld [vmem:[%s5153_s11 + $0x1a0] sm:$0xff] }
 0x334   : > { %v2295_v46 = vpop.f32.mrf.mxu1  ;;  %v5047_v39 = vld [vmem:[%s5153_s11 + $0x380] sm:$0xff] }
 0x335   : > { %4096 = vst.msk [vmem:[%s5226_s19 + $0x328] sm:$0xf] %vm3893_vm2, %v3855_v42  ;;  %v3736_v47 = vpack.c.bf16 %v3496_v43, %v3496_v43  ;;  %v3132_v48 = vmul.f32 %v6131_v63, %v2888_v44  ;;  %v2769_v49 = vmax.f32 %v1668_v45, %v2295_v46 }
 0x336   : > { %4735 = vmatmul.msk.bf16.gmra.mxu0 %vm1084_vm1, %v4985_v40  ;;  %4795 = vmatmul.msk.bf16.gmra.mxu2 %vm1084_vm1, %v5045_v41 }
 0x337   : > { %3977 = vst.msk [vmem:[%s5226_s19 + $0x14c] sm:$0xf] %vm3893_vm2, %v3736_v47  ;;  %v3376_v50 = vadd.f32 %v6139_v1, %v3132_v48  ;;  %v3013_v51 = vmul.f32 %v6131_v63, %v2769_v49  ;;  %4863 = vmatmul.msk.bf16.gmra.mxu1 %vm1084_vm1, %v4985_v40  ;;  %4923 = vmatmul.msk.bf16.gmra.mxu3 %vm1084_vm1, %v5045_v41 }
 0x339   : > { %v3616_v52 = vmax.f32 %v3376_v50, 0.0  ;;  %v3257_v53 = vadd.f32 %v6139_v1, %v3013_v51  ;;  %v1968_v54 = vpop.f32.mrf.mxu2 }
 0x33a   : > { %v2595_v55 = vpop.f32.mrf.mxu3 }
 0x33b   : > { %v3856_v56 = vpack.c.bf16 %v3616_v52, %v3616_v52  ;;  %v3497_v57 = vmax.f32 %v3257_v53, 0.0  ;;  %v2889_v58 = vmax.f32 %v1968_v54, %v2595_v55  ;;  %v1670_v29 = vpop.f32.mrf.mxu0 }
 0x33c   : > { %v2297_v60 = vpop.f32.mrf.mxu1 }
 0x33d   : > { %4097 = vst.msk [vmem:[%s5226_s19 + $0x32c] sm:$0xf] %vm3893_vm2, %v3856_v56  ;;  %v3737_v32 = vpack.c.bf16 %v3497_v57, %v3497_v57  ;;  %v3133_v62 = vmul.f32 %v6131_v63, %v2889_v58  ;;  %v2770_v59 = vmax.f32 %v1670_v29, %v2297_v60 }
 0x33f   : > { %3978 = vst.msk [vmem:[%s5226_s19 + $0x150] sm:$0xf] %vm3893_vm2, %v3737_v32  ;;  %v3377_v0 = vadd.f32 %v6139_v1, %v3133_v62  ;;  %v3014_v33 = vmul.f32 %v6131_v63, %v2770_v59 }
 0x341   : > { %v3617_v2 = vmax.f32 %v3377_v0, 0.0  ;;  %v3258_v3 = vadd.f32 %v6139_v1, %v3014_v33  ;;  %v1970_v4 = vpop.f32.mrf.mxu2 }
 0x342   : > { %v2597_v5 = vpop.f32.mrf.mxu3 }
 0x343   : > { %v3857_v8 = vpack.c.bf16 %v3617_v2, %v3617_v2  ;;  %v3498_v9 = vmax.f32 %v3258_v3, 0.0  ;;  %v2890_v10 = vmax.f32 %v1970_v4, %v2597_v5  ;;  %v1673_v11 = vpop.f32.mrf.mxu0  ;;  %v4988_v4 = vld [vmem:[%s5153_s11 + $0x1a8] sm:$0xff] }
 0x344   : > { %v2300_v12 = vpop.f32.mrf.mxu1  ;;  %v5048_v5 = vld [vmem:[%s5153_s11 + $0x388] sm:$0xff] }
 0x345   : > { %4098 = vst.msk [vmem:[%s5226_s19 + $0x330] sm:$0xf] %vm3893_vm2, %v3857_v8  ;;  %v3738_v13 = vpack.c.bf16 %v3498_v9, %v3498_v9  ;;  %v3134_v14 = vmul.f32 %v6131_v63, %v2890_v10  ;;  %v2771_v15 = vmax.f32 %v1673_v11, %v2300_v12 }
 0x346   : > { %4736 = vmatmul.msk.bf16.gmra.mxu0 %vm1084_vm1, %v4986_v6  ;;  %4796 = vmatmul.msk.bf16.gmra.mxu2 %vm1084_vm1, %v5046_v7 }
 0x347   : > { %3979 = vst.msk [vmem:[%s5226_s19 + $0x154] sm:$0xf] %vm3893_vm2, %v3738_v13  ;;  %v3378_v16 = vadd.f32 %v6139_v1, %v3134_v14  ;;  %v3015_v17 = vmul.f32 %v6131_v63, %v2771_v15  ;;  %4864 = vmatmul.msk.bf16.gmra.mxu1 %vm1084_vm1, %v4986_v6  ;;  %4924 = vmatmul.msk.bf16.gmra.mxu3 %vm1084_vm1, %v5046_v7 }
 0x349   : > { %v3618_v18 = vmax.f32 %v3378_v16, 0.0  ;;  %v3259_v19 = vadd.f32 %v6139_v1, %v3015_v17  ;;  %v1973_v20 = vpop.f32.mrf.mxu2 }
 0x34a   : > { %v2600_v21 = vpop.f32.mrf.mxu3 }
 0x34b   : > { %v3858_v22 = vpack.c.bf16 %v3618_v18, %v3618_v18  ;;  %v3499_v23 = vmax.f32 %v3259_v19, 0.0  ;;  %v2891_v24 = vmax.f32 %v1973_v20, %v2600_v21  ;;  %v1675_v25 = vpop.f32.mrf.mxu0 }
 0x34c   : > { %v2302_v26 = vpop.f32.mrf.mxu1 }
 0x34d   : > { %4099 = vst.msk [vmem:[%s5226_s19 + $0x334] sm:$0xf] %vm3893_vm2, %v3858_v22  ;;  %v3739_v27 = vpack.c.bf16 %v3499_v23, %v3499_v23  ;;  %v3135_v28 = vmul.f32 %v6131_v63, %v2891_v24  ;;  %v2772_v30 = vmax.f32 %v1675_v25, %v2302_v26 }
 0x34f   : > { %3980 = vst.msk [vmem:[%s5226_s19 + $0x158] sm:$0xf] %vm3893_vm2, %v3739_v27  ;;  %v3379_v61 = vadd.f32 %v6139_v1, %v3135_v28  ;;  %v3016_v31 = vmul.f32 %v6131_v63, %v2772_v30 }
 0x351   : > { %v3619_v34 = vmax.f32 %v3379_v61, 0.0  ;;  %v3260_v35 = vadd.f32 %v6139_v1, %v3016_v31  ;;  %v1975_v36 = vpop.f32.mrf.mxu2 }
 0x352   : > { %v2602_v37 = vpop.f32.mrf.mxu3 }
 0x353   : > { %v3859_v40 = vpack.c.bf16 %v3619_v34, %v3619_v34  ;;  %v3500_v41 = vmax.f32 %v3260_v35, 0.0  ;;  %v2892_v42 = vmax.f32 %v1975_v36, %v2602_v37  ;;  %v1678_v43 = vpop.f32.mrf.mxu0  ;;  %v4989_v36 = vld [vmem:[%s5153_s11 + $0x1b0] sm:$0xff] }
 0x354   : > { %v2305_v44 = vpop.f32.mrf.mxu1  ;;  %v5049_v37 = vld [vmem:[%s5153_s11 + $0x390] sm:$0xff] }
 0x355   : > { %4100 = vst.msk [vmem:[%s5226_s19 + $0x338] sm:$0xf] %vm3893_vm2, %v3859_v40  ;;  %v3740_v45 = vpack.c.bf16 %v3500_v41, %v3500_v41  ;;  %v3136_v46 = vmul.f32 %v6131_v63, %v2892_v42  ;;  %v2773_v47 = vmax.f32 %v1678_v43, %v2305_v44 }
 0x356   : > { %4737 = vmatmul.msk.bf16.gmra.mxu0 %vm1084_vm1, %v4987_v38  ;;  %4797 = vmatmul.msk.bf16.gmra.mxu2 %vm1084_vm1, %v5047_v39 }
 0x357   : > { %3981 = vst.msk [vmem:[%s5226_s19 + $0x15c] sm:$0xf] %vm3893_vm2, %v3740_v45  ;;  %v3380_v48 = vadd.f32 %v6139_v1, %v3136_v46  ;;  %v3017_v49 = vmul.f32 %v6131_v63, %v2773_v47  ;;  %4865 = vmatmul.msk.bf16.gmra.mxu1 %vm1084_vm1, %v4987_v38  ;;  %4925 = vmatmul.msk.bf16.gmra.mxu3 %vm1084_vm1, %v5047_v39 }
 0x359   : > { %v3620_v50 = vmax.f32 %v3380_v48, 0.0  ;;  %v3261_v51 = vadd.f32 %v6139_v1, %v3017_v49  ;;  %v1978_v52 = vpop.f32.mrf.mxu2 }
 0x35a   : > { %v2605_v53 = vpop.f32.mrf.mxu3 }
 0x35b   : > { %v3860_v54 = vpack.c.bf16 %v3620_v50, %v3620_v50  ;;  %v3501_v55 = vmax.f32 %v3261_v51, 0.0  ;;  %v2893_v56 = vmax.f32 %v1978_v52, %v2605_v53  ;;  %v1680_v57 = vpop.f32.mrf.mxu0 }
 0x35c   : > { %v2307_v58 = vpop.f32.mrf.mxu1 }
 0x35d   : > { %4101 = vst.msk [vmem:[%s5226_s19 + $0x33c] sm:$0xf] %vm3893_vm2, %v3860_v54  ;;  %v3741_v29 = vpack.c.bf16 %v3501_v55, %v3501_v55  ;;  %v3137_v60 = vmul.f32 %v6131_v63, %v2893_v56  ;;  %v2774_v32 = vmax.f32 %v1680_v57, %v2307_v58 }
 0x35f   : > { %3982 = vst.msk [vmem:[%s5226_s19 + $0x160] sm:$0xf] %vm3893_vm2, %v3741_v29  ;;  %v3381_v62 = vadd.f32 %v6139_v1, %v3137_v60  ;;  %v3018_v59 = vmul.f32 %v6131_v63, %v2774_v32 }
 0x361   : > { %v3621_v0 = vmax.f32 %v3381_v62, 0.0  ;;  %v3262_v33 = vadd.f32 %v6139_v1, %v3018_v59  ;;  %v1980_v2 = vpop.f32.mrf.mxu2 }
 0x362   : > { %v2607_v3 = vpop.f32.mrf.mxu3 }
 0x363   : > { %v3861_v6 = vpack.c.bf16 %v3621_v0, %v3621_v0  ;;  %v3502_v7 = vmax.f32 %v3262_v33, 0.0  ;;  %v2894_v8 = vmax.f32 %v1980_v2, %v2607_v3  ;;  %v1683_v9 = vpop.f32.mrf.mxu0  ;;  %v4990_v2 = vld [vmem:[%s5153_s11 + $0x1b8] sm:$0xff] }
 0x364   : > { %v2310_v10 = vpop.f32.mrf.mxu1  ;;  %v5050_v3 = vld [vmem:[%s5153_s11 + $0x398] sm:$0xff] }
 0x365   : > { %4102 = vst.msk [vmem:[%s5226_s19 + $0x340] sm:$0xf] %vm3893_vm2, %v3861_v6  ;;  %v3742_v11 = vpack.c.bf16 %v3502_v7, %v3502_v7  ;;  %v3138_v12 = vmul.f32 %v6131_v63, %v2894_v8  ;;  %v2775_v13 = vmax.f32 %v1683_v9, %v2310_v10 }
 0x366   : > { %4738 = vmatmul.msk.bf16.gmra.mxu0 %vm1084_vm1, %v4988_v4  ;;  %4798 = vmatmul.msk.bf16.gmra.mxu2 %vm1084_vm1, %v5048_v5 }
 0x367   : > { %3983 = vst.msk [vmem:[%s5226_s19 + $0x164] sm:$0xf] %vm3893_vm2, %v3742_v11  ;;  %v3382_v14 = vadd.f32 %v6139_v1, %v3138_v12  ;;  %v3019_v15 = vmul.f32 %v6131_v63, %v2775_v13  ;;  %4866 = vmatmul.msk.bf16.gmra.mxu1 %vm1084_vm1, %v4988_v4  ;;  %4926 = vmatmul.msk.bf16.gmra.mxu3 %vm1084_vm1, %v5048_v5 }
 0x369   : > { %v3622_v16 = vmax.f32 %v3382_v14, 0.0  ;;  %v3263_v17 = vadd.f32 %v6139_v1, %v3019_v15  ;;  %v1983_v18 = vpop.f32.mrf.mxu2 }
 0x36a   : > { %v2610_v19 = vpop.f32.mrf.mxu3 }
 0x36b   : > { %v3862_v20 = vpack.c.bf16 %v3622_v16, %v3622_v16  ;;  %v3503_v21 = vmax.f32 %v3263_v17, 0.0  ;;  %v2895_v22 = vmax.f32 %v1983_v18, %v2610_v19  ;;  %v1685_v23 = vpop.f32.mrf.mxu0 }
 0x36c   : > { %v2312_v24 = vpop.f32.mrf.mxu1 }
 0x36d   : > { %4103 = vst.msk [vmem:[%s5226_s19 + $0x344] sm:$0xf] %vm3893_vm2, %v3862_v20  ;;  %v3743_v25 = vpack.c.bf16 %v3503_v21, %v3503_v21  ;;  %v3139_v26 = vmul.f32 %v6131_v63, %v2895_v22  ;;  %v2776_v27 = vmax.f32 %v1685_v23, %v2312_v24 }
 0x36f   : > { %3984 = vst.msk [vmem:[%s5226_s19 + $0x168] sm:$0xf] %vm3893_vm2, %v3743_v25  ;;  %v3383_v28 = vadd.f32 %v6139_v1, %v3139_v26  ;;  %v3020_v30 = vmul.f32 %v6131_v63, %v2776_v27 }
 0x371   : > { %v3623_v61 = vmax.f32 %v3383_v28, 0.0  ;;  %v3264_v31 = vadd.f32 %v6139_v1, %v3020_v30  ;;  %v1985_v34 = vpop.f32.mrf.mxu2 }
 0x372   : > { %v2612_v35 = vpop.f32.mrf.mxu3 }
 0x373   : > { %v3863_v38 = vpack.c.bf16 %v3623_v61, %v3623_v61  ;;  %v3504_v39 = vmax.f32 %v3264_v31, 0.0  ;;  %v2896_v40 = vmax.f32 %v1985_v34, %v2612_v35  ;;  %v1688_v41 = vpop.f32.mrf.mxu0  ;;  %v4991_v34 = vld [vmem:[%s5153_s11 + $0x1c0] sm:$0xff] }
 0x374   : > { %v2315_v42 = vpop.f32.mrf.mxu1  ;;  %v5051_v35 = vld [vmem:[%s5153_s11 + $0x3a0] sm:$0xff] }
 0x375   : > { %4104 = vst.msk [vmem:[%s5226_s19 + $0x348] sm:$0xf] %vm3893_vm2, %v3863_v38  ;;  %v3744_v43 = vpack.c.bf16 %v3504_v39, %v3504_v39  ;;  %v3140_v44 = vmul.f32 %v6131_v63, %v2896_v40  ;;  %v2777_v45 = vmax.f32 %v1688_v41, %v2315_v42 }
 0x376   : > { %4739 = vmatmul.msk.bf16.gmra.mxu0 %vm1084_vm1, %v4989_v36  ;;  %4799 = vmatmul.msk.bf16.gmra.mxu2 %vm1084_vm1, %v5049_v37 }
 0x377   : > { %3985 = vst.msk [vmem:[%s5226_s19 + $0x16c] sm:$0xf] %vm3893_vm2, %v3744_v43  ;;  %v3384_v46 = vadd.f32 %v6139_v1, %v3140_v44  ;;  %v3021_v47 = vmul.f32 %v6131_v63, %v2777_v45  ;;  %4867 = vmatmul.msk.bf16.gmra.mxu1 %vm1084_vm1, %v4989_v36  ;;  %4927 = vmatmul.msk.bf16.gmra.mxu3 %vm1084_vm1, %v5049_v37 }
 0x379   : > { %v3624_v48 = vmax.f32 %v3384_v46, 0.0  ;;  %v3265_v49 = vadd.f32 %v6139_v1, %v3021_v47  ;;  %v1988_v50 = vpop.f32.mrf.mxu2 }
 0x37a   : > { %v2615_v51 = vpop.f32.mrf.mxu3 }
 0x37b   : > { %v3864_v52 = vpack.c.bf16 %v3624_v48, %v3624_v48  ;;  %v3505_v53 = vmax.f32 %v3265_v49, 0.0  ;;  %v2897_v54 = vmax.f32 %v1988_v50, %v2615_v51  ;;  %v1690_v55 = vpop.f32.mrf.mxu0 }
 0x37c   : > { %v2317_v56 = vpop.f32.mrf.mxu1 }
 0x37d   : > { %4105 = vst.msk [vmem:[%s5226_s19 + $0x34c] sm:$0xf] %vm3893_vm2, %v3864_v52  ;;  %v3745_v57 = vpack.c.bf16 %v3505_v53, %v3505_v53  ;;  %v3141_v58 = vmul.f32 %v6131_v63, %v2897_v54  ;;  %v2778_v29 = vmax.f32 %v1690_v55, %v2317_v56 }
 0x37f   : > { %3986 = vst.msk [vmem:[%s5226_s19 + $0x170] sm:$0xf] %vm3893_vm2, %v3745_v57  ;;  %v3385_v60 = vadd.f32 %v6139_v1, %v3141_v58  ;;  %v3022_v32 = vmul.f32 %v6131_v63, %v2778_v29 }
 0x381   : > { %v3625_v62 = vmax.f32 %v3385_v60, 0.0  ;;  %v3266_v59 = vadd.f32 %v6139_v1, %v3022_v32  ;;  %v1990_v0 = vpop.f32.mrf.mxu2 }
 0x382   : > { %v2617_v33 = vpop.f32.mrf.mxu3 }
 0x383   : > { %v3865_v4 = vpack.c.bf16 %v3625_v62, %v3625_v62  ;;  %v3506_v5 = vmax.f32 %v3266_v59, 0.0  ;;  %v2898_v6 = vmax.f32 %v1990_v0, %v2617_v33  ;;  %v1693_v7 = vpop.f32.mrf.mxu0  ;;  %v4992_v0 = vld [vmem:[%s5153_s11 + $0x1c8] sm:$0xff] }
 0x384   : > { %v2320_v8 = vpop.f32.mrf.mxu1  ;;  %v5052_v33 = vld [vmem:[%s5153_s11 + $0x3a8] sm:$0xff] }
 0x385   : > { %4106 = vst.msk [vmem:[%s5226_s19 + $0x350] sm:$0xf] %vm3893_vm2, %v3865_v4  ;;  %v3746_v9 = vpack.c.bf16 %v3506_v5, %v3506_v5  ;;  %v3142_v10 = vmul.f32 %v6131_v63, %v2898_v6  ;;  %v2779_v11 = vmax.f32 %v1693_v7, %v2320_v8 }
 0x386   : > { %4740 = vmatmul.msk.bf16.gmra.mxu0 %vm1084_vm1, %v4990_v2  ;;  %4800 = vmatmul.msk.bf16.gmra.mxu2 %vm1084_vm1, %v5050_v3 }
 0x387   : > { %3987 = vst.msk [vmem:[%s5226_s19 + $0x174] sm:$0xf] %vm3893_vm2, %v3746_v9  ;;  %v3386_v12 = vadd.f32 %v6139_v1, %v3142_v10  ;;  %v3023_v13 = vmul.f32 %v6131_v63, %v2779_v11  ;;  %4868 = vmatmul.msk.bf16.gmra.mxu1 %vm1084_vm1, %v4990_v2  ;;  %4928 = vmatmul.msk.bf16.gmra.mxu3 %vm1084_vm1, %v5050_v3 }
 0x389   : > { %v3626_v14 = vmax.f32 %v3386_v12, 0.0  ;;  %v3267_v15 = vadd.f32 %v6139_v1, %v3023_v13  ;;  %v1993_v16 = vpop.f32.mrf.mxu2 }
 0x38a   : > { %v2620_v17 = vpop.f32.mrf.mxu3 }
 0x38b   : > { %v3866_v18 = vpack.c.bf16 %v3626_v14, %v3626_v14  ;;  %v3507_v19 = vmax.f32 %v3267_v15, 0.0  ;;  %v2899_v20 = vmax.f32 %v1993_v16, %v2620_v17  ;;  %v1695_v21 = vpop.f32.mrf.mxu0 }
 0x38c   : > { %v2322_v22 = vpop.f32.mrf.mxu1 }
 0x38d   : > { %4107 = vst.msk [vmem:[%s5226_s19 + $0x354] sm:$0xf] %vm3893_vm2, %v3866_v18  ;;  %v3747_v23 = vpack.c.bf16 %v3507_v19, %v3507_v19  ;;  %v3143_v24 = vmul.f32 %v6131_v63, %v2899_v20  ;;  %v2780_v25 = vmax.f32 %v1695_v21, %v2322_v22 }
 0x38f   : > { %3988 = vst.msk [vmem:[%s5226_s19 + $0x178] sm:$0xf] %vm3893_vm2, %v3747_v23  ;;  %v3387_v26 = vadd.f32 %v6139_v1, %v3143_v24  ;;  %v3024_v27 = vmul.f32 %v6131_v63, %v2780_v25 }
 0x391   : > { %v3627_v28 = vmax.f32 %v3387_v26, 0.0  ;;  %v3268_v30 = vadd.f32 %v6139_v1, %v3024_v27  ;;  %v1995_v61 = vpop.f32.mrf.mxu2 }
 0x392   : > { %v2622_v31 = vpop.f32.mrf.mxu3 }
 0x393   : > { %v3867_v36 = vpack.c.bf16 %v3627_v28, %v3627_v28  ;;  %v3508_v37 = vmax.f32 %v3268_v30, 0.0  ;;  %v2900_v38 = vmax.f32 %v1995_v61, %v2622_v31  ;;  %v1698_v39 = vpop.f32.mrf.mxu0  ;;  %v4993_v61 = vld [vmem:[%s5153_s11 + $0x1d0] sm:$0xff] }
 0x394   : > { %v2325_v40 = vpop.f32.mrf.mxu1  ;;  %v5053_v31 = vld [vmem:[%s5153_s11 + $0x3b0] sm:$0xff] }
 0x395   : > { %4108 = vst.msk [vmem:[%s5226_s19 + $0x358] sm:$0xf] %vm3893_vm2, %v3867_v36  ;;  %v3748_v41 = vpack.c.bf16 %v3508_v37, %v3508_v37  ;;  %v3144_v42 = vmul.f32 %v6131_v63, %v2900_v38  ;;  %v2781_v43 = vmax.f32 %v1698_v39, %v2325_v40 }
 0x396   : > { %4741 = vmatmul.msk.bf16.gmra.mxu0 %vm1084_vm1, %v4991_v34  ;;  %4801 = vmatmul.msk.bf16.gmra.mxu2 %vm1084_vm1, %v5051_v35 }
 0x397   : > { %3989 = vst.msk [vmem:[%s5226_s19 + $0x17c] sm:$0xf] %vm3893_vm2, %v3748_v41  ;;  %v3388_v44 = vadd.f32 %v6139_v1, %v3144_v42  ;;  %v3025_v45 = vmul.f32 %v6131_v63, %v2781_v43  ;;  %4869 = vmatmul.msk.bf16.gmra.mxu1 %vm1084_vm1, %v4991_v34  ;;  %4929 = vmatmul.msk.bf16.gmra.mxu3 %vm1084_vm1, %v5051_v35 }
 0x399   : > { %v3628_v46 = vmax.f32 %v3388_v44, 0.0  ;;  %v3269_v47 = vadd.f32 %v6139_v1, %v3025_v45  ;;  %v1998_v48 = vpop.f32.mrf.mxu2 }
 0x39a   : > { %v2625_v49 = vpop.f32.mrf.mxu3 }
 0x39b   : > { %v3868_v50 = vpack.c.bf16 %v3628_v46, %v3628_v46  ;;  %v3509_v51 = vmax.f32 %v3269_v47, 0.0  ;;  %v2901_v52 = vmax.f32 %v1998_v48, %v2625_v49  ;;  %v1700_v53 = vpop.f32.mrf.mxu0 }
 0x39c   : > { %v2327_v54 = vpop.f32.mrf.mxu1 }
 0x39d   : > { %4109 = vst.msk [vmem:[%s5226_s19 + $0x35c] sm:$0xf] %vm3893_vm2, %v3868_v50  ;;  %v3749_v55 = vpack.c.bf16 %v3509_v51, %v3509_v51  ;;  %v3145_v56 = vmul.f32 %v6131_v63, %v2901_v52  ;;  %v2782_v57 = vmax.f32 %v1700_v53, %v2327_v54 }
 0x39f   : > { %3990 = vst.msk [vmem:[%s5226_s19 + $0x180] sm:$0xf] %vm3893_vm2, %v3749_v55  ;;  %v3389_v58 = vadd.f32 %v6139_v1, %v3145_v56  ;;  %v3026_v29 = vmul.f32 %v6131_v63, %v2782_v57 }
 0x3a1   : > { %v3629_v60 = vmax.f32 %v3389_v58, 0.0  ;;  %v3270_v32 = vadd.f32 %v6139_v1, %v3026_v29  ;;  %v2000_v62 = vpop.f32.mrf.mxu2 }
 0x3a2   : > { %v2627_v59 = vpop.f32.mrf.mxu3 }
 0x3a3   : > { %v3869_v2 = vpack.c.bf16 %v3629_v60, %v3629_v60  ;;  %v3510_v3 = vmax.f32 %v3270_v32, 0.0  ;;  %v2902_v4 = vmax.f32 %v2000_v62, %v2627_v59  ;;  %v1703_v5 = vpop.f32.mrf.mxu0  ;;  %v4994_v62 = vld [vmem:[%s5153_s11 + $0x1d8] sm:$0xff] }
 0x3a4   : > { %v2330_v6 = vpop.f32.mrf.mxu1  ;;  %v5054_v59 = vld [vmem:[%s5153_s11 + $0x3b8] sm:$0xff] }
 0x3a5   : > { %4110 = vst.msk [vmem:[%s5226_s19 + $0x360] sm:$0xf] %vm3893_vm2, %v3869_v2  ;;  %v3750_v7 = vpack.c.bf16 %v3510_v3, %v3510_v3  ;;  %v3146_v8 = vmul.f32 %v6131_v63, %v2902_v4  ;;  %v2783_v9 = vmax.f32 %v1703_v5, %v2330_v6 }
 0x3a6   : > { %4742 = vmatmul.msk.bf16.gmra.mxu0 %vm1084_vm1, %v4992_v0  ;;  %4802 = vmatmul.msk.bf16.gmra.mxu2 %vm1084_vm1, %v5052_v33 }
 0x3a7   : > { %3991 = vst.msk [vmem:[%s5226_s19 + $0x184] sm:$0xf] %vm3893_vm2, %v3750_v7  ;;  %v3390_v10 = vadd.f32 %v6139_v1, %v3146_v8  ;;  %v3027_v11 = vmul.f32 %v6131_v63, %v2783_v9  ;;  %4870 = vmatmul.msk.bf16.gmra.mxu1 %vm1084_vm1, %v4992_v0  ;;  %4930 = vmatmul.msk.bf16.gmra.mxu3 %vm1084_vm1, %v5052_v33 }
 0x3a9   : > { %v3630_v12 = vmax.f32 %v3390_v10, 0.0  ;;  %v3271_v13 = vadd.f32 %v6139_v1, %v3027_v11  ;;  %v2003_v14 = vpop.f32.mrf.mxu2 }
 0x3aa   : > { %v2630_v15 = vpop.f32.mrf.mxu3 }
 0x3ab   : > { %v3870_v16 = vpack.c.bf16 %v3630_v12, %v3630_v12  ;;  %v3511_v17 = vmax.f32 %v3271_v13, 0.0  ;;  %v2903_v18 = vmax.f32 %v2003_v14, %v2630_v15  ;;  %v1705_v19 = vpop.f32.mrf.mxu0 }
 0x3ac   : > { %v2332_v20 = vpop.f32.mrf.mxu1 }
 0x3ad   : > { %4111 = vst.msk [vmem:[%s5226_s19 + $0x364] sm:$0xf] %vm3893_vm2, %v3870_v16  ;;  %v3751_v21 = vpack.c.bf16 %v3511_v17, %v3511_v17  ;;  %v3147_v22 = vmul.f32 %v6131_v63, %v2903_v18  ;;  %v2784_v23 = vmax.f32 %v1705_v19, %v2332_v20 }
 0x3af   : > { %3992 = vst.msk [vmem:[%s5226_s19 + $0x188] sm:$0xf] %vm3893_vm2, %v3751_v21  ;;  %v3391_v24 = vadd.f32 %v6139_v1, %v3147_v22  ;;  %v3028_v25 = vmul.f32 %v6131_v63, %v2784_v23 }
 0x3b1   : > { %v3631_v26 = vmax.f32 %v3391_v24, 0.0  ;;  %v3272_v27 = vadd.f32 %v6139_v1, %v3028_v25  ;;  %v2005_v28 = vpop.f32.mrf.mxu2 }
 0x3b2   : > { %v2632_v30 = vpop.f32.mrf.mxu3 }
 0x3b3   : > { %v3871_v34 = vpack.c.bf16 %v3631_v26, %v3631_v26  ;;  %v3512_v35 = vmax.f32 %v3272_v27, 0.0  ;;  %v2904_v36 = vmax.f32 %v2005_v28, %v2632_v30  ;;  %v1708_v37 = vpop.f32.mrf.mxu0 }
 0x3b4   : > { %v2335_v38 = vpop.f32.mrf.mxu1 }
 0x3b5   : > { %4112 = vst.msk [vmem:[%s5226_s19 + $0x368] sm:$0xf] %vm3893_vm2, %v3871_v34  ;;  %v3752_v39 = vpack.c.bf16 %v3512_v35, %v3512_v35  ;;  %v3148_v40 = vmul.f32 %v6131_v63, %v2904_v36  ;;  %v2785_v41 = vmax.f32 %v1708_v37, %v2335_v38 }
 0x3b6   : > { %4743 = vmatmul.msk.bf16.gmra.mxu0 %vm1084_vm1, %v4993_v61  ;;  %4803 = vmatmul.msk.bf16.gmra.mxu2 %vm1084_vm1, %v5053_v31 }
 0x3b7   : > { %3993 = vst.msk [vmem:[%s5226_s19 + $0x18c] sm:$0xf] %vm3893_vm2, %v3752_v39  ;;  %v3392_v42 = vadd.f32 %v6139_v1, %v3148_v40  ;;  %v3029_v43 = vmul.f32 %v6131_v63, %v2785_v41  ;;  %4871 = vmatmul.msk.bf16.gmra.mxu1 %vm1084_vm1, %v4993_v61  ;;  %4931 = vmatmul.msk.bf16.gmra.mxu3 %vm1084_vm1, %v5053_v31 }
 0x3b9   : > { %v3632_v44 = vmax.f32 %v3392_v42, 0.0  ;;  %v3273_v45 = vadd.f32 %v6139_v1, %v3029_v43  ;;  %v2008_v46 = vpop.f32.mrf.mxu2 }
 0x3ba   : > { %v2635_v47 = vpop.f32.mrf.mxu3 }
 0x3bb   : > { %v3872_v48 = vpack.c.bf16 %v3632_v44, %v3632_v44  ;;  %v3513_v49 = vmax.f32 %v3273_v45, 0.0  ;;  %v2905_v50 = vmax.f32 %v2008_v46, %v2635_v47  ;;  %v1710_v51 = vpop.f32.mrf.mxu0 }
 0x3bc   : > { %v2337_v52 = vpop.f32.mrf.mxu1 }
 0x3bd   : > { %4113 = vst.msk [vmem:[%s5226_s19 + $0x36c] sm:$0xf] %vm3893_vm2, %v3872_v48  ;;  %v3753_v53 = vpack.c.bf16 %v3513_v49, %v3513_v49  ;;  %v3149_v54 = vmul.f32 %v6131_v63, %v2905_v50  ;;  %v2786_v55 = vmax.f32 %v1710_v51, %v2337_v52 }
 0x3bf   : > { %3994 = vst.msk [vmem:[%s5226_s19 + $0x190] sm:$0xf] %vm3893_vm2, %v3753_v53  ;;  %v3393_v56 = vadd.f32 %v6139_v1, %v3149_v54  ;;  %v3030_v57 = vmul.f32 %v6131_v63, %v2786_v55 }
 0x3c1   : > { %v3633_v58 = vmax.f32 %v3393_v56, 0.0  ;;  %v3274_v29 = vadd.f32 %v6139_v1, %v3030_v57  ;;  %v2010_v60 = vpop.f32.mrf.mxu2 }
 0x3c2   : > { %v2637_v32 = vpop.f32.mrf.mxu3 }
 0x3c3   : > { %v3873_v0 = vpack.c.bf16 %v3633_v58, %v3633_v58  ;;  %v3514_v33 = vmax.f32 %v3274_v29, 0.0  ;;  %v2906_v2 = vmax.f32 %v2010_v60, %v2637_v32  ;;  %v1713_v3 = vpop.f32.mrf.mxu0 }
 0x3c4   : > { %v2340_v4 = vpop.f32.mrf.mxu1 }
 0x3c5   : > { %4114 = vst.msk [vmem:[%s5226_s19 + $0x370] sm:$0xf] %vm3893_vm2, %v3873_v0  ;;  %v3754_v5 = vpack.c.bf16 %v3514_v33, %v3514_v33  ;;  %v3150_v6 = vmul.f32 %v6131_v63, %v2906_v2  ;;  %v2787_v7 = vmax.f32 %v1713_v3, %v2340_v4 }
 0x3c6   : > { %4744 = vmatmul.msk.bf16.gmra.mxu0 %vm1084_vm1, %v4994_v62  ;;  %4804 = vmatmul.msk.bf16.gmra.mxu2 %vm1084_vm1, %v5054_v59 }
 0x3c7   : > { %3995 = vst.msk [vmem:[%s5226_s19 + $0x194] sm:$0xf] %vm3893_vm2, %v3754_v5  ;;  %v3394_v8 = vadd.f32 %v6139_v1, %v3150_v6  ;;  %v3031_v9 = vmul.f32 %v6131_v63, %v2787_v7  ;;  %4872 = vmatmul.msk.bf16.gmra.mxu1 %vm1084_vm1, %v4994_v62  ;;  %4932 = vmatmul.msk.bf16.gmra.mxu3 %vm1084_vm1, %v5054_v59 }
 0x3c9   : > { %v3634_v10 = vmax.f32 %v3394_v8, 0.0  ;;  %v3275_v11 = vadd.f32 %v6139_v1, %v3031_v9  ;;  %v2013_v12 = vpop.f32.mrf.mxu2 }
 0x3ca   : > { %v2640_v13 = vpop.f32.mrf.mxu3 }
 0x3cb   : > { %v3874_v14 = vpack.c.bf16 %v3634_v10, %v3634_v10  ;;  %v3515_v15 = vmax.f32 %v3275_v11, 0.0  ;;  %v2907_v16 = vmax.f32 %v2013_v12, %v2640_v13  ;;  %v1715_v17 = vpop.f32.mrf.mxu0 }
 0x3cc   : > { %v2342_v18 = vpop.f32.mrf.mxu1 }
 0x3cd   : > { %4115 = vst.msk [vmem:[%s5226_s19 + $0x374] sm:$0xf] %vm3893_vm2, %v3874_v14  ;;  %v3755_v19 = vpack.c.bf16 %v3515_v15, %v3515_v15  ;;  %v3151_v20 = vmul.f32 %v6131_v63, %v2907_v16  ;;  %v2788_v21 = vmax.f32 %v1715_v17, %v2342_v18 }
 0x3cf   : > { %3996 = vst.msk [vmem:[%s5226_s19 + $0x198] sm:$0xf] %vm3893_vm2, %v3755_v19  ;;  %v3395_v22 = vadd.f32 %v6139_v1, %v3151_v20  ;;  %v3032_v23 = vmul.f32 %v6131_v63, %v2788_v21 }
 0x3d1   : > { %v3635_v24 = vmax.f32 %v3395_v22, 0.0  ;;  %v3276_v25 = vadd.f32 %v6139_v1, %v3032_v23  ;;  %v2015_v26 = vpop.f32.mrf.mxu2 }
 0x3d2   : > { %v2642_v27 = vpop.f32.mrf.mxu3 }
 0x3d3   : > { %v3875_v28 = vpack.c.bf16 %v3635_v24, %v3635_v24  ;;  %v3516_v30 = vmax.f32 %v3276_v25, 0.0  ;;  %v2908_v61 = vmax.f32 %v2015_v26, %v2642_v27  ;;  %v1718_v31 = vpop.f32.mrf.mxu0 }
 0x3d4   : > { %v2345_v34 = vpop.f32.mrf.mxu1 }
 0x3d5   : > { %4116 = vst.msk [vmem:[%s5226_s19 + $0x378] sm:$0xf] %vm3893_vm2, %v3875_v28  ;;  %v3756_v35 = vpack.c.bf16 %v3516_v30, %v3516_v30  ;;  %v3152_v36 = vmul.f32 %v6131_v63, %v2908_v61  ;;  %v2789_v37 = vmax.f32 %v1718_v31, %v2345_v34 }
 0x3d7   : > { %3997 = vst.msk [vmem:[%s5226_s19 + $0x19c] sm:$0xf] %vm3893_vm2, %v3756_v35  ;;  %v3396_v38 = vadd.f32 %v6139_v1, %v3152_v36  ;;  %v3033_v39 = vmul.f32 %v6131_v63, %v2789_v37 }
 0x3d9   : > { %v3636_v40 = vmax.f32 %v3396_v38, 0.0  ;;  %v3277_v41 = vadd.f32 %v6139_v1, %v3033_v39  ;;  %v2018_v42 = vpop.f32.mrf.mxu2 }
 0x3da   : > { %v2645_v43 = vpop.f32.mrf.mxu3 }
 0x3db   : > { %v3876_v44 = vpack.c.bf16 %v3636_v40, %v3636_v40  ;;  %v3517_v45 = vmax.f32 %v3277_v41, 0.0  ;;  %v2909_v46 = vmax.f32 %v2018_v42, %v2645_v43  ;;  %v1720_v47 = vpop.f32.mrf.mxu0 }
 0x3dc   : > { %v2347_v48 = vpop.f32.mrf.mxu1 }
 0x3dd   : > { %4117 = vst.msk [vmem:[%s5226_s19 + $0x37c] sm:$0xf] %vm3893_vm2, %v3876_v44  ;;  %v3757_v49 = vpack.c.bf16 %v3517_v45, %v3517_v45  ;;  %v3153_v50 = vmul.f32 %v6131_v63, %v2909_v46  ;;  %v2790_v51 = vmax.f32 %v1720_v47, %v2347_v48  ;;  %v6431_v44 = vld [vmem:[%s6538_s3] ss:$0 sm:$0xff] }
 0x3df   : > { %3998 = vst.msk [vmem:[%s5226_s19 + $0x1a0] sm:$0xf] %vm3893_vm2, %v3757_v49  ;;  %v3397_v52 = vadd.f32 %v6139_v1, %v3153_v50  ;;  %v3034_v53 = vmul.f32 %v6131_v63, %v2790_v51 }
 0x3e1   : > { %v3637_v54 = vmax.f32 %v3397_v52, 0.0  ;;  %v3278_v55 = vadd.f32 %v6139_v1, %v3034_v53  ;;  %v2020_v56 = vpop.f32.mrf.mxu2 }
 0x3e2   : > { %v2647_v57 = vpop.f32.mrf.mxu3 }
 0x3e3   : > { %v3877_v58 = vpack.c.bf16 %v3637_v54, %v3637_v54  ;;  %v3518_v29 = vmax.f32 %v3278_v55, 0.0  ;;  %v2910_v60 = vmax.f32 %v2020_v56, %v2647_v57  ;;  %v1723_v32 = vpop.f32.mrf.mxu0 }
 0x3e4   : > { %v2350_v62 = vpop.f32.mrf.mxu1 }
 0x3e5   : > { %4118 = vst.msk [vmem:[%s5226_s19 + $0x380] sm:$0xf] %vm3893_vm2, %v3877_v58  ;;  %v3758_v59 = vpack.c.bf16 %v3518_v29, %v3518_v29  ;;  %v3154_v0 = vmul.f32 %v6131_v63, %v2910_v60  ;;  %v2791_v33 = vmax.f32 %v1723_v32, %v2350_v62 }
 0x3e7   : > { %3999 = vst.msk [vmem:[%s5226_s19 + $0x1a4] sm:$0xf] %vm3893_vm2, %v3758_v59  ;;  %v3398_v2 = vadd.f32 %v6139_v1, %v3154_v0  ;;  %v3035_v3 = vmul.f32 %v6131_v63, %v2791_v33 }
 0x3e9   : > { %v3638_v4 = vmax.f32 %v3398_v2, 0.0  ;;  %v3279_v5 = vadd.f32 %v6139_v1, %v3035_v3  ;;  %v2023_v6 = vpop.f32.mrf.mxu2 }
 0x3ea   : > { %v2650_v7 = vpop.f32.mrf.mxu3 }
 0x3eb   : > { %v3878_v8 = vpack.c.bf16 %v3638_v4, %v3638_v4  ;;  %v3519_v9 = vmax.f32 %v3279_v5, 0.0  ;;  %v2911_v10 = vmax.f32 %v2023_v6, %v2650_v7  ;;  %v1725_v11 = vpop.f32.mrf.mxu0 }
 0x3ec   : > { %v2352_v12 = vpop.f32.mrf.mxu1 }
 0x3ed   : > { %4119 = vst.msk [vmem:[%s5226_s19 + $0x384] sm:$0xf] %vm3893_vm2, %v3878_v8  ;;  %v3759_v13 = vpack.c.bf16 %v3519_v9, %v3519_v9  ;;  %v3155_v14 = vmul.f32 %v6131_v63, %v2911_v10  ;;  %v2792_v15 = vmax.f32 %v1725_v11, %v2352_v12 }
 0x3ef   : > { %4000 = vst.msk [vmem:[%s5226_s19 + $0x1a8] sm:$0xf] %vm3893_vm2, %v3759_v13  ;;  %v3399_v16 = vadd.f32 %v6139_v1, %v3155_v14  ;;  %v3036_v17 = vmul.f32 %v6131_v63, %v2792_v15 }
 0x3f1   : > { %v3639_v18 = vmax.f32 %v3399_v16, 0.0  ;;  %v3280_v19 = vadd.f32 %v6139_v1, %v3036_v17  ;;  %v2025_v20 = vpop.f32.mrf.mxu2 }
 0x3f2   : > { %v2652_v21 = vpop.f32.mrf.mxu3 }
 0x3f3   : > { %v3879_v22 = vpack.c.bf16 %v3639_v18, %v3639_v18  ;;  %v3520_v23 = vmax.f32 %v3280_v19, 0.0  ;;  %v2912_v24 = vmax.f32 %v2025_v20, %v2652_v21  ;;  %v1728_v25 = vpop.f32.mrf.mxu0 }
 0x3f4   : > { %v2355_v26 = vpop.f32.mrf.mxu1 }
 0x3f5   : > { %4120 = vst.msk [vmem:[%s5226_s19 + $0x388] sm:$0xf] %vm3893_vm2, %v3879_v22  ;;  %v3760_v27 = vpack.c.bf16 %v3520_v23, %v3520_v23  ;;  %v3156_v28 = vmul.f32 %v6131_v63, %v2912_v24  ;;  %v2793_v30 = vmax.f32 %v1728_v25, %v2355_v26 }
 0x3f7   : > { %4001 = vst.msk [vmem:[%s5226_s19 + $0x1ac] sm:$0xf] %vm3893_vm2, %v3760_v27  ;;  %v3400_v61 = vadd.f32 %v6139_v1, %v3156_v28  ;;  %v3037_v31 = vmul.f32 %v6131_v63, %v2793_v30 }
 0x3f9   : > { %v3640_v34 = vmax.f32 %v3400_v61, 0.0  ;;  %v3281_v35 = vadd.f32 %v6139_v1, %v3037_v31  ;;  %v2028_v36 = vpop.f32.mrf.mxu2  ;;  %v6439_v1 = vld [vmem:[%s6539_s4] ss:$0 sm:$0xff] }
 0x3fa   : > { %v2655_v37 = vpop.f32.mrf.mxu3 }
 0x3fb   : > { %v3880_v38 = vpack.c.bf16 %v3640_v34, %v3640_v34  ;;  %v3521_v39 = vmax.f32 %v3281_v35, 0.0  ;;  %v2913_v40 = vmax.f32 %v2028_v36, %v2655_v37  ;;  %v1730_v41 = vpop.f32.mrf.mxu0 }
 0x3fc   : > { %v2357_v42 = vpop.f32.mrf.mxu1 }
 0x3fd   : > { %4121 = vst.msk [vmem:[%s5226_s19 + $0x38c] sm:$0xf] %vm3893_vm2, %v3880_v38  ;;  %v3761_v43 = vpack.c.bf16 %v3521_v39, %v3521_v39  ;;  %v3157_v63 = vmul.f32 %v6431_v44, %v2913_v40  ;;  %v2794_v45 = vmax.f32 %v1730_v41, %v2357_v42 }
 0x3ff   : > { %4002 = vst.msk [vmem:[%s5226_s19 + $0x1b0] sm:$0xf] %vm3893_vm2, %v3761_v43  ;;  %v3401_v46 = vadd.f32 %v6439_v1, %v3157_v63  ;;  %v3038_v47 = vmul.f32 %v6431_v44, %v2794_v45 }
 0x401   : > { %v3641_v48 = vmax.f32 %v3401_v46, 0.0  ;;  %v3282_v49 = vadd.f32 %v6439_v1, %v3038_v47  ;;  %v2030_v50 = vpop.f32.mrf.mxu2 }
 0x402   : > { %v2657_v51 = vpop.f32.mrf.mxu3 }
 0x403   : > { %v3881_v52 = vpack.c.bf16 %v3641_v48, %v3641_v48  ;;  %v3522_v53 = vmax.f32 %v3282_v49, 0.0  ;;  %v2914_v54 = vmax.f32 %v2030_v50, %v2657_v51  ;;  %v1733_v55 = vpop.f32.mrf.mxu0 }
 0x404   : > { %v2360_v56 = vpop.f32.mrf.mxu1 }
 0x405   : > { %4122 = vst.msk [vmem:[%s5226_s19 + $0x390] sm:$0xf] %vm3893_vm2, %v3881_v52  ;;  %v3762_v57 = vpack.c.bf16 %v3522_v53, %v3522_v53  ;;  %v3158_v58 = vmul.f32 %v6431_v44, %v2914_v54  ;;  %v2795_v29 = vmax.f32 %v1733_v55, %v2360_v56 }
 0x407   : > { %4003 = vst.msk [vmem:[%s5226_s19 + $0x1b4] sm:$0xf] %vm3893_vm2, %v3762_v57  ;;  %v3402_v60 = vadd.f32 %v6439_v1, %v3158_v58  ;;  %v3039_v32 = vmul.f32 %v6431_v44, %v2795_v29 }
 0x409   : > { %v3642_v62 = vmax.f32 %v3402_v60, 0.0  ;;  %v3283_v59 = vadd.f32 %v6439_v1, %v3039_v32  ;;  %v2033_v0 = vpop.f32.mrf.mxu2 }
 0x40a   : > { %v2660_v33 = vpop.f32.mrf.mxu3 }
 0x40b   : > { %v3882_v2 = vpack.c.bf16 %v3642_v62, %v3642_v62  ;;  %v3523_v3 = vmax.f32 %v3283_v59, 0.0  ;;  %v2915_v4 = vmax.f32 %v2033_v0, %v2660_v33  ;;  %v1735_v5 = vpop.f32.mrf.mxu0 }
 0x40c   : > { %v2362_v6 = vpop.f32.mrf.mxu1 }
 0x40d   : > { %4123 = vst.msk [vmem:[%s5226_s19 + $0x394] sm:$0xf] %vm3893_vm2, %v3882_v2  ;;  %v3763_v7 = vpack.c.bf16 %v3523_v3, %v3523_v3  ;;  %v3159_v8 = vmul.f32 %v6431_v44, %v2915_v4  ;;  %v2796_v9 = vmax.f32 %v1735_v5, %v2362_v6 }
 0x40f   : > { %4004 = vst.msk [vmem:[%s5226_s19 + $0x1b8] sm:$0xf] %vm3893_vm2, %v3763_v7  ;;  %v3403_v10 = vadd.f32 %v6439_v1, %v3159_v8  ;;  %v3040_v11 = vmul.f32 %v6431_v44, %v2796_v9 }
 0x411   : > { %v3643_v12 = vmax.f32 %v3403_v10, 0.0  ;;  %v3284_v13 = vadd.f32 %v6439_v1, %v3040_v11  ;;  %v2035_v14 = vpop.f32.mrf.mxu2 }
 0x412   : > { %v2662_v15 = vpop.f32.mrf.mxu3 }
 0x413   : > { %v3883_v16 = vpack.c.bf16 %v3643_v12, %v3643_v12  ;;  %v3524_v17 = vmax.f32 %v3284_v13, 0.0  ;;  %v2916_v18 = vmax.f32 %v2035_v14, %v2662_v15  ;;  %v1738_v19 = vpop.f32.mrf.mxu0 }
 0x414   : > { %v2365_v20 = vpop.f32.mrf.mxu1 }
 0x415   : > { %4124 = vst.msk [vmem:[%s5226_s19 + $0x398] sm:$0xf] %vm3893_vm2, %v3883_v16  ;;  %v3764_v21 = vpack.c.bf16 %v3524_v17, %v3524_v17  ;;  %v3160_v22 = vmul.f32 %v6431_v44, %v2916_v18  ;;  %v2797_v23 = vmax.f32 %v1738_v19, %v2365_v20 }
 0x417   : > { %4005 = vst.msk [vmem:[%s5226_s19 + $0x1bc] sm:$0xf] %vm3893_vm2, %v3764_v21  ;;  %v3404_v24 = vadd.f32 %v6439_v1, %v3160_v22  ;;  %v3041_v25 = vmul.f32 %v6431_v44, %v2797_v23 }
 0x419   : > { %v3644_v26 = vmax.f32 %v3404_v24, 0.0  ;;  %v3285_v27 = vadd.f32 %v6439_v1, %v3041_v25  ;;  %v2038_v28 = vpop.f32.mrf.mxu2 }
 0x41a   : > { %v2665_v30 = vpop.f32.mrf.mxu3 }
 0x41b   : > { %v3884_v61 = vpack.c.bf16 %v3644_v26, %v3644_v26  ;;  %v3525_v31 = vmax.f32 %v3285_v27, 0.0  ;;  %v2917_v34 = vmax.f32 %v2038_v28, %v2665_v30  ;;  %v1740_v35 = vpop.f32.mrf.mxu0 }
 0x41c   : > { %v2367_v36 = vpop.f32.mrf.mxu1 }
 0x41d   : > { %4125 = vst.msk [vmem:[%s5226_s19 + $0x39c] sm:$0xf] %vm3893_vm2, %v3884_v61  ;;  %v3765_v37 = vpack.c.bf16 %v3525_v31, %v3525_v31  ;;  %v3161_v38 = vmul.f32 %v6431_v44, %v2917_v34  ;;  %v2798_v39 = vmax.f32 %v1740_v35, %v2367_v36 }
 0x41f   : > { %4006 = vst.msk [vmem:[%s5226_s19 + $0x1c0] sm:$0xf] %vm3893_vm2, %v3765_v37  ;;  %v3405_v40 = vadd.f32 %v6439_v1, %v3161_v38  ;;  %v3042_v41 = vmul.f32 %v6431_v44, %v2798_v39 }
 0x421   : > { %v3645_v42 = vmax.f32 %v3405_v40, 0.0  ;;  %v3286_v43 = vadd.f32 %v6439_v1, %v3042_v41  ;;  %v2040_v63 = vpop.f32.mrf.mxu2 }
 0x422   : > { %v2667_v45 = vpop.f32.mrf.mxu3 }
 0x423   : > { %v3885_v46 = vpack.c.bf16 %v3645_v42, %v3645_v42  ;;  %v3526_v47 = vmax.f32 %v3286_v43, 0.0  ;;  %v2918_v48 = vmax.f32 %v2040_v63, %v2667_v45  ;;  %v1743_v49 = vpop.f32.mrf.mxu0 }
 0x424   : > { %v2370_v50 = vpop.f32.mrf.mxu1 }
 0x425   : > { %4126 = vst.msk [vmem:[%s5226_s19 + $0x3a0] sm:$0xf] %vm3893_vm2, %v3885_v46  ;;  %v3766_v51 = vpack.c.bf16 %v3526_v47, %v3526_v47  ;;  %v3162_v52 = vmul.f32 %v6431_v44, %v2918_v48  ;;  %v2799_v53 = vmax.f32 %v1743_v49, %v2370_v50 }
 0x427   : > { %4007 = vst.msk [vmem:[%s5226_s19 + $0x1c4] sm:$0xf] %vm3893_vm2, %v3766_v51  ;;  %v3406_v54 = vadd.f32 %v6439_v1, %v3162_v52  ;;  %v3043_v55 = vmul.f32 %v6431_v44, %v2799_v53 }
 0x429   : > { %v3646_v56 = vmax.f32 %v3406_v54, 0.0  ;;  %v3287_v57 = vadd.f32 %v6439_v1, %v3043_v55  ;;  %v2043_v58 = vpop.f32.mrf.mxu2 }
 0x42a   : > { %v2670_v29 = vpop.f32.mrf.mxu3 }
 0x42b   : > { %v3886_v60 = vpack.c.bf16 %v3646_v56, %v3646_v56  ;;  %v3527_v32 = vmax.f32 %v3287_v57, 0.0  ;;  %v2919_v62 = vmax.f32 %v2043_v58, %v2670_v29  ;;  %v1745_v59 = vpop.f32.mrf.mxu0 }
 0x42c   : > { %v2372_v0 = vpop.f32.mrf.mxu1 }
 0x42d   : > { %4127 = vst.msk [vmem:[%s5226_s19 + $0x3a4] sm:$0xf] %vm3893_vm2, %v3886_v60  ;;  %v3767_v33 = vpack.c.bf16 %v3527_v32, %v3527_v32  ;;  %v3163_v2 = vmul.f32 %v6431_v44, %v2919_v62  ;;  %v2800_v3 = vmax.f32 %v1745_v59, %v2372_v0 }
 0x42f   : > { %4008 = vst.msk [vmem:[%s5226_s19 + $0x1c8] sm:$0xf] %vm3893_vm2, %v3767_v33  ;;  %v3407_v4 = vadd.f32 %v6439_v1, %v3163_v2  ;;  %v3044_v5 = vmul.f32 %v6431_v44, %v2800_v3 }
 0x431   : > { %v3647_v6 = vmax.f32 %v3407_v4, 0.0  ;;  %v3288_v7 = vadd.f32 %v6439_v1, %v3044_v5  ;;  %v2045_v8 = vpop.f32.mrf.mxu2 }
 0x432   : > { %v2672_v9 = vpop.f32.mrf.mxu3 }
 0x433   : > { %v3887_v10 = vpack.c.bf16 %v3647_v6, %v3647_v6  ;;  %v3528_v11 = vmax.f32 %v3288_v7, 0.0  ;;  %v2920_v12 = vmax.f32 %v2045_v8, %v2672_v9  ;;  %v1748_v13 = vpop.f32.mrf.mxu0 }
 0x434   : > { %v2375_v14 = vpop.f32.mrf.mxu1 }
 0x435   : > { %4128 = vst.msk [vmem:[%s5226_s19 + $0x3a8] sm:$0xf] %vm3893_vm2, %v3887_v10  ;;  %v3768_v15 = vpack.c.bf16 %v3528_v11, %v3528_v11  ;;  %v3164_v16 = vmul.f32 %v6431_v44, %v2920_v12  ;;  %v2801_v17 = vmax.f32 %v1748_v13, %v2375_v14 }
 0x437   : > { %4009 = vst.msk [vmem:[%s5226_s19 + $0x1cc] sm:$0xf] %vm3893_vm2, %v3768_v15  ;;  %v3408_v18 = vadd.f32 %v6439_v1, %v3164_v16  ;;  %v3045_v19 = vmul.f32 %v6431_v44, %v2801_v17 }
 0x439   : > { %v3648_v20 = vmax.f32 %v3408_v18, 0.0  ;;  %v3289_v21 = vadd.f32 %v6439_v1, %v3045_v19  ;;  %v2048_v22 = vpop.f32.mrf.mxu2 }
 0x43a   : > { %v2675_v23 = vpop.f32.mrf.mxu3 }
 0x43b   : > { %v3888_v24 = vpack.c.bf16 %v3648_v20, %v3648_v20  ;;  %v3529_v25 = vmax.f32 %v3289_v21, 0.0  ;;  %v2921_v26 = vmax.f32 %v2048_v22, %v2675_v23  ;;  %v1750_v27 = vpop.f32.mrf.mxu0 }
 0x43c   : > { %v2377_v28 = vpop.f32.mrf.mxu1 }
 0x43d   : > { %4129 = vst.msk [vmem:[%s5226_s19 + $0x3ac] sm:$0xf] %vm3893_vm2, %v3888_v24  ;;  %v3769_v30 = vpack.c.bf16 %v3529_v25, %v3529_v25  ;;  %v3165_v61 = vmul.f32 %v6431_v44, %v2921_v26  ;;  %v2802_v31 = vmax.f32 %v1750_v27, %v2377_v28 }
 0x43f   : > { %4010 = vst.msk [vmem:[%s5226_s19 + $0x1d0] sm:$0xf] %vm3893_vm2, %v3769_v30  ;;  %v3409_v34 = vadd.f32 %v6439_v1, %v3165_v61  ;;  %v3046_v35 = vmul.f32 %v6431_v44, %v2802_v31 }
 0x441   : > { %v3649_v36 = vmax.f32 %v3409_v34, 0.0  ;;  %v3290_v37 = vadd.f32 %v6439_v1, %v3046_v35  ;;  %v2050_v38 = vpop.f32.mrf.mxu2 }
 0x442   : > { %v2677_v39 = vpop.f32.mrf.mxu3 }
 0x443   : > { %v3889_v40 = vpack.c.bf16 %v3649_v36, %v3649_v36  ;;  %v3530_v41 = vmax.f32 %v3290_v37, 0.0  ;;  %v2922_v42 = vmax.f32 %v2050_v38, %v2677_v39  ;;  %v1753_v43 = vpop.f32.mrf.mxu0 }
 0x444   : > { %v2380_v63 = vpop.f32.mrf.mxu1 }
 0x445   : > { %4130 = vst.msk [vmem:[%s5226_s19 + $0x3b0] sm:$0xf] %vm3893_vm2, %v3889_v40  ;;  %v3770_v45 = vpack.c.bf16 %v3530_v41, %v3530_v41  ;;  %v3166_v46 = vmul.f32 %v6431_v44, %v2922_v42  ;;  %v2803_v47 = vmax.f32 %v1753_v43, %v2380_v63 }
 0x447   : > { %4011 = vst.msk [vmem:[%s5226_s19 + $0x1d4] sm:$0xf] %vm3893_vm2, %v3770_v45  ;;  %v3410_v48 = vadd.f32 %v6439_v1, %v3166_v46  ;;  %v3047_v49 = vmul.f32 %v6431_v44, %v2803_v47 }
 0x449   : > { %v3650_v50 = vmax.f32 %v3410_v48, 0.0  ;;  %v3291_v51 = vadd.f32 %v6439_v1, %v3047_v49  ;;  %v2053_v52 = vpop.f32.mrf.mxu2 }
 0x44a   : > { %v2680_v53 = vpop.f32.mrf.mxu3 }
 0x44b   : > { %v3890_v54 = vpack.c.bf16 %v3650_v50, %v3650_v50  ;;  %v3531_v55 = vmax.f32 %v3291_v51, 0.0  ;;  %v2923_v56 = vmax.f32 %v2053_v52, %v2680_v53  ;;  %v1755_v57 = vpop.f32.mrf.mxu0 }
 0x44c   : > { %v2382_v58 = vpop.f32.mrf.mxu1 }
 0x44d   : > { %4131 = vst.msk [vmem:[%s5226_s19 + $0x3b4] sm:$0xf] %vm3893_vm2, %v3890_v54  ;;  %v3771_v29 = vpack.c.bf16 %v3531_v55, %v3531_v55  ;;  %v3167_v60 = vmul.f32 %v6431_v44, %v2923_v56  ;;  %v2804_v32 = vmax.f32 %v1755_v57, %v2382_v58 }
 0x44f   : > { %4012 = vst.msk [vmem:[%s5226_s19 + $0x1d8] sm:$0xf] %vm3893_vm2, %v3771_v29  ;;  %v3411_v62 = vadd.f32 %v6439_v1, %v3167_v60  ;;  %v3048_v59 = vmul.f32 %v6431_v44, %v2804_v32 }
 0x451   : > { %v3651_v0 = vmax.f32 %v3411_v62, 0.0  ;;  %v3292_v33 = vadd.f32 %v6439_v1, %v3048_v59  ;;  %v2055_v2 = vpop.f32.mrf.mxu2 }
 0x452   : > { %v2682_v3 = vpop.f32.mrf.mxu3 }
 0x453   : > { %v3891_v4 = vpack.c.bf16 %v3651_v0, %v3651_v0  ;;  %v3532_v5 = vmax.f32 %v3292_v33, 0.0  ;;  %v2924_v6 = vmax.f32 %v2055_v2, %v2682_v3 }
 0x455   : > { %4132 = vst.msk [vmem:[%s5226_s19 + $0x3b8] sm:$0xf] %vm3893_vm2, %v3891_v4  ;;  %v3772_v7 = vpack.c.bf16 %v3532_v5, %v3532_v5  ;;  %v3168_v8 = vmul.f32 %v6431_v44, %v2924_v6 }
 0x457   : > { %4013 = vst.msk [vmem:[%s5226_s19 + $0x1dc] sm:$0xf] %vm3893_vm2, %v3772_v7  ;;  %v3412_v9 = vadd.f32 %v6439_v1, %v3168_v8 }
 0x459   : > { %v3652_v10 = vmax.f32 %v3412_v9, 0.0 }
 0x45b   : > { %v3892_v11 = vpack.c.bf16 %v3652_v10, %v3652_v10 }
 0x45d   : > { %4133 = vst.msk [vmem:[%s5226_s19 + $0x3bc] sm:$0xf] %vm3893_vm2, %v3892_v11 }
 0x45e PF: > { %s15_s18 = sadd.s32 1, %s5087_s18  }
 0x45f   : > { %p12_p4 = scmp.ge.s32.totalorder %s15_s18, 7  }
 0x461   :  { %14 = sbr.rel (!%p12_p4) target bundleno = 1 (0x1), region = 70 }

// kernel: source_cnn_forward.4
= control target key start
LH: loop header
LB: loop body
LE: loop exit
PB: predicated region body
PF: predicated region fallthrough
CT: control target
= control target key end

     0   :  { %s5072_s18 = smov 0   ;;  %s7037_s0 = inlined_call_operand.vmem [shape: bf16[960,640], index: 0, kind: input, shape index: {}]   ;;  %s7038_s1 = inlined_call_operand.vmem [shape: bf16[640,64], index: 1, kind: input, shape index: {}]   ;;  %s7039_s2 = inlined_call_operand.vmem [shape: bf16[640,64], index: 2, kind: input, shape index: {}]   ;;  %s7040_s3 = inlined_call_operand.vmem [shape: f32[1,64], index: 3, kind: input, shape index: {}]   ;;  %s7041_s4 = inlined_call_operand.vmem [shape: f32[1,64], index: 4, kind: input, shape index: {}]   ;;  %s7042_s5 = inlined_call_operand.vmem [shape: bf16[960,64], index: 5, kind: output, shape index: {}]  }
   0x1 LB: > { %s3846_s19 = sadd.s32 4294967295, %s5040_s18   ;;  %p3850_p0 = scmp.ge.s32.totalorder %s5040_s18, 1  ;;  %s5040_s18 = sphi %s5072_s18, %s15_s18  }
   0x2   : > { %p189_p1 = scmp.lt.s32.totalorder %s5040_s18, 3 }
   0x4   : > { %p190_p2 = pnand %p3850_p0, %p189_p1 }
   0x6   : > { %193 = sbr.rel (%p190_p2) target bundleno = 1386 (0x56a), region = 40 }
   0xb   : > { %v4932_v0 = vld [vmem:[%s7038_s1 + $0x38] sm:$0xff]  ;;  %v4931_v2 = vld [vmem:[%s7038_s1 + $0x30] sm:$0xff]  ;;  %v4930_v4 = vld [vmem:[%s7038_s1 + $0x28] sm:$0xff]  ;;  %s218_s7 = smul.u32 60, %s3846_s19  ;;  %vm3729_vm0 = vcmask 519168  }
   0xc   : > { %v4940_v1 = vld [vmem:[%s7038_s1 + $0x78] sm:$0xff]  ;;  %5005 = vmatpush.bf16.msra.mxu2 %v4932_v0  ;;  %v4939_v3 = vld [vmem:[%s7038_s1 + $0x70] sm:$0xff]  ;;  %1511 = vmatpush.bf16.msra.mxu0 %v4932_v0  ;;  %v4938_v5 = vld [vmem:[%s7038_s1 + $0x68] sm:$0xff] }
   0xd   : > { %5013 = vmatpush.bf16.msra.mxu3 %v4940_v1  ;;  %1670 = vmatpush.bf16.msra.mxu1 %v4940_v1  ;;  %v4929_v6 = vld [vmem:[%s7038_s1 + $0x20] sm:$0xff]  ;;  %p219_p3 = scmp.lt.s32.totalorder %s218_s7, 119  ;;  %v4928_v8 = vld [vmem:[%s7038_s1 + $0x18] sm:$0xff]  ;;  %v4927_v10 = vld [vmem:[%s7038_s1 + $0x10] sm:$0xff] }
   0xe   : > { %v4937_v7 = vld [vmem:[%s7038_s1 + $0x60] sm:$0xff]  ;;  %v4936_v9 = vld [vmem:[%s7038_s1 + $0x58] sm:$0xff]  ;;  %v4935_v11 = vld [vmem:[%s7038_s1 + $0x50] sm:$0xff] }
   0xf   : > { %s7613_s7 = smov (!%p219_p3, %s218_s7), 119  ;;  %v4926_v12 = vld [vmem:[%s7038_s1 + $0x8] sm:$0xff]  ;;  %v4925_v14 = vld [vmem:[%s7038_s1] sm:$0xff]  ;;  %v4948_v24 = vld [vmem:[%s7038_s1 + $0xb8] sm:$0xff] }
  0x10   : > { %5006 = vmatpush.bf16.msra.mxu2 %v4931_v2  ;;  %1512 = vmatpush.bf16.msra.mxu0 %v4931_v2  ;;  %s5021_s21 = smul.u32 20, %s7613_s7  ;;  %v4934_v13 = vld [vmem:[%s7038_s1 + $0x48] sm:$0xff]  ;;  %v4933_v15 = vld [vmem:[%s7038_s1 + $0x40] sm:$0xff]  ;;  %v4956_v25 = vld [vmem:[%s7038_s1 + $0xf8] sm:$0xff]  ;;  %s3852_s8 = sshll.u32 %s7613_s7, 2 }
  0x11   : > { %5014 = vmatpush.bf16.msra.mxu3 %v4939_v3  ;;  %1671 = vmatpush.bf16.msra.mxu1 %v4939_v3  ;;  %v4964_v30 = vld [vmem:[%s7038_s1 + $0x138] sm:$0xff]  ;;  %v4947_v32 = vld [vmem:[%s7038_s1 + $0xb0] sm:$0xff]  ;;  %v4946_v48 = vld [vmem:[%s7038_s1 + $0xa8] sm:$0xff]  ;;  %s6587_s11 = scalar_lea.vmem %s7042_s5, %s3852_s8 }
  0x12   : > { %s5128_s28 = scalar_lea.vmem %s7037_s0, %s5021_s21  ;;  %v4972_v31 = vld [vmem:[%s7039_s2 + $0x38] sm:$0xff]  ;;  %v4955_v33 = vld [vmem:[%s7038_s1 + $0xf0] sm:$0xff]  ;;  %v4954_v49 = vld [vmem:[%s7038_s1 + $0xe8] sm:$0xff] }
  0x13   : > { %v4155_v16 = vld [vmem:[%s5128_s28 + $0x258] sm:$0xf]  ;;  %v4852_v17 = vld [vmem:[%s5128_s28 + $0x268] sm:$0xf0]  ;;  %v4850_v18 = vld [vmem:[%s5128_s28 + $0x25c] sm:$0xf] }
  0x14   : > { %5007 = vmatpush.bf16.msra.mxu2 %v4930_v4  ;;  %1513 = vmatpush.bf16.msra.mxu0 %v4930_v4  ;;  %v4157_v19 = vld [vmem:[%s5128_s28 + $0x26c] sm:$0xf0]  ;;  %v3855_v20 = vld [vmem:[%s5128_s28] sm:$0xf]  ;;  %v4777_v21 = vld [vmem:[%s5128_s28 + $0x10] sm:$0xf0]  ;;  %v5150_v26 = vor.u32 %v4852_v17, %v4155_v16 }
  0x15   : > { %5015 = vmatpush.bf16.msra.mxu3 %v4938_v5  ;;  %1672 = vmatpush.bf16.msra.mxu1 %v4938_v5  ;;  %v4775_v22 = vld [vmem:[%s5128_s28 + $0x4] sm:$0xf]  ;;  %v3857_v23 = vld [vmem:[%s5128_s28 + $0x14] sm:$0xf0]  ;;  %v5152_v27 = vor.u32 %v4850_v18, %v4157_v19  ;;  %v5154_v28 = vor.u32 %v4777_v21, %v3855_v20  ;;  %v4963_v34 = vld [vmem:[%s7038_s1 + $0x130] sm:$0xff] }
  0x16   : > { %v5156_v29 = vor.u32 %v4775_v22, %v3857_v23  ;;  %v4971_v35 = vld [vmem:[%s7039_s2 + $0x30] sm:$0xff]  ;;  %v4175_v36 = vld [vmem:[%s5128_s28 + $0x280] sm:$0xf]  ;;  %v4855_v38 = vld [vmem:[%s5128_s28 + $0x284] sm:$0xf] }
  0x17   : > { %7146 = vst [vmem:[#allocation2_spill] sm:$0xff] %v5152_v27  ;;  %v4857_v37 = vld [vmem:[%s5128_s28 + $0x290] sm:$0xf0]  ;;  %v4177_v39 = vld [vmem:[%s5128_s28 + $0x294] sm:$0xf0]  ;;  %v4962_v62 = vld [vmem:[%s7038_s1 + $0x128] sm:$0xff] }
  0x18   : > { %5008 = vmatpush.bf16.msra.mxu2 %v4929_v6  ;;  %1514 = vmatpush.bf16.msra.mxu0 %v4929_v6  ;;  %7147 = vst [vmem:[#allocation3_spill] sm:$0xff] %v5156_v29  ;;  %v3875_v40 = vld [vmem:[%s5128_s28 + $0x28] sm:$0xf]  ;;  %v4782_v41 = vld [vmem:[%s5128_s28 + $0x38] sm:$0xf0]  ;;  %v5188_v44 = vor.u32 %v4857_v37, %v4175_v36  ;;  %v5190_v45 = vor.u32 %v4855_v38, %v4177_v39 }
  0x19   : > { %5016 = vmatpush.bf16.msra.mxu3 %v4937_v7  ;;  %1673 = vmatpush.bf16.msra.mxu1 %v4937_v7  ;;  %v4780_v42 = vld [vmem:[%s5128_s28 + $0x2c] sm:$0xf]  ;;  %v3877_v43 = vld [vmem:[%s5128_s28 + $0x3c] sm:$0xf0]  ;;  %v5192_v46 = vor.u32 %v4782_v41, %v3875_v40  ;;  %v4195_v50 = vld [vmem:[%s5128_s28 + $0x2a8] sm:$0xf] }
  0x1a   : > { %7148 = vst [vmem:[#allocation4_spill] sm:$0xff] %v5190_v45  ;;  %v5194_v47 = vor.u32 %v4780_v42, %v3877_v43  ;;  %v4862_v51 = vld [vmem:[%s5128_s28 + $0x2b8] sm:$0xf0]  ;;  %v4860_v52 = vld [vmem:[%s5128_s28 + $0x2ac] sm:$0xf] }
  0x1b   : > { %v4197_v53 = vld [vmem:[%s5128_s28 + $0x2bc] sm:$0xf0]  ;;  %v3895_v54 = vld [vmem:[%s5128_s28 + $0x50] sm:$0xf]  ;;  %v4787_v55 = vld [vmem:[%s5128_s28 + $0x60] sm:$0xf0]  ;;  %v5214_v58 = vor.u32 %v4862_v51, %v4195_v50 }
  0x1c   : > { %5009 = vmatpush.bf16.msra.mxu2 %v4928_v8  ;;  %1515 = vmatpush.bf16.msra.mxu0 %v4928_v8  ;;  %7149 = vst [vmem:[#allocation5_spill] sm:$0xff] %v5194_v47  ;;  %v4785_v56 = vld [vmem:[%s5128_s28 + $0x54] sm:$0xf]  ;;  %v3897_v57 = vld [vmem:[%s5128_s28 + $0x64] sm:$0xf0]  ;;  %v5216_v59 = vor.u32 %v4860_v52, %v4197_v53  ;;  %v5218_v60 = vor.u32 %v4787_v55, %v3895_v54 }
  0x1d   : > { %5017 = vmatpush.bf16.msra.mxu3 %v4936_v9  ;;  %1674 = vmatpush.bf16.msra.mxu1 %v4936_v9  ;;  %v5220_v61 = vor.u32 %v4785_v56, %v3897_v57  ;;  %v4970_v63 = vld [vmem:[%s7039_s2 + $0x28] sm:$0xff]  ;;  %v4215_v0 = vld [vmem:[%s5128_s28 + $0x2d0] sm:$0xf]  ;;  %v4867_v1 = vld [vmem:[%s5128_s28 + $0x2e0] sm:$0xf0] }
  0x1e   : > { %7150 = vst [vmem:[#allocation6_spill] sm:$0xff] %v5216_v59  ;;  %v4865_v2 = vld [vmem:[%s5128_s28 + $0x2d4] sm:$0xf]  ;;  %v4217_v3 = vld [vmem:[%s5128_s28 + $0x2e4] sm:$0xf0]  ;;  %v5240_v8 = vor.u32 %v4867_v1, %v4215_v0 }
  0x1f   : > { %7151 = vst [vmem:[#allocation7_spill] sm:$0xff] %v5220_v61  ;;  %v3915_v4 = vld [vmem:[%s5128_s28 + $0x78] sm:$0xf]  ;;  %v4792_v5 = vld [vmem:[%s5128_s28 + $0x88] sm:$0xf0]  ;;  %v5242_v9 = vor.u32 %v4865_v2, %v4217_v3 }
  0x20   : > { %5010 = vmatpush.bf16.msra.mxu2 %v4927_v10  ;;  %1516 = vmatpush.bf16.msra.mxu0 %v4927_v10  ;;  %v4790_v6 = vld [vmem:[%s5128_s28 + $0x7c] sm:$0xf]  ;;  %v3917_v7 = vld [vmem:[%s5128_s28 + $0x8c] sm:$0xf0]  ;;  %v5244_v10 = vor.u32 %v4792_v5, %v3915_v4  ;;  %v3935_v18 = vld [vmem:[%s5128_s28 + $0xa0] sm:$0xf] }
  0x21   : > { %5018 = vmatpush.bf16.msra.mxu3 %v4935_v11  ;;  %1675 = vmatpush.bf16.msra.mxu1 %v4935_v11  ;;  %7152 = vst [vmem:[#allocation8_spill] sm:$0xff] %v5242_v9  ;;  %v5246_v11 = vor.u32 %v4790_v6, %v3917_v7  ;;  %v4870_v16 = vld [vmem:[%s5128_s28 + $0x2fc] sm:$0xf]  ;;  %v4237_v17 = vld [vmem:[%s5128_s28 + $0x30c] sm:$0xf0] }
  0x22   : > { %v4797_v19 = vld [vmem:[%s5128_s28 + $0xb0] sm:$0xf0]  ;;  %v4795_v20 = vld [vmem:[%s5128_s28 + $0xa4] sm:$0xf]  ;;  %v3937_v21 = vld [vmem:[%s5128_s28 + $0xb4] sm:$0xf0]  ;;  %v5268_v23 = vor.u32 %v4870_v16, %v4237_v17 }
  0x23   : > { %7153 = vst [vmem:[#allocation9_spill] sm:$0xff] %v5246_v11  ;;  %v3955_v36 = vld [vmem:[%s5128_s28 + $0xc8] sm:$0xf]  ;;  %v4802_v37 = vld [vmem:[%s5128_s28 + $0xd8] sm:$0xf0] }
  0x24   : > { %5011 = vmatpush.bf16.msra.mxu2 %v4926_v12  ;;  %1517 = vmatpush.bf16.msra.mxu0 %v4926_v12  ;;  %v4945_v12 = vld [vmem:[%s7038_s1 + $0xa0] sm:$0xff]  ;;  %7154 = vst [vmem:[#allocation10_spill] sm:$0xff] %v5268_v23  ;;  %v4800_v38 = vld [vmem:[%s5128_s28 + $0xcc] sm:$0xf]  ;;  %v5296_v42 = vor.u32 %v4802_v37, %v3955_v36  ;;  %v4275_v50 = vld [vmem:[%s5128_s28 + $0x348] sm:$0xf] }
  0x25   : > { %5019 = vmatpush.bf16.msra.mxu3 %v4934_v13  ;;  %1676 = vmatpush.bf16.msra.mxu1 %v4934_v13  ;;  %v4953_v13 = vld [vmem:[%s7038_s1 + $0xe0] sm:$0xff]  ;;  %v4882_v51 = vld [vmem:[%s5128_s28 + $0x358] sm:$0xf0]  ;;  %v4880_v52 = vld [vmem:[%s5128_s28 + $0x34c] sm:$0xf] }
  0x26   : > { %v3957_v39 = vld [vmem:[%s5128_s28 + $0xdc] sm:$0xf0]  ;;  %v3975_v54 = vld [vmem:[%s5128_s28 + $0xf0] sm:$0xf]  ;;  %v4807_v55 = vld [vmem:[%s5128_s28 + $0x100] sm:$0xf0] }
  0x27   : > { %v5298_v43 = vor.u32 %v4800_v38, %v3957_v39  ;;  %v4277_v53 = vld [vmem:[%s5128_s28 + $0x35c] sm:$0xf0]  ;;  %v4805_v56 = vld [vmem:[%s5128_s28 + $0xf4] sm:$0xf]  ;;  %v3977_v57 = vld [vmem:[%s5128_s28 + $0x104] sm:$0xf0]  ;;  %v5322_v0 = vor.u32 %v4807_v55, %v3975_v54 }
  0x28   : > { %5012 = vmatpush.bf16.msra.mxu2 %v4925_v14  ;;  %1518 = vmatpush.bf16.msra.mxu0 %v4925_v14  ;;  %v4235_v14 = vld [vmem:[%s5128_s28 + $0x2f8] sm:$0xf]  ;;  %v5324_v1 = vor.u32 %v4805_v56, %v3977_v57  ;;  %v4295_v4 = vld [vmem:[%s5128_s28 + $0x370] sm:$0xf]  ;;  %v4887_v5 = vld [vmem:[%s5128_s28 + $0x380] sm:$0xf0] }
  0x29   : > { %5020 = vmatpush.bf16.msra.mxu3 %v4933_v15  ;;  %1677 = vmatpush.bf16.msra.mxu1 %v4933_v15  ;;  %v4872_v15 = vld [vmem:[%s5128_s28 + $0x308] sm:$0xf0]  ;;  %7157 = vst [vmem:[#allocation13_spill] sm:$0xff] %v5298_v43  ;;  %v4960_v2 = vld [vmem:[%s7038_s1 + $0x118] sm:$0xff]  ;;  %v4885_v6 = vld [vmem:[%s5128_s28 + $0x374] sm:$0xf]  ;;  %v5344_v16 = vor.u32 %v4887_v5, %v4295_v4 }
  0x2a   : > { %v5266_v22 = vor.u32 %v4872_v15, %v4235_v14  ;;  %7159 = vst [vmem:[#allocation15_spill] sm:$0xff] %v5324_v1  ;;  %v4968_v3 = vld [vmem:[%s7039_s2 + $0x18] sm:$0xff]  ;;  %v4297_v7 = vld [vmem:[%s5128_s28 + $0x384] sm:$0xf0]  ;;  %v3997_v15 = vld [vmem:[%s5128_s28 + $0x12c] sm:$0xf0] }
  0x2b   : > { %1594 = vmatmul.bf16.vlgmr.msra.gmra.mxu2 %v5150_v26  ;;  %1519 = vmatmul.bf16.vlgmr.msra.gmra.mxu0 %v5154_v28  ;;  %v4810_v14 = vld [vmem:[%s5128_s28 + $0x11c] sm:$0xf]  ;;  %v5346_v17 = vor.u32 %v4885_v6, %v4297_v7  ;;  %v4815_v36 = vld [vmem:[%s5128_s28 + $0x144] sm:$0xf]  ;;  %v4017_v37 = vld [vmem:[%s5128_s28 + $0x154] sm:$0xf0] }
  0x2c   : > { %1829 = vmatpush.bf16.msrb.mxu2 %v4948_v24  ;;  %1753 = vmatmul.bf16.vlgmr.msra.gmra.mxu3 %v5152_v27  ;;  %v5270_v24 = vor.u32 %v4797_v19, %v3935_v18  ;;  %v5350_v19 = vor.u32 %v4810_v14, %v3997_v15  ;;  %v4967_v54 = vld [vmem:[%s7039_s2 + $0x10] sm:$0xff]  ;;  %v4335_v5 = vld [vmem:[%s5128_s28 + $0x3c0] sm:$0xf]  ;;  %v4895_v7 = vld [vmem:[%s5128_s28 + $0x3c4] sm:$0xf] }
  0x2d   : > { %1988 = vmatpush.bf16.msrb.mxu3 %v4956_v25  ;;  %1678 = vmatmul.bf16.vlgmr.msra.gmra.mxu1 %v5156_v29  ;;  %v5272_v25 = vor.u32 %v4795_v20, %v3937_v21  ;;  %7160 = vst [vmem:[#allocation16_spill] sm:$0xff] %v5346_v17  ;;  %v4943_v20 = vld [vmem:[%s7038_s1 + $0x90] sm:$0xff]  ;;  %v4822_v14 = vld [vmem:[%s5128_s28 + $0x178] sm:$0xf0]  ;;  %v4820_v15 = vld [vmem:[%s5128_s28 + $0x16c] sm:$0xf] }
  0x2e   : > { %2147 = vmatpush.bf16.msrb.mxu0 %v4964_v30  ;;  %2626 = vmatpush.bf16.msrb.mxu1 %v4972_v31  ;;  %v4961_v30 = vld [vmem:[%s7038_s1 + $0x120] sm:$0xff]  ;;  %7161 = vst [vmem:[#allocation17_spill] sm:$0xff] %v5350_v19  ;;  %v4951_v21 = vld [vmem:[%s7038_s1 + $0xd0] sm:$0xff] }
  0x2f   : > { %7155 = vst [vmem:[#allocation11_spill] sm:$0xff] %v5272_v25  ;;  %v4969_v31 = vld [vmem:[%s7039_s2 + $0x20] sm:$0xff]  ;;  %v4897_v6 = vld [vmem:[%s5128_s28 + $0x3d0] sm:$0xf0] }
  0x30   : > { %1830 = vmatpush.bf16.msrb.mxu2 %v4947_v32  ;;  %v4255_v32 = vld [vmem:[%s5128_s28 + $0x320] sm:$0xf]  ;;  %v4835_v27 = vld [vmem:[%s5128_s28 + $0x1e4] sm:$0xf]  ;;  %v4845_v29 = vld [vmem:[%s5128_s28 + $0x234] sm:$0xf] }
  0x31   : > { %1989 = vmatpush.bf16.msrb.mxu3 %v4955_v33  ;;  %v4877_v33 = vld [vmem:[%s5128_s28 + $0x330] sm:$0xf0] }
  0x32   : > { %2148 = vmatpush.bf16.msrb.mxu0 %v4963_v34  ;;  %2627 = vmatpush.bf16.msrb.mxu1 %v4971_v35  ;;  %v4875_v34 = vld [vmem:[%s5128_s28 + $0x324] sm:$0xf]  ;;  %v4257_v35 = vld [vmem:[%s5128_s28 + $0x334] sm:$0xf0]  ;;  %v5292_v40 = vor.u32 %v4877_v33, %v4255_v32  ;;  %v4890_v32 = vld [vmem:[%s5128_s28 + $0x39c] sm:$0xf] }
  0x33   : > { %v5294_v41 = vor.u32 %v4875_v34, %v4257_v35  ;;  %v4317_v33 = vld [vmem:[%s5128_s28 + $0x3ac] sm:$0xf0]  ;;  %v4015_v34 = vld [vmem:[%s5128_s28 + $0x140] sm:$0xf]  ;;  %v4817_v35 = vld [vmem:[%s5128_s28 + $0x150] sm:$0xf0] }
  0x34   : > { %1831 = vmatpush.bf16.msrb.mxu2 %v4946_v48  ;;  %v4944_v48 = vld [vmem:[%s7038_s1 + $0x98] sm:$0xff]  ;;  %v5372_v39 = vor.u32 %v4890_v32, %v4317_v33  ;;  %v5404_v32 = vor.u32 %v4897_v6, %v4335_v5  ;;  %v4355_v6 = vld [vmem:[%s5128_s28 + $0x3e8] sm:$0xf] }
  0x35   : > { %1990 = vmatpush.bf16.msrb.mxu3 %v4954_v49  ;;  %7156 = vst [vmem:[#allocation12_spill] sm:$0xff] %v5294_v41  ;;  %v4952_v49 = vld [vmem:[%s7038_s1 + $0xd8] sm:$0xff] }
  0x36   : > { %2149 = vmatpush.bf16.msrb.mxu0 %v4962_v62  ;;  %2628 = vmatpush.bf16.msrb.mxu1 %v4970_v63  ;;  %v5318_v62 = vor.u32 %v4882_v51, %v4275_v50  ;;  %v5320_v63 = vor.u32 %v4880_v52, %v4277_v53  ;;  %7162 = vst [vmem:[#allocation18_spill] sm:$0xff] %v5372_v39  ;;  %v4959_v53 = vld [vmem:[%s7038_s1 + $0x110] sm:$0xff] }
  0x37   : > { %7166 = vst [vmem:[#allocation22_spill] sm:$0xff] %v5404_v32 }
  0x38   : > { %1832 = vmatpush.bf16.msrb.mxu2 %v4945_v12  ;;  %7158 = vst [vmem:[#allocation14_spill] sm:$0xff] %v5320_v63  ;;  %v3995_v12 = vld [vmem:[%s5128_s28 + $0x118] sm:$0xf] }
  0x39   : > { %1991 = vmatpush.bf16.msrb.mxu3 %v4953_v13  ;;  %v4812_v13 = vld [vmem:[%s5128_s28 + $0x128] sm:$0xf0] }
  0x3a   : > { %2150 = vmatpush.bf16.msrb.mxu0 %v4961_v30  ;;  %2629 = vmatpush.bf16.msrb.mxu1 %v4969_v31  ;;  %v5348_v18 = vor.u32 %v4812_v13, %v3995_v12  ;;  %v4315_v30 = vld [vmem:[%s5128_s28 + $0x398] sm:$0xf]  ;;  %v4892_v31 = vld [vmem:[%s5128_s28 + $0x3a8] sm:$0xf0]  ;;  %v4035_v13 = vld [vmem:[%s5128_s28 + $0x168] sm:$0xf] }
  0x3b   : > { %1599 = vmatmul.bf16.gmra.mxu2 %v5188_v44  ;;  %1524 = vmatmul.bf16.gmra.mxu0 %v5192_v46  ;;  %v5370_v38 = vor.u32 %v4892_v31, %v4315_v30  ;;  %v4337_v12 = vld [vmem:[%s5128_s28 + $0x3d4] sm:$0xf0] }
  0x3c   : > { %1758 = vmatmul.bf16.gmra.mxu3 %v5190_v45  ;;  %1833 = vmatpush.bf16.msrb.mxu2 %v4944_v48  ;;  %v5374_v48 = vor.u32 %v4817_v35, %v4015_v34  ;;  %v5406_v33 = vor.u32 %v4895_v7, %v4337_v12  ;;  %v5408_v34 = vor.u32 %v4822_v14, %v4035_v13  ;;  %v4902_v7 = vld [vmem:[%s5128_s28 + $0x3f8] sm:$0xf0]  ;;  %v4900_v12 = vld [vmem:[%s5128_s28 + $0x3ec] sm:$0xf]  ;;  %v4357_v13 = vld [vmem:[%s5128_s28 + $0x3fc] sm:$0xf0] }
  0x3d   : > { %1683 = vmatmul.bf16.gmra.mxu1 %v5194_v47  ;;  %1992 = vmatpush.bf16.msrb.mxu3 %v4952_v49  ;;  %v5376_v49 = vor.u32 %v4815_v36, %v4017_v37  ;;  %v4055_v14 = vld [vmem:[%s5128_s28 + $0x190] sm:$0xf]  ;;  %v4837_v45 = vld [vmem:[%s5128_s28 + $0x1f0] sm:$0xf0] }
  0x3e   : > { %2151 = vmatpush.bf16.msrb.mxu0 %v4960_v2  ;;  %2630 = vmatpush.bf16.msrb.mxu1 %v4968_v3  ;;  %7167 = vst [vmem:[#allocation23_spill] sm:$0xff] %v5406_v33 }
  0x3f   : > { %7163 = vst [vmem:[#allocation19_spill] sm:$0xff] %v5376_v49 }
  0x40   : > { %1834 = vmatpush.bf16.msrb.mxu2 %v4943_v20  ;;  %v4037_v20 = vld [vmem:[%s5128_s28 + $0x17c] sm:$0xf0] }
  0x41   : > { %1993 = vmatpush.bf16.msrb.mxu3 %v4951_v21  ;;  %v5410_v35 = vor.u32 %v4820_v15, %v4037_v20  ;;  %v4827_v15 = vld [vmem:[%s5128_s28 + $0x1a0] sm:$0xf0]  ;;  %v4825_v20 = vld [vmem:[%s5128_s28 + $0x194] sm:$0xf] }
  0x42   : > { %2152 = vmatpush.bf16.msrb.mxu0 %v4959_v53  ;;  %2631 = vmatpush.bf16.msrb.mxu1 %v4967_v54 }
  0x43   : > { %7168 = vst [vmem:[#allocation24_spill] sm:$0xff] %v5410_v35 }
  0x4b   : > { %1604 = vmatmul.bf16.gmra.mxu2 %v5214_v58  ;;  %1529 = vmatmul.bf16.gmra.mxu0 %v5218_v60 }
  0x4c   : > { %1763 = vmatmul.bf16.gmra.mxu3 %v5216_v59 }
  0x4d   : > { %1688 = vmatmul.bf16.gmra.mxu1 %v5220_v61 }
  0x5b   : > { %1609 = vmatmul.bf16.gmra.mxu2 %v5240_v8  ;;  %1534 = vmatmul.bf16.gmra.mxu0 %v5244_v10 }
  0x5c   : > { %1768 = vmatmul.bf16.gmra.mxu3 %v5242_v9 }
  0x5d   : > { %1693 = vmatmul.bf16.gmra.mxu1 %v5246_v11 }
  0x6b   : > { %1614 = vmatmul.bf16.gmra.mxu2 %v5266_v22  ;;  %1539 = vmatmul.bf16.gmra.mxu0 %v5270_v24 }
  0x6c   : > { %1773 = vmatmul.bf16.gmra.mxu3 %v5268_v23 }
  0x6d   : > { %1698 = vmatmul.bf16.gmra.mxu1 %v5272_v25 }
  0x7b   : > { %1619 = vmatmul.bf16.gmra.mxu2 %v5292_v40  ;;  %1544 = vmatmul.bf16.gmra.mxu0 %v5296_v42 }
  0x7c   : > { %1778 = vmatmul.bf16.gmra.mxu3 %v5294_v41 }
  0x7d   : > { %1703 = vmatmul.bf16.gmra.mxu1 %v5298_v43 }
  0x8b   : > { %1624 = vmatmul.bf16.gmra.mxu2 %v5318_v62  ;;  %1549 = vmatmul.bf16.gmra.mxu0 %v5322_v0 }
  0x8c   : > { %1783 = vmatmul.bf16.gmra.mxu3 %v5320_v63 }
  0x8d   : > { %1708 = vmatmul.bf16.gmra.mxu1 %v5324_v1  ;;  %v4117_v1 = vld [vmem:[%s5128_s28 + $0x21c] sm:$0xf0] }
  0x9b   : > { %1629 = vmatmul.bf16.gmra.mxu2 %v5344_v16  ;;  %1554 = vmatmul.bf16.gmra.mxu0 %v5348_v18 }
  0x9c   : > { %1788 = vmatmul.bf16.gmra.mxu3 %v5346_v17  ;;  %v4077_v17 = vld [vmem:[%s5128_s28 + $0x1cc] sm:$0xf0] }
  0x9d   : > { %1713 = vmatmul.bf16.gmra.mxu1 %v5350_v19 }
  0xa8   : > { %v1520_v50 = vpop.f32.mrf.mxu0 }
  0xaa   : > { %v1679_v51 = vpop.f32.mrf.mxu1 }
  0xab   : > { %v5378_v52 = vadd.f32 %v1679_v51, %v1520_v50  ;;  %1634 = vmatmul.bf16.gmra.mxu2 %v5370_v38  ;;  %1559 = vmatmul.bf16.gmra.mxu0 %v5374_v48 }
  0xac   : > { %1793 = vmatmul.bf16.gmra.mxu3 %v5372_v39  ;;  %v4830_v39 = vld [vmem:[%s5128_s28 + $0x1bc] sm:$0xf] }
  0xad   : > { %1718 = vmatmul.bf16.gmra.mxu1 %v5376_v49 }
  0xae   : > { %v1595_v55 = vpop.f32.mrf.mxu2 }
  0xaf   : > { %v1754_v56 = vpop.f32.mrf.mxu3 }
  0xb0   : > { %v5390_v57 = vadd.f32 %v1754_v56, %v1595_v55  ;;  %v1522_v2 = vpop.f32.mrf.mxu0  ;;  %v4942_v55 = vld [vmem:[%s7038_s1 + $0x88] sm:$0xff] }
  0xb1   : > { %v4950_v56 = vld [vmem:[%s7038_s1 + $0xc8] sm:$0xff]  ;;  %1835 = vmatpush.bf16.msrb.mxu2 %v4942_v55 }
  0xb2   : > { %7164 = vst [vmem:[#allocation20_spill] sm:$0xff] %v5390_v57  ;;  %v1681_v3 = vpop.f32.mrf.mxu1  ;;  %1994 = vmatpush.bf16.msrb.mxu3 %v4950_v56  ;;  %v4958_v55 = vld [vmem:[%s7038_s1 + $0x108] sm:$0xff]  ;;  %v5445_v56 = vor.u32 %v4827_v15, %v4055_v14 }
  0xb3   : > { %v5392_v4 = vadd.f32 %v1681_v3, %v1522_v2  ;;  %2153 = vmatpush.bf16.msrb.mxu0 %v4958_v55  ;;  %v4377_v55 = vld [vmem:[%s5128_s28 + $0x424] sm:$0xf0] }
  0xb6   : > { %v1597_v21 = vpop.f32.mrf.mxu2 }
  0xb7   : > { %v1756_v30 = vpop.f32.mrf.mxu3 }
  0xb8   : > { %v5402_v31 = vadd.f32 %v1756_v30, %v1597_v21  ;;  %v1525_v36 = vpop.f32.mrf.mxu0  ;;  %v4057_v21 = vld [vmem:[%s5128_s28 + $0x1a4] sm:$0xf0] }
  0xba   : > { %7165 = vst [vmem:[#allocation21_spill] sm:$0xff] %v5402_v31  ;;  %v1684_v37 = vpop.f32.mrf.mxu1 }
  0xbb   : > { %v5412_v50 = vadd.f32 %v1684_v37, %v1525_v36  ;;  %1639 = vmatmul.bf16.gmra.mxu2 %v5404_v32  ;;  %1564 = vmatmul.bf16.gmra.mxu0 %v5408_v34 }
  0xbc   : > { %1798 = vmatmul.bf16.gmra.mxu3 %v5406_v33 }
  0xbd   : > { %1723 = vmatmul.bf16.gmra.mxu1 %v5410_v35 }
  0xbe   : > { %v1600_v51 = vpop.f32.mrf.mxu2 }
  0xbf   : > { %v1759_v53 = vpop.f32.mrf.mxu3 }
  0xc0   : > { %v5418_v54 = vadd.f32 %v1759_v53, %v1600_v51  ;;  %v1527_v2 = vpop.f32.mrf.mxu0  ;;  %v5438_v51 = vor.u32 %v4902_v7, %v4355_v6  ;;  %v5440_v53 = vor.u32 %v4900_v12, %v4357_v13  ;;  %v4966_v6 = vld [vmem:[%s7039_s2 + $0x8] sm:$0xff] }
  0xc1   : > { %2632 = vmatpush.bf16.msrb.mxu1 %v4966_v6 }
  0xc2   : > { %7169 = vst [vmem:[#allocation25_spill] sm:$0xff] %v5418_v54  ;;  %v1686_v3 = vpop.f32.mrf.mxu1 }
  0xc3   : > { %v5426_v5 = vadd.f32 %v1686_v3, %v1527_v2  ;;  %7171 = vst [vmem:[#allocation27_spill] sm:$0xff] %v5438_v51  ;;  %v5447_v2 = vor.u32 %v4825_v20, %v4057_v21  ;;  %v4375_v20 = vld [vmem:[%s5128_s28 + $0x410] sm:$0xf]  ;;  %v4907_v21 = vld [vmem:[%s5128_s28 + $0x420] sm:$0xf0] }
  0xc4   : > { %7172 = vst [vmem:[#allocation28_spill] sm:$0xff] %v5440_v53  ;;  %v5472_v6 = vor.u32 %v4907_v21, %v4375_v20 }
  0xc5   : > { %7173 = vst [vmem:[#allocation29_spill] sm:$0xff] %v5447_v2 }
  0xc6   : > { %v1602_v30 = vpop.f32.mrf.mxu2  ;;  %7176 = vst [vmem:[#allocation32_spill] sm:$0xff] %v5472_v6 }
  0xc7   : > { %v1761_v36 = vpop.f32.mrf.mxu3 }
  0xc8   : > { %v5436_v37 = vadd.f32 %v1761_v36, %v1602_v30  ;;  %v1530_v3 = vpop.f32.mrf.mxu0  ;;  %v4905_v36 = vld [vmem:[%s5128_s28 + $0x414] sm:$0xf] }
  0xca   : > { %7170 = vst [vmem:[#allocation26_spill] sm:$0xff] %v5436_v37  ;;  %v1689_v33 = vpop.f32.mrf.mxu1 }
  0xcb   : > { %v5449_v30 = vadd.f32 %v1689_v33, %v1530_v3  ;;  %1644 = vmatmul.bf16.gmra.mxu2 %v5438_v51  ;;  %1569 = vmatmul.bf16.gmra.mxu0 %v5445_v56  ;;  %v4075_v3 = vld [vmem:[%s5128_s28 + $0x1b8] sm:$0xf] }
  0xcc   : > { %1803 = vmatmul.bf16.gmra.mxu3 %v5440_v53  ;;  %v4832_v53 = vld [vmem:[%s5128_s28 + $0x1c8] sm:$0xf0] }
  0xcd   : > { %1728 = vmatmul.bf16.gmra.mxu1 %v5447_v2 }
  0xce   : > { %v1605_v33 = vpop.f32.mrf.mxu2 }
  0xcf   : > { %v1764_v7 = vpop.f32.mrf.mxu3 }
  0xd0   : > { %v5458_v12 = vadd.f32 %v1764_v7, %v1605_v33  ;;  %v1532_v13 = vpop.f32.mrf.mxu0  ;;  %v5474_v33 = vor.u32 %v4905_v36, %v4377_v55  ;;  %v5476_v7 = vor.u32 %v4832_v53, %v4075_v3  ;;  %v4395_v36 = vld [vmem:[%s5128_s28 + $0x438] sm:$0xf]  ;;  %v4912_v55 = vld [vmem:[%s5128_s28 + $0x448] sm:$0xf0]  ;;  %v4910_v3 = vld [vmem:[%s5128_s28 + $0x43c] sm:$0xf] }
  0xd1   : > { %v5506_v2 = vor.u32 %v4912_v55, %v4395_v36 }
  0xd2   : > { %7174 = vst [vmem:[#allocation30_spill] sm:$0xff] %v5458_v12  ;;  %v1691_v14 = vpop.f32.mrf.mxu1 }
  0xd3   : > { %v5460_v15 = vadd.f32 %v1691_v14, %v1532_v13  ;;  %7177 = vst [vmem:[#allocation33_spill] sm:$0xff] %v5474_v33  ;;  %v5478_v13 = vor.u32 %v4830_v39, %v4077_v17  ;;  %v4949_v39 = vld [vmem:[%s7038_s1 + $0xc0] sm:$0xff] }
  0xd4   : > { %1995 = vmatpush.bf16.msrb.mxu3 %v4949_v39  ;;  %7181 = vst [vmem:[#allocation37_spill] sm:$0xff] %v5506_v2  ;;  %v4957_v39 = vld [vmem:[%s7038_s1 + $0x100] sm:$0xff] }
  0xd5   : > { %7178 = vst [vmem:[#allocation34_spill] sm:$0xff] %v5478_v13  ;;  %2154 = vmatpush.bf16.msrb.mxu0 %v4957_v39  ;;  %v4417_v39 = vld [vmem:[%s5128_s28 + $0x474] sm:$0xf0] }
  0xd6   : > { %v1607_v63 = vpop.f32.mrf.mxu2 }
  0xd7   : > { %v1766_v41 = vpop.f32.mrf.mxu3 }
  0xd8   : > { %v5470_v23 = vadd.f32 %v1766_v41, %v1607_v63  ;;  %v1535_v14 = vpop.f32.mrf.mxu0  ;;  %v4941_v41 = vld [vmem:[%s7038_s1 + $0x80] sm:$0xff] }
  0xd9   : > { %1836 = vmatpush.bf16.msrb.mxu2 %v4941_v41 }
  0xda   : > { %7175 = vst [vmem:[#allocation31_spill] sm:$0xff] %v5470_v23  ;;  %v1694_v9 = vpop.f32.mrf.mxu1 }
  0xdb   : > { %v5480_v59 = vadd.f32 %v1694_v9, %v1535_v14  ;;  %1649 = vmatmul.bf16.gmra.mxu2 %v5472_v6  ;;  %1574 = vmatmul.bf16.gmra.mxu0 %v5476_v7  ;;  %v4397_v14 = vld [vmem:[%s5128_s28 + $0x44c] sm:$0xf0] }
  0xdc   : > { %1808 = vmatmul.bf16.gmra.mxu3 %v5474_v33  ;;  %v4095_v33 = vld [vmem:[%s5128_s28 + $0x1e0] sm:$0xf]  ;;  %v5508_v35 = vor.u32 %v4910_v3, %v4397_v14  ;;  %v4917_v14 = vld [vmem:[%s5128_s28 + $0x470] sm:$0xf0] }
  0xdd   : > { %1733 = vmatmul.bf16.gmra.mxu1 %v5478_v13  ;;  %v4097_v13 = vld [vmem:[%s5128_s28 + $0x1f4] sm:$0xf0] }
  0xde   : > { %v1610_v9 = vpop.f32.mrf.mxu2  ;;  %7182 = vst [vmem:[#allocation38_spill] sm:$0xff] %v5508_v35  ;;  %v5518_v49 = vor.u32 %v4835_v27, %v4097_v13 }
  0xdf   : > { %v1769_v63 = vpop.f32.mrf.mxu3 }
  0xe0   : > { %v5489_v17 = vadd.f32 %v1769_v63, %v1610_v9  ;;  %v1537_v53 = vpop.f32.mrf.mxu0  ;;  %7183 = vst [vmem:[#allocation39_spill] sm:$0xff] %v5518_v49 }
  0xe2   : > { %7179 = vst [vmem:[#allocation35_spill] sm:$0xff] %v5489_v17  ;;  %v1696_v20 = vpop.f32.mrf.mxu1 }
  0xe3   : > { %v5494_v21 = vadd.f32 %v1696_v20, %v1537_v53  ;;  %v4965_v53 = vld [vmem:[%s7039_s2] sm:$0xff]  ;;  %v5516_v20 = vor.u32 %v4837_v45, %v4095_v33 }
  0xe4   : > { %2633 = vmatpush.bf16.msrb.mxu1 %v4965_v53  ;;  %v4115_v53 = vld [vmem:[%s5128_s28 + $0x208] sm:$0xf] }
  0xe6   : > { %v1612_v41 = vpop.f32.mrf.mxu2 }
  0xe7   : > { %v1771_v9 = vpop.f32.mrf.mxu3 }
  0xe8   : > { %v5504_v63 = vadd.f32 %v1771_v9, %v1612_v41  ;;  %v1540_v19 = vpop.f32.mrf.mxu0  ;;  %v4915_v9 = vld [vmem:[%s5128_s28 + $0x464] sm:$0xf] }
  0xea   : > { %7180 = vst [vmem:[#allocation36_spill] sm:$0xff] %v5504_v63  ;;  %v1699_v41 = vpop.f32.mrf.mxu1 }
  0xeb   : > { %v5520_v36 = vadd.f32 %v1699_v41, %v1540_v19  ;;  %1654 = vmatmul.bf16.gmra.mxu2 %v5506_v2  ;;  %1579 = vmatmul.bf16.gmra.mxu0 %v5516_v20  ;;  %v4415_v19 = vld [vmem:[%s5128_s28 + $0x460] sm:$0xf]  ;;  %v4842_v41 = vld [vmem:[%s5128_s28 + $0x218] sm:$0xf0] }
  0xec   : > { %1813 = vmatmul.bf16.gmra.mxu3 %v5508_v35  ;;  %v4840_v35 = vld [vmem:[%s5128_s28 + $0x20c] sm:$0xf] }
  0xed   : > { %1738 = vmatmul.bf16.gmra.mxu1 %v5518_v49  ;;  %v5540_v49 = vor.u32 %v4917_v14, %v4415_v19 }
  0xee   : > { %v1615_v27 = vpop.f32.mrf.mxu2 }
  0xef   : > { %v1774_v45 = vpop.f32.mrf.mxu3  ;;  %7186 = vst [vmem:[#allocation42_spill] sm:$0xff] %v5540_v49 }
  0xf0   : > { %v5526_v33 = vadd.f32 %v1774_v45, %v1615_v27  ;;  %v1542_v13 = vpop.f32.mrf.mxu0  ;;  %v5542_v27 = vor.u32 %v4915_v9, %v4417_v39  ;;  %v5544_v45 = vor.u32 %v4842_v41, %v4115_v53  ;;  %v4996_v39 = vld [vmem:[%s7039_s2 + $0xf8] sm:$0xff]  ;;  %v4435_v53 = vld [vmem:[%s5128_s28 + $0x488] sm:$0xf] }
  0xf1   : > { %v4922_v41 = vld [vmem:[%s5128_s28 + $0x498] sm:$0xf0]  ;;  %3103 = vmatpush.bf16.msra.mxu0 %v4996_v39 }
  0xf2   : > { %7184 = vst [vmem:[#allocation40_spill] sm:$0xff] %v5526_v33  ;;  %v1701_v55 = vpop.f32.mrf.mxu1 }
  0xf3   : > { %v5528_v3 = vadd.f32 %v1701_v55, %v1542_v13  ;;  %7187 = vst [vmem:[#allocation43_spill] sm:$0xff] %v5542_v27  ;;  %v5546_v13 = vor.u32 %v4840_v35, %v4117_v1 }
  0xf5   : > { %7188 = vst [vmem:[#allocation44_spill] sm:$0xff] %v5546_v13 }
  0xf6   : > { %v1617_v43 = vpop.f32.mrf.mxu2 }
  0xf7   : > { %v1776_v25 = vpop.f32.mrf.mxu3 }
  0xf8   : > { %v5538_v11 = vadd.f32 %v1776_v25, %v1617_v43  ;;  %v1545_v55 = vpop.f32.mrf.mxu0  ;;  %v4980_v25 = vld [vmem:[%s7039_s2 + $0x78] sm:$0xff] }
  0xf9   : > { %2785 = vmatpush.bf16.msra.mxu2 %v4980_v25  ;;  %v4135_v25 = vld [vmem:[%s5128_s28 + $0x230] sm:$0xf] }
  0xfa   : > { %7185 = vst [vmem:[#allocation41_spill] sm:$0xff] %v5538_v11  ;;  %v1704_v61 = vpop.f32.mrf.mxu1 }
  0xfb   : > { %v5548_v47 = vadd.f32 %v1704_v61, %v1545_v55  ;;  %1659 = vmatmul.bf16.gmra.mxu2 %v5540_v49  ;;  %1584 = vmatmul.bf16.gmra.mxu0 %v5544_v45  ;;  %v4988_v61 = vld [vmem:[%s7039_s2 + $0xb8] sm:$0xff]  ;;  %v4920_v55 = vld [vmem:[%s5128_s28 + $0x48c] sm:$0xf]  ;;  %v4137_v49 = vld [vmem:[%s5128_s28 + $0x244] sm:$0xf0] }
  0xfc   : > { %1818 = vmatmul.bf16.gmra.mxu3 %v5542_v27  ;;  %v4437_v27 = vld [vmem:[%s5128_s28 + $0x49c] sm:$0xf0]  ;;  %v5586_v33 = vor.u32 %v4845_v29, %v4137_v49 }
  0xfd   : > { %1743 = vmatmul.bf16.gmra.mxu1 %v5546_v13  ;;  %2944 = vmatpush.bf16.msra.mxu3 %v4988_v61  ;;  %v4847_v13 = vld [vmem:[%s5128_s28 + $0x240] sm:$0xf0] }
  0xfe   : > { %v1620_v43 = vpop.f32.mrf.mxu2  ;;  %v5584_v11 = vor.u32 %v4847_v13, %v4135_v25  ;;  %7193 = vst [vmem:[#allocation49_spill] sm:$0xff] %v5586_v33  ;;  %v3863_v25 = vld [vmem:[%s5128_s28 + $0x8] sm:$0xf] }
  0xff   : > { %v1779_v1 = vpop.f32.mrf.mxu3 }
 0x100   : > { %v5560_v35 = vadd.f32 %v1779_v1, %v1620_v43  ;;  %v1547_v19 = vpop.f32.mrf.mxu0 }
 0x102   : > { %7189 = vst [vmem:[#allocation45_spill] sm:$0xff] %v5560_v35  ;;  %v1706_v14 = vpop.f32.mrf.mxu1  ;;  %v5577_v35 = vor.u32 %v4922_v41, %v4435_v53 }
 0x103   : > { %v5562_v9 = vadd.f32 %v1706_v14, %v1547_v19  ;;  %v5579_v19 = vor.u32 %v4920_v55, %v4437_v27  ;;  %v5004_v14 = vld [vmem:[%s7039_s2 + $0x138] sm:$0xff] }
 0x104   : > { %7191 = vst [vmem:[#allocation47_spill] sm:$0xff] %v5577_v35  ;;  %3262 = vmatpush.bf16.msra.mxu1 %v5004_v14  ;;  %v3871_v14 = vld [vmem:[%s5128_s28 + $0x10] sm:$0xf] }
 0x105   : > { %7192 = vst [vmem:[#allocation48_spill] sm:$0xff] %v5579_v19 }
 0x106   : > { %v1622_v61 = vpop.f32.mrf.mxu2 }
 0x107   : > { %v1781_v43 = vpop.f32.mrf.mxu3 }
 0x108   : > { %v5575_v1 = vadd.f32 %v1781_v43, %v1622_v61  ;;  %v1550_v39 = vpop.f32.mrf.mxu0  ;;  %v4776_v61 = vld [vmem:[%s5128_s28 + $0xc] sm:$0xf]  ;;  %v3865_v43 = vld [vmem:[%s5128_s28 + $0x1c] sm:$0xf0] }
 0x10a   : > { %7190 = vst [vmem:[#allocation46_spill] sm:$0xff] %v5575_v1  ;;  %v1709_v2 = vpop.f32.mrf.mxu1 }
 0x10b   : > { %v5588_v53 = vadd.f32 %v1709_v2, %v1550_v39  ;;  %1664 = vmatmul.bf16.gmra.mxu2 %v5577_v35  ;;  %1589 = vmatmul.bf16.gmra.mxu0 %v5584_v11  ;;  %v4778_v2 = vld [vmem:[%s5128_s28 + $0x18] sm:$0xf0]  ;;  %v4779_v39 = vld [vmem:[%s5128_s28 + $0x20] sm:$0xf0] }
 0x10c   : > { %1823 = vmatmul.bf16.gmra.mxu3 %v5579_v19  ;;  %v5606_v63 = vor.u32 %v4778_v2, %v3863_v25 }
 0x10d   : > { %1748 = vmatmul.bf16.gmra.mxu1 %v5586_v33  ;;  %v5608_v33 = vor.u32 %v4776_v61, %v3865_v43 }
 0x10e   : > { %v1625_v29 = vpop.f32.mrf.mxu2  ;;  %7196 = vst [vmem:[#allocation52_spill] sm:$0xff] %v5606_v63 }
 0x10f   : > { %v1784_v49 = vpop.f32.mrf.mxu3  ;;  %7197 = vst [vmem:[#allocation53_spill] sm:$0xff] %v5608_v33 }
 0x110   : > { %v5594_v27 = vadd.f32 %v1784_v49, %v1625_v29  ;;  %v1552_v13 = vpop.f32.mrf.mxu0  ;;  %v5610_v29 = vor.u32 %v4779_v39, %v3871_v14  ;;  %v3883_v14 = vld [vmem:[%s5128_s28 + $0x30] sm:$0xf]  ;;  %v4783_v39 = vld [vmem:[%s5128_s28 + $0x40] sm:$0xf0] }
 0x112   : > { %7194 = vst [vmem:[#allocation50_spill] sm:$0xff] %v5594_v27  ;;  %v1711_v41 = vpop.f32.mrf.mxu1 }
 0x113   : > { %v5596_v55 = vadd.f32 %v1711_v41, %v1552_v13  ;;  %7198 = vst [vmem:[#allocation54_spill] sm:$0xff] %v5610_v29 }
 0x116   : > { %v1627_v35 = vpop.f32.mrf.mxu2 }
 0x117   : > { %v1786_v19 = vpop.f32.mrf.mxu3 }
 0x118   : > { %v5604_v1 = vadd.f32 %v1786_v19, %v1627_v35  ;;  %v1555_v49 = vpop.f32.mrf.mxu0 }
 0x11a   : > { %7195 = vst [vmem:[#allocation51_spill] sm:$0xff] %v5604_v1  ;;  %v1714_v13 = vpop.f32.mrf.mxu1  ;;  %v3891_v1 = vld [vmem:[%s5128_s28 + $0x38] sm:$0xf] }
 0x11b   : > { %v5612_v41 = vadd.f32 %v1714_v13, %v1555_v49  ;;  %1837 = vmatmul.bf16.vlgmr.msrb.gmra.mxu2 %v5606_v63  ;;  %2155 = vmatmul.bf16.vlgmr.msrb.gmra.mxu0 %v5610_v29  ;;  %v4781_v49 = vld [vmem:[%s5128_s28 + $0x34] sm:$0xf]  ;;  %v3885_v13 = vld [vmem:[%s5128_s28 + $0x44] sm:$0xf0]  ;;  %v4784_v63 = vld [vmem:[%s5128_s28 + $0x48] sm:$0xf0]  ;;  %v5630_v29 = vor.u32 %v4783_v39, %v3883_v14 }
 0x11c   : > { %1996 = vmatmul.bf16.vlgmr.msrb.gmra.mxu3 %v5608_v33 }
 0x11d   : > { %2634 = vmatmul.bf16.vlgmr.msrb.gmra.mxu1 %v5154_v28  ;;  %7201 = vst [vmem:[#allocation57_spill] sm:$0xff] %v5630_v29  ;;  %v5632_v28 = vor.u32 %v4781_v49, %v3885_v13  ;;  %v3903_v49 = vld [vmem:[%s5128_s28 + $0x58] sm:$0xf]  ;;  %v4788_v13 = vld [vmem:[%s5128_s28 + $0x68] sm:$0xf0] }
 0x11e   : > { %v1630_v35 = vpop.f32.mrf.mxu2 }
 0x11f   : > { %v1789_v19 = vpop.f32.mrf.mxu3  ;;  %7202 = vst [vmem:[#allocation58_spill] sm:$0xff] %v5632_v28 }
 0x120   : > { %v5618_v25 = vadd.f32 %v1789_v19, %v1630_v35  ;;  %v1557_v2 = vpop.f32.mrf.mxu0  ;;  %v5634_v35 = vor.u32 %v4784_v63, %v3891_v1 }
 0x122   : > { %7199 = vst [vmem:[#allocation55_spill] sm:$0xff] %v5618_v25  ;;  %v1716_v61 = vpop.f32.mrf.mxu1 }
 0x123   : > { %v5620_v43 = vadd.f32 %v1716_v61, %v1557_v2  ;;  %7203 = vst [vmem:[#allocation59_spill] sm:$0xff] %v5634_v35 }
 0x126   : > { %v1632_v27 = vpop.f32.mrf.mxu2 }
 0x127   : > { %v1791_v33 = vpop.f32.mrf.mxu3 }
 0x128   : > { %v5628_v17 = vadd.f32 %v1791_v33, %v1632_v27  ;;  %v1560_v19 = vpop.f32.mrf.mxu0 }
 0x12a   : > { %7200 = vst [vmem:[#allocation56_spill] sm:$0xff] %v5628_v17  ;;  %v1719_v2 = vpop.f32.mrf.mxu1  ;;  %v3911_v17 = vld [vmem:[%s5128_s28 + $0x60] sm:$0xf] }
 0x12b   : > { %v5636_v61 = vadd.f32 %v1719_v2, %v1560_v19  ;;  %1842 = vmatmul.bf16.gmra.mxu2 %v5630_v29  ;;  %2160 = vmatmul.bf16.gmra.mxu0 %v5634_v35  ;;  %v4786_v19 = vld [vmem:[%s5128_s28 + $0x5c] sm:$0xf]  ;;  %v3905_v2 = vld [vmem:[%s5128_s28 + $0x6c] sm:$0xf0]  ;;  %v4789_v29 = vld [vmem:[%s5128_s28 + $0x70] sm:$0xf0]  ;;  %v5654_v35 = vor.u32 %v4788_v13, %v3903_v49 }
 0x12c   : > { %2001 = vmatmul.bf16.gmra.mxu3 %v5632_v28 }
 0x12d   : > { %2639 = vmatmul.bf16.gmra.mxu1 %v5192_v46  ;;  %7206 = vst [vmem:[#allocation62_spill] sm:$0xff] %v5654_v35  ;;  %v5656_v46 = vor.u32 %v4786_v19, %v3905_v2  ;;  %v5003_v2 = vld [vmem:[%s7039_s2 + $0x130] sm:$0xff] }
 0x12e   : > { %v1635_v33 = vpop.f32.mrf.mxu2  ;;  %3263 = vmatpush.bf16.msra.mxu1 %v5003_v2 }
 0x12f   : > { %v1794_v27 = vpop.f32.mrf.mxu3  ;;  %7207 = vst [vmem:[#allocation63_spill] sm:$0xff] %v5656_v46 }
 0x130   : > { %v5642_v63 = vadd.f32 %v1794_v27, %v1635_v33  ;;  %v1562_v1 = vpop.f32.mrf.mxu0  ;;  %v4979_v33 = vld [vmem:[%s7039_s2 + $0x70] sm:$0xff] }
 0x131   : > { %v4987_v27 = vld [vmem:[%s7039_s2 + $0xb0] sm:$0xff]  ;;  %2786 = vmatpush.bf16.msra.mxu2 %v4979_v33  ;;  %v3923_v33 = vld [vmem:[%s5128_s28 + $0x80] sm:$0xf] }
 0x132   : > { %7204 = vst [vmem:[#allocation60_spill] sm:$0xff] %v5642_v63  ;;  %v1721_v14 = vpop.f32.mrf.mxu1  ;;  %2945 = vmatpush.bf16.msra.mxu3 %v4987_v27  ;;  %v4791_v27 = vld [vmem:[%s5128_s28 + $0x84] sm:$0xf] }
 0x133   : > { %v5644_v39 = vadd.f32 %v1721_v14, %v1562_v1  ;;  %v5664_v1 = vor.u32 %v4789_v29, %v3911_v17 }
 0x135   : > { %7208 = vst [vmem:[#allocation64_spill] sm:$0xff] %v5664_v1 }
 0x136   : > { %v1637_v25 = vpop.f32.mrf.mxu2 }
 0x137   : > { %v1796_v28 = vpop.f32.mrf.mxu3 }
 0x138   : > { %v5652_v6 = vadd.f32 %v1796_v28, %v1637_v25  ;;  %v1565_v14 = vpop.f32.mrf.mxu0 }
 0x13a   : > { %7205 = vst [vmem:[#allocation61_spill] sm:$0xff] %v5652_v6  ;;  %v1724_v63 = vpop.f32.mrf.mxu1 }
 0x13b   : > { %v5666_v25 = vadd.f32 %v1724_v63, %v1565_v14  ;;  %1847 = vmatmul.bf16.gmra.mxu2 %v5654_v35  ;;  %2165 = vmatmul.bf16.gmra.mxu0 %v5664_v1  ;;  %v4995_v63 = vld [vmem:[%s7039_s2 + $0xf0] sm:$0xff]  ;;  %v3925_v14 = vld [vmem:[%s5128_s28 + $0x94] sm:$0xf0] }
 0x13c   : > { %2006 = vmatmul.bf16.gmra.mxu3 %v5656_v46  ;;  %3104 = vmatpush.bf16.msra.mxu0 %v4995_v63  ;;  %v5692_v63 = vor.u32 %v4791_v27, %v3925_v14 }
 0x13d   : > { %2644 = vmatmul.bf16.gmra.mxu1 %v5218_v60  ;;  %v4793_v60 = vld [vmem:[%s5128_s28 + $0x90] sm:$0xf0] }
 0x13e   : > { %v1640_v17 = vpop.f32.mrf.mxu2  ;;  %v5690_v35 = vor.u32 %v4793_v60, %v3923_v33  ;;  %7212 = vst [vmem:[#allocation68_spill] sm:$0xff] %v5692_v63 }
 0x13f   : > { %v1799_v29 = vpop.f32.mrf.mxu3 }
 0x140   : > { %v5672_v28 = vadd.f32 %v1799_v29, %v1640_v17  ;;  %v1567_v49 = vpop.f32.mrf.mxu0  ;;  %v3931_v17 = vld [vmem:[%s5128_s28 + $0x88] sm:$0xf]  ;;  %v4794_v29 = vld [vmem:[%s5128_s28 + $0x98] sm:$0xf0]  ;;  %7211 = vst [vmem:[#allocation67_spill] sm:$0xff] %v5690_v35 }
 0x142   : > { %7209 = vst [vmem:[#allocation65_spill] sm:$0xff] %v5672_v28  ;;  %v1726_v13 = vpop.f32.mrf.mxu1 }
 0x143   : > { %v5677_v19 = vadd.f32 %v1726_v13, %v1567_v49  ;;  %v5694_v49 = vor.u32 %v4794_v29, %v3931_v17  ;;  %v3943_v17 = vld [vmem:[%s5128_s28 + $0xa8] sm:$0xf]  ;;  %v4796_v29 = vld [vmem:[%s5128_s28 + $0xac] sm:$0xf] }
 0x145   : > { %7213 = vst [vmem:[#allocation69_spill] sm:$0xff] %v5694_v49 }
 0x146   : > { %v1642_v28 = vpop.f32.mrf.mxu2 }
 0x147   : > { %v1801_v1 = vpop.f32.mrf.mxu3 }
 0x148   : > { %v5688_v46 = vadd.f32 %v1801_v1, %v1642_v28  ;;  %v1570_v13 = vpop.f32.mrf.mxu0 }
 0x14a   : > { %7210 = vst [vmem:[#allocation66_spill] sm:$0xff] %v5688_v46  ;;  %v1729_v6 = vpop.f32.mrf.mxu1  ;;  %v3951_v46 = vld [vmem:[%s5128_s28 + $0xb0] sm:$0xf] }
 0x14b   : > { %v5696_v2 = vadd.f32 %v1729_v6, %v1570_v13  ;;  %1852 = vmatmul.bf16.gmra.mxu2 %v5690_v35  ;;  %2170 = vmatmul.bf16.gmra.mxu0 %v5694_v49  ;;  %v4798_v6 = vld [vmem:[%s5128_s28 + $0xb8] sm:$0xf0]  ;;  %v3945_v13 = vld [vmem:[%s5128_s28 + $0xbc] sm:$0xf0]  ;;  %v4799_v35 = vld [vmem:[%s5128_s28 + $0xc0] sm:$0xf0] }
 0x14c   : > { %2011 = vmatmul.bf16.gmra.mxu3 %v5692_v63  ;;  %v5714_v49 = vor.u32 %v4798_v6, %v3943_v17 }
 0x14d   : > { %2649 = vmatmul.bf16.gmra.mxu1 %v5244_v10  ;;  %v5716_v10 = vor.u32 %v4796_v29, %v3945_v13  ;;  %v3963_v29 = vld [vmem:[%s5128_s28 + $0xd0] sm:$0xf]  ;;  %v4803_v13 = vld [vmem:[%s5128_s28 + $0xe0] sm:$0xf0] }
 0x14e   : > { %v1645_v1 = vpop.f32.mrf.mxu2  ;;  %7216 = vst [vmem:[#allocation72_spill] sm:$0xff] %v5714_v49 }
 0x14f   : > { %v1804_v28 = vpop.f32.mrf.mxu3  ;;  %7217 = vst [vmem:[#allocation73_spill] sm:$0xff] %v5716_v10 }
 0x150   : > { %v5702_v33 = vadd.f32 %v1804_v28, %v1645_v1  ;;  %v1572_v60 = vpop.f32.mrf.mxu0  ;;  %v5718_v1 = vor.u32 %v4799_v35, %v3951_v46 }
 0x152   : > { %7214 = vst [vmem:[#allocation70_spill] sm:$0xff] %v5702_v33  ;;  %v1731_v27 = vpop.f32.mrf.mxu1 }
 0x153   : > { %v5704_v14 = vadd.f32 %v1731_v27, %v1572_v60  ;;  %7218 = vst [vmem:[#allocation74_spill] sm:$0xff] %v5718_v1 }
 0x156   : > { %v1647_v23 = vpop.f32.mrf.mxu2 }
 0x157   : > { %v1806_v63 = vpop.f32.mrf.mxu3 }
 0x158   : > { %v5712_v12 = vadd.f32 %v1806_v63, %v1647_v23  ;;  %v1575_v28 = vpop.f32.mrf.mxu0 }
 0x15a   : > { %7215 = vst [vmem:[#allocation71_spill] sm:$0xff] %v5712_v12  ;;  %v1734_v60 = vpop.f32.mrf.mxu1  ;;  %v3971_v12 = vld [vmem:[%s5128_s28 + $0xd8] sm:$0xf] }
 0x15b   : > { %v5720_v27 = vadd.f32 %v1734_v60, %v1575_v28  ;;  %1857 = vmatmul.bf16.gmra.mxu2 %v5714_v49  ;;  %2175 = vmatmul.bf16.gmra.mxu0 %v5718_v1  ;;  %v4801_v28 = vld [vmem:[%s5128_s28 + $0xd4] sm:$0xf]  ;;  %v3965_v60 = vld [vmem:[%s5128_s28 + $0xe4] sm:$0xf0]  ;;  %v4804_v49 = vld [vmem:[%s5128_s28 + $0xe8] sm:$0xf0]  ;;  %v5738_v1 = vor.u32 %v4803_v13, %v3963_v29 }
 0x15c   : > { %2016 = vmatmul.bf16.gmra.mxu3 %v5716_v10 }
 0x15d   : > { %2654 = vmatmul.bf16.gmra.mxu1 %v5270_v24  ;;  %7221 = vst [vmem:[#allocation77_spill] sm:$0xff] %v5738_v1  ;;  %v5740_v24 = vor.u32 %v4801_v28, %v3965_v60  ;;  %v4978_v28 = vld [vmem:[%s7039_s2 + $0x68] sm:$0xff] }
 0x15e   : > { %v1650_v23 = vpop.f32.mrf.mxu2  ;;  %v4986_v60 = vld [vmem:[%s7039_s2 + $0xa8] sm:$0xff]  ;;  %2787 = vmatpush.bf16.msra.mxu2 %v4978_v28 }
 0x15f   : > { %v1809_v63 = vpop.f32.mrf.mxu3  ;;  %7222 = vst [vmem:[#allocation78_spill] sm:$0xff] %v5740_v24  ;;  %2946 = vmatpush.bf16.msra.mxu3 %v4986_v60 }
 0x160   : > { %v5726_v35 = vadd.f32 %v1809_v63, %v1650_v23  ;;  %v1577_v46 = vpop.f32.mrf.mxu0  ;;  %v5742_v23 = vor.u32 %v4804_v49, %v3971_v12 }
 0x162   : > { %7219 = vst [vmem:[#allocation75_spill] sm:$0xff] %v5726_v35  ;;  %v1736_v17 = vpop.f32.mrf.mxu1 }
 0x163   : > { %v5728_v6 = vadd.f32 %v1736_v17, %v1577_v46  ;;  %7223 = vst [vmem:[#allocation79_spill] sm:$0xff] %v5742_v23 }
 0x166   : > { %v1652_v33 = vpop.f32.mrf.mxu2 }
 0x167   : > { %v1811_v10 = vpop.f32.mrf.mxu3 }
 0x168   : > { %v5736_v51 = vadd.f32 %v1811_v10, %v1652_v33  ;;  %v1580_v63 = vpop.f32.mrf.mxu0 }
 0x16a   : > { %7220 = vst [vmem:[#allocation76_spill] sm:$0xff] %v5736_v51  ;;  %v1739_v46 = vpop.f32.mrf.mxu1 }
 0x16b   : > { %v5744_v17 = vadd.f32 %v1739_v46, %v1580_v63  ;;  %1862 = vmatmul.bf16.gmra.mxu2 %v5738_v1  ;;  %2180 = vmatmul.bf16.gmra.mxu0 %v5742_v23  ;;  %v3983_v63 = vld [vmem:[%s5128_s28 + $0xf8] sm:$0xf]  ;;  %v4808_v46 = vld [vmem:[%s5128_s28 + $0x108] sm:$0xf0]  ;;  %v3985_v23 = vld [vmem:[%s5128_s28 + $0x10c] sm:$0xf0] }
 0x16c   : > { %2021 = vmatmul.bf16.gmra.mxu3 %v5740_v24 }
 0x16d   : > { %2659 = vmatmul.bf16.gmra.mxu1 %v5296_v42  ;;  %v4806_v42 = vld [vmem:[%s5128_s28 + $0xfc] sm:$0xf] }
 0x16e   : > { %v1655_v12 = vpop.f32.mrf.mxu2  ;;  %v5770_v1 = vor.u32 %v4806_v42, %v3985_v23  ;;  %v4813_v42 = vld [vmem:[%s5128_s28 + $0x130] sm:$0xf0] }
 0x16f   : > { %v1814_v49 = vpop.f32.mrf.mxu3 }
 0x170   : > { %v5750_v33 = vadd.f32 %v1814_v49, %v1655_v12  ;;  %v1582_v10 = vpop.f32.mrf.mxu0  ;;  %v3991_v12 = vld [vmem:[%s5128_s28 + $0x100] sm:$0xf]  ;;  %v4809_v49 = vld [vmem:[%s5128_s28 + $0x110] sm:$0xf0]  ;;  %7227 = vst [vmem:[#allocation83_spill] sm:$0xff] %v5770_v1 }
 0x171   : > { %v5772_v51 = vor.u32 %v4809_v49, %v3991_v12  ;;  %v4005_v12 = vld [vmem:[%s5128_s28 + $0x134] sm:$0xf0]  ;;  %v4011_v49 = vld [vmem:[%s5128_s28 + $0x128] sm:$0xf] }
 0x172   : > { %7224 = vst [vmem:[#allocation80_spill] sm:$0xff] %v5750_v33  ;;  %v1741_v29 = vpop.f32.mrf.mxu1 }
 0x173   : > { %v5752_v13 = vadd.f32 %v1741_v29, %v1582_v10  ;;  %v5768_v29 = vor.u32 %v4808_v46, %v3983_v63  ;;  %7228 = vst [vmem:[#allocation84_spill] sm:$0xff] %v5772_v51  ;;  %v4003_v63 = vld [vmem:[%s5128_s28 + $0x120] sm:$0xf]  ;;  %v5002_v46 = vld [vmem:[%s7039_s2 + $0x128] sm:$0xff] }
 0x174   : > { %3264 = vmatpush.bf16.msra.mxu1 %v5002_v46 }
 0x175   : > { %7226 = vst [vmem:[#allocation82_spill] sm:$0xff] %v5768_v29 }
 0x176   : > { %v1657_v33 = vpop.f32.mrf.mxu2 }
 0x177   : > { %v1816_v24 = vpop.f32.mrf.mxu3 }
 0x178   : > { %v5766_v10 = vadd.f32 %v1816_v24, %v1657_v33  ;;  %v1585_v35 = vpop.f32.mrf.mxu0  ;;  %v4994_v24 = vld [vmem:[%s7039_s2 + $0xe8] sm:$0xff] }
 0x179   : > { %3105 = vmatpush.bf16.msra.mxu0 %v4994_v24 }
 0x17a   : > { %7225 = vst [vmem:[#allocation81_spill] sm:$0xff] %v5766_v10  ;;  %v1744_v37 = vpop.f32.mrf.mxu1 }
 0x17b   : > { %v5774_v54 = vadd.f32 %v1744_v37, %v1585_v35  ;;  %1867 = vmatmul.bf16.gmra.mxu2 %v5768_v29  ;;  %2185 = vmatmul.bf16.gmra.mxu0 %v5772_v51  ;;  %v4814_v51 = vld [vmem:[%s5128_s28 + $0x138] sm:$0xf0] }
 0x17c   : > { %2026 = vmatmul.bf16.gmra.mxu3 %v5770_v1 }
 0x17d   : > { %2664 = vmatmul.bf16.gmra.mxu1 %v5322_v0  ;;  %v4811_v0 = vld [vmem:[%s5128_s28 + $0x124] sm:$0xf] }
 0x17e   : > { %v1660_v23 = vpop.f32.mrf.mxu2 }
 0x17f   : > { %v1819_v33 = vpop.f32.mrf.mxu3 }
 0x180   : > { %v5783_v37 = vadd.f32 %v1819_v33, %v1660_v23  ;;  %v1587_v35 = vpop.f32.mrf.mxu0  ;;  %v5798_v23 = vor.u32 %v4813_v42, %v4003_v63  ;;  %v5800_v33 = vor.u32 %v4811_v0, %v4005_v12  ;;  %v4023_v0 = vld [vmem:[%s5128_s28 + $0x148] sm:$0xf]  ;;  %v4816_v12 = vld [vmem:[%s5128_s28 + $0x14c] sm:$0xf] }
 0x182   : > { %7229 = vst [vmem:[#allocation85_spill] sm:$0xff] %v5783_v37  ;;  %v1746_v28 = vpop.f32.mrf.mxu1 }
 0x183   : > { %v5785_v60 = vadd.f32 %v1746_v28, %v1587_v35  ;;  %7231 = vst [vmem:[#allocation87_spill] sm:$0xff] %v5798_v23  ;;  %v5802_v35 = vor.u32 %v4814_v51, %v4011_v49  ;;  %v4025_v49 = vld [vmem:[%s5128_s28 + $0x15c] sm:$0xf0] }
 0x184   : > { %7232 = vst [vmem:[#allocation88_spill] sm:$0xff] %v5800_v33 }
 0x185   : > { %7233 = vst [vmem:[#allocation89_spill] sm:$0xff] %v5802_v35 }
 0x186   : > { %v1662_v1 = vpop.f32.mrf.mxu2 }
 0x187   : > { %v1821_v29 = vpop.f32.mrf.mxu3 }
 0x188   : > { %v5796_v24 = vadd.f32 %v1821_v29, %v1662_v1  ;;  %v1590_v28 = vpop.f32.mrf.mxu0 }
 0x18a   : > { %7230 = vst [vmem:[#allocation86_spill] sm:$0xff] %v5796_v24  ;;  %v1749_v37 = vpop.f32.mrf.mxu1 }
 0x18b   : > { %v5804_v10 = vadd.f32 %v1749_v37, %v1590_v28  ;;  %1872 = vmatmul.bf16.gmra.mxu2 %v5798_v23  ;;  %2190 = vmatmul.bf16.gmra.mxu0 %v5802_v35  ;;  %v4818_v37 = vld [vmem:[%s5128_s28 + $0x158] sm:$0xf0]  ;;  %v4031_v28 = vld [vmem:[%s5128_s28 + $0x150] sm:$0xf]  ;;  %v4819_v23 = vld [vmem:[%s5128_s28 + $0x160] sm:$0xf0] }
 0x18c   : > { %2031 = vmatmul.bf16.gmra.mxu3 %v5800_v33  ;;  %v5822_v35 = vor.u32 %v4818_v37, %v4023_v0 }
 0x18d   : > { %2669 = vmatmul.bf16.gmra.mxu1 %v5348_v18  ;;  %v5824_v18 = vor.u32 %v4816_v12, %v4025_v49  ;;  %v4043_v49 = vld [vmem:[%s5128_s28 + $0x170] sm:$0xf] }
 0x18e   : > { %v1665_v1 = vpop.f32.mrf.mxu2  ;;  %7236 = vst [vmem:[#allocation92_spill] sm:$0xff] %v5822_v35 }
 0x18f   : > { %v1824_v29 = vpop.f32.mrf.mxu3  ;;  %7237 = vst [vmem:[#allocation93_spill] sm:$0xff] %v5824_v18 }
 0x190   : > { %v5810_v51 = vadd.f32 %v1824_v29, %v1665_v1  ;;  %v1592_v63 = vpop.f32.mrf.mxu0  ;;  %v5826_v1 = vor.u32 %v4819_v23, %v4031_v28  ;;  %v4823_v28 = vld [vmem:[%s5128_s28 + $0x180] sm:$0xf0] }
 0x191   : > { %v5846_v31 = vor.u32 %v4823_v28, %v4043_v49  ;;  %v4985_v49 = vld [vmem:[%s7039_s2 + $0xa0] sm:$0xff]  ;;  %v4826_v28 = vld [vmem:[%s5128_s28 + $0x19c] sm:$0xf] }
 0x192   : > { %7234 = vst [vmem:[#allocation90_spill] sm:$0xff] %v5810_v51  ;;  %v1751_v46 = vpop.f32.mrf.mxu1  ;;  %2947 = vmatpush.bf16.msra.mxu3 %v4985_v49 }
 0x193   : > { %v5812_v42 = vadd.f32 %v1751_v46, %v1592_v63  ;;  %7238 = vst [vmem:[#allocation94_spill] sm:$0xff] %v5826_v1 }
 0x196   : > { %v1667_v24 = vpop.f32.mrf.mxu2 }
 0x197   : > { %v1826_v33 = vpop.f32.mrf.mxu3 }
 0x198   : > { %v5820_v32 = vadd.f32 %v1826_v33, %v1667_v24  ;;  %v2156_v29 = vpop.f32.mrf.mxu0 }
 0x19a   : > { %7235 = vst [vmem:[#allocation91_spill] sm:$0xff] %v5820_v32  ;;  %v5828_v63 = vpop.f32.mrf.mxu1  ;;  %v4051_v32 = vld [vmem:[%s5128_s28 + $0x178] sm:$0xf] }
 0x19b   : > { %7239 = vst [vmem:[#allocation95_spill] sm:$0xff] %v5828_v63  ;;  %1877 = vmatmul.bf16.gmra.mxu2 %v5822_v35  ;;  %2195 = vmatmul.bf16.gmra.mxu0 %v5826_v1  ;;  %v4821_v63 = vld [vmem:[%s5128_s28 + $0x174] sm:$0xf]  ;;  %v4045_v35 = vld [vmem:[%s5128_s28 + $0x184] sm:$0xf0] }
 0x19c   : > { %2036 = vmatmul.bf16.gmra.mxu3 %v5824_v18  ;;  %v4824_v18 = vld [vmem:[%s5128_s28 + $0x188] sm:$0xf0]  ;;  %v5848_v57 = vor.u32 %v4821_v63, %v4045_v35 }
 0x19d   : > { %2674 = vmatmul.bf16.gmra.mxu1 %v5374_v48 }
 0x19e   : > { %v1838_v24 = vpop.f32.mrf.mxu2 }
 0x19f   : > { %v1997_v33 = vpop.f32.mrf.mxu3  ;;  %v1839_v23 = vadd.f32 %v1838_v24, %v5378_v52  ;;  %v5850_v52 = vor.u32 %v4824_v18, %v4051_v32 }
 0x1a0   : > { %v2158_v0 = vpop.f32.mrf.mxu0 }
 0x1a1   : > { %v1998_v46 = vadd.f32 %v1997_v33, %v1839_v23  ;;  %7240 = vst [vmem:[#allocation96_spill] sm:$0xff] %v5850_v52 }
 0x1a2   : > { %v5835_v37 = vpop.f32.mrf.mxu1 }
 0x1a3   : > { %v5837_v12 = vadd.f32 %v2156_v29, %v1998_v46  ;;  %v4063_v46 = vld [vmem:[%s5128_s28 + $0x198] sm:$0xf] }
 0x1a6   : > { %v1840_v51 = vpop.f32.mrf.mxu2 }
 0x1a7   : > { %v1999_v1 = vpop.f32.mrf.mxu3  ;;  %v1841_v48 = vadd.f32 %v1840_v51, %v5392_v4 }
 0x1a8   : > { %v2161_v29 = vpop.f32.mrf.mxu0 }
 0x1a9   : > { %v2000_v24 = vadd.f32 %v1999_v1, %v1841_v48  ;;  %v4065_v48 = vld [vmem:[%s5128_s28 + $0x1ac] sm:$0xf0] }
 0x1aa   : > { %v5852_v33 = vpop.f32.mrf.mxu1 }
 0x1ab   : > { %7241 = vst [vmem:[#allocation97_spill] sm:$0xff] %v5852_v33  ;;  %v5854_v23 = vadd.f32 %v2158_v0, %v2000_v24  ;;  %1882 = vmatmul.bf16.gmra.mxu2 %v5846_v31  ;;  %2200 = vmatmul.bf16.gmra.mxu0 %v5850_v52  ;;  %v4977_v0 = vld [vmem:[%s7039_s2 + $0x60] sm:$0xff] }
 0x1ac   : > { %2041 = vmatmul.bf16.gmra.mxu3 %v5848_v57  ;;  %v4071_v24 = vld [vmem:[%s5128_s28 + $0x1a0] sm:$0xf]  ;;  %2788 = vmatpush.bf16.msra.mxu2 %v4977_v0 }
 0x1ad   : > { %7242 = vst [vmem:[#allocation98_spill] sm:$0xff] %v5854_v23  ;;  %2679 = vmatmul.bf16.gmra.mxu1 %v5408_v34  ;;  %v4828_v34 = vld [vmem:[%s5128_s28 + $0x1a8] sm:$0xf0] }
 0x1ae   : > { %v1843_v4 = vpop.f32.mrf.mxu2 }
 0x1af   : > { %v2002_v32 = vpop.f32.mrf.mxu3  ;;  %v1844_v35 = vadd.f32 %v1843_v4, %v5412_v50  ;;  %v4829_v50 = vld [vmem:[%s5128_s28 + $0x1b0] sm:$0xf0] }
 0x1b0   : > { %v2163_v18 = vpop.f32.mrf.mxu0 }
 0x1b1   : > { %v2003_v51 = vadd.f32 %v2002_v32, %v1844_v35  ;;  %v5878_v35 = vor.u32 %v4828_v34, %v4063_v46  ;;  %v5001_v46 = vld [vmem:[%s7039_s2 + $0x120] sm:$0xff] }
 0x1b2   : > { %v5861_v1 = vpop.f32.mrf.mxu1  ;;  %3265 = vmatpush.bf16.msra.mxu1 %v5001_v46 }
 0x1b3   : > { %7243 = vst [vmem:[#allocation99_spill] sm:$0xff] %v5861_v1  ;;  %v5863_v63 = vadd.f32 %v2161_v29, %v2003_v51  ;;  %v5880_v51 = vor.u32 %v4826_v28, %v4065_v48  ;;  %v5882_v1 = vor.u32 %v4829_v50, %v4071_v24  ;;  %v4083_v24 = vld [vmem:[%s5128_s28 + $0x1c0] sm:$0xf]  ;;  %v4833_v50 = vld [vmem:[%s5128_s28 + $0x1d0] sm:$0xf0] }
 0x1b4   : > { %v5910_v46 = vor.u32 %v4833_v50, %v4083_v24 }
 0x1b5   : > { %7244 = vst [vmem:[#allocation100_spill] sm:$0xff] %v5863_v63 }
 0x1b6   : > { %v1845_v4 = vpop.f32.mrf.mxu2  ;;  %7245 = vst [vmem:[#allocation101_spill] sm:$0xff] %v5882_v1 }
 0x1b7   : > { %v2004_v32 = vpop.f32.mrf.mxu3  ;;  %v1846_v29 = vadd.f32 %v1845_v4, %v5426_v5  ;;  %v4993_v5 = vld [vmem:[%s7039_s2 + $0xe0] sm:$0xff] }
 0x1b8   : > { %v2166_v33 = vpop.f32.mrf.mxu0  ;;  %3106 = vmatpush.bf16.msra.mxu0 %v4993_v5  ;;  %v4831_v4 = vld [vmem:[%s5128_s28 + $0x1c4] sm:$0xf] }
 0x1b9   : > { %v2005_v63 = vadd.f32 %v2004_v32, %v1846_v29  ;;  %v4085_v32 = vld [vmem:[%s5128_s28 + $0x1d4] sm:$0xf0]  ;;  %v4091_v29 = vld [vmem:[%s5128_s28 + $0x1c8] sm:$0xf] }
 0x1ba   : > { %v5884_v23 = vpop.f32.mrf.mxu1 }
 0x1bb   : > { %7246 = vst [vmem:[#allocation102_spill] sm:$0xff] %v5884_v23  ;;  %v5886_v52 = vadd.f32 %v2163_v18, %v2005_v63  ;;  %1887 = vmatmul.bf16.gmra.mxu2 %v5878_v35  ;;  %2205 = vmatmul.bf16.gmra.mxu0 %v5882_v1  ;;  %v4834_v23 = vld [vmem:[%s5128_s28 + $0x1d8] sm:$0xf0]  ;;  %v5912_v1 = vor.u32 %v4831_v4, %v4085_v32  ;;  %v4103_v4 = vld [vmem:[%s5128_s28 + $0x1e8] sm:$0xf] }
 0x1bc   : > { %2046 = vmatmul.bf16.gmra.mxu3 %v5880_v51  ;;  %v4838_v32 = vld [vmem:[%s5128_s28 + $0x1f8] sm:$0xf0] }
 0x1bd   : > { %7247 = vst [vmem:[#allocation103_spill] sm:$0xff] %v5886_v52  ;;  %2684 = vmatmul.bf16.gmra.mxu1 %v5445_v56 }
 0x1be   : > { %v1848_v18 = vpop.f32.mrf.mxu2  ;;  %7248 = vst [vmem:[#allocation104_spill] sm:$0xff] %v5912_v1 }
 0x1bf   : > { %v2007_v63 = vpop.f32.mrf.mxu3  ;;  %v1849_v0 = vadd.f32 %v1848_v18, %v5449_v30  ;;  %v5914_v30 = vor.u32 %v4834_v23, %v4091_v29  ;;  %v4836_v29 = vld [vmem:[%s5128_s28 + $0x1ec] sm:$0xf] }
 0x1c0   : > { %v2168_v34 = vpop.f32.mrf.mxu0 }
 0x1c1   : > { %v2008_v49 = vadd.f32 %v2007_v63, %v1849_v0  ;;  %7249 = vst [vmem:[#allocation105_spill] sm:$0xff] %v5914_v30 }
 0x1c2   : > { %v5899_v28 = vpop.f32.mrf.mxu1 }
 0x1c3   : > { %v5901_v48 = vadd.f32 %v2166_v33, %v2008_v49 }
 0x1c6   : > { %v1850_v52 = vpop.f32.mrf.mxu2 }
 0x1c7   : > { %v2009_v56 = vpop.f32.mrf.mxu3  ;;  %v1851_v5 = vadd.f32 %v1850_v52, %v5460_v15 }
 0x1c8   : > { %v2171_v33 = vpop.f32.mrf.mxu0 }
 0x1c9   : > { %v2010_v18 = vadd.f32 %v2009_v56, %v1851_v5  ;;  %v4105_v56 = vld [vmem:[%s5128_s28 + $0x1fc] sm:$0xf0]  ;;  %v4111_v5 = vld [vmem:[%s5128_s28 + $0x1f0] sm:$0xf] }
 0x1ca   : > { %v5916_v63 = vpop.f32.mrf.mxu1 }
 0x1cb   : > { %7250 = vst [vmem:[#allocation106_spill] sm:$0xff] %v5916_v63  ;;  %v5918_v0 = vadd.f32 %v2168_v34, %v2010_v18  ;;  %1892 = vmatmul.bf16.gmra.mxu2 %v5910_v46  ;;  %2210 = vmatmul.bf16.gmra.mxu0 %v5914_v30  ;;  %v4839_v18 = vld [vmem:[%s5128_s28 + $0x200] sm:$0xf0]  ;;  %v5936_v30 = vor.u32 %v4838_v32, %v4103_v4 }
 0x1cc   : > { %2051 = vmatmul.bf16.gmra.mxu3 %v5912_v1  ;;  %v5938_v1 = vor.u32 %v4836_v29, %v4105_v56  ;;  %v4123_v29 = vld [vmem:[%s5128_s28 + $0x210] sm:$0xf]  ;;  %v4843_v56 = vld [vmem:[%s5128_s28 + $0x220] sm:$0xf0] }
 0x1cd   : > { %7251 = vst [vmem:[#allocation107_spill] sm:$0xff] %v5918_v0  ;;  %2689 = vmatmul.bf16.gmra.mxu1 %v5476_v7 }
 0x1ce   : > { %v1853_v15 = vpop.f32.mrf.mxu2  ;;  %7252 = vst [vmem:[#allocation108_spill] sm:$0xff] %v5938_v1 }
 0x1cf   : > { %v2012_v52 = vpop.f32.mrf.mxu3  ;;  %v1854_v23 = vadd.f32 %v1853_v15, %v5480_v59  ;;  %v5940_v59 = vor.u32 %v4839_v18, %v4111_v5  ;;  %v4841_v5 = vld [vmem:[%s5128_s28 + $0x214] sm:$0xf]  ;;  %v4125_v18 = vld [vmem:[%s5128_s28 + $0x224] sm:$0xf0] }
 0x1d0   : > { %v2173_v24 = vpop.f32.mrf.mxu0 }
 0x1d1   : > { %v2013_v49 = vadd.f32 %v2012_v52, %v1854_v23  ;;  %7253 = vst [vmem:[#allocation109_spill] sm:$0xff] %v5940_v59 }
 0x1d2   : > { %v5925_v50 = vpop.f32.mrf.mxu1 }
 0x1d3   : > { %v5927_v34 = vadd.f32 %v2171_v33, %v2013_v49 }
 0x1d6   : > { %v1855_v63 = vpop.f32.mrf.mxu2 }
 0x1d7   : > { %v2014_v0 = vpop.f32.mrf.mxu3  ;;  %v1856_v7 = vadd.f32 %v1855_v63, %v5494_v21 }
 0x1d8   : > { %v2176_v33 = vpop.f32.mrf.mxu0 }
 0x1d9   : > { %v2015_v15 = vadd.f32 %v2014_v0, %v1856_v7  ;;  %v4131_v7 = vld [vmem:[%s5128_s28 + $0x218] sm:$0xf] }
 0x1da   : > { %v5942_v52 = vpop.f32.mrf.mxu1 }
 0x1db   : > { %7254 = vst [vmem:[#allocation110_spill] sm:$0xff] %v5942_v52  ;;  %v5944_v23 = vadd.f32 %v2173_v24, %v2015_v15  ;;  %1897 = vmatmul.bf16.gmra.mxu2 %v5936_v30  ;;  %2215 = vmatmul.bf16.gmra.mxu0 %v5940_v59  ;;  %v4844_v15 = vld [vmem:[%s5128_s28 + $0x228] sm:$0xf0]  ;;  %v5962_v59 = vor.u32 %v4843_v56, %v4123_v29 }
 0x1dc   : > { %2056 = vmatmul.bf16.gmra.mxu3 %v5938_v1  ;;  %v5964_v1 = vor.u32 %v4841_v5, %v4125_v18 }
 0x1dd   : > { %7255 = vst [vmem:[#allocation111_spill] sm:$0xff] %v5944_v23  ;;  %2694 = vmatmul.bf16.gmra.mxu1 %v5516_v20 }
 0x1de   : > { %v1858_v21 = vpop.f32.mrf.mxu2 }
 0x1df   : > { %v2017_v63 = vpop.f32.mrf.mxu3  ;;  %v1859_v0 = vadd.f32 %v1858_v21, %v5520_v36  ;;  %v5966_v36 = vor.u32 %v4844_v15, %v4131_v7  ;;  %v4143_v7 = vld [vmem:[%s5128_s28 + $0x238] sm:$0xf]  ;;  %v4848_v15 = vld [vmem:[%s5128_s28 + $0x248] sm:$0xf0] }
 0x1e0   : > { %v2178_v4 = vpop.f32.mrf.mxu0 }
 0x1e1   : > { %v2018_v49 = vadd.f32 %v2017_v63, %v1859_v0 }
 0x1e2   : > { %v5951_v32 = vpop.f32.mrf.mxu1 }
 0x1e3   : > { %v5953_v24 = vadd.f32 %v2176_v33, %v2018_v49 }
 0x1e6   : > { %v1860_v52 = vpop.f32.mrf.mxu2 }
 0x1e7   : > { %v2019_v23 = vpop.f32.mrf.mxu3  ;;  %v1861_v20 = vadd.f32 %v1860_v52, %v5528_v3  ;;  %v4976_v3 = vld [vmem:[%s7039_s2 + $0x58] sm:$0xff] }
 0x1e8   : > { %v2181_v63 = vpop.f32.mrf.mxu0  ;;  %v4984_v52 = vld [vmem:[%s7039_s2 + $0x98] sm:$0xff]  ;;  %2789 = vmatpush.bf16.msra.mxu2 %v4976_v3  ;;  %v4151_v3 = vld [vmem:[%s5128_s28 + $0x240] sm:$0xf] }
 0x1e9   : > { %v2020_v21 = vadd.f32 %v2019_v23, %v1861_v20  ;;  %2948 = vmatpush.bf16.msra.mxu3 %v4984_v52  ;;  %v4846_v20 = vld [vmem:[%s5128_s28 + $0x23c] sm:$0xf] }
 0x1ea   : > { %v5968_v33 = vpop.f32.mrf.mxu1 }
 0x1eb   : > { %7256 = vst [vmem:[#allocation112_spill] sm:$0xff] %v5968_v33  ;;  %v5970_v0 = vadd.f32 %v2178_v4, %v2020_v21  ;;  %1902 = vmatmul.bf16.gmra.mxu2 %v5962_v59  ;;  %2220 = vmatmul.bf16.gmra.mxu0 %v5966_v36  ;;  %v4145_v21 = vld [vmem:[%s5128_s28 + $0x24c] sm:$0xf0]  ;;  %v4849_v33 = vld [vmem:[%s5128_s28 + $0x250] sm:$0xf0] }
 0x1ec   : > { %2061 = vmatmul.bf16.gmra.mxu3 %v5964_v1 }
 0x1ed   : > { %7257 = vst [vmem:[#allocation113_spill] sm:$0xff] %v5970_v0  ;;  %2699 = vmatmul.bf16.gmra.mxu1 %v5544_v45  ;;  %v4992_v45 = vld [vmem:[%s7039_s2 + $0xd8] sm:$0xff] }
 0x1ee   : > { %v1863_v23 = vpop.f32.mrf.mxu2  ;;  %3107 = vmatpush.bf16.msra.mxu0 %v4992_v45 }
 0x1ef   : > { %v2022_v49 = vpop.f32.mrf.mxu3  ;;  %v1864_v4 = vadd.f32 %v1863_v23, %v5548_v47  ;;  %v5997_v23 = vor.u32 %v4848_v15, %v4143_v7 }
 0x1f0   : > { %v2183_v56 = vpop.f32.mrf.mxu0 }
 0x1f1   : > { %v2023_v29 = vadd.f32 %v2022_v49, %v1864_v4  ;;  %v5999_v49 = vor.u32 %v4846_v20, %v4145_v21  ;;  %v4163_v21 = vld [vmem:[%s5128_s28 + $0x260] sm:$0xf] }
 0x1f2   : > { %v5983_v5 = vpop.f32.mrf.mxu1 }
 0x1f3   : > { %7258 = vst [vmem:[#allocation114_spill] sm:$0xff] %v5983_v5  ;;  %v5985_v18 = vadd.f32 %v2181_v63, %v2023_v29  ;;  %v6001_v63 = vor.u32 %v4849_v33, %v4151_v3  ;;  %v4853_v3 = vld [vmem:[%s5128_s28 + $0x270] sm:$0xf0] }
 0x1f4   : > { %7260 = vst [vmem:[#allocation116_spill] sm:$0xff] %v5999_v49 }
 0x1f5   : > { %7259 = vst [vmem:[#allocation115_spill] sm:$0xff] %v5985_v18 }
 0x1f6   : > { %v1865_v52 = vpop.f32.mrf.mxu2  ;;  %7261 = vst [vmem:[#allocation117_spill] sm:$0xff] %v6001_v63 }
 0x1f7   : > { %v2024_v0 = vpop.f32.mrf.mxu3  ;;  %v1866_v47 = vadd.f32 %v1865_v52, %v5562_v9  ;;  %v5000_v9 = vld [vmem:[%s7039_s2 + $0x118] sm:$0xff]  ;;  %v4851_v52 = vld [vmem:[%s5128_s28 + $0x264] sm:$0xf] }
 0x1f8   : > { %v2186_v29 = vpop.f32.mrf.mxu0  ;;  %3266 = vmatpush.bf16.msra.mxu1 %v5000_v9  ;;  %v6026_v9 = vor.u32 %v4853_v3, %v4163_v21  ;;  %v4183_v3 = vld [vmem:[%s5128_s28 + $0x288] sm:$0xf] }
 0x1f9   : > { %v2025_v4 = vadd.f32 %v2024_v0, %v1866_v47  ;;  %v4165_v47 = vld [vmem:[%s5128_s28 + $0x274] sm:$0xf0] }
 0x1fa   : > { %v6003_v5 = vpop.f32.mrf.mxu1 }
 0x1fb   : > { %7262 = vst [vmem:[#allocation118_spill] sm:$0xff] %v6003_v5  ;;  %v6005_v18 = vadd.f32 %v2183_v56, %v2025_v4  ;;  %1907 = vmatmul.bf16.gmra.mxu2 %v5997_v23  ;;  %2225 = vmatmul.bf16.gmra.mxu0 %v6001_v63  ;;  %v4171_v4 = vld [vmem:[%s5128_s28 + $0x268] sm:$0xf]  ;;  %v4854_v5 = vld [vmem:[%s5128_s28 + $0x278] sm:$0xf0] }
 0x1fc   : > { %2066 = vmatmul.bf16.gmra.mxu3 %v5999_v49  ;;  %v6028_v49 = vor.u32 %v4851_v52, %v4165_v47  ;;  %v4858_v52 = vld [vmem:[%s5128_s28 + $0x298] sm:$0xf0]  ;;  %v4856_v47 = vld [vmem:[%s5128_s28 + $0x28c] sm:$0xf] }
 0x1fd   : > { %7263 = vst [vmem:[#allocation119_spill] sm:$0xff] %v6005_v18  ;;  %2704 = vmatmul.bf16.gmra.mxu1 %v5584_v11 }
 0x1fe   : > { %v1868_v33 = vpop.f32.mrf.mxu2  ;;  %7264 = vst [vmem:[#allocation120_spill] sm:$0xff] %v6028_v49 }
 0x1ff   : > { %v2027_v0 = vpop.f32.mrf.mxu3  ;;  %v1869_v56 = vadd.f32 %v1868_v33, %v5588_v53  ;;  %v6030_v53 = vor.u32 %v4854_v5, %v4171_v4  ;;  %v4185_v4 = vld [vmem:[%s5128_s28 + $0x29c] sm:$0xf0] }
 0x200   : > { %v2188_v45 = vpop.f32.mrf.mxu0 }
 0x201   : > { %v2028_v7 = vadd.f32 %v2027_v0, %v1869_v56  ;;  %7265 = vst [vmem:[#allocation121_spill] sm:$0xff] %v6030_v53 }
 0x202   : > { %v6015_v15 = vpop.f32.mrf.mxu1 }
 0x203   : > { %v6017_v20 = vadd.f32 %v2186_v29, %v2028_v7 }
 0x206   : > { %v1870_v18 = vpop.f32.mrf.mxu2 }
 0x207   : > { %v2029_v63 = vpop.f32.mrf.mxu3  ;;  %v1871_v11 = vadd.f32 %v1870_v18, %v5596_v55 }
 0x208   : > { %v2191_v29 = vpop.f32.mrf.mxu0 }
 0x209   : > { %v2030_v33 = vadd.f32 %v2029_v63, %v1871_v11  ;;  %v4191_v11 = vld [vmem:[%s5128_s28 + $0x290] sm:$0xf] }
 0x20a   : > { %v6032_v0 = vpop.f32.mrf.mxu1 }
 0x20b   : > { %7266 = vst [vmem:[#allocation122_spill] sm:$0xff] %v6032_v0  ;;  %v6034_v56 = vadd.f32 %v2188_v45, %v2030_v33  ;;  %1912 = vmatmul.bf16.gmra.mxu2 %v6026_v9  ;;  %2230 = vmatmul.bf16.gmra.mxu0 %v6030_v53  ;;  %v4859_v33 = vld [vmem:[%s5128_s28 + $0x2a0] sm:$0xf0]  ;;  %v6052_v53 = vor.u32 %v4858_v52, %v4183_v3 }
 0x20c   : > { %2071 = vmatmul.bf16.gmra.mxu3 %v6028_v49  ;;  %v6054_v49 = vor.u32 %v4856_v47, %v4185_v4  ;;  %v4203_v47 = vld [vmem:[%s5128_s28 + $0x2b0] sm:$0xf]  ;;  %v4863_v4 = vld [vmem:[%s5128_s28 + $0x2c0] sm:$0xf0] }
 0x20d   : > { %7267 = vst [vmem:[#allocation123_spill] sm:$0xff] %v6034_v56  ;;  %2709 = vmatmul.bf16.gmra.mxu1 %v5150_v26 }
 0x20e   : > { %v1873_v55 = vpop.f32.mrf.mxu2  ;;  %7268 = vst [vmem:[#allocation124_spill] sm:$0xff] %v6054_v49 }
 0x20f   : > { %v2032_v5 = vpop.f32.mrf.mxu3  ;;  %v1874_v18 = vadd.f32 %v1873_v55, %v5612_v41  ;;  %v6056_v41 = vor.u32 %v4859_v33, %v4191_v11  ;;  %v4861_v11 = vld [vmem:[%s5128_s28 + $0x2b4] sm:$0xf]  ;;  %v4205_v33 = vld [vmem:[%s5128_s28 + $0x2c4] sm:$0xf0] }
 0x210   : > { %v2193_v7 = vpop.f32.mrf.mxu0 }
 0x211   : > { %v2033_v63 = vadd.f32 %v2032_v5, %v1874_v18  ;;  %7269 = vst [vmem:[#allocation125_spill] sm:$0xff] %v6056_v41 }
 0x212   : > { %v6041_v21 = vpop.f32.mrf.mxu1 }
 0x213   : > { %v6043_v45 = vadd.f32 %v2191_v29, %v2033_v63 }
 0x216   : > { %v1875_v0 = vpop.f32.mrf.mxu2 }
 0x217   : > { %v2034_v56 = vpop.f32.mrf.mxu3  ;;  %v1876_v26 = vadd.f32 %v1875_v0, %v5620_v43 }
 0x218   : > { %v2196_v29 = vpop.f32.mrf.mxu0 }
 0x219   : > { %v2035_v55 = vadd.f32 %v2034_v56, %v1876_v26  ;;  %v4211_v26 = vld [vmem:[%s5128_s28 + $0x2b8] sm:$0xf] }
 0x21a   : > { %v6058_v5 = vpop.f32.mrf.mxu1 }
 0x21b   : > { %7270 = vst [vmem:[#allocation126_spill] sm:$0xff] %v6058_v5  ;;  %v6060_v18 = vadd.f32 %v2193_v7, %v2035_v55  ;;  %1917 = vmatmul.bf16.gmra.mxu2 %v6052_v53  ;;  %2235 = vmatmul.bf16.gmra.mxu0 %v6056_v41  ;;  %v4864_v55 = vld [vmem:[%s5128_s28 + $0x2c8] sm:$0xf0]  ;;  %v6078_v41 = vor.u32 %v4863_v4, %v4203_v47 }
 0x21c   : > { %2076 = vmatmul.bf16.gmra.mxu3 %v6054_v49  ;;  %v6080_v49 = vor.u32 %v4861_v11, %v4205_v33 }
 0x21d   : > { %7271 = vst [vmem:[#allocation127_spill] sm:$0xff] %v6060_v18  ;;  %2714 = vmatmul.bf16.gmra.mxu1 %v5188_v44 }
 0x21e   : > { %v1878_v43 = vpop.f32.mrf.mxu2 }
 0x21f   : > { %v2037_v0 = vpop.f32.mrf.mxu3  ;;  %v1879_v56 = vadd.f32 %v1878_v43, %v5636_v61  ;;  %v6082_v61 = vor.u32 %v4864_v55, %v4211_v26  ;;  %v4223_v26 = vld [vmem:[%s5128_s28 + $0x2d8] sm:$0xf]  ;;  %v4991_v55 = vld [vmem:[%s7039_s2 + $0xd0] sm:$0xff] }
 0x220   : > { %v2198_v3 = vpop.f32.mrf.mxu0  ;;  %3108 = vmatpush.bf16.msra.mxu0 %v4991_v55 }
 0x221   : > { %v2038_v63 = vadd.f32 %v2037_v0, %v1879_v56 }
 0x222   : > { %v6067_v52 = vpop.f32.mrf.mxu1 }
 0x223   : > { %v6069_v7 = vadd.f32 %v2196_v29, %v2038_v63 }
 0x226   : > { %v1880_v5 = vpop.f32.mrf.mxu2 }
 0x227   : > { %v2039_v18 = vpop.f32.mrf.mxu3  ;;  %v1881_v44 = vadd.f32 %v1880_v5, %v5644_v39  ;;  %v4975_v39 = vld [vmem:[%s7039_s2 + $0x50] sm:$0xff] }
 0x228   : > { %v2201_v0 = vpop.f32.mrf.mxu0  ;;  %v4983_v5 = vld [vmem:[%s7039_s2 + $0x90] sm:$0xff]  ;;  %2790 = vmatpush.bf16.msra.mxu2 %v4975_v39 }
 0x229   : > { %v2040_v43 = vadd.f32 %v2039_v18, %v1881_v44  ;;  %2949 = vmatpush.bf16.msra.mxu3 %v4983_v5  ;;  %v4868_v44 = vld [vmem:[%s5128_s28 + $0x2e8] sm:$0xf0]  ;;  %v4225_v39 = vld [vmem:[%s5128_s28 + $0x2ec] sm:$0xf0]  ;;  %v4231_v5 = vld [vmem:[%s5128_s28 + $0x2e0] sm:$0xf] }
 0x22a   : > { %v6084_v29 = vpop.f32.mrf.mxu1 }
 0x22b   : > { %7272 = vst [vmem:[#allocation128_spill] sm:$0xff] %v6084_v29  ;;  %v6086_v56 = vadd.f32 %v2198_v3, %v2040_v43  ;;  %1922 = vmatmul.bf16.gmra.mxu2 %v6078_v41  ;;  %2240 = vmatmul.bf16.gmra.mxu0 %v6082_v61  ;;  %v4866_v43 = vld [vmem:[%s5128_s28 + $0x2dc] sm:$0xf] }
 0x22c   : > { %2081 = vmatmul.bf16.gmra.mxu3 %v6080_v49 }
 0x22d   : > { %7273 = vst [vmem:[#allocation129_spill] sm:$0xff] %v6086_v56  ;;  %2719 = vmatmul.bf16.gmra.mxu1 %v5214_v58  ;;  %v4999_v58 = vld [vmem:[%s7039_s2 + $0x110] sm:$0xff] }
 0x22e   : > { %v1883_v18 = vpop.f32.mrf.mxu2  ;;  %3267 = vmatpush.bf16.msra.mxu1 %v4999_v58 }
 0x22f   : > { %v2042_v63 = vpop.f32.mrf.mxu3  ;;  %v1884_v3 = vadd.f32 %v1883_v18, %v5666_v25  ;;  %v4869_v25 = vld [vmem:[%s5128_s28 + $0x2f0] sm:$0xf0] }
 0x230   : > { %v2203_v4 = vpop.f32.mrf.mxu0 }
 0x231   : > { %v2043_v47 = vadd.f32 %v2042_v63, %v1884_v3  ;;  %v6116_v3 = vor.u32 %v4868_v44, %v4223_v26 }
 0x232   : > { %v6099_v11 = vpop.f32.mrf.mxu1 }
 0x233   : > { %7274 = vst [vmem:[#allocation130_spill] sm:$0xff] %v6099_v11  ;;  %v6101_v33 = vadd.f32 %v2201_v0, %v2043_v47  ;;  %v6118_v47 = vor.u32 %v4866_v43, %v4225_v39  ;;  %v6120_v11 = vor.u32 %v4869_v25, %v4231_v5  ;;  %v4873_v5 = vld [vmem:[%s5128_s28 + $0x310] sm:$0xf0]  ;;  %v4871_v25 = vld [vmem:[%s5128_s28 + $0x304] sm:$0xf] }
 0x235   : > { %7275 = vst [vmem:[#allocation131_spill] sm:$0xff] %v6101_v33 }
 0x236   : > { %v1885_v18 = vpop.f32.mrf.mxu2  ;;  %7276 = vst [vmem:[#allocation132_spill] sm:$0xff] %v6118_v47 }
 0x237   : > { %v2044_v63 = vpop.f32.mrf.mxu3  ;;  %v1886_v0 = vadd.f32 %v1885_v18, %v5677_v19  ;;  %7277 = vst [vmem:[#allocation133_spill] sm:$0xff] %v6120_v11  ;;  %v4245_v18 = vld [vmem:[%s5128_s28 + $0x314] sm:$0xf0] }
 0x238   : > { %v2206_v29 = vpop.f32.mrf.mxu0 }
 0x239   : > { %v2045_v33 = vadd.f32 %v2044_v63, %v1886_v0  ;;  %v4251_v63 = vld [vmem:[%s5128_s28 + $0x308] sm:$0xf]  ;;  %v4874_v0 = vld [vmem:[%s5128_s28 + $0x318] sm:$0xf0] }
 0x23a   : > { %v6122_v56 = vpop.f32.mrf.mxu1 }
 0x23b   : > { %7278 = vst [vmem:[#allocation134_spill] sm:$0xff] %v6122_v56  ;;  %v6124_v55 = vadd.f32 %v2203_v4, %v2045_v33  ;;  %1927 = vmatmul.bf16.gmra.mxu2 %v6116_v3  ;;  %2245 = vmatmul.bf16.gmra.mxu0 %v6120_v11  ;;  %v4243_v33 = vld [vmem:[%s5128_s28 + $0x300] sm:$0xf] }
 0x23c   : > { %2086 = vmatmul.bf16.gmra.mxu3 %v6118_v47  ;;  %v6142_v11 = vor.u32 %v4873_v5, %v4243_v33  ;;  %v6144_v47 = vor.u32 %v4871_v25, %v4245_v18  ;;  %v4263_v25 = vld [vmem:[%s5128_s28 + $0x328] sm:$0xf]  ;;  %v4878_v18 = vld [vmem:[%s5128_s28 + $0x338] sm:$0xf0] }
 0x23d   : > { %7279 = vst [vmem:[#allocation135_spill] sm:$0xff] %v6124_v55  ;;  %2724 = vmatmul.bf16.gmra.mxu1 %v5240_v8 }
 0x23e   : > { %v1888_v19 = vpop.f32.mrf.mxu2  ;;  %7280 = vst [vmem:[#allocation136_spill] sm:$0xff] %v6144_v47 }
 0x23f   : > { %v2047_v26 = vpop.f32.mrf.mxu3  ;;  %v1889_v58 = vadd.f32 %v1888_v19, %v5696_v2  ;;  %v6146_v2 = vor.u32 %v4874_v0, %v4251_v63  ;;  %v4876_v63 = vld [vmem:[%s5128_s28 + $0x32c] sm:$0xf]  ;;  %v4265_v0 = vld [vmem:[%s5128_s28 + $0x33c] sm:$0xf0] }
 0x240   : > { %v2208_v43 = vpop.f32.mrf.mxu0 }
 0x241   : > { %v2048_v44 = vadd.f32 %v2047_v26, %v1889_v58  ;;  %7281 = vst [vmem:[#allocation137_spill] sm:$0xff] %v6146_v2 }
 0x242   : > { %v6131_v39 = vpop.f32.mrf.mxu1 }
 0x243   : > { %v6133_v4 = vadd.f32 %v2206_v29, %v2048_v44 }
 0x246   : > { %v1890_v56 = vpop.f32.mrf.mxu2 }
 0x247   : > { %v2049_v55 = vpop.f32.mrf.mxu3  ;;  %v1891_v8 = vadd.f32 %v1890_v56, %v5704_v14 }
 0x248   : > { %v2211_v29 = vpop.f32.mrf.mxu0 }
 0x249   : > { %v2050_v19 = vadd.f32 %v2049_v55, %v1891_v8  ;;  %v4271_v8 = vld [vmem:[%s5128_s28 + $0x330] sm:$0xf] }
 0x24a   : > { %v6148_v26 = vpop.f32.mrf.mxu1 }
 0x24b   : > { %7282 = vst [vmem:[#allocation138_spill] sm:$0xff] %v6148_v26  ;;  %v6150_v58 = vadd.f32 %v2208_v43, %v2050_v19  ;;  %1932 = vmatmul.bf16.gmra.mxu2 %v6142_v11  ;;  %2250 = vmatmul.bf16.gmra.mxu0 %v6146_v2  ;;  %v4879_v19 = vld [vmem:[%s5128_s28 + $0x340] sm:$0xf0]  ;;  %v6168_v2 = vor.u32 %v4878_v18, %v4263_v25 }
 0x24c   : > { %2091 = vmatmul.bf16.gmra.mxu3 %v6144_v47  ;;  %v6170_v47 = vor.u32 %v4876_v63, %v4265_v0  ;;  %v4283_v63 = vld [vmem:[%s5128_s28 + $0x350] sm:$0xf]  ;;  %v4974_v0 = vld [vmem:[%s7039_s2 + $0x48] sm:$0xff] }
 0x24d   : > { %7283 = vst [vmem:[#allocation139_spill] sm:$0xff] %v6150_v58  ;;  %2729 = vmatmul.bf16.gmra.mxu1 %v5266_v22  ;;  %2791 = vmatpush.bf16.msra.mxu2 %v4974_v0 }
 0x24e   : > { %v1893_v14 = vpop.f32.mrf.mxu2 }
 0x24f   : > { %v2052_v56 = vpop.f32.mrf.mxu3  ;;  %v1894_v55 = vadd.f32 %v1893_v14, %v5720_v27  ;;  %v6172_v27 = vor.u32 %v4879_v19, %v4271_v8  ;;  %v4982_v8 = vld [vmem:[%s7039_s2 + $0x88] sm:$0xff]  ;;  %v4881_v19 = vld [vmem:[%s5128_s28 + $0x354] sm:$0xf] }
 0x250   : > { %v2213_v33 = vpop.f32.mrf.mxu0  ;;  %2950 = vmatpush.bf16.msra.mxu3 %v4982_v8 }
 0x251   : > { %v2053_v44 = vadd.f32 %v2052_v56, %v1894_v55  ;;  %7284 = vst [vmem:[#allocation140_spill] sm:$0xff] %v6172_v27 }
 0x252   : > { %v6157_v5 = vpop.f32.mrf.mxu1 }
 0x253   : > { %v6159_v43 = vadd.f32 %v2211_v29, %v2053_v44 }
 0x256   : > { %v1895_v26 = vpop.f32.mrf.mxu2 }
 0x257   : > { %v2054_v58 = vpop.f32.mrf.mxu3  ;;  %v1896_v22 = vadd.f32 %v1895_v26, %v5728_v6 }
 0x258   : > { %v2216_v29 = vpop.f32.mrf.mxu0 }
 0x259   : > { %v2055_v14 = vadd.f32 %v2054_v58, %v1896_v22  ;;  %v4285_v22 = vld [vmem:[%s5128_s28 + $0x364] sm:$0xf0] }
 0x25a   : > { %v6174_v56 = vpop.f32.mrf.mxu1 }
 0x25b   : > { %7285 = vst [vmem:[#allocation141_spill] sm:$0xff] %v6174_v56  ;;  %v6176_v55 = vadd.f32 %v2213_v33, %v2055_v14  ;;  %1937 = vmatmul.bf16.gmra.mxu2 %v6168_v2  ;;  %2255 = vmatmul.bf16.gmra.mxu0 %v6172_v27  ;;  %v4291_v14 = vld [vmem:[%s5128_s28 + $0x358] sm:$0xf] }
 0x25c   : > { %2096 = vmatmul.bf16.gmra.mxu3 %v6170_v47 }
 0x25d   : > { %7286 = vst [vmem:[#allocation142_spill] sm:$0xff] %v6176_v55  ;;  %2734 = vmatmul.bf16.gmra.mxu1 %v5292_v40  ;;  %v4883_v40 = vld [vmem:[%s5128_s28 + $0x360] sm:$0xf0] }
 0x25e   : > { %v1898_v6 = vpop.f32.mrf.mxu2 }
 0x25f   : > { %v2057_v26 = vpop.f32.mrf.mxu3  ;;  %v1899_v58 = vadd.f32 %v1898_v6, %v5744_v17  ;;  %v4884_v17 = vld [vmem:[%s5128_s28 + $0x368] sm:$0xf0] }
 0x260   : > { %v2218_v25 = vpop.f32.mrf.mxu0 }
 0x261   : > { %v2058_v44 = vadd.f32 %v2057_v26, %v1899_v58  ;;  %v6200_v58 = vor.u32 %v4883_v40, %v4283_v63 }
 0x262   : > { %v6183_v33 = vpop.f32.mrf.mxu1 }
 0x263   : > { %7287 = vst [vmem:[#allocation143_spill] sm:$0xff] %v6183_v33  ;;  %v6185_v18 = vadd.f32 %v2216_v29, %v2058_v44  ;;  %v6202_v44 = vor.u32 %v4881_v19, %v4285_v22  ;;  %v6204_v33 = vor.u32 %v4884_v17, %v4291_v14  ;;  %v4303_v22 = vld [vmem:[%s5128_s28 + $0x378] sm:$0xf]  ;;  %v4888_v14 = vld [vmem:[%s5128_s28 + $0x388] sm:$0xf0] }
 0x264   : > { %v4886_v17 = vld [vmem:[%s5128_s28 + $0x37c] sm:$0xf] }
 0x265   : > { %7288 = vst [vmem:[#allocation144_spill] sm:$0xff] %v6185_v18 }
 0x266   : > { %v1900_v6 = vpop.f32.mrf.mxu2 }
 0x267   : > { %v2059_v26 = vpop.f32.mrf.mxu3  ;;  %v1901_v29 = vadd.f32 %v1900_v6, %v5752_v13  ;;  %v4990_v13 = vld [vmem:[%s7039_s2 + $0xc8] sm:$0xff]  ;;  %v4305_v6 = vld [vmem:[%s5128_s28 + $0x38c] sm:$0xf0] }
 0x268   : > { %v2221_v56 = vpop.f32.mrf.mxu0  ;;  %3109 = vmatpush.bf16.msra.mxu0 %v4990_v13 }
 0x269   : > { %v2060_v18 = vadd.f32 %v2059_v26, %v1901_v29  ;;  %v4311_v26 = vld [vmem:[%s5128_s28 + $0x380] sm:$0xf]  ;;  %v4889_v29 = vld [vmem:[%s5128_s28 + $0x390] sm:$0xf0] }
 0x26a   : > { %v6206_v55 = vpop.f32.mrf.mxu1 }
 0x26b   : > { %7289 = vst [vmem:[#allocation145_spill] sm:$0xff] %v6206_v55  ;;  %v6208_v27 = vadd.f32 %v2218_v25, %v2060_v18  ;;  %1942 = vmatmul.bf16.gmra.mxu2 %v6200_v58  ;;  %2260 = vmatmul.bf16.gmra.mxu0 %v6204_v33 }
 0x26c   : > { %2101 = vmatmul.bf16.gmra.mxu3 %v6202_v44 }
 0x26d   : > { %2739 = vmatmul.bf16.gmra.mxu1 %v5318_v62  ;;  %v4998_v62 = vld [vmem:[%s7039_s2 + $0x108] sm:$0xff] }
 0x26e   : > { %v1903_v63 = vpop.f32.mrf.mxu2  ;;  %3268 = vmatpush.bf16.msra.mxu1 %v4998_v62 }
 0x26f   : > { %v2062_v25 = vpop.f32.mrf.mxu3  ;;  %v1904_v18 = vadd.f32 %v1903_v63, %v5774_v54  ;;  %v6232_v63 = vor.u32 %v4888_v14, %v4303_v22 }
 0x270   : > { %v2223_v8 = vpop.f32.mrf.mxu0 }
 0x271   : > { %v2063_v0 = vadd.f32 %v2062_v25, %v1904_v18  ;;  %v6234_v25 = vor.u32 %v4886_v17, %v4305_v6  ;;  %v4323_v6 = vld [vmem:[%s5128_s28 + $0x3a0] sm:$0xf] }
 0x272   : > { %v6218_v40 = vpop.f32.mrf.mxu1 }
 0x273   : > { %7290 = vst [vmem:[#allocation146_spill] sm:$0xff] %v6218_v40  ;;  %v6220_v19 = vadd.f32 %v2221_v56, %v2063_v0  ;;  %v6236_v56 = vor.u32 %v4889_v29, %v4311_v26  ;;  %v4893_v26 = vld [vmem:[%s5128_s28 + $0x3b0] sm:$0xf0]  ;;  %v4891_v29 = vld [vmem:[%s5128_s28 + $0x3a4] sm:$0xf] }
 0x274   : > { %7292 = vst [vmem:[#allocation148_spill] sm:$0xff] %v6234_v25 }
 0x275   : > { %7291 = vst [vmem:[#allocation147_spill] sm:$0xff] %v6220_v19 }
 0x276   : > { %v1905_v13 = vpop.f32.mrf.mxu2  ;;  %7293 = vst [vmem:[#allocation149_spill] sm:$0xff] %v6236_v56 }
 0x277   : > { %v2064_v55 = vpop.f32.mrf.mxu3  ;;  %v1906_v54 = vadd.f32 %v1905_v13, %v5785_v60  ;;  %v4325_v13 = vld [vmem:[%s5128_s28 + $0x3b4] sm:$0xf0] }
 0x278   : > { %v2226_v0 = vpop.f32.mrf.mxu0 }
 0x279   : > { %v2065_v18 = vadd.f32 %v2064_v55, %v1906_v54  ;;  %v4331_v54 = vld [vmem:[%s5128_s28 + $0x3a8] sm:$0xf] }
 0x27a   : > { %v6238_v40 = vpop.f32.mrf.mxu1 }
 0x27b   : > { %7294 = vst [vmem:[#allocation150_spill] sm:$0xff] %v6238_v40  ;;  %v6240_v19 = vadd.f32 %v2223_v8, %v2065_v18  ;;  %1947 = vmatmul.bf16.gmra.mxu2 %v6232_v63  ;;  %2265 = vmatmul.bf16.gmra.mxu0 %v6236_v56  ;;  %v4894_v18 = vld [vmem:[%s5128_s28 + $0x3b8] sm:$0xf0]  ;;  %v6258_v56 = vor.u32 %v4893_v26, %v4323_v6 }
 0x27c   : > { %2106 = vmatmul.bf16.gmra.mxu3 %v6234_v25  ;;  %v6260_v25 = vor.u32 %v4891_v29, %v4325_v13  ;;  %v4343_v13 = vld [vmem:[%s5128_s28 + $0x3c8] sm:$0xf] }
 0x27d   : > { %7295 = vst [vmem:[#allocation151_spill] sm:$0xff] %v6240_v19  ;;  %2744 = vmatmul.bf16.gmra.mxu1 %v5344_v16 }
 0x27e   : > { %v1908_v60 = vpop.f32.mrf.mxu2  ;;  %7297 = vst [vmem:[#allocation153_spill] sm:$0xff] %v6258_v56 }
 0x27f   : > { %v2067_v55 = vpop.f32.mrf.mxu3  ;;  %v1909_v22 = vadd.f32 %v1908_v60, %v5804_v10  ;;  %7298 = vst [vmem:[#allocation154_spill] sm:$0xff] %v6260_v25  ;;  %v6262_v10 = vor.u32 %v4894_v18, %v4331_v54  ;;  %v4898_v54 = vld [vmem:[%s5128_s28 + $0x3d8] sm:$0xf0]  ;;  %v4896_v18 = vld [vmem:[%s5128_s28 + $0x3cc] sm:$0xf] }
 0x280   : > { %v2228_v14 = vpop.f32.mrf.mxu0 }
 0x281   : > { %v2068_v62 = vadd.f32 %v2067_v55, %v1909_v22  ;;  %7299 = vst [vmem:[#allocation155_spill] sm:$0xff] %v6262_v10 }
 0x282   : > { %v6247_v17 = vpop.f32.mrf.mxu1 }
 0x283   : > { %7296 = vst [vmem:[#allocation152_spill] sm:$0xff] %v6247_v17  ;;  %v6249_v8 = vadd.f32 %v2226_v0, %v2068_v62 }
 0x286   : > { %v1910_v40 = vpop.f32.mrf.mxu2 }
 0x287   : > { %v2069_v19 = vpop.f32.mrf.mxu3  ;;  %v1911_v16 = vadd.f32 %v1910_v40, %v5812_v42 }
 0x288   : > { %v2231_v0 = vpop.f32.mrf.mxu0 }
 0x289   : > { %v2070_v60 = vadd.f32 %v2069_v19, %v1911_v16  ;;  %v7302_v19 = vld [vmem:[#allocation20_spill] sm:$0xff]  ;;  %v4345_v16 = vld [vmem:[%s5128_s28 + $0x3dc] sm:$0xf0] }
 0x28a   : > { %v6264_v55 = vpop.f32.mrf.mxu1  ;;  %v6286_v17 = vor.u32 %v4896_v18, %v4345_v16  ;;  %v4363_v16 = vld [vmem:[%s5128_s28 + $0x3f0] sm:$0xf] }
 0x28b   : > { %7300 = vst [vmem:[#allocation156_spill] sm:$0xff] %v6264_v55  ;;  %v6266_v22 = vadd.f32 %v2228_v14, %v2070_v60  ;;  %1952 = vmatmul.bf16.gmra.mxu2 %v6258_v56  ;;  %2270 = vmatmul.bf16.gmra.mxu0 %v6262_v10  ;;  %v4351_v60 = vld [vmem:[%s5128_s28 + $0x3d0] sm:$0xf]  ;;  %v4899_v55 = vld [vmem:[%s5128_s28 + $0x3e0] sm:$0xf0]  ;;  %v6284_v56 = vor.u32 %v4898_v54, %v4343_v13 }
 0x28c   : > { %2111 = vmatmul.bf16.gmra.mxu3 %v6260_v25  ;;  %v7305_v25 = vld [vmem:[#allocation21_spill] sm:$0xff]  ;;  %7307 = vst [vmem:[#allocation159_spill] sm:$0xff] %v6286_v17 }
 0x28d   : > { %7301 = vst [vmem:[#allocation157_spill] sm:$0xff] %v6266_v22  ;;  %2749 = vmatmul.bf16.gmra.mxu1 %v5370_v38 }
 0x28e   : > { %v1913_v42 = vpop.f32.mrf.mxu2  ;;  %7306 = vst [vmem:[#allocation21_spill] sm:$0xff] %v6284_v56 }
 0x28f   : > { %v2072_v40 = vpop.f32.mrf.mxu3  ;;  %v1914_v62 = vadd.f32 %v1913_v42, %v7302_v19  ;;  %v6288_v42 = vor.u32 %v4899_v55, %v4351_v60  ;;  %v4973_v60 = vld [vmem:[%s7039_s2 + $0x40] sm:$0xff] }
 0x290   : > { %v2233_v26 = vpop.f32.mrf.mxu0  ;;  %2792 = vmatpush.bf16.msra.mxu2 %v4973_v60  ;;  %v7322_v60 = vld [vmem:[#allocation30_spill] sm:$0xff] }
 0x291   : > { %v2073_v6 = vadd.f32 %v2072_v40, %v1914_v62  ;;  %7308 = vst [vmem:[#allocation160_spill] sm:$0xff] %v6288_v42 }
 0x292   : > { %v6273_v29 = vpop.f32.mrf.mxu1 }
 0x293   : > { %7303 = vst [vmem:[#allocation20_spill] sm:$0xff] %v6273_v29  ;;  %v6275_v14 = vadd.f32 %v2231_v0, %v2073_v6 }
 0x295   : > { %7304 = vst [vmem:[#allocation158_spill] sm:$0xff] %v6275_v14 }
 0x296   : > { %v1915_v22 = vpop.f32.mrf.mxu2 }
 0x297   : > { %v2074_v10 = vpop.f32.mrf.mxu3  ;;  %v1916_v38 = vadd.f32 %v1915_v22, %v7305_v25  ;;  %v7311_v25 = vld [vmem:[#allocation22_spill] sm:$0xff]  ;;  %v7312_v22 = vld [vmem:[#allocation25_spill] sm:$0xff] }
 0x298   : > { %v2236_v0 = vpop.f32.mrf.mxu0 }
 0x299   : > { %v2075_v40 = vadd.f32 %v2074_v10, %v1916_v38  ;;  %v4981_v38 = vld [vmem:[%s7039_s2 + $0x80] sm:$0xff] }
 0x29a   : > { %v6290_v19 = vpop.f32.mrf.mxu1  ;;  %2951 = vmatpush.bf16.msra.mxu3 %v4981_v38 }
 0x29b   : > { %7309 = vst [vmem:[#allocation161_spill] sm:$0xff] %v6290_v19  ;;  %v6292_v62 = vadd.f32 %v2233_v26, %v2075_v40  ;;  %1957 = vmatmul.bf16.gmra.mxu2 %v6284_v56  ;;  %2275 = vmatmul.bf16.gmra.mxu0 %v6288_v42  ;;  %v4903_v40 = vld [vmem:[%s5128_s28 + $0x400] sm:$0xf0]  ;;  %v4365_v19 = vld [vmem:[%s5128_s28 + $0x404] sm:$0xf0] }
 0x29c   : > { %2116 = vmatmul.bf16.gmra.mxu3 %v6286_v17 }
 0x29d   : > { %7310 = vst [vmem:[#allocation162_spill] sm:$0xff] %v6292_v62  ;;  %2754 = vmatmul.bf16.gmra.mxu1 %v7311_v25  ;;  %v4901_v25 = vld [vmem:[%s5128_s28 + $0x3f4] sm:$0xf]  ;;  %v4371_v62 = vld [vmem:[%s5128_s28 + $0x3f8] sm:$0xf] }
 0x29e   : > { %v1918_v55 = vpop.f32.mrf.mxu2 }
 0x29f   : > { %v2077_v10 = vpop.f32.mrf.mxu3  ;;  %v1919_v6 = vadd.f32 %v1918_v55, %v7312_v22  ;;  %v4904_v55 = vld [vmem:[%s5128_s28 + $0x408] sm:$0xf0] }
 0x2a0   : > { %v2238_v54 = vpop.f32.mrf.mxu0 }
 0x2a1   : > { %v2078_v13 = vadd.f32 %v2077_v10, %v1919_v6 }
 0x2a2   : > { %v6299_v26 = vpop.f32.mrf.mxu1 }
 0x2a3   : > { %7313 = vst [vmem:[#allocation22_spill] sm:$0xff] %v6299_v26  ;;  %v6301_v18 = vadd.f32 %v2236_v0, %v2078_v13  ;;  %v7315_v0 = vld [vmem:[#allocation26_spill] sm:$0xff]  ;;  %v6316_v13 = vor.u32 %v4903_v40, %v4363_v16  ;;  %v6318_v26 = vor.u32 %v4901_v25, %v4365_v19 }
 0x2a4   : > { %v4989_v19 = vld [vmem:[%s7039_s2 + $0xc0] sm:$0xff] }
 0x2a5   : > { %7314 = vst [vmem:[#allocation25_spill] sm:$0xff] %v6301_v18  ;;  %v6320_v18 = vor.u32 %v4904_v55, %v4371_v62  ;;  %v4997_v62 = vld [vmem:[%s7039_s2 + $0x100] sm:$0xff]  ;;  %3110 = vmatpush.bf16.msra.mxu0 %v4989_v19  ;;  %v7325_v19 = vld [vmem:[#allocation31_spill] sm:$0xff] }
 0x2a6   : > { %v1920_v10 = vpop.f32.mrf.mxu2  ;;  %7316 = vst [vmem:[#allocation26_spill] sm:$0xff] %v6316_v13  ;;  %3269 = vmatpush.bf16.msra.mxu1 %v4997_v62 }
 0x2a7   : > { %v2079_v22 = vpop.f32.mrf.mxu3  ;;  %v1921_v6 = vadd.f32 %v1920_v10, %v7315_v0  ;;  %7317 = vst [vmem:[#allocation163_spill] sm:$0xff] %v6318_v26  ;;  %v4908_v0 = vld [vmem:[%s5128_s28 + $0x428] sm:$0xf0] }
 0x2a8   : > { %7318 = vst [vmem:[#allocation164_spill] sm:$0xff] %v6320_v18  ;;  %v2241_v17 = vpop.f32.mrf.mxu0 }
 0x2a9   : > { %v2080_v42 = vadd.f32 %v2079_v22, %v1921_v6  ;;  %v4383_v22 = vld [vmem:[%s5128_s28 + $0x418] sm:$0xf]  ;;  %v4906_v6 = vld [vmem:[%s5128_s28 + $0x41c] sm:$0xf] }
 0x2aa   : > { %v6322_v56 = vpop.f32.mrf.mxu1 }
 0x2ab   : > { %7319 = vst [vmem:[#allocation165_spill] sm:$0xff] %v6322_v56  ;;  %v6324_v29 = vadd.f32 %v2238_v54, %v2080_v42  ;;  %1962 = vmatmul.bf16.gmra.mxu2 %v6316_v13  ;;  %2280 = vmatmul.bf16.gmra.mxu0 %v6320_v18  ;;  %v7321_v42 = vld [vmem:[#allocation27_spill] sm:$0xff]  ;;  %v4385_v56 = vld [vmem:[%s5128_s28 + $0x42c] sm:$0xf0]  ;;  %v4909_v18 = vld [vmem:[%s5128_s28 + $0x430] sm:$0xf0]  ;;  %v6348_v13 = vor.u32 %v4908_v0, %v4383_v22 }
 0x2ac   : > { %2121 = vmatmul.bf16.gmra.mxu3 %v6318_v26  ;;  %v6350_v14 = vor.u32 %v4906_v6, %v4385_v56  ;;  %v7331_v56 = vld [vmem:[#allocation32_spill] sm:$0xff] }
 0x2ad   : > { %7320 = vst [vmem:[#allocation166_spill] sm:$0xff] %v6324_v29  ;;  %2759 = vmatmul.bf16.gmra.mxu1 %v7321_v42  ;;  %v4391_v29 = vld [vmem:[%s5128_s28 + $0x420] sm:$0xf] }
 0x2ae   : > { %v1923_v54 = vpop.f32.mrf.mxu2  ;;  %7326 = vst [vmem:[#allocation31_spill] sm:$0xff] %v6348_v13 }
 0x2af   : > { %v2082_v16 = vpop.f32.mrf.mxu3  ;;  %v1924_v38 = vadd.f32 %v1923_v54, %v7322_v60  ;;  %7327 = vst [vmem:[#allocation167_spill] sm:$0xff] %v6350_v14  ;;  %v6352_v54 = vor.u32 %v4909_v18, %v4391_v29  ;;  %v7332_v18 = vld [vmem:[#allocation35_spill] sm:$0xff] }
 0x2b0   : > { %v2243_v25 = vpop.f32.mrf.mxu0 }
 0x2b1   : > { %v2083_v40 = vadd.f32 %v2082_v16, %v1924_v38  ;;  %7328 = vst [vmem:[#allocation168_spill] sm:$0xff] %v6352_v54 }
 0x2b2   : > { %v6337_v55 = vpop.f32.mrf.mxu1 }
 0x2b3   : > { %7323 = vst [vmem:[#allocation27_spill] sm:$0xff] %v6337_v55  ;;  %v6339_v10 = vadd.f32 %v2241_v17, %v2083_v40 }
 0x2b5   : > { %7324 = vst [vmem:[#allocation30_spill] sm:$0xff] %v6339_v10 }
 0x2b6   : > { %v1925_v26 = vpop.f32.mrf.mxu2 }
 0x2b7   : > { %v2084_v42 = vpop.f32.mrf.mxu3  ;;  %v1926_v62 = vadd.f32 %v1925_v26, %v7325_v19  ;;  %v4913_v19 = vld [vmem:[%s5128_s28 + $0x450] sm:$0xf0] }
 0x2b8   : > { %v2246_v17 = vpop.f32.mrf.mxu0 }
 0x2b9   : > { %v2085_v16 = vadd.f32 %v2084_v42, %v1926_v62  ;;  %v4403_v42 = vld [vmem:[%s5128_s28 + $0x440] sm:$0xf]  ;;  %v4911_v62 = vld [vmem:[%s5128_s28 + $0x444] sm:$0xf] }
 0x2ba   : > { %v6354_v60 = vpop.f32.mrf.mxu1  ;;  %v6374_v55 = vor.u32 %v4913_v19, %v4403_v42 }
 0x2bb   : > { %7329 = vst [vmem:[#allocation169_spill] sm:$0xff] %v6354_v60  ;;  %v6356_v38 = vadd.f32 %v2243_v25, %v2085_v16  ;;  %1967 = vmatmul.bf16.gmra.mxu2 %v6348_v13  ;;  %2285 = vmatmul.bf16.gmra.mxu0 %v6352_v54  ;;  %v4405_v16 = vld [vmem:[%s5128_s28 + $0x454] sm:$0xf0]  ;;  %v4411_v60 = vld [vmem:[%s5128_s28 + $0x448] sm:$0xf]  ;;  %v7335_v13 = vld [vmem:[#allocation36_spill] sm:$0xff] }
 0x2bc   : > { %2126 = vmatmul.bf16.gmra.mxu3 %v6350_v14  ;;  %7336 = vst [vmem:[#allocation36_spill] sm:$0xff] %v6374_v55  ;;  %v6376_v10 = vor.u32 %v4911_v62, %v4405_v16  ;;  %v4423_v62 = vld [vmem:[%s5128_s28 + $0x468] sm:$0xf]  ;;  %v4918_v16 = vld [vmem:[%s5128_s28 + $0x478] sm:$0xf0] }
 0x2bd   : > { %7330 = vst [vmem:[#allocation170_spill] sm:$0xff] %v6356_v38  ;;  %2764 = vmatmul.bf16.gmra.mxu1 %v7331_v56  ;;  %v4914_v38 = vld [vmem:[%s5128_s28 + $0x458] sm:$0xf0] }
 0x2be   : > { %v1928_v29 = vpop.f32.mrf.mxu2  ;;  %7337 = vst [vmem:[#allocation171_spill] sm:$0xff] %v6376_v10 }
 0x2bf   : > { %v2087_v26 = vpop.f32.mrf.mxu3  ;;  %v1929_v40 = vadd.f32 %v1928_v29, %v7332_v18  ;;  %v6378_v29 = vor.u32 %v4914_v38, %v4411_v60  ;;  %v7342_v60 = vld [vmem:[#allocation40_spill] sm:$0xff] }
 0x2c0   : > { %v2248_v0 = vpop.f32.mrf.mxu0 }
 0x2c1   : > { %v2088_v22 = vadd.f32 %v2087_v26, %v1929_v40  ;;  %7338 = vst [vmem:[#allocation172_spill] sm:$0xff] %v6378_v29 }
 0x2c2   : > { %v6363_v6 = vpop.f32.mrf.mxu1 }
 0x2c3   : > { %7333 = vst [vmem:[#allocation32_spill] sm:$0xff] %v6363_v6  ;;  %v6365_v25 = vadd.f32 %v2246_v17, %v2088_v22  ;;  %v6400_v6 = vor.u32 %v4918_v16, %v4423_v62 }
 0x2c5   : > { %7334 = vst [vmem:[#allocation35_spill] sm:$0xff] %v6365_v25 }
 0x2c6   : > { %v1930_v14 = vpop.f32.mrf.mxu2 }
 0x2c7   : > { %v2089_v54 = vpop.f32.mrf.mxu3  ;;  %v1931_v56 = vadd.f32 %v1930_v14, %v7335_v13  ;;  %v7341_v14 = vld [vmem:[#allocation37_spill] sm:$0xff] }
 0x2c8   : > { %v2251_v17 = vpop.f32.mrf.mxu0 }
 0x2c9   : > { %v2090_v26 = vadd.f32 %v2089_v54, %v1931_v56  ;;  %v4916_v56 = vld [vmem:[%s5128_s28 + $0x46c] sm:$0xf] }
 0x2ca   : > { %v6380_v18 = vpop.f32.mrf.mxu1 }
 0x2cb   : > { %7339 = vst [vmem:[#allocation173_spill] sm:$0xff] %v6380_v18  ;;  %v6382_v40 = vadd.f32 %v2248_v0, %v2090_v26  ;;  %1972 = vmatmul.bf16.gmra.mxu2 %v6374_v55  ;;  %2290 = vmatmul.bf16.gmra.mxu0 %v6378_v29  ;;  %v4425_v26 = vld [vmem:[%s5128_s28 + $0x47c] sm:$0xf0]  ;;  %v4431_v18 = vld [vmem:[%s5128_s28 + $0x470] sm:$0xf]  ;;  %v7345_v55 = vld [vmem:[#allocation41_spill] sm:$0xff] }
 0x2cc   : > { %2131 = vmatmul.bf16.gmra.mxu3 %v6376_v10  ;;  %7346 = vst [vmem:[#allocation41_spill] sm:$0xff] %v6400_v6  ;;  %v6402_v25 = vor.u32 %v4916_v56, %v4425_v26  ;;  %v4443_v56 = vld [vmem:[%s5128_s28 + $0x490] sm:$0xf]  ;;  %v4923_v26 = vld [vmem:[%s5128_s28 + $0x4a0] sm:$0xf0] }
 0x2cd   : > { %7340 = vst [vmem:[#allocation174_spill] sm:$0xff] %v6382_v40  ;;  %2769 = vmatmul.bf16.gmra.mxu1 %v7341_v14  ;;  %v4919_v40 = vld [vmem:[%s5128_s28 + $0x480] sm:$0xf0] }
 0x2ce   : > { %v1933_v13 = vpop.f32.mrf.mxu2  ;;  %7347 = vst [vmem:[#allocation175_spill] sm:$0xff] %v6402_v25 }
 0x2cf   : > { %v2092_v54 = vpop.f32.mrf.mxu3  ;;  %v1934_v38 = vadd.f32 %v1933_v13, %v7342_v60  ;;  %v6404_v13 = vor.u32 %v4919_v40, %v4431_v18  ;;  %v7352_v18 = vld [vmem:[#allocation45_spill] sm:$0xff] }
 0x2d0   : > { %v2253_v42 = vpop.f32.mrf.mxu0 }
 0x2d1   : > { %v2093_v22 = vadd.f32 %v2092_v54, %v1934_v38  ;;  %7348 = vst [vmem:[#allocation176_spill] sm:$0xff] %v6404_v13 }
 0x2d2   : > { %v6389_v19 = vpop.f32.mrf.mxu1 }
 0x2d3   : > { %7343 = vst [vmem:[#allocation37_spill] sm:$0xff] %v6389_v19  ;;  %v6391_v0 = vadd.f32 %v2251_v17, %v2093_v22  ;;  %v6426_v19 = vor.u32 %v4923_v26, %v4443_v56  ;;  %v7362_v56 = vld [vmem:[#allocation50_spill] sm:$0xff] }
 0x2d5   : > { %7344 = vst [vmem:[#allocation40_spill] sm:$0xff] %v6391_v0 }
 0x2d6   : > { %v1935_v10 = vpop.f32.mrf.mxu2 }
 0x2d7   : > { %v2094_v29 = vpop.f32.mrf.mxu3  ;;  %v1936_v14 = vadd.f32 %v1935_v10, %v7345_v55  ;;  %v7351_v55 = vld [vmem:[#allocation42_spill] sm:$0xff] }
 0x2d8   : > { %v2256_v17 = vpop.f32.mrf.mxu0 }
 0x2d9   : > { %v2095_v54 = vadd.f32 %v2094_v29, %v1936_v14  ;;  %v4921_v14 = vld [vmem:[%s5128_s28 + $0x494] sm:$0xf] }
 0x2da   : > { %v6406_v60 = vpop.f32.mrf.mxu1 }
 0x2db   : > { %7349 = vst [vmem:[#allocation177_spill] sm:$0xff] %v6406_v60  ;;  %v6408_v38 = vadd.f32 %v2253_v42, %v2095_v54  ;;  %1977 = vmatmul.bf16.gmra.mxu2 %v6400_v6  ;;  %2295 = vmatmul.bf16.gmra.mxu0 %v6404_v13  ;;  %v4445_v54 = vld [vmem:[%s5128_s28 + $0x4a4] sm:$0xf0]  ;;  %v4451_v60 = vld [vmem:[%s5128_s28 + $0x498] sm:$0xf]  ;;  %v7355_v6 = vld [vmem:[#allocation46_spill] sm:$0xff] }
 0x2dc   : > { %2136 = vmatmul.bf16.gmra.mxu3 %v6402_v25  ;;  %7356 = vst [vmem:[#allocation46_spill] sm:$0xff] %v6426_v19  ;;  %v6428_v0 = vor.u32 %v4921_v14, %v4445_v54 }
 0x2dd   : > { %7350 = vst [vmem:[#allocation178_spill] sm:$0xff] %v6408_v38  ;;  %2774 = vmatmul.bf16.gmra.mxu1 %v7351_v55  ;;  %v4924_v38 = vld [vmem:[%s5128_s28 + $0x4a8] sm:$0xf0] }
 0x2de   : > { %v1938_v10 = vpop.f32.mrf.mxu2  ;;  %7357 = vst [vmem:[#allocation179_spill] sm:$0xff] %v6428_v0 }
 0x2df   : > { %v2097_v29 = vpop.f32.mrf.mxu3  ;;  %v1939_v40 = vadd.f32 %v1938_v10, %v7352_v18  ;;  %v6430_v10 = vor.u32 %v4924_v38, %v4451_v60 }
 0x2e0   : > { %v2258_v62 = vpop.f32.mrf.mxu0 }
 0x2e1   : > { %v2098_v22 = vadd.f32 %v2097_v29, %v1939_v40  ;;  %7358 = vst [vmem:[#allocation180_spill] sm:$0xff] %v6430_v10 }
 0x2e2   : > { %v6415_v16 = vpop.f32.mrf.mxu1 }
 0x2e3   : > { %7353 = vst [vmem:[#allocation42_spill] sm:$0xff] %v6415_v16  ;;  %v6417_v42 = vadd.f32 %v2256_v17, %v2098_v22  ;;  %v7361_v22 = vld [vmem:[#allocation47_spill] sm:$0xff]  ;;  %v7456_v16 = vld [vmem:[#allocation100_spill] sm:$0xff] }
 0x2e5   : > { %7354 = vst [vmem:[#allocation45_spill] sm:$0xff] %v6417_v42 }
 0x2e6   : > { %v1940_v25 = vpop.f32.mrf.mxu2 }
 0x2e7   : > { %v2099_v13 = vpop.f32.mrf.mxu3  ;;  %v1941_v55 = vadd.f32 %v1940_v25, %v7355_v6 }
 0x2e8   : > { %v2261_v18 = vpop.f32.mrf.mxu0 }
 0x2e9   : > { %v2100_v29 = vadd.f32 %v2099_v13, %v1941_v55  ;;  %v7365_v55 = vld [vmem:[#allocation51_spill] sm:$0xff] }
 0x2ea   : > { %v6432_v17 = vpop.f32.mrf.mxu1 }
 0x2eb   : > { %7359 = vst [vmem:[#allocation181_spill] sm:$0xff] %v6432_v17  ;;  %v6434_v40 = vadd.f32 %v2258_v62, %v2100_v29  ;;  %1982 = vmatmul.bf16.gmra.mxu2 %v6426_v19  ;;  %2300 = vmatmul.bf16.gmra.mxu0 %v6430_v10  ;;  %v7369_v19 = vld [vmem:[#allocation52_spill] sm:$0xff] }
 0x2ec   : > { %2141 = vmatmul.bf16.gmra.mxu3 %v6428_v0 }
 0x2ed   : > { %7360 = vst [vmem:[#allocation182_spill] sm:$0xff] %v6434_v40  ;;  %2779 = vmatmul.bf16.gmra.mxu1 %v7361_v22  ;;  %v7368_v22 = vld [vmem:[#allocation3_spill] sm:$0xff] }
 0x2ee   : > { %v1943_v6 = vpop.f32.mrf.mxu2 }
 0x2ef   : > { %v2102_v25 = vpop.f32.mrf.mxu3  ;;  %v1944_v26 = vadd.f32 %v1943_v6, %v7362_v56  ;;  %v7370_v6 = vld [vmem:[#allocation53_spill] sm:$0xff] }
 0x2f0   : > { %v2263_v38 = vpop.f32.mrf.mxu0 }
 0x2f1   : > { %v2103_v60 = vadd.f32 %v2102_v25, %v1944_v26  ;;  %v7371_v25 = vld [vmem:[#allocation54_spill] sm:$0xff]  ;;  %v7372_v26 = vld [vmem:[#allocation55_spill] sm:$0xff] }
 0x2f2   : > { %v6441_v13 = vpop.f32.mrf.mxu1 }
 0x2f3   : > { %7363 = vst [vmem:[#allocation47_spill] sm:$0xff] %v6441_v13  ;;  %v6443_v14 = vadd.f32 %v2261_v18, %v2103_v60 }
 0x2f5   : > { %7364 = vst [vmem:[#allocation50_spill] sm:$0xff] %v6443_v14  ;;  %v7379_v14 = vld [vmem:[#allocation57_spill] sm:$0xff] }
 0x2f6   : > { %v1945_v62 = vpop.f32.mrf.mxu2 }
 0x2f7   : > { %v2104_v54 = vpop.f32.mrf.mxu3  ;;  %v1946_v29 = vadd.f32 %v1945_v62, %v7365_v55 }
 0x2f8   : > { %v2266_v40 = vpop.f32.mrf.mxu0 }
 0x2f9   : > { %v2105_v17 = vadd.f32 %v2104_v54, %v1946_v29  ;;  %v7375_v29 = vld [vmem:[#allocation56_spill] sm:$0xff] }
 0x2fa   : > { %v6446_v0 = vpop.f32.mrf.mxu1 }
 0x2fb   : > { %7366 = vst [vmem:[#allocation51_spill] sm:$0xff] %v6446_v0  ;;  %v6448_v10 = vadd.f32 %v2263_v38, %v2105_v17  ;;  %2793 = vmatmul.bf16.vlgmr.msra.gmra.mxu2 %v7368_v22  ;;  %3111 = vmatmul.bf16.vlgmr.msra.gmra.mxu0 %v7370_v6 }
 0x2fc   : > { %2952 = vmatmul.bf16.vlgmr.msra.gmra.mxu3 %v7369_v19 }
 0x2fd   : > { %7367 = vst [vmem:[#allocation183_spill] sm:$0xff] %v6448_v10  ;;  %3270 = vmatmul.bf16.vlgmr.msra.gmra.mxu1 %v7371_v25  ;;  %v7378_v25 = vld [vmem:[#allocation5_spill] sm:$0xff] }
 0x2fe   : > { %v1948_v18 = vpop.f32.mrf.mxu2 }
 0x2ff   : > { %v2107_v56 = vpop.f32.mrf.mxu3  ;;  %v1949_v60 = vadd.f32 %v1948_v18, %v7372_v26  ;;  %v7380_v18 = vld [vmem:[#allocation58_spill] sm:$0xff]  ;;  %v7382_v26 = vld [vmem:[#allocation60_spill] sm:$0xff] }
 0x300   : > { %v2268_v62 = vpop.f32.mrf.mxu0 }
 0x301   : > { %v2108_v13 = vadd.f32 %v2107_v56, %v1949_v60  ;;  %v7381_v56 = vld [vmem:[#allocation59_spill] sm:$0xff] }
 0x302   : > { %v6455_v54 = vpop.f32.mrf.mxu1 }
 0x303   : > { %7373 = vst [vmem:[#allocation3_spill] sm:$0xff] %v6455_v54  ;;  %v6457_v55 = vadd.f32 %v2266_v40, %v2108_v13 }
 0x305   : > { %7374 = vst [vmem:[#allocation52_spill] sm:$0xff] %v6457_v55  ;;  %v7389_v55 = vld [vmem:[#allocation62_spill] sm:$0xff] }
 0x306   : > { %v1950_v17 = vpop.f32.mrf.mxu2 }
 0x307   : > { %v2109_v38 = vpop.f32.mrf.mxu3  ;;  %v1951_v22 = vadd.f32 %v1950_v17, %v7375_v29 }
 0x308   : > { %v2271_v19 = vpop.f32.mrf.mxu0 }
 0x309   : > { %v2110_v0 = vadd.f32 %v2109_v38, %v1951_v22  ;;  %v7385_v22 = vld [vmem:[#allocation61_spill] sm:$0xff] }
 0x30a   : > { %v6460_v10 = vpop.f32.mrf.mxu1 }
 0x30b   : > { %7376 = vst [vmem:[#allocation53_spill] sm:$0xff] %v6460_v10  ;;  %v6462_v6 = vadd.f32 %v2268_v62, %v2110_v0  ;;  %2798 = vmatmul.bf16.gmra.mxu2 %v7378_v25  ;;  %3116 = vmatmul.bf16.gmra.mxu0 %v7380_v18 }
 0x30c   : > { %2957 = vmatmul.bf16.gmra.mxu3 %v7379_v14 }
 0x30d   : > { %7377 = vst [vmem:[#allocation54_spill] sm:$0xff] %v6462_v6  ;;  %3275 = vmatmul.bf16.gmra.mxu1 %v7381_v56  ;;  %v7388_v56 = vld [vmem:[#allocation7_spill] sm:$0xff] }
 0x30e   : > { %v1953_v40 = vpop.f32.mrf.mxu2 }
 0x30f   : > { %v2112_v13 = vpop.f32.mrf.mxu3  ;;  %v1954_v60 = vadd.f32 %v1953_v40, %v7382_v26  ;;  %v7390_v40 = vld [vmem:[#allocation63_spill] sm:$0xff]  ;;  %v7392_v26 = vld [vmem:[#allocation65_spill] sm:$0xff] }
 0x310   : > { %v2273_v17 = vpop.f32.mrf.mxu0 }
 0x311   : > { %v2113_v54 = vadd.f32 %v2112_v13, %v1954_v60  ;;  %v7391_v13 = vld [vmem:[#allocation64_spill] sm:$0xff] }
 0x312   : > { %v6469_v38 = vpop.f32.mrf.mxu1 }
 0x313   : > { %7383 = vst [vmem:[#allocation55_spill] sm:$0xff] %v6469_v38  ;;  %v6471_v29 = vadd.f32 %v2271_v19, %v2113_v54 }
 0x315   : > { %7384 = vst [vmem:[#allocation56_spill] sm:$0xff] %v6471_v29  ;;  %v7399_v29 = vld [vmem:[#allocation67_spill] sm:$0xff] }
 0x316   : > { %v1955_v0 = vpop.f32.mrf.mxu2 }
 0x317   : > { %v2114_v62 = vpop.f32.mrf.mxu3  ;;  %v1956_v25 = vadd.f32 %v1955_v0, %v7385_v22 }
 0x318   : > { %v2276_v14 = vpop.f32.mrf.mxu0 }
 0x319   : > { %v2115_v10 = vadd.f32 %v2114_v62, %v1956_v25  ;;  %v7395_v25 = vld [vmem:[#allocation66_spill] sm:$0xff] }
 0x31a   : > { %v6474_v6 = vpop.f32.mrf.mxu1 }
 0x31b   : > { %7386 = vst [vmem:[#allocation5_spill] sm:$0xff] %v6474_v6  ;;  %v6476_v18 = vadd.f32 %v2273_v17, %v2115_v10  ;;  %2803 = vmatmul.bf16.gmra.mxu2 %v7388_v56  ;;  %3121 = vmatmul.bf16.gmra.mxu0 %v7390_v40 }
 0x31c   : > { %2962 = vmatmul.bf16.gmra.mxu3 %v7389_v55 }
 0x31d   : > { %7387 = vst [vmem:[#allocation57_spill] sm:$0xff] %v6476_v18  ;;  %3280 = vmatmul.bf16.gmra.mxu1 %v7391_v13  ;;  %v7398_v13 = vld [vmem:[#allocation9_spill] sm:$0xff] }
 0x31e   : > { %v1958_v54 = vpop.f32.mrf.mxu2 }
 0x31f   : > { %v2117_v19 = vpop.f32.mrf.mxu3  ;;  %v1959_v60 = vadd.f32 %v1958_v54, %v7392_v26  ;;  %v7400_v54 = vld [vmem:[#allocation68_spill] sm:$0xff]  ;;  %v7402_v26 = vld [vmem:[#allocation70_spill] sm:$0xff] }
 0x320   : > { %v2278_v0 = vpop.f32.mrf.mxu0 }
 0x321   : > { %v2118_v38 = vadd.f32 %v2117_v19, %v1959_v60  ;;  %v7401_v19 = vld [vmem:[#allocation69_spill] sm:$0xff] }
 0x322   : > { %v6483_v62 = vpop.f32.mrf.mxu1 }
 0x323   : > { %7393 = vst [vmem:[#allocation58_spill] sm:$0xff] %v6483_v62  ;;  %v6485_v22 = vadd.f32 %v2276_v14, %v2118_v38 }
 0x325   : > { %7394 = vst [vmem:[#allocation59_spill] sm:$0xff] %v6485_v22  ;;  %v7409_v22 = vld [vmem:[#allocation72_spill] sm:$0xff] }
 0x326   : > { %v1960_v10 = vpop.f32.mrf.mxu2 }
 0x327   : > { %v2119_v17 = vpop.f32.mrf.mxu3  ;;  %v1961_v56 = vadd.f32 %v1960_v10, %v7395_v25 }
 0x328   : > { %v2281_v55 = vpop.f32.mrf.mxu0 }
 0x329   : > { %v2120_v6 = vadd.f32 %v2119_v17, %v1961_v56  ;;  %v7405_v56 = vld [vmem:[#allocation71_spill] sm:$0xff] }
 0x32a   : > { %v6488_v18 = vpop.f32.mrf.mxu1 }
 0x32b   : > { %7396 = vst [vmem:[#allocation60_spill] sm:$0xff] %v6488_v18  ;;  %v6490_v40 = vadd.f32 %v2278_v0, %v2120_v6  ;;  %2808 = vmatmul.bf16.gmra.mxu2 %v7398_v13  ;;  %3126 = vmatmul.bf16.gmra.mxu0 %v7400_v54 }
 0x32c   : > { %2967 = vmatmul.bf16.gmra.mxu3 %v7399_v29 }
 0x32d   : > { %7397 = vst [vmem:[#allocation61_spill] sm:$0xff] %v6490_v40  ;;  %3285 = vmatmul.bf16.gmra.mxu1 %v7401_v19  ;;  %v7408_v19 = vld [vmem:[#allocation11_spill] sm:$0xff] }
 0x32e   : > { %v1963_v38 = vpop.f32.mrf.mxu2 }
 0x32f   : > { %v2122_v14 = vpop.f32.mrf.mxu3  ;;  %v1964_v60 = vadd.f32 %v1963_v38, %v7402_v26  ;;  %v7410_v38 = vld [vmem:[#allocation73_spill] sm:$0xff]  ;;  %v7412_v26 = vld [vmem:[#allocation75_spill] sm:$0xff] }
 0x330   : > { %v2283_v10 = vpop.f32.mrf.mxu0 }
 0x331   : > { %v2123_v62 = vadd.f32 %v2122_v14, %v1964_v60  ;;  %v7411_v14 = vld [vmem:[#allocation74_spill] sm:$0xff] }
 0x332   : > { %v6497_v17 = vpop.f32.mrf.mxu1 }
 0x333   : > { %7403 = vst [vmem:[#allocation7_spill] sm:$0xff] %v6497_v17  ;;  %v6499_v25 = vadd.f32 %v2281_v55, %v2123_v62 }
 0x335   : > { %7404 = vst [vmem:[#allocation62_spill] sm:$0xff] %v6499_v25  ;;  %v7419_v25 = vld [vmem:[#allocation77_spill] sm:$0xff] }
 0x336   : > { %v1965_v6 = vpop.f32.mrf.mxu2 }
 0x337   : > { %v2124_v0 = vpop.f32.mrf.mxu3  ;;  %v1966_v13 = vadd.f32 %v1965_v6, %v7405_v56 }
 0x338   : > { %v2286_v29 = vpop.f32.mrf.mxu0 }
 0x339   : > { %v2125_v18 = vadd.f32 %v2124_v0, %v1966_v13  ;;  %v7415_v13 = vld [vmem:[#allocation76_spill] sm:$0xff] }
 0x33a   : > { %v6502_v40 = vpop.f32.mrf.mxu1 }
 0x33b   : > { %7406 = vst [vmem:[#allocation63_spill] sm:$0xff] %v6502_v40  ;;  %v6504_v54 = vadd.f32 %v2283_v10, %v2125_v18  ;;  %2813 = vmatmul.bf16.gmra.mxu2 %v7408_v19  ;;  %3131 = vmatmul.bf16.gmra.mxu0 %v7410_v38 }
 0x33c   : > { %2972 = vmatmul.bf16.gmra.mxu3 %v7409_v22 }
 0x33d   : > { %7407 = vst [vmem:[#allocation64_spill] sm:$0xff] %v6504_v54  ;;  %3290 = vmatmul.bf16.gmra.mxu1 %v7411_v14  ;;  %v7418_v14 = vld [vmem:[#allocation13_spill] sm:$0xff] }
 0x33e   : > { %v1968_v62 = vpop.f32.mrf.mxu2 }
 0x33f   : > { %v2127_v55 = vpop.f32.mrf.mxu3  ;;  %v1969_v60 = vadd.f32 %v1968_v62, %v7412_v26  ;;  %v7420_v62 = vld [vmem:[#allocation78_spill] sm:$0xff]  ;;  %v7422_v26 = vld [vmem:[#allocation80_spill] sm:$0xff] }
 0x340   : > { %v2288_v6 = vpop.f32.mrf.mxu0 }
 0x341   : > { %v2128_v17 = vadd.f32 %v2127_v55, %v1969_v60  ;;  %v7421_v55 = vld [vmem:[#allocation79_spill] sm:$0xff] }
 0x342   : > { %v6511_v0 = vpop.f32.mrf.mxu1 }
 0x343   : > { %7413 = vst [vmem:[#allocation65_spill] sm:$0xff] %v6511_v0  ;;  %v6513_v56 = vadd.f32 %v2286_v29, %v2128_v17 }
 0x345   : > { %7414 = vst [vmem:[#allocation66_spill] sm:$0xff] %v6513_v56  ;;  %v7429_v56 = vld [vmem:[#allocation82_spill] sm:$0xff] }
 0x346   : > { %v1970_v18 = vpop.f32.mrf.mxu2 }
 0x347   : > { %v2129_v10 = vpop.f32.mrf.mxu3  ;;  %v1971_v19 = vadd.f32 %v1970_v18, %v7415_v13 }
 0x348   : > { %v2291_v22 = vpop.f32.mrf.mxu0 }
 0x349   : > { %v2130_v40 = vadd.f32 %v2129_v10, %v1971_v19  ;;  %v7425_v19 = vld [vmem:[#allocation81_spill] sm:$0xff] }
 0x34a   : > { %v6516_v54 = vpop.f32.mrf.mxu1 }
 0x34b   : > { %7416 = vst [vmem:[#allocation9_spill] sm:$0xff] %v6516_v54  ;;  %v6518_v38 = vadd.f32 %v2288_v6, %v2130_v40  ;;  %2818 = vmatmul.bf16.gmra.mxu2 %v7418_v14  ;;  %3136 = vmatmul.bf16.gmra.mxu0 %v7420_v62 }
 0x34c   : > { %2977 = vmatmul.bf16.gmra.mxu3 %v7419_v25 }
 0x34d   : > { %7417 = vst [vmem:[#allocation67_spill] sm:$0xff] %v6518_v38  ;;  %3295 = vmatmul.bf16.gmra.mxu1 %v7421_v55  ;;  %v7428_v55 = vld [vmem:[#allocation15_spill] sm:$0xff] }
 0x34e   : > { %v1973_v17 = vpop.f32.mrf.mxu2 }
 0x34f   : > { %v2132_v29 = vpop.f32.mrf.mxu3  ;;  %v1974_v60 = vadd.f32 %v1973_v17, %v7422_v26  ;;  %v7430_v17 = vld [vmem:[#allocation83_spill] sm:$0xff]  ;;  %v7432_v26 = vld [vmem:[#allocation85_spill] sm:$0xff] }
 0x350   : > { %v2293_v18 = vpop.f32.mrf.mxu0 }
 0x351   : > { %v2133_v0 = vadd.f32 %v2132_v29, %v1974_v60  ;;  %v7431_v29 = vld [vmem:[#allocation84_spill] sm:$0xff] }
 0x352   : > { %v6525_v10 = vpop.f32.mrf.mxu1 }
 0x353   : > { %7423 = vst [vmem:[#allocation68_spill] sm:$0xff] %v6525_v10  ;;  %v6527_v13 = vadd.f32 %v2291_v22, %v2133_v0 }
 0x355   : > { %7424 = vst [vmem:[#allocation69_spill] sm:$0xff] %v6527_v13  ;;  %v7439_v13 = vld [vmem:[#allocation87_spill] sm:$0xff] }
 0x356   : > { %v1975_v40 = vpop.f32.mrf.mxu2 }
 0x357   : > { %v2134_v6 = vpop.f32.mrf.mxu3  ;;  %v1976_v14 = vadd.f32 %v1975_v40, %v7425_v19 }
 0x358   : > { %v2296_v25 = vpop.f32.mrf.mxu0 }
 0x359   : > { %v2135_v54 = vadd.f32 %v2134_v6, %v1976_v14  ;;  %v7435_v14 = vld [vmem:[#allocation86_spill] sm:$0xff] }
 0x35a   : > { %v6530_v38 = vpop.f32.mrf.mxu1 }
 0x35b   : > { %7426 = vst [vmem:[#allocation70_spill] sm:$0xff] %v6530_v38  ;;  %v6532_v62 = vadd.f32 %v2293_v18, %v2135_v54  ;;  %2823 = vmatmul.bf16.gmra.mxu2 %v7428_v55  ;;  %3141 = vmatmul.bf16.gmra.mxu0 %v7430_v17 }
 0x35c   : > { %2982 = vmatmul.bf16.gmra.mxu3 %v7429_v56 }
 0x35d   : > { %7427 = vst [vmem:[#allocation71_spill] sm:$0xff] %v6532_v62  ;;  %3300 = vmatmul.bf16.gmra.mxu1 %v7431_v29  ;;  %v7438_v29 = vld [vmem:[#allocation17_spill] sm:$0xff] }
 0x35e   : > { %v1978_v0 = vpop.f32.mrf.mxu2 }
 0x35f   : > { %v2137_v22 = vpop.f32.mrf.mxu3  ;;  %v1979_v60 = vadd.f32 %v1978_v0, %v7432_v26  ;;  %v7440_v0 = vld [vmem:[#allocation88_spill] sm:$0xff]  ;;  %v7442_v26 = vld [vmem:[#allocation90_spill] sm:$0xff] }
 0x360   : > { %v2298_v40 = vpop.f32.mrf.mxu0 }
 0x361   : > { %v2138_v10 = vadd.f32 %v2137_v22, %v1979_v60  ;;  %v7441_v22 = vld [vmem:[#allocation89_spill] sm:$0xff] }
 0x362   : > { %v6539_v6 = vpop.f32.mrf.mxu1 }
 0x363   : > { %7433 = vst [vmem:[#allocation11_spill] sm:$0xff] %v6539_v6  ;;  %v6541_v19 = vadd.f32 %v2296_v25, %v2138_v10 }
 0x365   : > { %7434 = vst [vmem:[#allocation72_spill] sm:$0xff] %v6541_v19  ;;  %v7448_v19 = vld [vmem:[#allocation92_spill] sm:$0xff] }
 0x366   : > { %v1980_v54 = vpop.f32.mrf.mxu2 }
 0x367   : > { %v2139_v18 = vpop.f32.mrf.mxu3  ;;  %v1981_v55 = vadd.f32 %v1980_v54, %v7435_v14 }
 0x368   : > { %v2301_v56 = vpop.f32.mrf.mxu0 }
 0x369   : > { %v2140_v38 = vadd.f32 %v2139_v18, %v1981_v55  ;;  %v7445_v55 = vld [vmem:[#allocation91_spill] sm:$0xff] }
 0x36a   : > { %v6544_v62 = vpop.f32.mrf.mxu1 }
 0x36b   : > { %7436 = vst [vmem:[#allocation73_spill] sm:$0xff] %v6544_v62  ;;  %v6546_v17 = vadd.f32 %v2298_v40, %v2140_v38  ;;  %2828 = vmatmul.bf16.gmra.mxu2 %v7438_v29  ;;  %3146 = vmatmul.bf16.gmra.mxu0 %v7440_v0 }
 0x36c   : > { %2987 = vmatmul.bf16.gmra.mxu3 %v7439_v13 }
 0x36d   : > { %7437 = vst [vmem:[#allocation74_spill] sm:$0xff] %v6546_v17  ;;  %3305 = vmatmul.bf16.gmra.mxu1 %v7441_v22  ;;  %v7447_v22 = vld [vmem:[#allocation19_spill] sm:$0xff] }
 0x36e   : > { %v1983_v10 = vpop.f32.mrf.mxu2 }
 0x36f   : > { %v2142_v25 = vpop.f32.mrf.mxu3  ;;  %v1984_v60 = vadd.f32 %v1983_v10, %v7442_v26  ;;  %v7449_v10 = vld [vmem:[#allocation93_spill] sm:$0xff] }
 0x370   : > { %v2303_v54 = vpop.f32.mrf.mxu0 }
 0x371   : > { %v2143_v6 = vadd.f32 %v2142_v25, %v1984_v60  ;;  %v7450_v25 = vld [vmem:[#allocation94_spill] sm:$0xff] }
 0x372   : > { %v6553_v18 = vpop.f32.mrf.mxu1 }
 0x373   : > { %7443 = vst [vmem:[#allocation75_spill] sm:$0xff] %v6553_v18  ;;  %v6555_v14 = vadd.f32 %v2301_v56, %v2143_v6  ;;  %v7451_v56 = vld [vmem:[#allocation95_spill] sm:$0xff] }
 0x375   : > { %7444 = vst [vmem:[#allocation76_spill] sm:$0xff] %v6555_v14 }
 0x376   : > { %v1985_v38 = vpop.f32.mrf.mxu2 }
 0x377   : > { %v2144_v40 = vpop.f32.mrf.mxu3  ;;  %v1986_v29 = vadd.f32 %v1985_v38, %v7445_v55 }
 0x378   : > { %v3112_v13 = vpop.f32.mrf.mxu0 }
 0x379   : > { %v2145_v62 = vadd.f32 %v2144_v40, %v1986_v29 }
 0x37a   : > { %v3271_v17 = vpop.f32.mrf.mxu1 }
 0x37b   : > { %v6558_v0 = vadd.f32 %v2303_v54, %v2145_v62  ;;  %2833 = vmatmul.bf16.gmra.mxu2 %v7447_v22  ;;  %3151 = vmatmul.bf16.gmra.mxu0 %v7449_v10  ;;  %v6568_v62 = vld [vmem:[%s7040_s3] ss:$0 sm:$0xff] }
 0x37c   : > { %2992 = vmatmul.bf16.gmra.mxu3 %v7448_v19  ;;  %v6574_v10 = vld [vmem:[%s7041_s4] ss:$0 sm:$0xff] }
 0x37d   : > { %7446 = vst [vmem:[#allocation13_spill] sm:$0xff] %v6558_v0  ;;  %3310 = vmatmul.bf16.gmra.mxu1 %v7450_v25 }
 0x37e   : > { %v2794_v26 = vpop.f32.mrf.mxu2 }
 0x37f   : > { %v2953_v6 = vpop.f32.mrf.mxu3  ;;  %v2795_v60 = vadd.f32 %v2794_v26, %v7451_v56 }
 0x380   : > { %v3114_v38 = vpop.f32.mrf.mxu0 }
 0x381   : > { %v2954_v18 = vadd.f32 %v2953_v6, %v2795_v60  ;;  %v7452_v60 = vld [vmem:[#allocation24_spill] sm:$0xff] }
 0x382   : > { %v3273_v40 = vpop.f32.mrf.mxu1 }
 0x383   : > { %v3113_v55 = vadd.f32 %v3112_v13, %v2954_v18 }
 0x385   : > { %v3272_v29 = vadd.f32 %v3271_v17, %v3113_v55 }
 0x386   : > { %v2796_v19 = vpop.f32.mrf.mxu2 }
 0x387   : > { %v2955_v54 = vpop.f32.mrf.mxu3  ;;  %v3421_v22 = vmax.f32 %v5837_v12, %v3272_v29  ;;  %v2797_v25 = vadd.f32 %v2796_v19, %v5835_v37  ;;  %v7453_v12 = vld [vmem:[#allocation96_spill] sm:$0xff] }
 0x388   : > { %v3117_v17 = vpop.f32.mrf.mxu0 }
 0x389   : > { %v3485_v26 = vmul.f32 %v6568_v62, %v3421_v22  ;;  %v2956_v18 = vadd.f32 %v2955_v54, %v2797_v25  ;;  %v7454_v54 = vld [vmem:[#allocation98_spill] sm:$0xff]  ;;  %v7455_v25 = vld [vmem:[#allocation97_spill] sm:$0xff] }
 0x38a   : > { %v3276_v13 = vpop.f32.mrf.mxu1 }
 0x38b   : > { %v3549_v6 = vadd.f32 %v6574_v10, %v3485_v26  ;;  %v3115_v56 = vadd.f32 %v3114_v38, %v2956_v18  ;;  %2838 = vmatmul.bf16.gmra.mxu2 %v7452_v60  ;;  %3156 = vmatmul.bf16.gmra.mxu0 %v5848_v57 }
 0x38c   : > { %2997 = vmatmul.bf16.gmra.mxu3 %v5846_v31 }
 0x38d   : > { %3315 = vmatmul.bf16.gmra.mxu1 %v7453_v12  ;;  %v3609_v55 = vmax.f32 %v3549_v6, 0.0  ;;  %v3274_v29 = vadd.f32 %v3273_v40, %v3115_v56 }
 0x38e   : > { %v2799_v37 = vpop.f32.mrf.mxu2 }
 0x38f   : > { %v2958_v19 = vpop.f32.mrf.mxu3  ;;  %v3669_v38 = vpack.c.bf16 %v3609_v55, %v3609_v55  ;;  %v3422_v22 = vmax.f32 %v7454_v54, %v3274_v29  ;;  %v2800_v31 = vadd.f32 %v2799_v37, %v7455_v25  ;;  %v7457_v54 = vld [vmem:[#allocation99_spill] sm:$0xff] }
 0x390   : > { %v3119_v26 = vpop.f32.mrf.mxu0 }
 0x391   : > { %3730 = vst.msk [vmem:[%s6587_s11] sm:$0xf] %vm3729_vm0, %v3669_v38  ;;  %v3486_v57 = vmul.f32 %v6568_v62, %v3422_v22  ;;  %v2959_v40 = vadd.f32 %v2958_v19, %v2800_v31  ;;  %v7458_v31 = vld [vmem:[#allocation29_spill] sm:$0xff] }
 0x392   : > { %v3278_v18 = vpop.f32.mrf.mxu1 }
 0x393   : > { %v3550_v6 = vadd.f32 %v6574_v10, %v3486_v57  ;;  %v3118_v56 = vadd.f32 %v3117_v17, %v2959_v40 }
 0x395   : > { %v3610_v60 = vmax.f32 %v3550_v6, 0.0  ;;  %v3277_v12 = vadd.f32 %v3276_v13, %v3118_v56  ;;  %v7461_v56 = vld [vmem:[#allocation102_spill] sm:$0xff] }
 0x396   : > { %v2801_v0 = vpop.f32.mrf.mxu2 }
 0x397   : > { %v2960_v14 = vpop.f32.mrf.mxu3  ;;  %v3670_v55 = vpack.c.bf16 %v3610_v60, %v3610_v60  ;;  %v3423_v29 = vmax.f32 %v7456_v16, %v3277_v12  ;;  %v2802_v42 = vadd.f32 %v2801_v0, %v7457_v54  ;;  %v7459_v16 = vld [vmem:[#allocation101_spill] sm:$0xff] }
 0x398   : > { %v3122_v19 = vpop.f32.mrf.mxu0 }
 0x399   : > { %3731 = vst.msk [vmem:[%s6587_s11 + $0x4] sm:$0xf] %vm3729_vm0, %v3670_v55  ;;  %v3487_v37 = vmul.f32 %v6568_v62, %v3423_v29  ;;  %v2961_v38 = vadd.f32 %v2960_v14, %v2802_v42  ;;  %v7460_v42 = vld [vmem:[#allocation103_spill] sm:$0xff] }
 0x39a   : > { %v3281_v22 = vpop.f32.mrf.mxu1 }
 0x39b   : > { %v3551_v25 = vadd.f32 %v6574_v10, %v3487_v37  ;;  %v3120_v17 = vadd.f32 %v3119_v26, %v2961_v38  ;;  %2843 = vmatmul.bf16.gmra.mxu2 %v7458_v31  ;;  %3161 = vmatmul.bf16.gmra.mxu0 %v5880_v51 }
 0x39c   : > { %3002 = vmatmul.bf16.gmra.mxu3 %v5878_v35 }
 0x39d   : > { %3320 = vmatmul.bf16.gmra.mxu1 %v7459_v16  ;;  %v3611_v0 = vmax.f32 %v3551_v25, 0.0  ;;  %v3279_v13 = vadd.f32 %v3278_v18, %v3120_v17 }
 0x39e   : > { %v2804_v57 = vpop.f32.mrf.mxu2 }
 0x39f   : > { %v2963_v40 = vpop.f32.mrf.mxu3  ;;  %v3671_v6 = vpack.c.bf16 %v3611_v0, %v3611_v0  ;;  %v3424_v14 = vmax.f32 %v7460_v42, %v3279_v13  ;;  %v2805_v60 = vadd.f32 %v2804_v57, %v7461_v56 }
 0x3a0   : > { %v3124_v35 = vpop.f32.mrf.mxu0 }
 0x3a1   : > { %3732 = vst.msk [vmem:[%s6587_s11 + $0x8] sm:$0xf] %vm3729_vm0, %v3671_v6  ;;  %v3488_v26 = vmul.f32 %v6568_v62, %v3424_v14  ;;  %v2964_v12 = vadd.f32 %v2963_v40, %v2805_v60  ;;  %v7462_v6 = vld [vmem:[#allocation34_spill] sm:$0xff] }
 0x3a2   : > { %v3283_v55 = vpop.f32.mrf.mxu1 }
 0x3a3   : > { %v3552_v51 = vadd.f32 %v6574_v10, %v3488_v26  ;;  %v3123_v29 = vadd.f32 %v3122_v19, %v2964_v12  ;;  %v7465_v26 = vld [vmem:[#allocation107_spill] sm:$0xff] }
 0x3a5   : > { %v3612_v54 = vmax.f32 %v3552_v51, 0.0  ;;  %v3282_v18 = vadd.f32 %v3281_v22, %v3123_v29  ;;  %v7463_v22 = vld [vmem:[#allocation104_spill] sm:$0xff]  ;;  %v7466_v51 = vld [vmem:[#allocation106_spill] sm:$0xff] }
 0x3a6   : > { %v2806_v37 = vpop.f32.mrf.mxu2 }
 0x3a7   : > { %v2965_v38 = vpop.f32.mrf.mxu3  ;;  %v3672_v25 = vpack.c.bf16 %v3612_v54, %v3612_v54  ;;  %v3425_v17 = vmax.f32 %v5901_v48, %v3282_v18  ;;  %v2807_v31 = vadd.f32 %v2806_v37, %v5899_v28  ;;  %v7464_v48 = vld [vmem:[#allocation105_spill] sm:$0xff] }
 0x3a8   : > { %v3127_v13 = vpop.f32.mrf.mxu0 }
 0x3a9   : > { %3733 = vst.msk [vmem:[%s6587_s11 + $0xc] sm:$0xf] %vm3729_vm0, %v3672_v25  ;;  %v3489_v16 = vmul.f32 %v6568_v62, %v3425_v17  ;;  %v2966_v0 = vadd.f32 %v2965_v38, %v2807_v31 }
 0x3aa   : > { %v3286_v57 = vpop.f32.mrf.mxu1 }
 0x3ab   : > { %v3553_v40 = vadd.f32 %v6574_v10, %v3489_v16  ;;  %v3125_v19 = vadd.f32 %v3124_v35, %v2966_v0  ;;  %2848 = vmatmul.bf16.gmra.mxu2 %v7462_v6  ;;  %3166 = vmatmul.bf16.gmra.mxu0 %v7463_v22 }
 0x3ac   : > { %3007 = vmatmul.bf16.gmra.mxu3 %v5910_v46 }
 0x3ad   : > { %3325 = vmatmul.bf16.gmra.mxu1 %v7464_v48  ;;  %v3613_v28 = vmax.f32 %v3553_v40, 0.0  ;;  %v3284_v42 = vadd.f32 %v3283_v55, %v3125_v19 }
 0x3ae   : > { %v2809_v14 = vpop.f32.mrf.mxu2 }
 0x3af   : > { %v2968_v56 = vpop.f32.mrf.mxu3  ;;  %v3673_v60 = vpack.c.bf16 %v3613_v28, %v3613_v28  ;;  %v3426_v12 = vmax.f32 %v7465_v26, %v3284_v42  ;;  %v2810_v29 = vadd.f32 %v2809_v14, %v7466_v51  ;;  %v7467_v42 = vld [vmem:[#allocation39_spill] sm:$0xff] }
 0x3b0   : > { %v3129_v46 = vpop.f32.mrf.mxu0 }
 0x3b1   : > { %3734 = vst.msk [vmem:[%s6587_s11 + $0x10] sm:$0xf] %vm3729_vm0, %v3673_v60  ;;  %v3490_v35 = vmul.f32 %v6568_v62, %v3426_v12  ;;  %v2969_v54 = vadd.f32 %v2968_v56, %v2810_v29  ;;  %v7470_v12 = vld [vmem:[#allocation111_spill] sm:$0xff]  ;;  %v7471_v29 = vld [vmem:[#allocation110_spill] sm:$0xff] }
 0x3b2   : > { %v3288_v18 = vpop.f32.mrf.mxu1 }
 0x3b3   : > { %v3554_v37 = vadd.f32 %v6574_v10, %v3490_v35  ;;  %v3128_v38 = vadd.f32 %v3127_v13, %v2969_v54 }
 0x3b5   : > { %v3614_v25 = vmax.f32 %v3554_v37, 0.0  ;;  %v3287_v55 = vadd.f32 %v3286_v57, %v3128_v38  ;;  %v7468_v57 = vld [vmem:[#allocation108_spill] sm:$0xff] }
 0x3b6   : > { %v2811_v17 = vpop.f32.mrf.mxu2 }
 0x3b7   : > { %v2970_v31 = vpop.f32.mrf.mxu3  ;;  %v3674_v16 = vpack.c.bf16 %v3614_v25, %v3614_v25  ;;  %v3427_v0 = vmax.f32 %v5927_v34, %v3287_v55  ;;  %v2812_v40 = vadd.f32 %v2811_v17, %v5925_v50  ;;  %v7469_v34 = vld [vmem:[#allocation109_spill] sm:$0xff] }
 0x3b8   : > { %v3132_v22 = vpop.f32.mrf.mxu0 }
 0x3b9   : > { %3735 = vst.msk [vmem:[%s6587_s11 + $0x14] sm:$0xf] %vm3729_vm0, %v3674_v16  ;;  %v3491_v19 = vmul.f32 %v6568_v62, %v3427_v0  ;;  %v2971_v6 = vadd.f32 %v2970_v31, %v2812_v40 }
 0x3ba   : > { %v3291_v48 = vpop.f32.mrf.mxu1 }
 0x3bb   : > { %v3555_v28 = vadd.f32 %v6574_v10, %v3491_v19  ;;  %v3130_v13 = vadd.f32 %v3129_v46, %v2971_v6  ;;  %2853 = vmatmul.bf16.gmra.mxu2 %v7467_v42  ;;  %3171 = vmatmul.bf16.gmra.mxu0 %v7468_v57  ;;  %v7472_v57 = vld [vmem:[#allocation44_spill] sm:$0xff] }
 0x3bc   : > { %3012 = vmatmul.bf16.gmra.mxu3 %v5936_v30 }
 0x3bd   : > { %3330 = vmatmul.bf16.gmra.mxu1 %v7469_v34  ;;  %v3615_v50 = vmax.f32 %v3555_v28, 0.0  ;;  %v3289_v14 = vadd.f32 %v3288_v18, %v3130_v13 }
 0x3be   : > { %v2814_v56 = vpop.f32.mrf.mxu2 }
 0x3bf   : > { %v2973_v60 = vpop.f32.mrf.mxu3  ;;  %v3675_v26 = vpack.c.bf16 %v3615_v50, %v3615_v50  ;;  %v3428_v51 = vmax.f32 %v7470_v12, %v3289_v14  ;;  %v2815_v35 = vadd.f32 %v2814_v56, %v7471_v29  ;;  %v7473_v14 = vld [vmem:[#allocation113_spill] sm:$0xff] }
 0x3c0   : > { %v3134_v30 = vpop.f32.mrf.mxu0 }
 0x3c1   : > { %3736 = vst.msk [vmem:[%s6587_s11 + $0x18] sm:$0xf] %vm3729_vm0, %v3675_v26  ;;  %v3492_v54 = vmul.f32 %v6568_v62, %v3428_v51  ;;  %v2974_v46 = vadd.f32 %v2973_v60, %v2815_v35  ;;  %v7474_v60 = vld [vmem:[#allocation112_spill] sm:$0xff] }
 0x3c2   : > { %v3293_v37 = vpop.f32.mrf.mxu1 }
 0x3c3   : > { %v3556_v38 = vadd.f32 %v6574_v10, %v3492_v54  ;;  %v3133_v25 = vadd.f32 %v3132_v22, %v2974_v46 }
 0x3c5   : > { %v3616_v55 = vmax.f32 %v3556_v38, 0.0  ;;  %v3292_v18 = vadd.f32 %v3291_v48, %v3133_v25  ;;  %v7475_v38 = vld [vmem:[#allocation115_spill] sm:$0xff] }
 0x3c6   : > { %v2816_v17 = vpop.f32.mrf.mxu2 }
 0x3c7   : > { %v2975_v31 = vpop.f32.mrf.mxu3  ;;  %v3676_v16 = vpack.c.bf16 %v3616_v55, %v3616_v55  ;;  %v3429_v0 = vmax.f32 %v5953_v24, %v3292_v18  ;;  %v2817_v40 = vadd.f32 %v2816_v17, %v5951_v32  ;;  %v7476_v55 = vld [vmem:[#allocation114_spill] sm:$0xff] }
 0x3c8   : > { %v3137_v28 = vpop.f32.mrf.mxu0 }
 0x3c9   : > { %3737 = vst.msk [vmem:[%s6587_s11 + $0x1c] sm:$0xf] %vm3729_vm0, %v3676_v16  ;;  %v3493_v19 = vmul.f32 %v6568_v62, %v3429_v0  ;;  %v2976_v6 = vadd.f32 %v2975_v31, %v2817_v40 }
 0x3ca   : > { %v3296_v13 = vpop.f32.mrf.mxu1 }
 0x3cb   : > { %v3557_v42 = vadd.f32 %v6574_v10, %v3493_v19  ;;  %v3135_v22 = vadd.f32 %v3134_v30, %v2976_v6  ;;  %2858 = vmatmul.bf16.gmra.mxu2 %v7472_v57  ;;  %3176 = vmatmul.bf16.gmra.mxu0 %v5964_v1  ;;  %v7477_v6 = vld [vmem:[#allocation49_spill] sm:$0xff] }
 0x3cc   : > { %3017 = vmatmul.bf16.gmra.mxu3 %v5962_v59 }
 0x3cd   : > { %3335 = vmatmul.bf16.gmra.mxu1 %v5966_v36  ;;  %v3617_v32 = vmax.f32 %v3557_v42, 0.0  ;;  %v3294_v24 = vadd.f32 %v3293_v37, %v3135_v22 }
 0x3ce   : > { %v2819_v48 = vpop.f32.mrf.mxu2 }
 0x3cf   : > { %v2978_v34 = vpop.f32.mrf.mxu3  ;;  %v3677_v50 = vpack.c.bf16 %v3617_v32, %v3617_v32  ;;  %v3430_v56 = vmax.f32 %v7473_v14, %v3294_v24  ;;  %v2820_v26 = vadd.f32 %v2819_v48, %v7474_v60  ;;  %v7480_v48 = vld [vmem:[#allocation119_spill] sm:$0xff] }
 0x3d0   : > { %v3139_v59 = vpop.f32.mrf.mxu0 }
 0x3d1   : > { %3738 = vst.msk [vmem:[%s6587_s11 + $0x20] sm:$0xf] %vm3729_vm0, %v3677_v50  ;;  %v3494_v12 = vmul.f32 %v6568_v62, %v3430_v56  ;;  %v2979_v51 = vadd.f32 %v2978_v34, %v2820_v26  ;;  %v7481_v50 = vld [vmem:[#allocation118_spill] sm:$0xff] }
 0x3d2   : > { %v3298_v29 = vpop.f32.mrf.mxu1 }
 0x3d3   : > { %v3558_v1 = vadd.f32 %v6574_v10, %v3494_v12  ;;  %v3138_v36 = vadd.f32 %v3137_v28, %v2979_v51  ;;  %v7478_v28 = vld [vmem:[#allocation116_spill] sm:$0xff] }
 0x3d5   : > { %v3618_v35 = vmax.f32 %v3558_v1, 0.0  ;;  %v3297_v54 = vadd.f32 %v3296_v13, %v3138_v36  ;;  %v7479_v13 = vld [vmem:[#allocation117_spill] sm:$0xff] }
 0x3d6   : > { %v2821_v46 = vpop.f32.mrf.mxu2 }
 0x3d7   : > { %v2980_v30 = vpop.f32.mrf.mxu3  ;;  %v3678_v37 = vpack.c.bf16 %v3618_v35, %v3618_v35  ;;  %v3431_v25 = vmax.f32 %v7475_v38, %v3297_v54  ;;  %v2822_v18 = vadd.f32 %v2821_v46, %v7476_v55 }
 0x3d8   : > { %v3142_v16 = vpop.f32.mrf.mxu0 }
 0x3d9   : > { %3739 = vst.msk [vmem:[%s6587_s11 + $0x24] sm:$0xf] %vm3729_vm0, %v3678_v37  ;;  %v3495_v17 = vmul.f32 %v6568_v62, %v3431_v25  ;;  %v2981_v31 = vadd.f32 %v2980_v30, %v2822_v18 }
 0x3da   : > { %v3301_v0 = vpop.f32.mrf.mxu1 }
 0x3db   : > { %v3559_v40 = vadd.f32 %v6574_v10, %v3495_v17  ;;  %v3140_v19 = vadd.f32 %v3139_v59, %v2981_v31  ;;  %2863 = vmatmul.bf16.gmra.mxu2 %v7477_v6  ;;  %3181 = vmatmul.bf16.gmra.mxu0 %v7478_v28  ;;  %v7482_v17 = vld [vmem:[#allocation2_spill] sm:$0xff]  ;;  %v7483_v31 = vld [vmem:[#allocation120_spill] sm:$0xff]  ;;  %v7485_v6 = vld [vmem:[#allocation123_spill] sm:$0xff] }
 0x3dc   : > { %3022 = vmatmul.bf16.gmra.mxu3 %v5997_v23 }
 0x3dd   : > { %3340 = vmatmul.bf16.gmra.mxu1 %v7479_v13  ;;  %v3619_v42 = vmax.f32 %v3559_v40, 0.0  ;;  %v3299_v22 = vadd.f32 %v3298_v29, %v3140_v19  ;;  %v7486_v13 = vld [vmem:[#allocation122_spill] sm:$0xff] }
 0x3de   : > { %v2824_v57 = vpop.f32.mrf.mxu2 }
 0x3df   : > { %v2983_v32 = vpop.f32.mrf.mxu3  ;;  %v3679_v24 = vpack.c.bf16 %v3619_v42, %v3619_v42  ;;  %v3432_v34 = vmax.f32 %v7480_v48, %v3299_v22  ;;  %v2825_v14 = vadd.f32 %v2824_v57, %v7481_v50 }
 0x3e0   : > { %v3144_v23 = vpop.f32.mrf.mxu0 }
 0x3e1   : > { %3740 = vst.msk [vmem:[%s6587_s11 + $0x28] sm:$0xf] %vm3729_vm0, %v3679_v24  ;;  %v3496_v56 = vmul.f32 %v6568_v62, %v3432_v34  ;;  %v2984_v60 = vadd.f32 %v2983_v32, %v2825_v14 }
 0x3e2   : > { %v3303_v26 = vpop.f32.mrf.mxu1 }
 0x3e3   : > { %v3560_v12 = vadd.f32 %v6574_v10, %v3496_v56  ;;  %v3143_v51 = vadd.f32 %v3142_v16, %v2984_v60 }
 0x3e5   : > { %v3620_v59 = vmax.f32 %v3560_v12, 0.0  ;;  %v3302_v29 = vadd.f32 %v3301_v0, %v3143_v51 }
 0x3e6   : > { %v2826_v1 = vpop.f32.mrf.mxu2 }
 0x3e7   : > { %v2985_v36 = vpop.f32.mrf.mxu3  ;;  %v3680_v35 = vpack.c.bf16 %v3620_v59, %v3620_v59  ;;  %v3433_v54 = vmax.f32 %v6017_v20, %v3302_v29  ;;  %v2827_v46 = vadd.f32 %v2826_v1, %v6015_v15  ;;  %v7484_v20 = vld [vmem:[#allocation121_spill] sm:$0xff] }
 0x3e8   : > { %v3147_v38 = vpop.f32.mrf.mxu0 }
 0x3e9   : > { %3741 = vst.msk [vmem:[%s6587_s11 + $0x2c] sm:$0xf] %vm3729_vm0, %v3680_v35  ;;  %v3497_v30 = vmul.f32 %v6568_v62, %v3433_v54  ;;  %v2986_v37 = vadd.f32 %v2985_v36, %v2827_v46  ;;  %v7487_v35 = vld [vmem:[#allocation4_spill] sm:$0xff] }
 0x3ea   : > { %v3306_v25 = vpop.f32.mrf.mxu1  ;;  %v7488_v54 = vld [vmem:[#allocation124_spill] sm:$0xff] }
 0x3eb   : > { %v3561_v55 = vadd.f32 %v6574_v10, %v3497_v30  ;;  %v3145_v18 = vadd.f32 %v3144_v23, %v2986_v37  ;;  %2868 = vmatmul.bf16.gmra.mxu2 %v7482_v17  ;;  %3186 = vmatmul.bf16.gmra.mxu0 %v7483_v31 }
 0x3ec   : > { %3027 = vmatmul.bf16.gmra.mxu3 %v6026_v9 }
 0x3ed   : > { %3345 = vmatmul.bf16.gmra.mxu1 %v7484_v20  ;;  %v3621_v15 = vmax.f32 %v3561_v55, 0.0  ;;  %v3304_v16 = vadd.f32 %v3303_v26, %v3145_v18  ;;  %v7491_v18 = vld [vmem:[#allocation126_spill] sm:$0xff] }
 0x3ee   : > { %v2829_v0 = vpop.f32.mrf.mxu2 }
 0x3ef   : > { %v2988_v40 = vpop.f32.mrf.mxu3  ;;  %v3681_v19 = vpack.c.bf16 %v3621_v15, %v3621_v15  ;;  %v3434_v28 = vmax.f32 %v7485_v6, %v3304_v16  ;;  %v2830_v42 = vadd.f32 %v2829_v0, %v7486_v13 }
 0x3f0   : > { %v3149_v9 = vpop.f32.mrf.mxu0 }
 0x3f1   : > { %3742 = vst.msk [vmem:[%s6587_s11 + $0x30] sm:$0xf] %vm3729_vm0, %v3681_v19  ;;  %v3498_v22 = vmul.f32 %v6568_v62, %v3434_v28  ;;  %v2989_v57 = vadd.f32 %v2988_v40, %v2830_v42 }
 0x3f2   : > { %v3308_v32 = vpop.f32.mrf.mxu1 }
 0x3f3   : > { %v3562_v24 = vadd.f32 %v6574_v10, %v3498_v22  ;;  %v3148_v48 = vadd.f32 %v3147_v38, %v2989_v57 }
 0x3f5   : > { %v3622_v34 = vmax.f32 %v3562_v24, 0.0  ;;  %v3307_v50 = vadd.f32 %v3306_v25, %v3148_v48  ;;  %v7490_v25 = vld [vmem:[#allocation127_spill] sm:$0xff] }
 0x3f6   : > { %v2831_v14 = vpop.f32.mrf.mxu2 }
 0x3f7   : > { %v2990_v56 = vpop.f32.mrf.mxu3  ;;  %v3682_v60 = vpack.c.bf16 %v3622_v34, %v3622_v34  ;;  %v3435_v23 = vmax.f32 %v6043_v45, %v3307_v50  ;;  %v2832_v26 = vadd.f32 %v2831_v14, %v6041_v21  ;;  %v7489_v45 = vld [vmem:[#allocation125_spill] sm:$0xff]  ;;  %v7492_v50 = vld [vmem:[#allocation6_spill] sm:$0xff] }
 0x3f8   : > { %v3152_v59 = vpop.f32.mrf.mxu0 }
 0x3f9   : > { %3743 = vst.msk [vmem:[%s6587_s11 + $0x34] sm:$0xf] %vm3729_vm0, %v3682_v60  ;;  %v3499_v12 = vmul.f32 %v6568_v62, %v3435_v23  ;;  %v2991_v51 = vadd.f32 %v2990_v56, %v2832_v26  ;;  %v7493_v23 = vld [vmem:[#allocation129_spill] sm:$0xff] }
 0x3fa   : > { %v3311_v29 = vpop.f32.mrf.mxu1 }
 0x3fb   : > { %v3563_v1 = vadd.f32 %v6574_v10, %v3499_v12  ;;  %v3150_v36 = vadd.f32 %v3149_v9, %v2991_v51  ;;  %2873 = vmatmul.bf16.gmra.mxu2 %v7487_v35  ;;  %3191 = vmatmul.bf16.gmra.mxu0 %v7488_v54  ;;  %v7494_v12 = vld [vmem:[#allocation128_spill] sm:$0xff] }
 0x3fc   : > { %3032 = vmatmul.bf16.gmra.mxu3 %v6052_v53 }
 0x3fd   : > { %3350 = vmatmul.bf16.gmra.mxu1 %v7489_v45  ;;  %v3623_v21 = vmax.f32 %v3563_v1, 0.0  ;;  %v3309_v46 = vadd.f32 %v3308_v32, %v3150_v36 }
 0x3fe   : > { %v2834_v30 = vpop.f32.mrf.mxu2 }
 0x3ff   : > { %v2993_v37 = vpop.f32.mrf.mxu3  ;;  %v3683_v38 = vpack.c.bf16 %v3623_v21, %v3623_v21  ;;  %v3436_v55 = vmax.f32 %v7490_v25, %v3309_v46  ;;  %v2835_v17 = vadd.f32 %v2834_v30, %v7491_v18  ;;  %v7495_v46 = vld [vmem:[#allocation131_spill] sm:$0xff] }
 0x400   : > { %v3154_v53 = vpop.f32.mrf.mxu0 }
 0x401   : > { %3744 = vst.msk [vmem:[%s6587_s11 + $0x38] sm:$0xf] %vm3729_vm0, %v3683_v38  ;;  %v3500_v31 = vmul.f32 %v6568_v62, %v3436_v55  ;;  %v2994_v20 = vadd.f32 %v2993_v37, %v2835_v17  ;;  %v7496_v37 = vld [vmem:[#allocation130_spill] sm:$0xff] }
 0x402   : > { %v3313_v15 = vpop.f32.mrf.mxu1 }
 0x403   : > { %v3564_v16 = vadd.f32 %v6574_v10, %v3500_v31  ;;  %v3153_v0 = vadd.f32 %v3152_v59, %v2994_v20 }
 0x405   : > { %v3624_v40 = vmax.f32 %v3564_v16, 0.0  ;;  %v3312_v19 = vadd.f32 %v3311_v29, %v3153_v0  ;;  %v7499_v16 = vld [vmem:[#allocation133_spill] sm:$0xff] }
 0x406   : > { %v2836_v6 = vpop.f32.mrf.mxu2 }
 0x407   : > { %v2995_v28 = vpop.f32.mrf.mxu3  ;;  %v3684_v13 = vpack.c.bf16 %v3624_v40, %v3624_v40  ;;  %v3437_v42 = vmax.f32 %v6069_v7, %v3312_v19  ;;  %v2837_v22 = vadd.f32 %v2836_v6, %v6067_v52 }
 0x408   : > { %v3157_v32 = vpop.f32.mrf.mxu0 }
 0x409   : > { %3745 = vst.msk [vmem:[%s6587_s11 + $0x3c] sm:$0xf] %vm3729_vm0, %v3684_v13  ;;  %v3501_v57 = vmul.f32 %v6568_v62, %v3437_v42  ;;  %v2996_v9 = vadd.f32 %v2995_v28, %v2837_v22  ;;  %v7500_v13 = vld [vmem:[#allocation135_spill] sm:$0xff]  ;;  %v7501_v22 = vld [vmem:[#allocation134_spill] sm:$0xff] }
 0x40a   : > { %v3316_v24 = vpop.f32.mrf.mxu1 }
 0x40b   : > { %v3565_v48 = vadd.f32 %v6574_v10, %v3501_v57  ;;  %v3155_v34 = vadd.f32 %v3154_v53, %v2996_v9  ;;  %2878 = vmatmul.bf16.gmra.mxu2 %v7492_v50  ;;  %3196 = vmatmul.bf16.gmra.mxu0 %v6080_v49  ;;  %v7497_v53 = vld [vmem:[#allocation8_spill] sm:$0xff] }
 0x40c   : > { %3037 = vmatmul.bf16.gmra.mxu3 %v6078_v41 }
 0x40d   : > { %3355 = vmatmul.bf16.gmra.mxu1 %v6082_v61  ;;  %v3625_v52 = vmax.f32 %v3565_v48, 0.0  ;;  %v3314_v7 = vadd.f32 %v3313_v15, %v3155_v34  ;;  %v7498_v15 = vld [vmem:[#allocation132_spill] sm:$0xff] }
 0x40e   : > { %v2839_v14 = vpop.f32.mrf.mxu2 }
 0x40f   : > { %v2998_v56 = vpop.f32.mrf.mxu3  ;;  %v3685_v60 = vpack.c.bf16 %v3625_v52, %v3625_v52  ;;  %v3438_v26 = vmax.f32 %v7493_v23, %v3314_v7  ;;  %v2840_v51 = vadd.f32 %v2839_v14, %v7494_v12 }
 0x410   : > { %v3159_v41 = vpop.f32.mrf.mxu0 }
 0x411   : > { %3746 = vst.msk [vmem:[%s6587_s11 + $0x40] sm:$0xf] %vm3729_vm0, %v3685_v60  ;;  %v3502_v59 = vmul.f32 %v6568_v62, %v3438_v26  ;;  %v2999_v29 = vadd.f32 %v2998_v56, %v2840_v51 }
 0x412   : > { %v3318_v1 = vpop.f32.mrf.mxu1 }
 0x413   : > { %v3566_v49 = vadd.f32 %v6574_v10, %v3502_v59  ;;  %v3158_v61 = vadd.f32 %v3157_v32, %v2999_v29 }
 0x415   : > { %v3626_v36 = vmax.f32 %v3566_v49, 0.0  ;;  %v3317_v35 = vadd.f32 %v3316_v24, %v3158_v61  ;;  %v7503_v49 = vld [vmem:[#allocation136_spill] sm:$0xff] }
 0x416   : > { %v2841_v54 = vpop.f32.mrf.mxu2 }
 0x417   : > { %v3000_v45 = vpop.f32.mrf.mxu3  ;;  %v3686_v21 = vpack.c.bf16 %v3626_v36, %v3626_v36  ;;  %v3439_v30 = vmax.f32 %v7495_v46, %v3317_v35  ;;  %v2842_v38 = vadd.f32 %v2841_v54, %v7496_v37  ;;  %v7506_v46 = vld [vmem:[#allocation138_spill] sm:$0xff] }
 0x418   : > { %v3162_v18 = vpop.f32.mrf.mxu0 }
 0x419   : > { %3747 = vst.msk [vmem:[%s6587_s11 + $0x44] sm:$0xf] %vm3729_vm0, %v3686_v21  ;;  %v3503_v25 = vmul.f32 %v6568_v62, %v3439_v30  ;;  %v3001_v55 = vadd.f32 %v3000_v45, %v2842_v38  ;;  %v7505_v45 = vld [vmem:[#allocation139_spill] sm:$0xff] }
 0x41a   : > { %v3321_v17 = vpop.f32.mrf.mxu1 }
 0x41b   : > { %v3567_v31 = vadd.f32 %v6574_v10, %v3503_v25  ;;  %v3160_v20 = vadd.f32 %v3159_v41, %v3001_v55  ;;  %2883 = vmatmul.bf16.gmra.mxu2 %v7497_v53  ;;  %3201 = vmatmul.bf16.gmra.mxu0 %v7498_v15 }
 0x41c   : > { %3042 = vmatmul.bf16.gmra.mxu3 %v6116_v3 }
 0x41d   : > { %3360 = vmatmul.bf16.gmra.mxu1 %v7499_v16  ;;  %v3627_v0 = vmax.f32 %v3567_v31, 0.0  ;;  %v3319_v40 = vadd.f32 %v3318_v1, %v3160_v20  ;;  %v7502_v1 = vld [vmem:[#allocation10_spill] sm:$0xff] }
 0x41e   : > { %v2844_v19 = vpop.f32.mrf.mxu2 }
 0x41f   : > { %v3003_v6 = vpop.f32.mrf.mxu3  ;;  %v3687_v28 = vpack.c.bf16 %v3627_v0, %v3627_v0  ;;  %v3440_v42 = vmax.f32 %v7500_v13, %v3319_v40  ;;  %v2845_v57 = vadd.f32 %v2844_v19, %v7501_v22  ;;  %v7507_v22 = vld [vmem:[#allocation12_spill] sm:$0xff] }
 0x420   : > { %v3164_v3 = vpop.f32.mrf.mxu0 }
 0x421   : > { %3748 = vst.msk [vmem:[%s6587_s11 + $0x48] sm:$0xf] %vm3729_vm0, %v3687_v28  ;;  %v3504_v9 = vmul.f32 %v6568_v62, %v3440_v42  ;;  %v3004_v32 = vadd.f32 %v3003_v6, %v2845_v57 }
 0x422   : > { %v3323_v24 = vpop.f32.mrf.mxu1 }
 0x423   : > { %v3568_v48 = vadd.f32 %v6574_v10, %v3504_v9  ;;  %v3163_v34 = vadd.f32 %v3162_v18, %v3004_v32 }
 0x425   : > { %v3628_v50 = vmax.f32 %v3568_v48, 0.0  ;;  %v3322_v52 = vadd.f32 %v3321_v17, %v3163_v34  ;;  %v7510_v34 = vld [vmem:[#allocation141_spill] sm:$0xff] }
 0x426   : > { %v2846_v7 = vpop.f32.mrf.mxu2 }
 0x427   : > { %v3005_v14 = vpop.f32.mrf.mxu3  ;;  %v3688_v56 = vpack.c.bf16 %v3628_v50, %v3628_v50  ;;  %v3441_v60 = vmax.f32 %v6133_v4, %v3322_v52  ;;  %v2847_v23 = vadd.f32 %v2846_v7, %v6131_v39  ;;  %v7504_v4 = vld [vmem:[#allocation137_spill] sm:$0xff] }
 0x428   : > { %v3167_v51 = vpop.f32.mrf.mxu0 }
 0x429   : > { %3749 = vst.msk [vmem:[%s6587_s11 + $0x4c] sm:$0xf] %vm3729_vm0, %v3688_v56  ;;  %v3505_v26 = vmul.f32 %v6568_v62, %v3441_v60  ;;  %v3006_v12 = vadd.f32 %v3005_v14, %v2847_v23 }
 0x42a   : > { %v3326_v59 = vpop.f32.mrf.mxu1 }
 0x42b   : > { %v3569_v29 = vadd.f32 %v6574_v10, %v3505_v26  ;;  %v3165_v41 = vadd.f32 %v3164_v3, %v3006_v12  ;;  %2888 = vmatmul.bf16.gmra.mxu2 %v7502_v1  ;;  %3206 = vmatmul.bf16.gmra.mxu0 %v7503_v49 }
 0x42c   : > { %3047 = vmatmul.bf16.gmra.mxu3 %v6142_v11 }
 0x42d   : > { %3365 = vmatmul.bf16.gmra.mxu1 %v7504_v4  ;;  %v3629_v39 = vmax.f32 %v3569_v29, 0.0  ;;  %v3324_v61 = vadd.f32 %v3323_v24, %v3165_v41  ;;  %v7509_v24 = vld [vmem:[#allocation142_spill] sm:$0xff]  ;;  %v7512_v41 = vld [vmem:[#allocation143_spill] sm:$0xff] }
 0x42e   : > { %v2849_v36 = vpop.f32.mrf.mxu2 }
 0x42f   : > { %v3008_v35 = vpop.f32.mrf.mxu3  ;;  %v3689_v54 = vpack.c.bf16 %v3629_v39, %v3629_v39  ;;  %v3442_v21 = vmax.f32 %v7505_v45, %v3324_v61  ;;  %v2850_v30 = vadd.f32 %v2849_v36, %v7506_v46 }
 0x430   : > { %v3169_v11 = vpop.f32.mrf.mxu0 }
 0x431   : > { %3750 = vst.msk [vmem:[%s6587_s11 + $0x50] sm:$0xf] %vm3729_vm0, %v3689_v54  ;;  %v3506_v37 = vmul.f32 %v6568_v62, %v3442_v21  ;;  %v3009_v38 = vadd.f32 %v3008_v35, %v2850_v30  ;;  %v7513_v54 = vld [vmem:[#allocation14_spill] sm:$0xff] }
 0x432   : > { %v3328_v25 = vpop.f32.mrf.mxu1 }
 0x433   : > { %v3570_v55 = vadd.f32 %v6574_v10, %v3506_v37  ;;  %v3168_v18 = vadd.f32 %v3167_v51, %v3009_v38 }
 0x435   : > { %v3630_v17 = vmax.f32 %v3570_v55, 0.0  ;;  %v3327_v31 = vadd.f32 %v3326_v59, %v3168_v18  ;;  %v7511_v59 = vld [vmem:[#allocation144_spill] sm:$0xff] }
 0x436   : > { %v2851_v20 = vpop.f32.mrf.mxu2 }
 0x437   : > { %v3010_v53 = vpop.f32.mrf.mxu3  ;;  %v3690_v15 = vpack.c.bf16 %v3630_v17, %v3630_v17  ;;  %v3443_v16 = vmax.f32 %v6159_v43, %v3327_v31  ;;  %v2852_v0 = vadd.f32 %v2851_v20, %v6157_v5  ;;  %v7508_v43 = vld [vmem:[#allocation140_spill] sm:$0xff] }
 0x438   : > { %v3172_v6 = vpop.f32.mrf.mxu0 }
 0x439   : > { %3751 = vst.msk [vmem:[%s6587_s11 + $0x54] sm:$0xf] %vm3729_vm0, %v3690_v15  ;;  %v3507_v40 = vmul.f32 %v6568_v62, %v3443_v16  ;;  %v3011_v19 = vadd.f32 %v3010_v53, %v2852_v0  ;;  %v7515_v0 = vld [vmem:[#allocation147_spill] sm:$0xff] }
 0x43a   : > { %v3331_v28 = vpop.f32.mrf.mxu1 }
 0x43b   : > { %v3571_v13 = vadd.f32 %v6574_v10, %v3507_v40  ;;  %v3170_v42 = vadd.f32 %v3169_v11, %v3011_v19  ;;  %2893 = vmatmul.bf16.gmra.mxu2 %v7507_v22  ;;  %3211 = vmatmul.bf16.gmra.mxu0 %v6170_v47  ;;  %v7514_v11 = vld [vmem:[#allocation145_spill] sm:$0xff]  ;;  %v7516_v40 = vld [vmem:[#allocation146_spill] sm:$0xff] }
 0x43c   : > { %3052 = vmatmul.bf16.gmra.mxu3 %v6168_v2 }
 0x43d   : > { %3370 = vmatmul.bf16.gmra.mxu1 %v7508_v43  ;;  %v3631_v5 = vmax.f32 %v3571_v13, 0.0  ;;  %v3329_v57 = vadd.f32 %v3328_v25, %v3170_v42 }
 0x43e   : > { %v2854_v9 = vpop.f32.mrf.mxu2 }
 0x43f   : > { %v3013_v32 = vpop.f32.mrf.mxu3  ;;  %v3691_v3 = vpack.c.bf16 %v3631_v5, %v3631_v5  ;;  %v3444_v48 = vmax.f32 %v7509_v24, %v3329_v57  ;;  %v2855_v50 = vadd.f32 %v2854_v9, %v7510_v34  ;;  %v7517_v5 = vld [vmem:[#allocation16_spill] sm:$0xff]  ;;  %v7519_v9 = vld [vmem:[#allocation149_spill] sm:$0xff] }
 0x440   : > { %v3174_v2 = vpop.f32.mrf.mxu0  ;;  %v7518_v57 = vld [vmem:[#allocation148_spill] sm:$0xff] }
 0x441   : > { %3752 = vst.msk [vmem:[%s6587_s11 + $0x58] sm:$0xf] %vm3729_vm0, %v3691_v3  ;;  %v3508_v52 = vmul.f32 %v6568_v62, %v3444_v48  ;;  %v3014_v7 = vadd.f32 %v3013_v32, %v2855_v50  ;;  %v7520_v50 = vld [vmem:[#allocation151_spill] sm:$0xff] }
 0x442   : > { %v3333_v14 = vpop.f32.mrf.mxu1 }
 0x443   : > { %v3572_v47 = vadd.f32 %v6574_v10, %v3508_v52  ;;  %v3173_v56 = vadd.f32 %v3172_v6, %v3014_v7  ;;  %v7521_v7 = vld [vmem:[#allocation150_spill] sm:$0xff] }
 0x445   : > { %v3632_v60 = vmax.f32 %v3572_v47, 0.0  ;;  %v3332_v23 = vadd.f32 %v3331_v28, %v3173_v56 }
 0x446   : > { %v2856_v26 = vpop.f32.mrf.mxu2 }
 0x447   : > { %v3015_v12 = vpop.f32.mrf.mxu3  ;;  %v3692_v51 = vpack.c.bf16 %v3632_v60, %v3632_v60  ;;  %v3445_v29 = vmax.f32 %v7511_v59, %v3332_v23  ;;  %v2857_v1 = vadd.f32 %v2856_v26, %v7512_v41 }
 0x448   : > { %v3177_v39 = vpop.f32.mrf.mxu0 }
 0x449   : > { %3753 = vst.msk [vmem:[%s6587_s11 + $0x5c] sm:$0xf] %vm3729_vm0, %v3692_v51  ;;  %v3509_v49 = vmul.f32 %v6568_v62, %v3445_v29  ;;  %v3016_v4 = vadd.f32 %v3015_v12, %v2857_v1  ;;  %v7522_v1 = vld [vmem:[#allocation152_spill] sm:$0xff] }
 0x44a   : > { %v3336_v61 = vpop.f32.mrf.mxu1 }
 0x44b   : > { %v3573_v36 = vadd.f32 %v6574_v10, %v3509_v49  ;;  %v3175_v35 = vadd.f32 %v3174_v2, %v3016_v4  ;;  %2898 = vmatmul.bf16.gmra.mxu2 %v7513_v54  ;;  %3216 = vmatmul.bf16.gmra.mxu0 %v6202_v44 }
 0x44c   : > { %3057 = vmatmul.bf16.gmra.mxu3 %v6200_v58 }
 0x44d   : > { %3375 = vmatmul.bf16.gmra.mxu1 %v6204_v33  ;;  %v3633_v45 = vmax.f32 %v3573_v36, 0.0  ;;  %v3334_v21 = vadd.f32 %v3333_v14, %v3175_v35 }
 0x44e   : > { %v2859_v46 = vpop.f32.mrf.mxu2 }
 0x44f   : > { %v3018_v30 = vpop.f32.mrf.mxu3  ;;  %v3693_v37 = vpack.c.bf16 %v3633_v45, %v3633_v45  ;;  %v3446_v38 = vmax.f32 %v6208_v27, %v3334_v21  ;;  %v2860_v25 = vadd.f32 %v2859_v46, %v7514_v11  ;;  %v7523_v45 = vld [vmem:[#allocation18_spill] sm:$0xff]  ;;  %v7524_v21 = vld [vmem:[#allocation153_spill] sm:$0xff] }
 0x450   : > { %v3179_v58 = vpop.f32.mrf.mxu0  ;;  %v7525_v46 = vld [vmem:[#allocation154_spill] sm:$0xff] }
 0x451   : > { %3754 = vst.msk [vmem:[%s6587_s11 + $0x60] sm:$0xf] %vm3729_vm0, %v3693_v37  ;;  %v3510_v55 = vmul.f32 %v6568_v62, %v3446_v38  ;;  %v3019_v18 = vadd.f32 %v3018_v30, %v2860_v25 }
 0x452   : > { %v3338_v17 = vpop.f32.mrf.mxu1 }
 0x453   : > { %v3574_v44 = vadd.f32 %v6574_v10, %v3510_v55  ;;  %v3178_v33 = vadd.f32 %v3177_v39, %v3019_v18  ;;  %v7527_v55 = vld [vmem:[#allocation157_spill] sm:$0xff] }
 0x455   : > { %v3634_v31 = vmax.f32 %v3574_v44, 0.0  ;;  %v3337_v20 = vadd.f32 %v3336_v61, %v3178_v33 }
 0x456   : > { %v2861_v53 = vpop.f32.mrf.mxu2 }
 0x457   : > { %v3020_v15 = vpop.f32.mrf.mxu3  ;;  %v3694_v16 = vpack.c.bf16 %v3634_v31, %v3634_v31  ;;  %v3447_v27 = vmax.f32 %v7515_v0, %v3337_v20  ;;  %v2862_v19 = vadd.f32 %v2861_v53, %v7516_v40 }
 0x458   : > { %v3182_v13 = vpop.f32.mrf.mxu0 }
 0x459   : > { %3755 = vst.msk [vmem:[%s6587_s11 + $0x64] sm:$0xf] %vm3729_vm0, %v3694_v16  ;;  %v3511_v6 = vmul.f32 %v6568_v62, %v3447_v27  ;;  %v3021_v28 = vadd.f32 %v3020_v15, %v2862_v19 }
 0x45a   : > { %v3341_v42 = vpop.f32.mrf.mxu1 }
 0x45b   : > { %v3575_v22 = vadd.f32 %v6574_v10, %v3511_v6  ;;  %v3180_v43 = vadd.f32 %v3179_v58, %v3021_v28  ;;  %2903 = vmatmul.bf16.gmra.mxu2 %v7517_v5  ;;  %3221 = vmatmul.bf16.gmra.mxu0 %v7518_v57  ;;  %v7528_v58 = vld [vmem:[#allocation156_spill] sm:$0xff]  ;;  %v7529_v6 = vld [vmem:[#allocation158_spill] sm:$0xff] }
 0x45c   : > { %3062 = vmatmul.bf16.gmra.mxu3 %v6232_v63 }
 0x45d   : > { %3380 = vmatmul.bf16.gmra.mxu1 %v7519_v9  ;;  %v3635_v32 = vmax.f32 %v3575_v22, 0.0  ;;  %v3339_v3 = vadd.f32 %v3338_v17, %v3180_v43 }
 0x45e   : > { %v2864_v24 = vpop.f32.mrf.mxu2 }
 0x45f   : > { %v3023_v48 = vpop.f32.mrf.mxu3  ;;  %v3695_v34 = vpack.c.bf16 %v3635_v32, %v3635_v32  ;;  %v3448_v52 = vmax.f32 %v7520_v50, %v3339_v3  ;;  %v2865_v2 = vadd.f32 %v2864_v24, %v7521_v7  ;;  %v7531_v3 = vld [vmem:[#allocation23_spill] sm:$0xff]  ;;  %v7532_v24 = vld [vmem:[#allocation21_spill] sm:$0xff] }
 0x460   : > { %v3184_v63 = vpop.f32.mrf.mxu0 }
 0x461   : > { %3756 = vst.msk [vmem:[%s6587_s11 + $0x68] sm:$0xf] %vm3729_vm0, %v3695_v34  ;;  %v3512_v14 = vmul.f32 %v6568_v62, %v3448_v52  ;;  %v3024_v47 = vadd.f32 %v3023_v48, %v2865_v2  ;;  %v7533_v48 = vld [vmem:[#allocation159_spill] sm:$0xff]  ;;  %v7534_v34 = vld [vmem:[#allocation160_spill] sm:$0xff] }
 0x462   : > { %v3343_v56 = vpop.f32.mrf.mxu1 }
 0x463   : > { %v3576_v60 = vadd.f32 %v6574_v10, %v3512_v14  ;;  %v3183_v23 = vadd.f32 %v3182_v13, %v3024_v47  ;;  %v7530_v13 = vld [vmem:[#allocation20_spill] sm:$0xff]  ;;  %v7535_v47 = vld [vmem:[#allocation162_spill] sm:$0xff] }
 0x465   : > { %v3636_v26 = vmax.f32 %v3576_v60, 0.0  ;;  %v3342_v12 = vadd.f32 %v3341_v42, %v3183_v23 }
 0x466   : > { %v2866_v51 = vpop.f32.mrf.mxu2 }
 0x467   : > { %v3025_v59 = vpop.f32.mrf.mxu3  ;;  %v3696_v29 = vpack.c.bf16 %v3636_v26, %v3636_v26  ;;  %v3449_v41 = vmax.f32 %v6249_v8, %v3342_v12  ;;  %v2867_v49 = vadd.f32 %v2866_v51, %v7522_v1  ;;  %v7526_v8 = vld [vmem:[#allocation155_spill] sm:$0xff] }
 0x468   : > { %v3187_v61 = vpop.f32.mrf.mxu0 }
 0x469   : > { %3757 = vst.msk [vmem:[%s6587_s11 + $0x6c] sm:$0xf] %vm3729_vm0, %v3696_v29  ;;  %v3513_v4 = vmul.f32 %v6568_v62, %v3449_v41  ;;  %v3026_v39 = vadd.f32 %v3025_v59, %v2867_v49 }
 0x46a   : > { %v3346_v36 = vpop.f32.mrf.mxu1 }
 0x46b   : > { %v3577_v35 = vadd.f32 %v6574_v10, %v3513_v4  ;;  %v3185_v54 = vadd.f32 %v3184_v63, %v3026_v39  ;;  %2908 = vmatmul.bf16.gmra.mxu2 %v7523_v45  ;;  %3226 = vmatmul.bf16.gmra.mxu0 %v7525_v46 }
 0x46c   : > { %3067 = vmatmul.bf16.gmra.mxu3 %v7524_v21 }
 0x46d   : > { %3385 = vmatmul.bf16.gmra.mxu1 %v7526_v8  ;;  %v3637_v30 = vmax.f32 %v3577_v35, 0.0  ;;  %v3344_v37 = vadd.f32 %v3343_v56, %v3185_v54  ;;  %v7536_v56 = vld [vmem:[#allocation161_spill] sm:$0xff]  ;;  %v7538_v35 = vld [vmem:[#allocation22_spill] sm:$0xff] }
 0x46e   : > { %v2869_v38 = vpop.f32.mrf.mxu2  ;;  %v6848_v8 = vld [vmem:[%s7041_s4] ss:$0 sm:$0xff] }
 0x46f   : > { %v3028_v11 = vpop.f32.mrf.mxu3  ;;  %v3697_v25 = vpack.c.bf16 %v3637_v30, %v3637_v30  ;;  %v3450_v18 = vmax.f32 %v7527_v55, %v3344_v37  ;;  %v2870_v17 = vadd.f32 %v2869_v38, %v7528_v58  ;;  %v7539_v38 = vld [vmem:[#allocation28_spill] sm:$0xff] }
 0x470   : > { %v3189_v31 = vpop.f32.mrf.mxu0  ;;  %v7542_v55 = vld [vmem:[#allocation164_spill] sm:$0xff] }
 0x471   : > { %3758 = vst.msk [vmem:[%s6587_s11 + $0x70] sm:$0xf] %vm3729_vm0, %v3697_v25  ;;  %v3514_v44 = vmul.f32 %v6568_v62, %v3450_v18  ;;  %v3029_v33 = vadd.f32 %v3028_v11, %v2870_v17  ;;  %v7540_v11 = vld [vmem:[#allocation26_spill] sm:$0xff]  ;;  %v7541_v25 = vld [vmem:[#allocation163_spill] sm:$0xff] }
 0x472   : > { %v3348_v20 = vpop.f32.mrf.mxu1 }
 0x473   : > { %v3578_v53 = vadd.f32 %v6574_v10, %v3514_v44  ;;  %v3188_v15 = vadd.f32 %v3187_v61, %v3029_v33  ;;  %v7537_v61 = vld [vmem:[#allocation25_spill] sm:$0xff] }
 0x475   : > { %v3638_v16 = vmax.f32 %v3578_v53, 0.0  ;;  %v3347_v0 = vadd.f32 %v3346_v36, %v3188_v15  ;;  %v7544_v53 = vld [vmem:[#allocation165_spill] sm:$0xff] }
 0x476   : > { %v2871_v27 = vpop.f32.mrf.mxu2 }
 0x477   : > { %v3030_v40 = vpop.f32.mrf.mxu3  ;;  %v3698_v19 = vpack.c.bf16 %v3638_v16, %v3638_v16  ;;  %v3451_v28 = vmax.f32 %v7529_v6, %v3347_v0  ;;  %v2872_v42 = vadd.f32 %v2871_v27, %v7530_v13 }
 0x478   : > { %v3192_v5 = vpop.f32.mrf.mxu0 }
 0x479   : > { %3759 = vst.msk [vmem:[%s6587_s11 + $0x74] sm:$0xf] %vm3729_vm0, %v3698_v19  ;;  %v3515_v22 = vmul.f32 %v6568_v62, %v3451_v28  ;;  %v3031_v43 = vadd.f32 %v3030_v40, %v2872_v42 }
 0x47a   : > { %v3351_v57 = vpop.f32.mrf.mxu1 }
 0x47b   : > { %v3579_v9 = vadd.f32 %v6574_v10, %v3515_v22  ;;  %v3190_v32 = vadd.f32 %v3189_v31, %v3031_v43  ;;  %2913 = vmatmul.bf16.gmra.mxu2 %v7531_v3  ;;  %3231 = vmatmul.bf16.gmra.mxu0 %v7533_v48  ;;  %v7543_v31 = vld [vmem:[#allocation166_spill] sm:$0xff] }
 0x47c   : > { %3072 = vmatmul.bf16.gmra.mxu3 %v7532_v24 }
 0x47d   : > { %3390 = vmatmul.bf16.gmra.mxu1 %v7534_v34  ;;  %v3639_v50 = vmax.f32 %v3579_v9, 0.0  ;;  %v3349_v52 = vadd.f32 %v3348_v20, %v3190_v32  ;;  %v7546_v9 = vld [vmem:[#allocation27_spill] sm:$0xff] }
 0x47e   : > { %v2874_v7 = vpop.f32.mrf.mxu2 }
 0x47f   : > { %v3033_v2 = vpop.f32.mrf.mxu3  ;;  %v3699_v14 = vpack.c.bf16 %v3639_v50, %v3639_v50  ;;  %v3452_v63 = vmax.f32 %v7535_v47, %v3349_v52  ;;  %v2875_v60 = vadd.f32 %v2874_v7, %v7536_v56  ;;  %v7547_v7 = vld [vmem:[#allocation33_spill] sm:$0xff]  ;;  %v7550_v47 = vld [vmem:[#allocation168_spill] sm:$0xff] }
 0x480   : > { %v3194_v12 = vpop.f32.mrf.mxu0 }
 0x481   : > { %3760 = vst.msk [vmem:[%s6587_s11 + $0x78] sm:$0xf] %vm3729_vm0, %v3699_v14  ;;  %v3516_v23 = vmul.f32 %v6568_v62, %v3452_v63  ;;  %v3034_v26 = vadd.f32 %v3033_v2, %v2875_v60  ;;  %v6842_v62 = vld [vmem:[%s7040_s3] ss:$0 sm:$0xff]  ;;  %v7548_v2 = vld [vmem:[#allocation31_spill] sm:$0xff] }
 0x482   : > { %v3353_v51 = vpop.f32.mrf.mxu1  ;;  %v7549_v14 = vld [vmem:[#allocation167_spill] sm:$0xff] }
 0x483   : > { %v3580_v59 = vadd.f32 %v6574_v10, %v3516_v23  ;;  %v3193_v29 = vadd.f32 %v3192_v5, %v3034_v26  ;;  %v7545_v5 = vld [vmem:[#allocation30_spill] sm:$0xff] }
 0x485   : > { %v3640_v41 = vmax.f32 %v3580_v59, 0.0  ;;  %v3352_v1 = vadd.f32 %v3351_v57, %v3193_v29  ;;  %v7552_v59 = vld [vmem:[#allocation169_spill] sm:$0xff] }
 0x486   : > { %v2876_v49 = vpop.f32.mrf.mxu2 }
 0x487   : > { %v3035_v4 = vpop.f32.mrf.mxu3  ;;  %v3700_v39 = vpack.c.bf16 %v3640_v41, %v3640_v41  ;;  %v3453_v36 = vmax.f32 %v7537_v61, %v3352_v1  ;;  %v2877_v54 = vadd.f32 %v2876_v49, %v7538_v35 }
 0x488   : > { %v3197_v21 = vpop.f32.mrf.mxu0 }
 0x489   : > { %3761 = vst.msk [vmem:[%s6587_s11 + $0x7c] sm:$0xf] %vm3729_vm0, %v3700_v39  ;;  %v3517_v45 = vmul.f32 %v6842_v62, %v3453_v36  ;;  %v3036_v10 = vadd.f32 %v3035_v4, %v2877_v54 }
 0x48a   : > { %v3356_v46 = vpop.f32.mrf.mxu1 }
 0x48b   : > { %v3581_v30 = vadd.f32 %v6848_v8, %v3517_v45  ;;  %v3195_v37 = vadd.f32 %v3194_v12, %v3036_v10  ;;  %2918 = vmatmul.bf16.gmra.mxu2 %v7539_v38  ;;  %3236 = vmatmul.bf16.gmra.mxu0 %v7541_v25  ;;  %v7551_v12 = vld [vmem:[#allocation170_spill] sm:$0xff] }
 0x48c   : > { %3077 = vmatmul.bf16.gmra.mxu3 %v7540_v11 }
 0x48d   : > { %3395 = vmatmul.bf16.gmra.mxu1 %v7542_v55  ;;  %v3641_v18 = vmax.f32 %v3581_v30, 0.0  ;;  %v3354_v58 = vadd.f32 %v3353_v51, %v3195_v37  ;;  %v7554_v30 = vld [vmem:[#allocation32_spill] sm:$0xff] }
 0x48e   : > { %v2879_v17 = vpop.f32.mrf.mxu2 }
 0x48f   : > { %v3038_v44 = vpop.f32.mrf.mxu3  ;;  %v3701_v33 = vpack.c.bf16 %v3641_v18, %v3641_v18  ;;  %v3454_v20 = vmax.f32 %v7543_v31, %v3354_v58  ;;  %v2880_v15 = vadd.f32 %v2879_v17, %v7544_v53  ;;  %v7555_v17 = vld [vmem:[#allocation38_spill] sm:$0xff]  ;;  %v7558_v31 = vld [vmem:[#allocation172_spill] sm:$0xff] }
 0x490   : > { %v3199_v27 = vpop.f32.mrf.mxu0 }
 0x491   : > { %3762 = vst.msk [vmem:[%s6587_s11 + $0x80] sm:$0xf] %vm3729_vm0, %v3701_v33  ;;  %v3518_v16 = vmul.f32 %v6842_v62, %v3454_v20  ;;  %v3039_v0 = vadd.f32 %v3038_v44, %v2880_v15  ;;  %v7556_v44 = vld [vmem:[#allocation36_spill] sm:$0xff]  ;;  %v7557_v33 = vld [vmem:[#allocation171_spill] sm:$0xff] }
 0x492   : > { %v3358_v40 = vpop.f32.mrf.mxu1 }
 0x493   : > { %v3582_v19 = vadd.f32 %v6848_v8, %v3518_v16  ;;  %v3198_v6 = vadd.f32 %v3197_v21, %v3039_v0  ;;  %v7553_v21 = vld [vmem:[#allocation35_spill] sm:$0xff] }
 0x495   : > { %v3642_v28 = vmax.f32 %v3582_v19, 0.0  ;;  %v3357_v13 = vadd.f32 %v3356_v46, %v3198_v6  ;;  %v7560_v19 = vld [vmem:[#allocation173_spill] sm:$0xff] }
 0x496   : > { %v2881_v42 = vpop.f32.mrf.mxu2 }
 0x497   : > { %v3040_v22 = vpop.f32.mrf.mxu3  ;;  %v3702_v43 = vpack.c.bf16 %v3642_v28, %v3642_v28  ;;  %v3455_v57 = vmax.f32 %v7545_v5, %v3357_v13  ;;  %v2882_v32 = vadd.f32 %v2881_v42, %v7546_v9 }
 0x498   : > { %v3202_v48 = vpop.f32.mrf.mxu0 }
 0x499   : > { %3763 = vst.msk [vmem:[%s6587_s11 + $0x84] sm:$0xf] %vm3729_vm0, %v3702_v43  ;;  %v3519_v3 = vmul.f32 %v6842_v62, %v3455_v57  ;;  %v3041_v24 = vadd.f32 %v3040_v22, %v2882_v32 }
 0x49a   : > { %v3361_v34 = vpop.f32.mrf.mxu1 }
 0x49b   : > { %v3583_v50 = vadd.f32 %v6848_v8, %v3519_v3  ;;  %v3200_v52 = vadd.f32 %v3199_v27, %v3041_v24  ;;  %2923 = vmatmul.bf16.gmra.mxu2 %v7547_v7  ;;  %3241 = vmatmul.bf16.gmra.mxu0 %v7549_v14  ;;  %v7559_v27 = vld [vmem:[#allocation174_spill] sm:$0xff] }
 0x49c   : > { %3082 = vmatmul.bf16.gmra.mxu3 %v7548_v2 }
 0x49d   : > { %3400 = vmatmul.bf16.gmra.mxu1 %v7550_v47  ;;  %v3643_v63 = vmax.f32 %v3583_v50, 0.0  ;;  %v3359_v56 = vadd.f32 %v3358_v40, %v3200_v52  ;;  %v7562_v50 = vld [vmem:[#allocation37_spill] sm:$0xff] }
 0x49e   : > { %v2884_v60 = vpop.f32.mrf.mxu2 }
 0x49f   : > { %v3043_v23 = vpop.f32.mrf.mxu3  ;;  %v3703_v26 = vpack.c.bf16 %v3643_v63, %v3643_v63  ;;  %v3456_v51 = vmax.f32 %v7551_v12, %v3359_v56  ;;  %v2885_v29 = vadd.f32 %v2884_v60, %v7552_v59  ;;  %v7563_v60 = vld [vmem:[#allocation43_spill] sm:$0xff]  ;;  %v7566_v12 = vld [vmem:[#allocation176_spill] sm:$0xff] }
 0x4a0   : > { %v3204_v49 = vpop.f32.mrf.mxu0 }
 0x4a1   : > { %3764 = vst.msk [vmem:[%s6587_s11 + $0x88] sm:$0xf] %vm3729_vm0, %v3703_v26  ;;  %v3520_v41 = vmul.f32 %v6842_v62, %v3456_v51  ;;  %v3044_v1 = vadd.f32 %v3043_v23, %v2885_v29  ;;  %v7564_v23 = vld [vmem:[#allocation41_spill] sm:$0xff]  ;;  %v7565_v26 = vld [vmem:[#allocation175_spill] sm:$0xff] }
 0x4a2   : > { %v3363_v4 = vpop.f32.mrf.mxu1 }
 0x4a3   : > { %v3584_v39 = vadd.f32 %v6848_v8, %v3520_v41  ;;  %v3203_v61 = vadd.f32 %v3202_v48, %v3044_v1  ;;  %v7561_v48 = vld [vmem:[#allocation40_spill] sm:$0xff] }
 0x4a5   : > { %v3644_v36 = vmax.f32 %v3584_v39, 0.0  ;;  %v3362_v35 = vadd.f32 %v3361_v34, %v3203_v61  ;;  %v7568_v39 = vld [vmem:[#allocation177_spill] sm:$0xff] }
 0x4a6   : > { %v2886_v54 = vpop.f32.mrf.mxu2 }
 0x4a7   : > { %v3045_v45 = vpop.f32.mrf.mxu3  ;;  %v3704_v10 = vpack.c.bf16 %v3644_v36, %v3644_v36  ;;  %v3457_v46 = vmax.f32 %v7553_v21, %v3362_v35  ;;  %v2887_v37 = vadd.f32 %v2886_v54, %v7554_v30 }
 0x4a8   : > { %v3207_v25 = vpop.f32.mrf.mxu0 }
 0x4a9   : > { %3765 = vst.msk [vmem:[%s6587_s11 + $0x8c] sm:$0xf] %vm3729_vm0, %v3704_v10  ;;  %v3521_v38 = vmul.f32 %v6842_v62, %v3457_v46  ;;  %v3046_v11 = vadd.f32 %v3045_v45, %v2887_v37 }
 0x4aa   : > { %v3366_v55 = vpop.f32.mrf.mxu1 }
 0x4ab   : > { %v3585_v18 = vadd.f32 %v6848_v8, %v3521_v38  ;;  %v3205_v58 = vadd.f32 %v3204_v49, %v3046_v11  ;;  %2928 = vmatmul.bf16.gmra.mxu2 %v7555_v17  ;;  %3246 = vmatmul.bf16.gmra.mxu0 %v7557_v33  ;;  %v7567_v49 = vld [vmem:[#allocation178_spill] sm:$0xff] }
 0x4ac   : > { %3087 = vmatmul.bf16.gmra.mxu3 %v7556_v44 }
 0x4ad   : > { %3405 = vmatmul.bf16.gmra.mxu1 %v7558_v31  ;;  %v3645_v20 = vmax.f32 %v3585_v18, 0.0  ;;  %v3364_v53 = vadd.f32 %v3363_v4, %v3205_v58  ;;  %v7570_v18 = vld [vmem:[#allocation42_spill] sm:$0xff] }
 0x4ae   : > { %v2889_v15 = vpop.f32.mrf.mxu2 }
 0x4af   : > { %v3048_v16 = vpop.f32.mrf.mxu3  ;;  %v3705_v0 = vpack.c.bf16 %v3645_v20, %v3645_v20  ;;  %v3458_v40 = vmax.f32 %v7559_v27, %v3364_v53  ;;  %v2890_v6 = vadd.f32 %v2889_v15, %v7560_v19  ;;  %v7571_v15 = vld [vmem:[#allocation48_spill] sm:$0xff] }
 0x4b0   : > { %v3209_v42 = vpop.f32.mrf.mxu0  ;;  %v7574_v27 = vld [vmem:[#allocation180_spill] sm:$0xff] }
 0x4b1   : > { %3766 = vst.msk [vmem:[%s6587_s11 + $0x90] sm:$0xf] %vm3729_vm0, %v3705_v0  ;;  %v3522_v28 = vmul.f32 %v6842_v62, %v3458_v40  ;;  %v3049_v13 = vadd.f32 %v3048_v16, %v2890_v6  ;;  %v7572_v16 = vld [vmem:[#allocation46_spill] sm:$0xff]  ;;  %v7573_v0 = vld [vmem:[#allocation179_spill] sm:$0xff] }
 0x4b2   : > { %v3368_v22 = vpop.f32.mrf.mxu1 }
 0x4b3   : > { %v3586_v43 = vadd.f32 %v6848_v8, %v3522_v28  ;;  %v3208_v5 = vadd.f32 %v3207_v25, %v3049_v13  ;;  %v7569_v25 = vld [vmem:[#allocation45_spill] sm:$0xff] }
 0x4b5   : > { %v3646_v57 = vmax.f32 %v3586_v43, 0.0  ;;  %v3367_v9 = vadd.f32 %v3366_v55, %v3208_v5  ;;  %v7576_v43 = vld [vmem:[#allocation181_spill] sm:$0xff] }
 0x4b6   : > { %v2891_v32 = vpop.f32.mrf.mxu2 }
 0x4b7   : > { %v3050_v3 = vpop.f32.mrf.mxu3  ;;  %v3706_v24 = vpack.c.bf16 %v3646_v57, %v3646_v57  ;;  %v3459_v34 = vmax.f32 %v7561_v48, %v3367_v9  ;;  %v2892_v52 = vadd.f32 %v2891_v32, %v7562_v50 }
 0x4b8   : > { %v3212_v14 = vpop.f32.mrf.mxu0 }
 0x4b9   : > { %3767 = vst.msk [vmem:[%s6587_s11 + $0x94] sm:$0xf] %vm3729_vm0, %v3706_v24  ;;  %v3523_v7 = vmul.f32 %v6842_v62, %v3459_v34  ;;  %v3051_v2 = vadd.f32 %v3050_v3, %v2892_v52 }
 0x4ba   : > { %v3371_v47 = vpop.f32.mrf.mxu1 }
 0x4bb   : > { %v3587_v63 = vadd.f32 %v6848_v8, %v3523_v7  ;;  %v3210_v56 = vadd.f32 %v3209_v42, %v3051_v2  ;;  %2933 = vmatmul.bf16.gmra.mxu2 %v7563_v60  ;;  %3251 = vmatmul.bf16.gmra.mxu0 %v7565_v26  ;;  %v7575_v42 = vld [vmem:[#allocation182_spill] sm:$0xff] }
 0x4bc   : > { %3092 = vmatmul.bf16.gmra.mxu3 %v7564_v23 }
 0x4bd   : > { %3410 = vmatmul.bf16.gmra.mxu1 %v7566_v12  ;;  %v3647_v51 = vmax.f32 %v3587_v63, 0.0  ;;  %v3369_v59 = vadd.f32 %v3368_v22, %v3210_v56  ;;  %v7578_v63 = vld [vmem:[#allocation47_spill] sm:$0xff] }
 0x4be   : > { %v2894_v29 = vpop.f32.mrf.mxu2 }
 0x4bf   : > { %v3053_v41 = vpop.f32.mrf.mxu3  ;;  %v3707_v1 = vpack.c.bf16 %v3647_v51, %v3647_v51  ;;  %v3460_v4 = vmax.f32 %v7567_v49, %v3369_v59  ;;  %v2895_v61 = vadd.f32 %v2894_v29, %v7568_v39  ;;  %v7579_v39 = vld [vmem:[#allocation183_spill] sm:$0xff] }
 0x4c0   : > { %v3214_v54 = vpop.f32.mrf.mxu0 }
 0x4c1   : > { %3768 = vst.msk [vmem:[%s6587_s11 + $0x98] sm:$0xf] %vm3729_vm0, %v3707_v1  ;;  %v3524_v36 = vmul.f32 %v6842_v62, %v3460_v4  ;;  %v3054_v35 = vadd.f32 %v3053_v41, %v2895_v61 }
 0x4c2   : > { %v3373_v45 = vpop.f32.mrf.mxu1 }
 0x4c3   : > { %v3588_v10 = vadd.f32 %v6848_v8, %v3524_v36  ;;  %v3213_v21 = vadd.f32 %v3212_v14, %v3054_v35  ;;  %v7577_v14 = vld [vmem:[#allocation50_spill] sm:$0xff]  ;;  %v7580_v36 = vld [vmem:[#allocation51_spill] sm:$0xff] }
 0x4c5   : > { %v3648_v46 = vmax.f32 %v3588_v10, 0.0  ;;  %v3372_v30 = vadd.f32 %v3371_v47, %v3213_v21 }
 0x4c6   : > { %v2896_v37 = vpop.f32.mrf.mxu2 }
 0x4c7   : > { %v3055_v38 = vpop.f32.mrf.mxu3  ;;  %v3708_v11 = vpack.c.bf16 %v3648_v46, %v3648_v46  ;;  %v3461_v55 = vmax.f32 %v7569_v25, %v3372_v30  ;;  %v2897_v58 = vadd.f32 %v2896_v37, %v7570_v18  ;;  %v7581_v18 = vld [vmem:[#allocation52_spill] sm:$0xff] }
 0x4c8   : > { %v3217_v33 = vpop.f32.mrf.mxu0 }
 0x4c9   : > { %3769 = vst.msk [vmem:[%s6587_s11 + $0x9c] sm:$0xf] %vm3729_vm0, %v3708_v11  ;;  %v3525_v17 = vmul.f32 %v6842_v62, %v3461_v55  ;;  %v3056_v44 = vadd.f32 %v3055_v38, %v2897_v58 }
 0x4ca   : > { %v3376_v31 = vpop.f32.mrf.mxu1 }
 0x4cb   : > { %v3589_v20 = vadd.f32 %v6848_v8, %v3525_v17  ;;  %v3215_v53 = vadd.f32 %v3214_v54, %v3056_v44  ;;  %2938 = vmatmul.bf16.gmra.mxu2 %v7571_v15  ;;  %3256 = vmatmul.bf16.gmra.mxu0 %v7573_v0  ;;  %v7582_v17 = vld [vmem:[#allocation3_spill] sm:$0xff] }
 0x4cc   : > { %3097 = vmatmul.bf16.gmra.mxu3 %v7572_v16 }
 0x4cd   : > { %3415 = vmatmul.bf16.gmra.mxu1 %v7574_v27  ;;  %v3649_v40 = vmax.f32 %v3589_v20, 0.0  ;;  %v3374_v19 = vadd.f32 %v3373_v45, %v3215_v53 }
 0x4ce   : > { %v2899_v6 = vpop.f32.mrf.mxu2 }
 0x4cf   : > { %v3058_v28 = vpop.f32.mrf.mxu3  ;;  %v3709_v13 = vpack.c.bf16 %v3649_v40, %v3649_v40  ;;  %v3462_v22 = vmax.f32 %v7575_v42, %v3374_v19  ;;  %v2900_v5 = vadd.f32 %v2899_v6, %v7576_v43  ;;  %v7584_v42 = vld [vmem:[#allocation53_spill] sm:$0xff] }
 0x4d0   : > { %v3219_v32 = vpop.f32.mrf.mxu0 }
 0x4d1   : > { %3770 = vst.msk [vmem:[%s6587_s11 + $0xa0] sm:$0xf] %vm3729_vm0, %v3709_v13  ;;  %v3526_v57 = vmul.f32 %v6842_v62, %v3462_v22  ;;  %v3059_v9 = vadd.f32 %v3058_v28, %v2900_v5  ;;  %v7583_v28 = vld [vmem:[#allocation54_spill] sm:$0xff] }
 0x4d2   : > { %v3378_v3 = vpop.f32.mrf.mxu1 }
 0x4d3   : > { %v3590_v24 = vadd.f32 %v6848_v8, %v3526_v57  ;;  %v3218_v48 = vadd.f32 %v3217_v33, %v3059_v9 }
 0x4d5   : > { %v3650_v34 = vmax.f32 %v3590_v24, 0.0  ;;  %v3377_v50 = vadd.f32 %v3376_v31, %v3218_v48 }
 0x4d6   : > { %v2901_v52 = vpop.f32.mrf.mxu2 }
 0x4d7   : > { %v3060_v7 = vpop.f32.mrf.mxu3  ;;  %v3710_v2 = vpack.c.bf16 %v3650_v34, %v3650_v34  ;;  %v3463_v47 = vmax.f32 %v7577_v14, %v3377_v50  ;;  %v2902_v56 = vadd.f32 %v2901_v52, %v7578_v63  ;;  %v7586_v14 = vld [vmem:[#allocation55_spill] sm:$0xff] }
 0x4d8   : > { %v3222_v26 = vpop.f32.mrf.mxu0 }
 0x4d9   : > { %3771 = vst.msk [vmem:[%s6587_s11 + $0xa4] sm:$0xf] %vm3729_vm0, %v3710_v2  ;;  %v3527_v60 = vmul.f32 %v6842_v62, %v3463_v47  ;;  %v3061_v23 = vadd.f32 %v3060_v7, %v2902_v56  ;;  %v7585_v7 = vld [vmem:[#allocation56_spill] sm:$0xff] }
 0x4da   : > { %v3381_v12 = vpop.f32.mrf.mxu1 }
 0x4db   : > { %v3591_v51 = vadd.f32 %v6848_v8, %v3527_v60  ;;  %v3220_v59 = vadd.f32 %v3219_v32, %v3061_v23 }
 0x4dd   : > { %v3651_v29 = vmax.f32 %v3591_v51, 0.0  ;;  %v3379_v41 = vadd.f32 %v3378_v3, %v3220_v59 }
 0x4de   : > { %v2904_v1 = vpop.f32.mrf.mxu2 }
 0x4df   : > { %v3063_v49 = vpop.f32.mrf.mxu3  ;;  %v3711_v4 = vpack.c.bf16 %v3651_v29, %v3651_v29  ;;  %v3464_v61 = vmax.f32 %v7579_v39, %v3379_v41  ;;  %v2905_v35 = vadd.f32 %v2904_v1, %v7580_v36  ;;  %v7588_v39 = vld [vmem:[#allocation5_spill] sm:$0xff] }
 0x4e0   : > { %v3224_v10 = vpop.f32.mrf.mxu0 }
 0x4e1   : > { %3772 = vst.msk [vmem:[%s6587_s11 + $0xa8] sm:$0xf] %vm3729_vm0, %v3711_v4  ;;  %v3528_v54 = vmul.f32 %v6842_v62, %v3464_v61  ;;  %v3064_v45 = vadd.f32 %v3063_v49, %v2905_v35  ;;  %v7587_v49 = vld [vmem:[#allocation57_spill] sm:$0xff] }
 0x4e2   : > { %v3383_v21 = vpop.f32.mrf.mxu1 }
 0x4e3   : > { %v3592_v46 = vadd.f32 %v6848_v8, %v3528_v54  ;;  %v3223_v30 = vadd.f32 %v3222_v26, %v3064_v45 }
 0x4e5   : > { %v3652_v37 = vmax.f32 %v3592_v46, 0.0  ;;  %v3382_v38 = vadd.f32 %v3381_v12, %v3223_v30 }
 0x4e6   : > { %v2906_v11 = vpop.f32.mrf.mxu2 }
 0x4e7   : > { %v3065_v25 = vpop.f32.mrf.mxu3  ;;  %v3712_v55 = vpack.c.bf16 %v3652_v37, %v3652_v37  ;;  %v3465_v58 = vmax.f32 %v7581_v18, %v3382_v38  ;;  %v2907_v44 = vadd.f32 %v2906_v11, %v7582_v17  ;;  %v7590_v18 = vld [vmem:[#allocation58_spill] sm:$0xff] }
 0x4e8   : > { %v3227_v20 = vpop.f32.mrf.mxu0 }
 0x4e9   : > { %3773 = vst.msk [vmem:[%s6587_s11 + $0xac] sm:$0xf] %vm3729_vm0, %v3712_v55  ;;  %v3529_v33 = vmul.f32 %v6842_v62, %v3465_v58  ;;  %v3066_v31 = vadd.f32 %v3065_v25, %v2907_v44  ;;  %v7589_v25 = vld [vmem:[#allocation59_spill] sm:$0xff] }
 0x4ea   : > { %v3386_v53 = vpop.f32.mrf.mxu1 }
 0x4eb   : > { %v3593_v15 = vadd.f32 %v6848_v8, %v3529_v33  ;;  %v3225_v16 = vadd.f32 %v3224_v10, %v3066_v31 }
 0x4ed   : > { %v3653_v0 = vmax.f32 %v3593_v15, 0.0  ;;  %v3384_v27 = vadd.f32 %v3383_v21, %v3225_v16 }
 0x4ee   : > { %v2909_v40 = vpop.f32.mrf.mxu2 }
 0x4ef   : > { %v3068_v19 = vpop.f32.mrf.mxu3  ;;  %v3713_v6 = vpack.c.bf16 %v3653_v0, %v3653_v0  ;;  %v3466_v13 = vmax.f32 %v7583_v28, %v3384_v27  ;;  %v2910_v22 = vadd.f32 %v2909_v40, %v7584_v42  ;;  %v7592_v28 = vld [vmem:[#allocation60_spill] sm:$0xff] }
 0x4f0   : > { %v3229_v57 = vpop.f32.mrf.mxu0 }
 0x4f1   : > { %3774 = vst.msk [vmem:[%s6587_s11 + $0xb0] sm:$0xf] %vm3729_vm0, %v3713_v6  ;;  %v3530_v43 = vmul.f32 %v6842_v62, %v3466_v13  ;;  %v3069_v5 = vadd.f32 %v3068_v19, %v2910_v22  ;;  %v7591_v19 = vld [vmem:[#allocation61_spill] sm:$0xff] }
 0x4f2   : > { %v3388_v9 = vpop.f32.mrf.mxu1 }
 0x4f3   : > { %v3594_v32 = vadd.f32 %v6848_v8, %v3530_v43  ;;  %v3228_v3 = vadd.f32 %v3227_v20, %v3069_v5 }
 0x4f5   : > { %v3654_v24 = vmax.f32 %v3594_v32, 0.0  ;;  %v3387_v48 = vadd.f32 %v3386_v53, %v3228_v3 }
 0x4f6   : > { %v2911_v34 = vpop.f32.mrf.mxu2 }
 0x4f7   : > { %v3070_v50 = vpop.f32.mrf.mxu3  ;;  %v3714_v52 = vpack.c.bf16 %v3654_v24, %v3654_v24  ;;  %v3467_v2 = vmax.f32 %v7585_v7, %v3387_v48  ;;  %v2912_v47 = vadd.f32 %v2911_v34, %v7586_v14  ;;  %v7594_v7 = vld [vmem:[#allocation7_spill] sm:$0xff] }
 0x4f8   : > { %v3232_v60 = vpop.f32.mrf.mxu0 }
 0x4f9   : > { %3775 = vst.msk [vmem:[%s6587_s11 + $0xb4] sm:$0xf] %vm3729_vm0, %v3714_v52  ;;  %v3531_v63 = vmul.f32 %v6842_v62, %v3467_v2  ;;  %v3071_v56 = vadd.f32 %v3070_v50, %v2912_v47  ;;  %v7593_v50 = vld [vmem:[#allocation62_spill] sm:$0xff] }
 0x4fa   : > { %v3391_v23 = vpop.f32.mrf.mxu1 }
 0x4fb   : > { %v3595_v26 = vadd.f32 %v6848_v8, %v3531_v63  ;;  %v3230_v12 = vadd.f32 %v3229_v57, %v3071_v56 }
 0x4fd   : > { %v3655_v51 = vmax.f32 %v3595_v26, 0.0  ;;  %v3389_v59 = vadd.f32 %v3388_v9, %v3230_v12 }
 0x4fe   : > { %v2914_v29 = vpop.f32.mrf.mxu2 }
 0x4ff   : > { %v3073_v41 = vpop.f32.mrf.mxu3  ;;  %v3715_v1 = vpack.c.bf16 %v3655_v51, %v3655_v51  ;;  %v3468_v4 = vmax.f32 %v7587_v49, %v3389_v59  ;;  %v2915_v61 = vadd.f32 %v2914_v29, %v7588_v39  ;;  %v7596_v49 = vld [vmem:[#allocation63_spill] sm:$0xff] }
 0x500   : > { %v3234_v54 = vpop.f32.mrf.mxu0 }
 0x501   : > { %3776 = vst.msk [vmem:[%s6587_s11 + $0xb8] sm:$0xf] %vm3729_vm0, %v3715_v1  ;;  %v3532_v36 = vmul.f32 %v6842_v62, %v3468_v4  ;;  %v3074_v35 = vadd.f32 %v3073_v41, %v2915_v61  ;;  %v7595_v41 = vld [vmem:[#allocation64_spill] sm:$0xff] }
 0x502   : > { %v3393_v45 = vpop.f32.mrf.mxu1 }
 0x503   : > { %v3596_v10 = vadd.f32 %v6848_v8, %v3532_v36  ;;  %v3233_v21 = vadd.f32 %v3232_v60, %v3074_v35 }
 0x505   : > { %v3656_v46 = vmax.f32 %v3596_v10, 0.0  ;;  %v3392_v30 = vadd.f32 %v3391_v23, %v3233_v21 }
 0x506   : > { %v2916_v37 = vpop.f32.mrf.mxu2 }
 0x507   : > { %v3075_v38 = vpop.f32.mrf.mxu3  ;;  %v3716_v11 = vpack.c.bf16 %v3656_v46, %v3656_v46  ;;  %v3469_v55 = vmax.f32 %v7589_v25, %v3392_v30  ;;  %v2917_v58 = vadd.f32 %v2916_v37, %v7590_v18  ;;  %v7598_v25 = vld [vmem:[#allocation65_spill] sm:$0xff] }
 0x508   : > { %v3237_v33 = vpop.f32.mrf.mxu0 }
 0x509   : > { %3777 = vst.msk [vmem:[%s6587_s11 + $0xbc] sm:$0xf] %vm3729_vm0, %v3716_v11  ;;  %v3533_v17 = vmul.f32 %v6842_v62, %v3469_v55  ;;  %v3076_v44 = vadd.f32 %v3075_v38, %v2917_v58  ;;  %v7597_v38 = vld [vmem:[#allocation66_spill] sm:$0xff] }
 0x50a   : > { %v3396_v31 = vpop.f32.mrf.mxu1 }
 0x50b   : > { %v3597_v20 = vadd.f32 %v6848_v8, %v3533_v17  ;;  %v3235_v53 = vadd.f32 %v3234_v54, %v3076_v44 }
 0x50d   : > { %v3657_v15 = vmax.f32 %v3597_v20, 0.0  ;;  %v3394_v16 = vadd.f32 %v3393_v45, %v3235_v53 }
 0x50e   : > { %v2919_v0 = vpop.f32.mrf.mxu2 }
 0x50f   : > { %v3078_v27 = vpop.f32.mrf.mxu3  ;;  %v3717_v40 = vpack.c.bf16 %v3657_v15, %v3657_v15  ;;  %v3470_v6 = vmax.f32 %v7591_v19, %v3394_v16  ;;  %v2920_v13 = vadd.f32 %v2919_v0, %v7592_v28  ;;  %v7600_v19 = vld [vmem:[#allocation9_spill] sm:$0xff] }
 0x510   : > { %v3239_v43 = vpop.f32.mrf.mxu0 }
 0x511   : > { %3778 = vst.msk [vmem:[%s6587_s11 + $0xc0] sm:$0xf] %vm3729_vm0, %v3717_v40  ;;  %v3534_v42 = vmul.f32 %v6842_v62, %v3470_v6  ;;  %v3079_v22 = vadd.f32 %v3078_v27, %v2920_v13  ;;  %v7599_v27 = vld [vmem:[#allocation67_spill] sm:$0xff] }
 0x512   : > { %v3398_v5 = vpop.f32.mrf.mxu1 }
 0x513   : > { %v3598_v57 = vadd.f32 %v6848_v8, %v3534_v42  ;;  %v3238_v9 = vadd.f32 %v3237_v33, %v3079_v22 }
 0x515   : > { %v3658_v32 = vmax.f32 %v3598_v57, 0.0  ;;  %v3397_v3 = vadd.f32 %v3396_v31, %v3238_v9 }
 0x516   : > { %v2921_v24 = vpop.f32.mrf.mxu2 }
 0x517   : > { %v3080_v48 = vpop.f32.mrf.mxu3  ;;  %v3718_v34 = vpack.c.bf16 %v3658_v32, %v3658_v32  ;;  %v3471_v52 = vmax.f32 %v7593_v50, %v3397_v3  ;;  %v2922_v2 = vadd.f32 %v2921_v24, %v7594_v7  ;;  %v7602_v50 = vld [vmem:[#allocation68_spill] sm:$0xff] }
 0x518   : > { %v3242_v63 = vpop.f32.mrf.mxu0 }
 0x519   : > { %3779 = vst.msk [vmem:[%s6587_s11 + $0xc4] sm:$0xf] %vm3729_vm0, %v3718_v34  ;;  %v3535_v14 = vmul.f32 %v6842_v62, %v3471_v52  ;;  %v3081_v47 = vadd.f32 %v3080_v48, %v2922_v2  ;;  %v7601_v48 = vld [vmem:[#allocation69_spill] sm:$0xff] }
 0x51a   : > { %v3401_v56 = vpop.f32.mrf.mxu1 }
 0x51b   : > { %v3599_v60 = vadd.f32 %v6848_v8, %v3535_v14  ;;  %v3240_v23 = vadd.f32 %v3239_v43, %v3081_v47 }
 0x51d   : > { %v3659_v26 = vmax.f32 %v3599_v60, 0.0  ;;  %v3399_v12 = vadd.f32 %v3398_v5, %v3240_v23 }
 0x51e   : > { %v2924_v51 = vpop.f32.mrf.mxu2 }
 0x51f   : > { %v3083_v59 = vpop.f32.mrf.mxu3  ;;  %v3719_v29 = vpack.c.bf16 %v3659_v26, %v3659_v26  ;;  %v3472_v1 = vmax.f32 %v7595_v41, %v3399_v12  ;;  %v2925_v4 = vadd.f32 %v2924_v51, %v7596_v49  ;;  %v7604_v41 = vld [vmem:[#allocation70_spill] sm:$0xff] }
 0x520   : > { %v3244_v36 = vpop.f32.mrf.mxu0 }
 0x521   : > { %3780 = vst.msk [vmem:[%s6587_s11 + $0xc8] sm:$0xf] %vm3729_vm0, %v3719_v29  ;;  %v3536_v39 = vmul.f32 %v6842_v62, %v3472_v1  ;;  %v3084_v61 = vadd.f32 %v3083_v59, %v2925_v4  ;;  %v7603_v59 = vld [vmem:[#allocation71_spill] sm:$0xff] }
 0x522   : > { %v3403_v35 = vpop.f32.mrf.mxu1 }
 0x523   : > { %v3600_v54 = vadd.f32 %v6848_v8, %v3536_v39  ;;  %v3243_v45 = vadd.f32 %v3242_v63, %v3084_v61 }
 0x525   : > { %v3660_v10 = vmax.f32 %v3600_v54, 0.0  ;;  %v3402_v21 = vadd.f32 %v3401_v56, %v3243_v45 }
 0x526   : > { %v2926_v46 = vpop.f32.mrf.mxu2 }
 0x527   : > { %v3085_v30 = vpop.f32.mrf.mxu3  ;;  %v3720_v37 = vpack.c.bf16 %v3660_v10, %v3660_v10  ;;  %v3473_v11 = vmax.f32 %v7597_v38, %v3402_v21  ;;  %v2927_v55 = vadd.f32 %v2926_v46, %v7598_v25  ;;  %v7605_v46 = vld [vmem:[#allocation72_spill] sm:$0xff] }
 0x528   : > { %v3247_v17 = vpop.f32.mrf.mxu0 }
 0x529   : > { %3781 = vst.msk [vmem:[%s6587_s11 + $0xcc] sm:$0xf] %vm3729_vm0, %v3720_v37  ;;  %v3537_v18 = vmul.f32 %v6842_v62, %v3473_v11  ;;  %v3086_v58 = vadd.f32 %v3085_v30, %v2927_v55  ;;  %v7606_v37 = vld [vmem:[#allocation11_spill] sm:$0xff] }
 0x52a   : > { %v3406_v44 = vpop.f32.mrf.mxu1 }
 0x52b   : > { %v3601_v33 = vadd.f32 %v6848_v8, %v3537_v18  ;;  %v3245_v31 = vadd.f32 %v3244_v36, %v3086_v58 }
 0x52d   : > { %v3661_v20 = vmax.f32 %v3601_v33, 0.0  ;;  %v3404_v53 = vadd.f32 %v3403_v35, %v3245_v31 }
 0x52e   : > { %v2929_v15 = vpop.f32.mrf.mxu2 }
 0x52f   : > { %v3088_v16 = vpop.f32.mrf.mxu3  ;;  %v3721_v0 = vpack.c.bf16 %v3661_v20, %v3661_v20  ;;  %v3474_v40 = vmax.f32 %v7599_v27, %v3404_v53  ;;  %v2930_v6 = vadd.f32 %v2929_v15, %v7600_v19  ;;  %v7607_v53 = vld [vmem:[#allocation74_spill] sm:$0xff] }
 0x530   : > { %v3249_v42 = vpop.f32.mrf.mxu0 }
 0x531   : > { %3782 = vst.msk [vmem:[%s6587_s11 + $0xd0] sm:$0xf] %vm3729_vm0, %v3721_v0  ;;  %v3538_v28 = vmul.f32 %v6842_v62, %v3474_v40  ;;  %v3089_v13 = vadd.f32 %v3088_v16, %v2930_v6  ;;  %v7608_v16 = vld [vmem:[#allocation73_spill] sm:$0xff] }
 0x532   : > { %v3408_v5 = vpop.f32.mrf.mxu1 }
 0x533   : > { %v3602_v22 = vadd.f32 %v6848_v8, %v3538_v28  ;;  %v3248_v43 = vadd.f32 %v3247_v17, %v3089_v13 }
 0x535   : > { %v3662_v57 = vmax.f32 %v3602_v22, 0.0  ;;  %v3407_v9 = vadd.f32 %v3406_v44, %v3248_v43 }
 0x536   : > { %v2931_v32 = vpop.f32.mrf.mxu2 }
 0x537   : > { %v3090_v3 = vpop.f32.mrf.mxu3  ;;  %v3722_v24 = vpack.c.bf16 %v3662_v57, %v3662_v57  ;;  %v3475_v34 = vmax.f32 %v7601_v48, %v3407_v9  ;;  %v2932_v52 = vadd.f32 %v2931_v32, %v7602_v50  ;;  %v7609_v57 = vld [vmem:[#allocation76_spill] sm:$0xff]  ;;  %v7610_v32 = vld [vmem:[#allocation75_spill] sm:$0xff] }
 0x538   : > { %v3252_v63 = vpop.f32.mrf.mxu0 }
 0x539   : > { %3783 = vst.msk [vmem:[%s6587_s11 + $0xd4] sm:$0xf] %vm3729_vm0, %v3722_v24  ;;  %v3539_v7 = vmul.f32 %v6842_v62, %v3475_v34  ;;  %v3091_v2 = vadd.f32 %v3090_v3, %v2932_v52 }
 0x53a   : > { %v3411_v23 = vpop.f32.mrf.mxu1 }
 0x53b   : > { %v3603_v14 = vadd.f32 %v6848_v8, %v3539_v7  ;;  %v3250_v47 = vadd.f32 %v3249_v42, %v3091_v2 }
 0x53d   : > { %v3663_v56 = vmax.f32 %v3603_v14, 0.0  ;;  %v3409_v60 = vadd.f32 %v3408_v5, %v3250_v47 }
 0x53e   : > { %v2934_v26 = vpop.f32.mrf.mxu2 }
 0x53f   : > { %v3093_v12 = vpop.f32.mrf.mxu3  ;;  %v3723_v51 = vpack.c.bf16 %v3663_v56, %v3663_v56  ;;  %v3476_v29 = vmax.f32 %v7603_v59, %v3409_v60  ;;  %v2935_v1 = vadd.f32 %v2934_v26, %v7604_v41  ;;  %v7611_v56 = vld [vmem:[#allocation13_spill] sm:$0xff] }
 0x540   : > { %v3254_v54 = vpop.f32.mrf.mxu0 }
 0x541   : > { %3784 = vst.msk [vmem:[%s6587_s11 + $0xd8] sm:$0xf] %vm3729_vm0, %v3723_v51  ;;  %v3540_v49 = vmul.f32 %v6842_v62, %v3476_v29  ;;  %v3094_v4 = vadd.f32 %v3093_v12, %v2935_v1 }
 0x542   : > { %v3413_v11 = vpop.f32.mrf.mxu1 }
 0x543   : > { %v3604_v39 = vadd.f32 %v6848_v8, %v3540_v49  ;;  %v3253_v61 = vadd.f32 %v3252_v63, %v3094_v4 }
 0x545   : > { %v3664_v36 = vmax.f32 %v3604_v39, 0.0  ;;  %v3412_v35 = vadd.f32 %v3411_v23, %v3253_v61 }
 0x546   : > { %v2936_v45 = vpop.f32.mrf.mxu2 }
 0x547   : > { %v3095_v10 = vpop.f32.mrf.mxu3  ;;  %v3724_v21 = vpack.c.bf16 %v3664_v36, %v3664_v36  ;;  %v3477_v30 = vmax.f32 %v7605_v46, %v3412_v35  ;;  %v2937_v38 = vadd.f32 %v2936_v45, %v7606_v37 }
 0x548   : > { %v3257_v27 = vpop.f32.mrf.mxu0 }
 0x549   : > { %3785 = vst.msk [vmem:[%s6587_s11 + $0xdc] sm:$0xf] %vm3729_vm0, %v3724_v21  ;;  %v3541_v25 = vmul.f32 %v6842_v62, %v3477_v30  ;;  %v3096_v55 = vadd.f32 %v3095_v10, %v2937_v38 }
 0x54a   : > { %v3416_v6 = vpop.f32.mrf.mxu1 }
 0x54b   : > { %v3605_v18 = vadd.f32 %v6848_v8, %v3541_v25  ;;  %v3255_v58 = vadd.f32 %v3254_v54, %v3096_v55 }
 0x54d   : > { %v3665_v17 = vmax.f32 %v3605_v18, 0.0  ;;  %v3414_v44 = vadd.f32 %v3413_v11, %v3255_v58 }
 0x54e   : > { %v2939_v33 = vpop.f32.mrf.mxu2 }
 0x54f   : > { %v3098_v31 = vpop.f32.mrf.mxu3  ;;  %v3725_v20 = vpack.c.bf16 %v3665_v17, %v3665_v17  ;;  %v3478_v15 = vmax.f32 %v7607_v53, %v3414_v44  ;;  %v2940_v0 = vadd.f32 %v2939_v33, %v7608_v16 }
 0x550   : > { %v3259_v50 = vpop.f32.mrf.mxu0 }
 0x551   : > { %3786 = vst.msk [vmem:[%s6587_s11 + $0xe0] sm:$0xf] %vm3729_vm0, %v3725_v20  ;;  %v3542_v40 = vmul.f32 %v6842_v62, %v3478_v15  ;;  %v3099_v19 = vadd.f32 %v3098_v31, %v2940_v0 }
 0x552   : > { %v3418_v2 = vpop.f32.mrf.mxu1 }
 0x553   : > { %v3606_v28 = vadd.f32 %v6848_v8, %v3542_v40  ;;  %v3258_v13 = vadd.f32 %v3257_v27, %v3099_v19 }
 0x555   : > { %v3666_v42 = vmax.f32 %v3606_v28, 0.0  ;;  %v3417_v22 = vadd.f32 %v3416_v6, %v3258_v13 }
 0x556   : > { %v2941_v43 = vpop.f32.mrf.mxu2 }
 0x557   : > { %v3726_v5 = vpack.c.bf16 %v3666_v42, %v3666_v42  ;;  %v3479_v9 = vmax.f32 %v7609_v57, %v3417_v22  ;;  %v2942_v3 = vadd.f32 %v2941_v43, %v7610_v32  ;;  %v3100_v24 = vpop.f32.mrf.mxu3 }
 0x559   : > { %3787 = vst.msk [vmem:[%s6587_s11 + $0xe4] sm:$0xf] %vm3729_vm0, %v3726_v5  ;;  %v3543_v48 = vmul.f32 %v6842_v62, %v3479_v9  ;;  %v3101_v34 = vadd.f32 %v3100_v24, %v2942_v3 }
 0x55b   : > { %v3607_v52 = vadd.f32 %v6848_v8, %v3543_v48  ;;  %v3260_v7 = vadd.f32 %v3259_v50, %v3101_v34 }
 0x55d   : > { %v3667_v14 = vmax.f32 %v3607_v52, 0.0  ;;  %v3419_v47 = vadd.f32 %v3418_v2, %v3260_v7 }
 0x55f   : > { %v3727_v63 = vpack.c.bf16 %v3667_v14, %v3667_v14  ;;  %v3480_v60 = vmax.f32 %v7611_v56, %v3419_v47 }
 0x561   : > { %3788 = vst.msk [vmem:[%s6587_s11 + $0xe8] sm:$0xf] %vm3729_vm0, %v3727_v63  ;;  %v3544_v23 = vmul.f32 %v6842_v62, %v3480_v60 }
 0x563   : > { %v3608_v26 = vadd.f32 %v6848_v8, %v3544_v23 }
 0x565   : > { %v3668_v12 = vmax.f32 %v3608_v26, 0.0 }
 0x567   : > { %v3728_v51 = vpack.c.bf16 %v3668_v12, %v3668_v12 }
 0x569   : > { %3789 = vst.msk [vmem:[%s6587_s11 + $0xec] sm:$0xf] %vm3729_vm0, %v3728_v51 }
 0x56a PF: > { %s15_s18 = sadd.s32 1, %s5040_s18  }
 0x56b   : > { %p12_p4 = scmp.ge.s32.totalorder %s15_s18, 4  }
 0x56d   :  { %14 = sbr.rel (!%p12_p4) target bundleno = 1 (0x1), region = 70 }

// kernel: source_cnn_forward.5
= control target key start
LH: loop header
LB: loop body
LE: loop exit
PB: predicated region body
PF: predicated region fallthrough
CT: control target
= control target key end

     0   :  { %vm1114_vm0 = vcmask 523264   ;;  %vm2022_vm1 = vcmask 516096   ;;  %vm2030_vm2 = vcmask 1040896   ;;  %vm2593_vm3 = vcmask 261120   ;;  %s5751_s1 = inlined_call_operand.vmem [shape: bf16[640,64], index: 1, kind: input, shape index: {}]   ;;  %s5752_s2 = inlined_call_operand.vmem [shape: bf16[640,64], index: 2, kind: input, shape index: {}]   ;;  %s5753_s0 = inlined_call_operand.vmem [shape: bf16[6,16,640], index: 0, kind: input, shape index: {}]   ;;  %s5754_s3 = inlined_call_operand.vmem [shape: f32[1,64], index: 3, kind: input, shape index: {}]   ;;  %s5755_s4 = inlined_call_operand.vmem [shape: f32[1,64], index: 4, kind: input, shape index: {}]   ;;  %s5756_s5 = inlined_call_operand.vmem [shape: bf16[3,64,64], index: 5, kind: input, shape index: {}]   ;;  %s5757_s6 = inlined_call_operand.vmem [shape: f32[1,64], index: 6, kind: input, shape index: {}]   ;;  %s5758_s7 = inlined_call_operand.vmem [shape: f32[1,64], index: 7, kind: input, shape index: {}]   ;;  %s5759_s8 = inlined_call_operand.vmem [shape: f32[512,256], index: 8, kind: input, shape index: {}]   ;;  %s5760_s10 = inlined_call_operand.vmem [shape: f32[256,128], index: 10, kind: input, shape index: {}]   ;;  %s5761_s11 = inlined_call_operand.vmem [shape: f32[1,128], index: 11, kind: input, shape index: {}]   ;;  %s5762_s12 = inlined_call_operand.vmem [shape: f32[128,64], index: 12, kind: input, shape index: {}]   ;;  %s5763_s9 = inlined_call_operand.vmem [shape: f32[1,256], index: 9, kind: input, shape index: {}]   ;;  %s5764_s13 = inlined_call_operand.vmem [shape: f32[1,64], index: 13, kind: input, shape index: {}]   ;;  %s5765_s14 = inlined_call_operand.vmem [shape: f32[64,32], index: 14, kind: input, shape index: {}]   ;;  %s5766_s15 = inlined_call_operand.vmem [shape: f32[1,32], index: 15, kind: input, shape index: {}]   ;;  %s5767_s16 = inlined_call_operand.vmem [shape: f32[32,1], index: 16, kind: input, shape index: {}]   ;;  %s5768_s17 = inlined_call_operand.<no memory space> [shape: f32[1,1], index: 17, kind: input, shape index: {}]   ;;  %s5769_s18 = inlined_call_operand.vmem [shape: f32[2,1], index: 18, kind: output, shape index: {}]  }
   0x1   :  { %5867 = sst [smem:[#allocation47_spill]] %s5751_s1  ;;  %vm2617_vm4 = vcmask 1024  }
   0x2   :  { %5868 = sst [smem:[#allocation48_spill]] %s5752_s2 }
   0x3   :  { %5869 = sst [smem:[#allocation49_spill]] %s5753_s0 }
   0x4   :  { %s5870_s29 = sld [smem:[#allocation47_spill]] }
   0x5   :  { %s5889_s25 = sld [smem:[#allocation48_spill]] }
   0x6   :  { %s5890_s28 = sld [smem:[#allocation49_spill]] }
   0xa   :  { %v3485_v0 = vld [vmem:[%s5870_s29 + $0x38] sm:$0xff]  ;;  %v3507_v4 = vld [vmem:[%s5870_s29 + $0x30] sm:$0xff]  ;;  %v3531_v8 = vld [vmem:[%s5870_s29 + $0x28] sm:$0xff] }
   0xb   :  { %v3490_v1 = vld [vmem:[%s5870_s29 + $0x78] sm:$0xff]  ;;  %496 = vmatpush.bf16.msra.mxu0 %v3485_v0  ;;  %5872 = vst [vmem:[#allocation5_spill] sm:$0xff] %v3507_v4  ;;  %v3512_v5 = vld [vmem:[%s5870_s29 + $0x70] sm:$0xff]  ;;  %v3536_v9 = vld [vmem:[%s5870_s29 + $0x68] sm:$0xff] }
   0xc   :  { %5871 = vst [vmem:[#allocation4_spill] sm:$0xff] %v3490_v1  ;;  %v3495_v2 = vld [vmem:[%s5870_s29 + $0xb8] sm:$0xff]  ;;  %510 = vmatpush.bf16.msra.mxu1 %v3490_v1  ;;  %v3519_v6 = vld [vmem:[%s5870_s29 + $0xb0] sm:$0xff]  ;;  %v3543_v10 = vld [vmem:[%s5870_s29 + $0xa8] sm:$0xff] }
   0xd   :  { %v3500_v3 = vld [vmem:[%s5870_s29 + $0xf8] sm:$0xff]  ;;  %5873 = vst [vmem:[#allocation6_spill] sm:$0xff] %v3512_v5  ;;  %524 = vmatpush.bf16.msra.mxu2 %v3495_v2  ;;  %v3524_v7 = vld [vmem:[%s5870_s29 + $0xf0] sm:$0xff]  ;;  %v3548_v11 = vld [vmem:[%s5870_s29 + $0xe8] sm:$0xff] }
   0xe   :  { %538 = vmatpush.bf16.msra.mxu3 %v3500_v3  ;;  %5874 = vst [vmem:[#allocation7_spill] sm:$0xff] %v3531_v8  ;;  %v3555_v12 = vld [vmem:[%s5870_s29 + $0x20] sm:$0xff]  ;;  %v3579_v16 = vld [vmem:[%s5870_s29 + $0x18] sm:$0xff]  ;;  %v3603_v20 = vld [vmem:[%s5870_s29 + $0x10] sm:$0xff] }
   0xf   :  { %497 = vmatpush.bf16.msra.mxu0 %v3507_v4  ;;  %5875 = vst [vmem:[#allocation8_spill] sm:$0xff] %v3536_v9  ;;  %v3560_v13 = vld [vmem:[%s5870_s29 + $0x60] sm:$0xff]  ;;  %v3584_v17 = vld [vmem:[%s5870_s29 + $0x58] sm:$0xff]  ;;  %v3608_v21 = vld [vmem:[%s5870_s29 + $0x50] sm:$0xff] }
  0x10   :  { %511 = vmatpush.bf16.msra.mxu1 %v3512_v5  ;;  %5876 = vst [vmem:[#allocation9_spill] sm:$0xff] %v3555_v12  ;;  %v3567_v14 = vld [vmem:[%s5870_s29 + $0xa0] sm:$0xff]  ;;  %v3591_v18 = vld [vmem:[%s5870_s29 + $0x98] sm:$0xff]  ;;  %v3615_v22 = vld [vmem:[%s5870_s29 + $0x90] sm:$0xff] }
  0x11   :  { %525 = vmatpush.bf16.msra.mxu2 %v3519_v6  ;;  %5877 = vst [vmem:[#allocation10_spill] sm:$0xff] %v3560_v13  ;;  %v3572_v15 = vld [vmem:[%s5870_s29 + $0xe0] sm:$0xff]  ;;  %v3596_v19 = vld [vmem:[%s5870_s29 + $0xd8] sm:$0xff]  ;;  %v3620_v23 = vld [vmem:[%s5870_s29 + $0xd0] sm:$0xff] }
  0x12   :  { %539 = vmatpush.bf16.msra.mxu3 %v3524_v7  ;;  %5878 = vst [vmem:[#allocation11_spill] sm:$0xff] %v3579_v16  ;;  %v3627_v24 = vld [vmem:[%s5870_s29 + $0x8] sm:$0xff]  ;;  %v3649_v28 = vld [vmem:[%s5870_s29] sm:$0xff]  ;;  %v3671_v32 = vld [vmem:[%s5870_s29 + $0x138] sm:$0xff] }
  0x13   :  { %498 = vmatpush.bf16.msra.mxu0 %v3531_v8  ;;  %5879 = vst [vmem:[#allocation12_spill] sm:$0xff] %v3584_v17  ;;  %v3632_v25 = vld [vmem:[%s5870_s29 + $0x48] sm:$0xff]  ;;  %v3654_v29 = vld [vmem:[%s5870_s29 + $0x40] sm:$0xff]  ;;  %v3676_v33 = vld [vmem:[%s5889_s25 + $0x38] sm:$0xff] }
  0x14   :  { %512 = vmatpush.bf16.msra.mxu1 %v3536_v9  ;;  %5880 = vst [vmem:[#allocation13_spill] sm:$0xff] %v3591_v18  ;;  %v3639_v26 = vld [vmem:[%s5870_s29 + $0x88] sm:$0xff]  ;;  %v3659_v30 = vld [vmem:[%s5870_s29 + $0x80] sm:$0xff]  ;;  %v3255_v35 = vld [vmem:[%s5890_s28 + $0x10] sm:$0xf0] }
  0x15   :  { %526 = vmatpush.bf16.msra.mxu2 %v3543_v10  ;;  %5881 = vst [vmem:[#allocation14_spill] sm:$0xff] %v3603_v20  ;;  %v3644_v27 = vld [vmem:[%s5870_s29 + $0xc8] sm:$0xff]  ;;  %v3664_v31 = vld [vmem:[%s5870_s29 + $0xc0] sm:$0xff]  ;;  %v3256_v37 = vld [vmem:[%s5890_s28 + $0x18] sm:$0xf0] }
  0x16   :  { %540 = vmatpush.bf16.msra.mxu3 %v3548_v11  ;;  %5882 = vst [vmem:[#allocation15_spill] sm:$0xff] %v3608_v21  ;;  %v2625_v34 = vld [vmem:[%s5890_s28] sm:$0xf]  ;;  %v2633_v36 = vld [vmem:[%s5890_s28 + $0x8] sm:$0xf]  ;;  %v3707_v42 = vld [vmem:[%s5889_s25 + $0x78] sm:$0xff] }
  0x17   :  { %499 = vmatpush.bf16.msra.mxu0 %v3555_v12  ;;  %5883 = vst [vmem:[#allocation16_spill] sm:$0xff] %v3615_v22  ;;  %v3254_v38 = vld [vmem:[%s5890_s28 + $0xc] sm:$0xf]  ;;  %v2635_v39 = vld [vmem:[%s5890_s28 + $0x1c] sm:$0xf0]  ;;  %v3712_v43 = vld [vmem:[%s5889_s25 + $0xb8] sm:$0xff]  ;;  %v3716_v44 = vor.u32 %v3255_v35, %v2625_v34  ;;  %v3718_v45 = vor.u32 %v3256_v37, %v2633_v36 }
  0x18   :  { %513 = vmatpush.bf16.msra.mxu1 %v3560_v13  ;;  %5884 = vst [vmem:[#allocation17_spill] sm:$0xff] %v3627_v24  ;;  %v3253_v40 = vld [vmem:[%s5890_s28 + $0x4] sm:$0xf]  ;;  %v2627_v41 = vld [vmem:[%s5890_s28 + $0x14] sm:$0xf0]  ;;  %v3722_v46 = vor.u32 %v3254_v38, %v2635_v39  ;;  %v3731_v48 = vld [vmem:[%s5870_s29 + $0x130] sm:$0xff] }
  0x19   :  { %527 = vmatpush.bf16.msra.mxu2 %v3567_v14  ;;  %5885 = vst [vmem:[#allocation18_spill] sm:$0xff] %v3632_v25  ;;  %v3724_v47 = vor.u32 %v3253_v40, %v2627_v41  ;;  %v3736_v49 = vld [vmem:[%s5889_s25 + $0x30] sm:$0xff]  ;;  %v3759_v52 = vld [vmem:[%s5870_s29 + $0x128] sm:$0xff]  ;;  %v3783_v56 = vld [vmem:[%s5870_s29 + $0x120] sm:$0xff] }
  0x1a   :  { %541 = vmatpush.bf16.msra.mxu3 %v3572_v15  ;;  %5886 = vst [vmem:[#allocation19_spill] sm:$0xff] %v3639_v26  ;;  %v3743_v50 = vld [vmem:[%s5889_s25 + $0x70] sm:$0xff]  ;;  %v3764_v53 = vld [vmem:[%s5889_s25 + $0x28] sm:$0xff]  ;;  %v3788_v57 = vld [vmem:[%s5889_s25 + $0x20] sm:$0xff] }
  0x1b   :  { %500 = vmatpush.bf16.msra.mxu0 %v3579_v16  ;;  %5887 = vst [vmem:[#allocation20_spill] sm:$0xff] %v3649_v28  ;;  %v3748_v51 = vld [vmem:[%s5889_s25 + $0xb0] sm:$0xff]  ;;  %v3771_v54 = vld [vmem:[%s5889_s25 + $0x68] sm:$0xff]  ;;  %v3795_v58 = vld [vmem:[%s5889_s25 + $0x60] sm:$0xff] }
  0x1c   :  { %514 = vmatpush.bf16.msra.mxu1 %v3584_v17  ;;  %5888 = vst [vmem:[#allocation21_spill] sm:$0xff] %v3671_v32  ;;  %v3776_v55 = vld [vmem:[%s5889_s25 + $0xa8] sm:$0xff]  ;;  %v3800_v59 = vld [vmem:[%s5889_s25 + $0xa0] sm:$0xff]  ;;  %v3807_v60 = vld [vmem:[%s5870_s29 + $0x118] sm:$0xff] }
  0x1d   :  { %528 = vmatpush.bf16.msra.mxu2 %v3591_v18  ;;  %5891 = vst [vmem:[#allocation22_spill] sm:$0xff] %v3707_v42  ;;  %v3812_v61 = vld [vmem:[%s5889_s25 + $0x18] sm:$0xff]  ;;  %v3831_v34 = vld [vmem:[%s5870_s29 + $0x110] sm:$0xff]  ;;  %v3855_v38 = vld [vmem:[%s5870_s29 + $0x108] sm:$0xff] }
  0x1e   :  { %542 = vmatpush.bf16.msra.mxu3 %v3596_v19  ;;  %5892 = vst [vmem:[#allocation23_spill] sm:$0xff] %v3731_v48  ;;  %v3819_v62 = vld [vmem:[%s5889_s25 + $0x58] sm:$0xff]  ;;  %v3836_v35 = vld [vmem:[%s5889_s25 + $0x10] sm:$0xff]  ;;  %v3860_v39 = vld [vmem:[%s5889_s25 + $0x8] sm:$0xff] }
  0x1f   :  { %501 = vmatpush.bf16.msra.mxu0 %v3603_v20  ;;  %5893 = vst [vmem:[#allocation24_spill] sm:$0xff] %v3743_v50  ;;  %v3824_v63 = vld [vmem:[%s5889_s25 + $0x98] sm:$0xff]  ;;  %v3843_v36 = vld [vmem:[%s5889_s25 + $0x50] sm:$0xff]  ;;  %v3867_v40 = vld [vmem:[%s5889_s25 + $0x48] sm:$0xff] }
  0x20   :  { %515 = vmatpush.bf16.msra.mxu1 %v3608_v21  ;;  %5894 = vst [vmem:[#allocation25_spill] sm:$0xff] %v3748_v51  ;;  %v3848_v37 = vld [vmem:[%s5889_s25 + $0x90] sm:$0xff]  ;;  %v3872_v41 = vld [vmem:[%s5889_s25 + $0x88] sm:$0xff] }
  0x21   :  { %529 = vmatpush.bf16.msra.mxu2 %v3615_v22  ;;  %5895 = vst [vmem:[#allocation26_spill] sm:$0xff] %v3759_v52 }
  0x22   :  { %543 = vmatpush.bf16.msra.mxu3 %v3620_v23  ;;  %5896 = vst [vmem:[#allocation27_spill] sm:$0xff] %v3771_v54 }
  0x23   :  { %502 = vmatpush.bf16.msra.mxu0 %v3627_v24  ;;  %5897 = vst [vmem:[#allocation28_spill] sm:$0xff] %v3776_v55 }
  0x24   :  { %516 = vmatpush.bf16.msra.mxu1 %v3632_v25  ;;  %5898 = vst [vmem:[#allocation29_spill] sm:$0xff] %v3783_v56 }
  0x25   :  { %530 = vmatpush.bf16.msra.mxu2 %v3639_v26  ;;  %5899 = vst [vmem:[#allocation30_spill] sm:$0xff] %v3795_v58 }
  0x26   :  { %544 = vmatpush.bf16.msra.mxu3 %v3644_v27  ;;  %5900 = vst [vmem:[#allocation31_spill] sm:$0xff] %v3800_v59 }
  0x27   :  { %503 = vmatpush.bf16.msra.mxu0 %v3649_v28  ;;  %5901 = vst [vmem:[#allocation32_spill] sm:$0xff] %v3807_v60 }
  0x28   :  { %517 = vmatpush.bf16.msra.mxu1 %v3654_v29  ;;  %5902 = vst [vmem:[#allocation33_spill] sm:$0xff] %v3819_v62 }
  0x29   :  { %531 = vmatpush.bf16.msra.mxu2 %v3659_v30  ;;  %5903 = vst [vmem:[#allocation34_spill] sm:$0xff] %v3824_v63 }
  0x2a   :  { %545 = vmatpush.bf16.msra.mxu3 %v3664_v31  ;;  %504 = vmatmul.bf16.vlgmr.msra.gmra.mxu0 %v3716_v44  ;;  %5904 = vst [vmem:[#allocation35_spill] sm:$0xff] %v3831_v34 }
  0x2b   :  { %552 = vmatpush.bf16.msrb.mxu0 %v3671_v32  ;;  %518 = vmatmul.bf16.vlgmr.msra.gmra.mxu1 %v3724_v47  ;;  %5905 = vst [vmem:[#allocation36_spill] sm:$0xff] %v3843_v36 }
  0x2c   :  { %806 = vmatpush.bf16.msrb.mxu1 %v3676_v33  ;;  %532 = vmatmul.bf16.vlgmr.msra.gmra.mxu2 %v3718_v45  ;;  %5906 = vst [vmem:[#allocation37_spill] sm:$0xff] %v3848_v37 }
  0x2d   :  { %820 = vmatpush.bf16.msrb.mxu2 %v3707_v42  ;;  %546 = vmatmul.bf16.vlgmr.msra.gmra.mxu3 %v3722_v46  ;;  %5907 = vst [vmem:[#allocation38_spill] sm:$0xff] %v3855_v38 }
  0x2e   :  { %834 = vmatpush.bf16.msrb.mxu3 %v3712_v43  ;;  %5908 = vst [vmem:[#allocation39_spill] sm:$0xff] %v3867_v40 }
  0x2f   :  { %553 = vmatpush.bf16.msrb.mxu0 %v3731_v48  ;;  %5909 = vst [vmem:[#allocation40_spill] sm:$0xff] %v3872_v41 }
  0x30   :  { %807 = vmatpush.bf16.msrb.mxu1 %v3736_v49 }
  0x31   :  { %821 = vmatpush.bf16.msrb.mxu2 %v3743_v50 }
  0x32   :  { %835 = vmatpush.bf16.msrb.mxu3 %v3748_v51  ;;  %v3930_v51 = vld [vmem:[%s5889_s25 + $0x130] sm:$0xff] }
  0x33   :  { %554 = vmatpush.bf16.msrb.mxu0 %v3759_v52 }
  0x34   :  { %808 = vmatpush.bf16.msrb.mxu1 %v3764_v53 }
  0x35   :  { %822 = vmatpush.bf16.msrb.mxu2 %v3771_v54  ;;  %v3925_v54 = vld [vmem:[%s5889_s25 + $0xf0] sm:$0xff] }
  0x36   :  { %836 = vmatpush.bf16.msrb.mxu3 %v3776_v55  ;;  %v3907_v55 = vld [vmem:[%s5889_s25 + $0xf8] sm:$0xff] }
  0x37   :  { %555 = vmatpush.bf16.msrb.mxu0 %v3783_v56 }
  0x38   :  { %809 = vmatpush.bf16.msrb.mxu1 %v3788_v57 }
  0x39   :  { %823 = vmatpush.bf16.msrb.mxu2 %v3795_v58  ;;  %v3257_v58 = vld [vmem:[%s5890_s28 + $0x20] sm:$0xf0] }
  0x3a   :  { %837 = vmatpush.bf16.msrb.mxu3 %v3800_v59  ;;  %v2641_v59 = vld [vmem:[%s5890_s28 + $0x10] sm:$0xf] }
  0x3b   :  { %556 = vmatpush.bf16.msrb.mxu0 %v3807_v60 }
  0x3c   :  { %810 = vmatpush.bf16.msrb.mxu1 %v3812_v61 }
  0x3d   :  { %824 = vmatpush.bf16.msrb.mxu2 %v3819_v62  ;;  %v3896_v62 = vld [vmem:[%s5889_s25 + $0x80] sm:$0xff] }
  0x3e   :  { %838 = vmatpush.bf16.msrb.mxu3 %v3824_v63  ;;  %v3889_v63 = vld [vmem:[%s5889_s25 + $0x40] sm:$0xff] }
  0x3f   :  { %557 = vmatpush.bf16.msrb.mxu0 %v3831_v34  ;;  %5911 = vst [vmem:[#allocation42_spill] sm:$0xff] %v3889_v63 }
  0x40   :  { %811 = vmatpush.bf16.msrb.mxu1 %v3836_v35 }
  0x41   :  { %825 = vmatpush.bf16.msrb.mxu2 %v3843_v36  ;;  %v3879_v36 = vld [vmem:[%s5870_s29 + $0x100] sm:$0xff] }
  0x42   :  { %839 = vmatpush.bf16.msrb.mxu3 %v3848_v37  ;;  %5910 = vst [vmem:[#allocation41_spill] sm:$0xff] %v3879_v36  ;;  %v3884_v37 = vld [vmem:[%s5889_s25] sm:$0xff] }
  0x43   :  { %558 = vmatpush.bf16.msrb.mxu0 %v3855_v38 }
  0x44   :  { %812 = vmatpush.bf16.msrb.mxu1 %v3860_v39 }
  0x45   :  { %826 = vmatpush.bf16.msrb.mxu2 %v3867_v40  ;;  %v3916_v40 = vor.u32 %v3257_v58, %v2641_v59  ;;  %v3943_v58 = vld [vmem:[%s5889_s25 + $0xe8] sm:$0xff] }
  0x46   :  { %840 = vmatpush.bf16.msrb.mxu3 %v3872_v41  ;;  %v3912_v41 = vld [vmem:[%s5889_s25 + $0x138] sm:$0xff]  ;;  %v3948_v59 = vld [vmem:[%s5889_s25 + $0x128] sm:$0xff] }
  0x47   :  { %559 = vmatpush.bf16.msrb.mxu0 %v3879_v36 }
  0x48   :  { %813 = vmatpush.bf16.msrb.mxu1 %v3884_v37 }
  0x49   :  { %827 = vmatpush.bf16.msrb.mxu2 %v3889_v63 }
  0x4a   :  { %841 = vmatpush.bf16.msrb.mxu3 %v3896_v62  ;;  %560 = vmatmul.bf16.vlgmr.msrb.gmra.mxu0 %v3916_v40 }
  0x4b   :  { %848 = vmatpush.bf16.msra.mxu0 %v3907_v55  ;;  %814 = vmatmul.bf16.vlgmr.msrb.gmra.mxu1 %v3716_v44  ;;  %v3957_v44 = vld [vmem:[%s5889_s25 + $0xe0] sm:$0xff] }
  0x4c   :  { %862 = vmatpush.bf16.msra.mxu1 %v3912_v41  ;;  %828 = vmatmul.bf16.vlgmr.msrb.gmra.mxu2 %v3724_v47  ;;  %v3971_v47 = vld [vmem:[%s5889_s25 + $0xd8] sm:$0xff] }
  0x4d   :  { %932 = vmatpush.bf16.msra.mxu2 %v3485_v0  ;;  %842 = vmatmul.bf16.vlgmr.msrb.gmra.mxu3 %v3718_v45  ;;  %v3962_v45 = vld [vmem:[%s5889_s25 + $0x120] sm:$0xff] }
  0x4e   :  { %946 = vmatpush.bf16.msra.mxu3 %v3490_v1  ;;  %v2973_v1 = vld [vmem:[%s5890_s28 + $0x3c] sm:$0xf0] }
  0x4f   :  { %849 = vmatpush.bf16.msra.mxu0 %v3925_v54 }
  0x50   :  { %863 = vmatpush.bf16.msra.mxu1 %v3930_v51 }
  0x51   :  { %933 = vmatpush.bf16.msra.mxu2 %v3507_v4  ;;  %v3262_v4 = vld [vmem:[%s5890_s28 + $0x2c] sm:$0xf] }
  0x52   :  { %947 = vmatpush.bf16.msra.mxu3 %v3512_v5  ;;  %v3976_v5 = vld [vmem:[%s5889_s25 + $0x118] sm:$0xff] }
  0x53   :  { %850 = vmatpush.bf16.msra.mxu0 %v3943_v58 }
  0x54   :  { %864 = vmatpush.bf16.msra.mxu1 %v3948_v59 }
  0x55   :  { %934 = vmatpush.bf16.msra.mxu2 %v3531_v8  ;;  %v3990_v8 = vld [vmem:[%s5889_s25 + $0x110] sm:$0xff] }
  0x56   :  { %948 = vmatpush.bf16.msra.mxu3 %v3536_v9  ;;  %v3985_v9 = vld [vmem:[%s5889_s25 + $0xd0] sm:$0xff] }
  0x57   :  { %851 = vmatpush.bf16.msra.mxu0 %v3957_v44 }
  0x58   :  { %865 = vmatpush.bf16.msra.mxu1 %v3962_v45 }
  0x59   :  { %935 = vmatpush.bf16.msra.mxu2 %v3555_v12  ;;  %v4004_v12 = vld [vmem:[%s5889_s25 + $0x108] sm:$0xff] }
  0x5a   :  { %949 = vmatpush.bf16.msra.mxu3 %v3560_v13  ;;  %v3999_v13 = vld [vmem:[%s5889_s25 + $0xc8] sm:$0xff]  ;;  %5913 = vst [vmem:[#allocation44_spill] sm:$0xff] %v4004_v12 }
  0x5b   :  { %852 = vmatpush.bf16.msra.mxu0 %v3971_v47  ;;  %5912 = vst [vmem:[#allocation43_spill] sm:$0xff] %v3999_v13 }
  0x5c   :  { %866 = vmatpush.bf16.msra.mxu1 %v3976_v5 }
  0x5d   :  { %936 = vmatpush.bf16.msra.mxu2 %v3579_v16  ;;  %v4018_v16 = vld [vmem:[%s5889_s25 + $0x100] sm:$0xff] }
  0x5e   :  { %950 = vmatpush.bf16.msra.mxu3 %v3584_v17  ;;  %v4013_v17 = vld [vmem:[%s5889_s25 + $0xc0] sm:$0xff]  ;;  %5915 = vst [vmem:[#allocation46_spill] sm:$0xff] %v4018_v16 }
  0x5f   :  { %853 = vmatpush.bf16.msra.mxu0 %v3985_v9  ;;  %5914 = vst [vmem:[#allocation45_spill] sm:$0xff] %v4013_v17 }
  0x60   :  { %867 = vmatpush.bf16.msra.mxu1 %v3990_v8 }
  0x61   :  { %937 = vmatpush.bf16.msra.mxu2 %v3603_v20  ;;  %v3264_v20 = vld [vmem:[%s5890_s28 + $0x38] sm:$0xf0] }
  0x62   :  { %951 = vmatpush.bf16.msra.mxu3 %v3608_v21  ;;  %v2971_v21 = vld [vmem:[%s5890_s28 + $0x28] sm:$0xf] }
  0x63   :  { %854 = vmatpush.bf16.msra.mxu0 %v3999_v13 }
  0x64   :  { %868 = vmatpush.bf16.msra.mxu1 %v4004_v12 }
  0x65   :  { %938 = vmatpush.bf16.msra.mxu2 %v3627_v24  ;;  %v4038_v24 = vor.u32 %v3262_v4, %v2973_v1  ;;  %v2979_v1 = vld [vmem:[%s5890_s28 + $0x30] sm:$0xf]  ;;  %v3265_v4 = vld [vmem:[%s5890_s28 + $0x40] sm:$0xf0] }
  0x66   :  { %952 = vmatpush.bf16.msra.mxu3 %v3632_v25  ;;  %v2972_v25 = vor.u32 %v3264_v20, %v2971_v21  ;;  %v2987_v20 = vld [vmem:[%s5890_s28 + $0x38] sm:$0xf]  ;;  %v3266_v21 = vld [vmem:[%s5890_s28 + $0x48] sm:$0xf0] }
  0x67   :  { %855 = vmatpush.bf16.msra.mxu0 %v4013_v17 }
  0x68   :  { %869 = vmatpush.bf16.msra.mxu1 %v4018_v16 }
  0x69   :  { %939 = vmatpush.bf16.msra.mxu2 %v3649_v28 }
  0x6a   :  { %953 = vmatpush.bf16.msra.mxu3 %v3654_v29  ;;  %856 = vmatmul.bf16.vlgmr.msra.gmra.mxu0 %v3722_v46  ;;  %v3263_v46 = vld [vmem:[%s5890_s28 + $0x34] sm:$0xf] }
  0x6b   :  { %960 = vmatpush.bf16.msrb.mxu0 %v3495_v2  ;;  %870 = vmatmul.bf16.vlgmr.msra.gmra.mxu1 %v3916_v40  ;;  %v2981_v40 = vld [vmem:[%s5890_s28 + $0x44] sm:$0xf0] }
  0x6c   :  { %974 = vmatpush.bf16.msrb.mxu1 %v3500_v3  ;;  %940 = vmatmul.bf16.vlgmr.msra.gmra.mxu2 %v2972_v25 }
  0x6d   :  { %988 = vmatpush.bf16.msrb.mxu2 %v3671_v32  ;;  %954 = vmatmul.bf16.vlgmr.msra.gmra.mxu3 %v4038_v24 }
  0x6e   :  { %1002 = vmatpush.bf16.msrb.mxu3 %v3676_v33 }
  0x6f   :  { %961 = vmatpush.bf16.msrb.mxu0 %v3519_v6 }
  0x70   :  { %975 = vmatpush.bf16.msrb.mxu1 %v3524_v7 }
  0x71   :  { %989 = vmatpush.bf16.msrb.mxu2 %v3731_v48 }
  0x72   :  { %1003 = vmatpush.bf16.msrb.mxu3 %v3736_v49 }
  0x73   :  { %962 = vmatpush.bf16.msrb.mxu0 %v3543_v10 }
  0x74   :  { %976 = vmatpush.bf16.msrb.mxu1 %v3548_v11 }
  0x75   :  { %990 = vmatpush.bf16.msrb.mxu2 %v3759_v52 }
  0x76   :  { %1004 = vmatpush.bf16.msrb.mxu3 %v3764_v53 }
  0x77   :  { %963 = vmatpush.bf16.msrb.mxu0 %v3567_v14 }
  0x78   :  { %977 = vmatpush.bf16.msrb.mxu1 %v3572_v15 }
  0x79   :  { %991 = vmatpush.bf16.msrb.mxu2 %v3783_v56 }
  0x7a   :  { %1005 = vmatpush.bf16.msrb.mxu3 %v3788_v57 }
  0x7b   :  { %964 = vmatpush.bf16.msrb.mxu0 %v3591_v18  ;;  %v2984_v18 = vor.u32 %v3263_v46, %v2981_v40  ;;  %v5920_v46 = vld [vmem:[#allocation31_spill] sm:$0xff]  ;;  %v5922_v40 = vld [vmem:[#allocation34_spill] sm:$0xff] }
  0x7c   :  { %978 = vmatpush.bf16.msrb.mxu1 %v3596_v19 }
  0x7d   :  { %992 = vmatpush.bf16.msrb.mxu2 %v3807_v60 }
  0x7e   :  { %1006 = vmatpush.bf16.msrb.mxu3 %v3812_v61 }
  0x7f   :  { %965 = vmatpush.bf16.msrb.mxu0 %v3615_v22  ;;  %v2988_v22 = vor.u32 %v3266_v21, %v2987_v20  ;;  %v5918_v20 = vld [vmem:[#allocation28_spill] sm:$0xff]  ;;  %v5919_v21 = vld [vmem:[#allocation30_spill] sm:$0xff] }
  0x80   :  { %979 = vmatpush.bf16.msrb.mxu1 %v3620_v23 }
  0x81   :  { %993 = vmatpush.bf16.msrb.mxu2 %v3831_v34 }
  0x82   :  { %1007 = vmatpush.bf16.msrb.mxu3 %v3836_v35 }
  0x83   :  { %966 = vmatpush.bf16.msrb.mxu0 %v3639_v26  ;;  %v2980_v26 = vor.u32 %v3265_v4, %v2979_v1  ;;  %v5916_v1 = vld [vmem:[#allocation25_spill] sm:$0xff]  ;;  %v5917_v4 = vld [vmem:[#allocation27_spill] sm:$0xff] }
  0x84   :  { %980 = vmatpush.bf16.msrb.mxu1 %v3644_v27 }
  0x85   :  { %994 = vmatpush.bf16.msrb.mxu2 %v3855_v38 }
  0x86   :  { %1008 = vmatpush.bf16.msrb.mxu3 %v3860_v39 }
  0x87   :  { %967 = vmatpush.bf16.msrb.mxu0 %v3659_v30 }
  0x88   :  { %981 = vmatpush.bf16.msrb.mxu1 %v3664_v31 }
  0x89   :  { %995 = vmatpush.bf16.msrb.mxu2 %v3879_v36 }
  0x8a   :  { %1009 = vmatpush.bf16.msrb.mxu3 %v3884_v37  ;;  %968 = vmatmul.bf16.vlgmr.msrb.gmra.mxu0 %v2980_v26 }
  0x8b   :  { %1016 = vmatpush.bf16.msra.mxu0 %v3707_v42  ;;  %982 = vmatmul.bf16.vlgmr.msrb.gmra.mxu1 %v2984_v18  ;;  %v5926_v42 = vld [vmem:[#allocation40_spill] sm:$0xff] }
  0x8c   :  { %1030 = vmatpush.bf16.msra.mxu1 %v3712_v43  ;;  %996 = vmatmul.bf16.vlgmr.msrb.gmra.mxu2 %v2988_v22 }
  0x8d   :  { %1044 = vmatpush.bf16.msra.mxu2 %v3907_v55  ;;  %1010 = vmatmul.bf16.vlgmr.msrb.gmra.mxu3 %v2972_v25  ;;  %v5921_v25 = vld [vmem:[#allocation33_spill] sm:$0xff] }
  0x8e   :  { %1058 = vmatpush.bf16.msra.mxu3 %v3912_v41 }
  0x8f   :  { %1017 = vmatpush.bf16.msra.mxu0 %v3743_v50  ;;  %v5924_v50 = vld [vmem:[#allocation37_spill] sm:$0xff] }
  0x90   :  { %1031 = vmatpush.bf16.msra.mxu1 %v5916_v1 }
  0x91   :  { %1045 = vmatpush.bf16.msra.mxu2 %v3925_v54 }
  0x92   :  { %1059 = vmatpush.bf16.msra.mxu3 %v3930_v51 }
  0x93   :  { %1018 = vmatpush.bf16.msra.mxu0 %v5917_v4  ;;  %v5923_v4 = vld [vmem:[#allocation36_spill] sm:$0xff] }
  0x94   :  { %1032 = vmatpush.bf16.msra.mxu1 %v5918_v20 }
  0x95   :  { %1046 = vmatpush.bf16.msra.mxu2 %v3943_v58 }
  0x96   :  { %1060 = vmatpush.bf16.msra.mxu3 %v3948_v59 }
  0x97   :  { %1019 = vmatpush.bf16.msra.mxu0 %v5919_v21  ;;  %v5925_v21 = vld [vmem:[#allocation39_spill] sm:$0xff] }
  0x98   :  { %1033 = vmatpush.bf16.msra.mxu1 %v5920_v46 }
  0x99   :  { %1047 = vmatpush.bf16.msra.mxu2 %v3957_v44 }
  0x9a   :  { %1061 = vmatpush.bf16.msra.mxu3 %v3962_v45 }
  0x9b   :  { %1020 = vmatpush.bf16.msra.mxu0 %v5921_v25  ;;  %v5929_v25 = vld [vmem:[#allocation6_spill] sm:$0xff] }
  0x9c   :  { %1034 = vmatpush.bf16.msra.mxu1 %v5922_v40 }
  0x9d   :  { %1048 = vmatpush.bf16.msra.mxu2 %v3971_v47 }
  0x9e   :  { %1062 = vmatpush.bf16.msra.mxu3 %v3976_v5 }
  0x9f   :  { %1021 = vmatpush.bf16.msra.mxu0 %v5923_v4  ;;  %v5927_v4 = vld [vmem:[#allocation4_spill] sm:$0xff] }
  0xa0   :  { %1035 = vmatpush.bf16.msra.mxu1 %v5924_v50 }
  0xa1   :  { %1049 = vmatpush.bf16.msra.mxu2 %v3985_v9 }
  0xa2   :  { %1063 = vmatpush.bf16.msra.mxu3 %v3990_v8 }
  0xa3   :  { %1022 = vmatpush.bf16.msra.mxu0 %v5925_v21  ;;  %v5928_v21 = vld [vmem:[#allocation5_spill] sm:$0xff] }
  0xa4   :  { %1036 = vmatpush.bf16.msra.mxu1 %v5926_v42 }
  0xa5   :  { %1050 = vmatpush.bf16.msra.mxu2 %v3999_v13  ;;  %v5934_v13 = vld [vmem:[#allocation11_spill] sm:$0xff] }
  0xa6   :  { %1064 = vmatpush.bf16.msra.mxu3 %v4004_v12  ;;  %v5931_v12 = vld [vmem:[#allocation8_spill] sm:$0xff] }
  0xa7   :  { %1023 = vmatpush.bf16.msra.mxu0 %v3889_v63  ;;  %v5930_v63 = vld [vmem:[#allocation7_spill] sm:$0xff] }
  0xa8   :  { %1037 = vmatpush.bf16.msra.mxu1 %v3896_v62 }
  0xa9   :  { %1051 = vmatpush.bf16.msra.mxu2 %v4013_v17  ;;  %v5932_v17 = vld [vmem:[#allocation9_spill] sm:$0xff] }
  0xaa   :  { %1065 = vmatpush.bf16.msra.mxu3 %v4018_v16  ;;  %1024 = vmatmul.bf16.vlgmr.msra.gmra.mxu0 %v4038_v24  ;;  %v5933_v16 = vld [vmem:[#allocation10_spill] sm:$0xff] }
  0xab   :  { %1038 = vmatmul.bf16.vlgmr.msra.gmra.mxu1 %v2980_v26  ;;  %v5936_v24 = vld [vmem:[#allocation14_spill] sm:$0xff] }
  0xac   :  { %1052 = vmatmul.bf16.vlgmr.msra.gmra.mxu2 %v2984_v18  ;;  %v5937_v18 = vld [vmem:[#allocation15_spill] sm:$0xff]  ;;  %v5939_v26 = vld [vmem:[#allocation18_spill] sm:$0xff] }
  0xad   :  { %1206 = vmatpush.bf16.msrb.mxu2 %v3485_v0  ;;  %1066 = vmatmul.bf16.vlgmr.msra.gmra.mxu3 %v2988_v22  ;;  %v5938_v22 = vld [vmem:[#allocation17_spill] sm:$0xff] }
  0xae   :  { %1220 = vmatpush.bf16.msrb.mxu3 %v5927_v4  ;;  %v5935_v4 = vld [vmem:[#allocation12_spill] sm:$0xff] }
  0xb1   :  { %1207 = vmatpush.bf16.msrb.mxu2 %v5928_v21 }
  0xb2   :  { %1221 = vmatpush.bf16.msrb.mxu3 %v5929_v25  ;;  %v519_v25 = vpop.f32.mrf.mxu1 }
  0xb5   :  { %1208 = vmatpush.bf16.msrb.mxu2 %v5930_v63 }
  0xb6   :  { %1222 = vmatpush.bf16.msrb.mxu3 %v5931_v12  ;;  %v505_v12 = vpop.f32.mrf.mxu0 }
  0xb9   :  { %1209 = vmatpush.bf16.msrb.mxu2 %v5932_v17 }
  0xba   :  { %1223 = vmatpush.bf16.msrb.mxu3 %v5933_v16  ;;  %v533_v16 = vpop.f32.mrf.mxu2 }
  0xbd   :  { %1210 = vmatpush.bf16.msrb.mxu2 %v5934_v13 }
  0xbe   :  { %1224 = vmatpush.bf16.msrb.mxu3 %v5935_v4  ;;  %v507_v4 = vpop.f32.mrf.mxu0 }
  0xc1   :  { %1211 = vmatpush.bf16.msrb.mxu2 %v5936_v24 }
  0xc2   :  { %1225 = vmatpush.bf16.msrb.mxu3 %v5937_v18  ;;  %v521_v18 = vpop.f32.mrf.mxu1 }
  0xc5   :  { %1212 = vmatpush.bf16.msrb.mxu2 %v5938_v22  ;;  %v522_v22 = vadd.f32 %v521_v18, %v507_v4  ;;  %v4210_v18 = vld [vmem:[%s5756_s5 + $0x30] sm:$0xff] }
  0xc6   :  { %1226 = vmatpush.bf16.msrb.mxu3 %v5939_v26  ;;  %v535_v26 = vpop.f32.mrf.mxu2  ;;  %5945 = vst [vmem:[#allocation40_spill] sm:$0xff] %v4210_v18 }
  0xc9   :  { %1213 = vmatpush.bf16.msrb.mxu2 %v3649_v28 }
  0xca   :  { %1227 = vmatpush.bf16.msrb.mxu3 %v3654_v29  ;;  %v547_v29 = vpop.f32.mrf.mxu3 }
  0xcd   :  { %1262 = vmatpush.bf16.msra.mxu2 %v3671_v32 }
  0xce   :  { %1276 = vmatpush.bf16.msra.mxu3 %v3676_v33  ;;  %v4153_v33 = vld [vmem:[%s5756_s5 + $0x18] sm:$0xff] }
  0xcf   :  { %5940 = vst [vmem:[#allocation25_spill] sm:$0xff] %v4153_v33  ;;  %1163 = vmatpush.bf16.msrb.mxu1 %v4153_v33  ;;  %v4169_v33 = vld [vmem:[%s5756_s5 + $0x8] sm:$0xff] }
  0xd0   :  { %5942 = vst [vmem:[#allocation31_spill] sm:$0xff] %v4169_v33 }
  0xd1   :  { %1263 = vmatpush.bf16.msra.mxu2 %v3731_v48 }
  0xd2   :  { %1277 = vmatpush.bf16.msra.mxu3 %v3736_v49  ;;  %v815_v49 = vpop.f32.mrf.mxu1 }
  0xd5   :  { %1264 = vmatpush.bf16.msra.mxu2 %v3759_v52 }
  0xd6   :  { %1278 = vmatpush.bf16.msra.mxu3 %v3764_v53  ;;  %v4161_v53 = vld [vmem:[%s5756_s5 + $0x10] sm:$0xff] }
  0xd7   :  { %5941 = vst [vmem:[#allocation28_spill] sm:$0xff] %v4161_v53  ;;  %1164 = vmatpush.bf16.msrb.mxu1 %v4161_v53  ;;  %v4177_v53 = vld [vmem:[%s5756_s5] sm:$0xff] }
  0xd8   :  { %5943 = vst [vmem:[#allocation34_spill] sm:$0xff] %v4177_v53 }
  0xd9   :  { %1265 = vmatpush.bf16.msra.mxu2 %v3783_v56 }
  0xda   :  { %1279 = vmatpush.bf16.msra.mxu3 %v3788_v57  ;;  %v561_v57 = vpop.f32.mrf.mxu0 }
  0xdb   :  { %1165 = vmatpush.bf16.msrb.mxu1 %v4169_v33  ;;  %v520_v33 = vadd.f32 %v519_v25, %v505_v12 }
  0xdd   :  { %1266 = vmatpush.bf16.msra.mxu2 %v3807_v60  ;;  %v817_v60 = vpop.f32.mrf.mxu1 }
  0xde   :  { %1280 = vmatpush.bf16.msra.mxu3 %v3812_v61  ;;  %v549_v61 = vpop.f32.mrf.mxu3 }
  0xdf   :  { %1166 = vmatpush.bf16.msrb.mxu1 %v4177_v53 }
  0xe1   :  { %1267 = vmatpush.bf16.msra.mxu2 %v3831_v34  ;;  %v829_v34 = vpop.f32.mrf.mxu2 }
  0xe2   :  { %1281 = vmatpush.bf16.msra.mxu3 %v3836_v35  ;;  %v563_v35 = vpop.f32.mrf.mxu0 }
  0xe3   :  { %1248 = vmatpush.bf16.msra.mxu1 %v3500_v3 }
  0xe5   :  { %1268 = vmatpush.bf16.msra.mxu2 %v3855_v38  ;;  %v830_v38 = vadd.f32 %v829_v34, %v815_v49  ;;  %v536_v34 = vadd.f32 %v535_v26, %v522_v22  ;;  %v4218_v26 = vld [vmem:[%s5756_s5 + $0x28] sm:$0xff] }
  0xe6   :  { %1282 = vmatpush.bf16.msra.mxu3 %v3860_v39  ;;  %v843_v56 = vpop.f32.mrf.mxu3  ;;  %v534_v39 = vadd.f32 %v533_v16, %v520_v33  ;;  %5946 = vst [vmem:[#allocation4_spill] sm:$0xff] %v4218_v26 }
  0xe7   :  { %1249 = vmatpush.bf16.msra.mxu1 %v3524_v7  ;;  %v844_v52 = vadd.f32 %v843_v56, %v830_v38  ;;  %v4189_v56 = vld [vmem:[%s5754_s3] ss:$0 sm:$0xff]  ;;  %v550_v4 = vadd.f32 %v549_v61, %v536_v34 }
  0xe8   :  { %v871_v28 = vpop.f32.mrf.mxu1  ;;  %v548_v53 = vadd.f32 %v547_v29, %v534_v39  ;;  %v4227_v61 = vld [vmem:[%s5756_s5 + $0x20] sm:$0xff] }
  0xe9   :  { %1269 = vmatpush.bf16.msra.mxu2 %v3879_v36  ;;  %v831_v48 = vpop.f32.mrf.mxu2  ;;  %5947 = vst [vmem:[#allocation5_spill] sm:$0xff] %v4227_v61 }
  0xea   :  { %1283 = vmatpush.bf16.msra.mxu3 %v3884_v37  ;;  %v857_v32 = vpop.f32.mrf.mxu0  ;;  %v832_v24 = vadd.f32 %v831_v48, %v817_v60  ;;  %v562_v12 = vadd.f32 %v561_v57, %v548_v53  ;;  %v564_v48 = vadd.f32 %v563_v35, %v550_v4  ;;  %v5948_v4 = vld [vmem:[#allocation13_spill] sm:$0xff] }
  0xeb   :  { %1250 = vmatpush.bf16.msra.mxu1 %v3548_v11  ;;  %v858_v36 = vadd.f32 %v857_v32, %v844_v52  ;;  %v4196_v52 = vld [vmem:[%s5755_s4] ss:$0 sm:$0xff] }
  0xed   :  { %v872_v13 = vadd.f32 %v871_v28, %v858_v36  ;;  %v4202_v36 = vld [vmem:[%s5756_s5 + $0x38] sm:$0xff] }
  0xee   :  { %v845_v37 = vpop.f32.mrf.mxu3  ;;  %5944 = vst [vmem:[#allocation37_spill] sm:$0xff] %v4202_v36  ;;  %1122 = vmatpush.bf16.msrb.mxu0 %v4202_v36 }
  0xef   :  { %1251 = vmatpush.bf16.msra.mxu1 %v3572_v15  ;;  %v876_v25 = vmax.f32 %v562_v12, %v872_v13  ;;  %v846_v38 = vadd.f32 %v845_v37, %v832_v24 }
  0xf0   :  { %v873_v29 = vpop.f32.mrf.mxu1 }
  0xf1   :  { %v881_v28 = vmul.f32 %v4189_v56, %v876_v25  ;;  %v941_v35 = vpop.f32.mrf.mxu2 }
  0xf2   :  { %v859_v16 = vpop.f32.mrf.mxu0  ;;  %1123 = vmatpush.bf16.msrb.mxu0 %v4210_v18 }
  0xf3   :  { %1252 = vmatpush.bf16.msra.mxu1 %v3596_v19  ;;  %v860_v32 = vadd.f32 %v859_v16, %v846_v38  ;;  %v886_v24 = vadd.f32 %v4196_v52, %v881_v28  ;;  %v3039_v38 = vld [vmem:[%s5890_s28 + $0x50] sm:$0xf]  ;;  %v3273_v16 = vld [vmem:[%s5890_s28 + $0x60] sm:$0xf0] }
  0xf5   :  { %v874_v13 = vadd.f32 %v873_v29, %v860_v32  ;;  %v888_v49 = vmax.f32 %v886_v24, 0.0  ;;  %v3271_v29 = vld [vmem:[%s5890_s28 + $0x54] sm:$0xf]  ;;  %v3040_v32 = vor.u32 %v3273_v16, %v3039_v38  ;;  %v3055_v16 = vld [vmem:[%s5890_s28 + $0x60] sm:$0xf] }
  0xf6   :  { %1124 = vmatpush.bf16.msrb.mxu0 %v4218_v26  ;;  %v955_v39 = vpop.f32.mrf.mxu3  ;;  %v5949_v24 = vld [vmem:[#allocation16_spill] sm:$0xff] }
  0xf7   :  { %1253 = vmatpush.bf16.msra.mxu1 %v3620_v23  ;;  %v877_v60 = vmax.f32 %v564_v48, %v874_v13  ;;  %v3041_v48 = vld [vmem:[%s5890_s28 + $0x64] sm:$0xf0]  ;;  %1214 = vmatmul.bf16.vlgmr.msrb.gmra.mxu2 %v3040_v32 }
  0xf8   :  { %v4252_v28 = vor.u32 %v3271_v29, %v3041_v48  ;;  %1318 = vmatpush.bf16.msrb.mxu2 %v3907_v55 }
  0xf9   :  { %v882_v22 = vmul.f32 %v4189_v56, %v877_v60  ;;  %v943_v37 = vpop.f32.mrf.mxu2 }
  0xfa   :  { %1125 = vmatpush.bf16.msrb.mxu0 %v4227_v61  ;;  %1228 = vmatmul.bf16.vlgmr.msrb.gmra.mxu3 %v4252_v28 }
  0xfb   :  { %1254 = vmatpush.bf16.msra.mxu1 %v3644_v27  ;;  %v887_v33 = vadd.f32 %v4196_v52, %v882_v22  ;;  %1332 = vmatpush.bf16.msrb.mxu3 %v3912_v41 }
  0xfc   :  { %1319 = vmatpush.bf16.msrb.mxu2 %v3925_v54 }
  0xfd   :  { %v889_v53 = vmax.f32 %v887_v33, 0.0  ;;  %v5950_v33 = vld [vmem:[#allocation19_spill] sm:$0xff] }
  0xfe   :  { %1234 = vmatpush.bf16.msra.mxu0 %v3495_v2  ;;  %v957_v12 = vpop.f32.mrf.mxu3 }
  0xff   :  { %1255 = vmatpush.bf16.msra.mxu1 %v3664_v31  ;;  %v890_v57 = vpack.c.bf16 %v889_v53, %v888_v49  ;;  %1333 = vmatpush.bf16.msrb.mxu3 %v3930_v51  ;;  %v3275_v51 = vld [vmem:[%s5890_s28 + $0x70] sm:$0xf0] }
 0x100   :  { %1320 = vmatpush.bf16.msrb.mxu2 %v3943_v58  ;;  %v3056_v48 = vor.u32 %v3275_v51, %v3055_v16 }
 0x101   :  { %3030 = vmatmul.msk.bf16.vlgmr.msrb.gmra.mxu1 %vm1114_vm0, %v890_v57  ;;  %v956_v57 = vadd.f32 %v955_v39, %v941_v35  ;;  %v3272_v35 = vld [vmem:[%s5890_s28 + $0x5c] sm:$0xf]  ;;  %v3049_v39 = vld [vmem:[%s5890_s28 + $0x6c] sm:$0xf0] }
 0x102   :  { %1235 = vmatpush.bf16.msra.mxu0 %v3519_v6 }
 0x103   :  { %1304 = vmatpush.bf16.msrb.mxu1 %v3712_v43  ;;  %1334 = vmatpush.bf16.msrb.mxu3 %v3948_v59 }
 0x104   :  { %1321 = vmatpush.bf16.msrb.mxu2 %v3957_v44 }
 0x106   :  { %1236 = vmatpush.bf16.msra.mxu0 %v3543_v10 }
 0x107   :  { %1305 = vmatpush.bf16.msrb.mxu1 %v5916_v1  ;;  %v969_v34 = vpop.f32.mrf.mxu0  ;;  %1335 = vmatpush.bf16.msrb.mxu3 %v3962_v45 }
 0x108   :  { %v983_v25 = vpop.f32.mrf.mxu1  ;;  %v970_v59 = vadd.f32 %v969_v34, %v956_v57  ;;  %1270 = vmatmul.bf16.vlgmr.msra.gmra.mxu2 %v3056_v48 }
 0x109   :  { %1322 = vmatpush.bf16.msrb.mxu2 %v3971_v47 }
 0x10a   :  { %1237 = vmatpush.bf16.msra.mxu0 %v3567_v14  ;;  %1284 = vmatmul.bf16.vlgmr.msra.gmra.mxu3 %v3040_v32  ;;  %v984_v16 = vadd.f32 %v983_v25, %v970_v59  ;;  %v958_v32 = vadd.f32 %v957_v12, %v943_v37  ;;  %v5952_v59 = vld [vmem:[#allocation44_spill] sm:$0xff]  ;;  %v5953_v37 = vld [vmem:[#allocation45_spill] sm:$0xff] }
 0x10b   :  { %1306 = vmatpush.bf16.msrb.mxu1 %v5918_v20  ;;  %1336 = vmatpush.bf16.msrb.mxu3 %v3976_v5  ;;  %v5951_v5 = vld [vmem:[#allocation43_spill] sm:$0xff] }
 0x10d   :  { %1323 = vmatpush.bf16.msrb.mxu2 %v3985_v9 }
 0x10e   :  { %1238 = vmatpush.bf16.msra.mxu0 %v5948_v4 }
 0x10f   :  { %1307 = vmatpush.bf16.msrb.mxu1 %v5920_v46  ;;  %v997_v13 = vpop.f32.mrf.mxu2  ;;  %v971_v22 = vpop.f32.mrf.mxu0  ;;  %1337 = vmatpush.bf16.msrb.mxu3 %v3990_v8 }
 0x110   :  { %v1011_v60 = vpop.f32.mrf.mxu3  ;;  %v985_v49 = vpop.f32.mrf.mxu1  ;;  %v998_v36 = vadd.f32 %v997_v13, %v984_v16  ;;  %v5962_v16 = vld [vmem:[#allocation27_spill] sm:$0xff] }
 0x111   :  { %1324 = vmatpush.bf16.msrb.mxu2 %v5951_v5 }
 0x112   :  { %1239 = vmatpush.bf16.msra.mxu0 %v5949_v24 }
 0x113   :  { %1308 = vmatpush.bf16.msrb.mxu1 %v5922_v40  ;;  %1338 = vmatpush.bf16.msrb.mxu3 %v5952_v59  ;;  %v4409_v59 = vld [vmem:[%s5870_s29 + $0x60] sm:$0xff] }
 0x115   :  { %1325 = vmatpush.bf16.msrb.mxu2 %v5953_v37 }
 0x116   :  { %1240 = vmatpush.bf16.msra.mxu0 %v5950_v33 }
 0x117   :  { %1309 = vmatpush.bf16.msrb.mxu1 %v5924_v50  ;;  %v999_v53 = vpop.f32.mrf.mxu2 }
 0x118   :  { %v1013_v41 = vpop.f32.mrf.mxu3 }
 0x119   :  { %1468 = vmatpush.bf16.msra.mxu2 %v3495_v2 }
 0x11a   :  { %1241 = vmatpush.bf16.msra.mxu0 %v3659_v30 }
 0x11b   :  { %1310 = vmatpush.bf16.msrb.mxu1 %v5926_v42 }
 0x11d   :  { %1469 = vmatpush.bf16.msra.mxu2 %v3519_v6  ;;  %v5957_v6 = vld [vmem:[#allocation22_spill] sm:$0xff] }
 0x11f   :  { %1311 = vmatpush.bf16.msrb.mxu1 %v3896_v62 }
 0x121   :  { %1470 = vmatpush.bf16.msra.mxu2 %v3543_v10  ;;  %v5960_v10 = vld [vmem:[#allocation20_spill] sm:$0xff] }
 0x125   :  { %1471 = vmatpush.bf16.msra.mxu2 %v3567_v14  ;;  %v5963_v14 = vld [vmem:[#allocation23_spill] sm:$0xff] }
 0x127   :  { %v1025_v38 = vpop.f32.mrf.mxu0 }
 0x128   :  { %v1026_v29 = vadd.f32 %v1025_v38, %v1011_v60  ;;  %v1039_v61 = vpop.f32.mrf.mxu1  ;;  %v3052_v60 = vor.u32 %v3272_v35, %v3049_v39 }
 0x129   :  { %1472 = vmatpush.bf16.msra.mxu2 %v5948_v4  ;;  %v5966_v4 = vld [vmem:[#allocation26_spill] sm:$0xff] }
 0x12a   :  { %v1040_v26 = vadd.f32 %v1039_v61, %v1026_v29  ;;  %1256 = vmatmul.bf16.vlgmr.msra.gmra.mxu1 %v3052_v60  ;;  %v972_v61 = vadd.f32 %v971_v22, %v958_v32  ;;  %v5954_v22 = vld [vmem:[#allocation46_spill] sm:$0xff]  ;;  %1326 = vmatmul.bf16.vlgmr.msrb.gmra.mxu2 %v3052_v60  ;;  %v5959_v60 = vld [vmem:[#allocation24_spill] sm:$0xff] }
 0x12b   :  { %1440 = vmatpush.bf16.msra.mxu1 %v3485_v0  ;;  %1339 = vmatpush.bf16.msrb.mxu3 %v5954_v22  ;;  %v4393_v32 = vld [vmem:[%s5870_s29 + $0x70] sm:$0xff]  ;;  %v4427_v22 = vld [vmem:[%s5870_s29 + $0x48] sm:$0xff] }
 0x12c   :  { %v986_v39 = vadd.f32 %v985_v49, %v972_v61 }
 0x12d   :  { %1473 = vmatpush.bf16.msra.mxu2 %v5949_v24  ;;  %v5968_v24 = vld [vmem:[#allocation29_spill] sm:$0xff] }
 0x12e   :  { %v1000_v8 = vadd.f32 %v999_v53, %v986_v39  ;;  %1340 = vmatmul.bf16.vlgmr.msrb.gmra.mxu3 %v3056_v48  ;;  %v5956_v48 = vld [vmem:[#allocation14_spill] sm:$0xff] }
 0x12f   :  { %v1053_v45 = vpop.f32.mrf.mxu2  ;;  %v1027_v57 = vpop.f32.mrf.mxu0  ;;  %1441 = vmatpush.bf16.msra.mxu1 %v5928_v21  ;;  %v3047_v21 = vld [vmem:[%s5890_s28 + $0x58] sm:$0xf]  ;;  %1482 = vmatpush.bf16.msra.mxu3 %v3500_v3 }
 0x130   :  { %v1067_v38 = vpop.f32.mrf.mxu3  ;;  %v1054_v34 = vadd.f32 %v1053_v45, %v1040_v26  ;;  %v1028_v18 = vadd.f32 %v1027_v57, %v1013_v41  ;;  %v1041_v29 = vpop.f32.mrf.mxu1  ;;  %v5955_v41 = vld [vmem:[#allocation11_spill] sm:$0xff] }
 0x131   :  { %1474 = vmatpush.bf16.msra.mxu2 %v5950_v33  ;;  %v5971_v33 = vld [vmem:[#allocation42_spill] sm:$0xff] }
 0x132   :  { %v1068_v51 = vadd.f32 %v1067_v38, %v1054_v34  ;;  %v1042_v26 = vadd.f32 %v1041_v29, %v1028_v18  ;;  %v4385_v34 = vld [vmem:[%s5870_s29 + $0x78] sm:$0xff]  ;;  %v4401_v29 = vld [vmem:[%s5870_s29 + $0x68] sm:$0xff] }
 0x133   :  { %1442 = vmatpush.bf16.msra.mxu1 %v5930_v63  ;;  %1483 = vmatpush.bf16.msra.mxu3 %v3524_v7  ;;  %v5958_v7 = vld [vmem:[#allocation17_spill] sm:$0xff] }
 0x134   :  { %v1072_v25 = vmax.f32 %v998_v36, %v1068_v51  ;;  %v3274_v36 = vld [vmem:[%s5890_s28 + $0x68] sm:$0xf0] }
 0x135   :  { %v3048_v2 = vor.u32 %v3274_v36, %v3047_v21  ;;  %1475 = vmatpush.bf16.msra.mxu2 %v3659_v30  ;;  %v5970_v30 = vld [vmem:[#allocation32_spill] sm:$0xff] }
 0x136   :  { %v1074_v12 = vmul.f32 %v4189_v56, %v1072_v25 }
 0x137   :  { %v1055_v35 = vpop.f32.mrf.mxu2  ;;  %1443 = vmatpush.bf16.msra.mxu1 %v5932_v17  ;;  %1484 = vmatpush.bf16.msra.mxu3 %v3548_v11  ;;  %v5961_v11 = vld [vmem:[#allocation21_spill] sm:$0xff] }
 0x138   :  { %v1056_v45 = vadd.f32 %v1055_v35, %v1042_v26  ;;  %v1069_v0 = vpop.f32.mrf.mxu3  ;;  %v1076_v63 = vadd.f32 %v4196_v52, %v1074_v12  ;;  %v4421_v12 = vld [vmem:[%s5870_s29 + $0x50] sm:$0xff] }
 0x139   :  { %1524 = vmatpush.bf16.msrb.mxu2 %v5957_v6 }
 0x13a   :  { %v1070_v13 = vadd.f32 %v1069_v0, %v1056_v45  ;;  %1312 = vmatmul.bf16.vlgmr.msrb.gmra.mxu1 %v3048_v2  ;;  %v1078_v3 = vmax.f32 %v1076_v63, 0.0  ;;  %v4415_v45 = vld [vmem:[%s5870_s29 + $0x58] sm:$0xff]  ;;  %v4433_v63 = vld [vmem:[%s5870_s29 + $0x40] sm:$0xff] }
 0x13b   :  { %1444 = vmatpush.bf16.msra.mxu1 %v5955_v41  ;;  %1485 = vmatpush.bf16.msra.mxu3 %v3572_v15  ;;  %v5964_v15 = vld [vmem:[#allocation30_spill] sm:$0xff] }
 0x13c   :  { %v1073_v18 = vmax.f32 %v1000_v8, %v1070_v13 }
 0x13d   :  { %1525 = vmatpush.bf16.msrb.mxu2 %v5959_v60 }
 0x13e   :  { %v1075_v49 = vmul.f32 %v4189_v56, %v1073_v18 }
 0x13f   :  { %1445 = vmatpush.bf16.msra.mxu1 %v5956_v48  ;;  %1486 = vmatpush.bf16.msra.mxu3 %v3596_v19  ;;  %v5965_v19 = vld [vmem:[#allocation33_spill] sm:$0xff]  ;;  %v3282_v48 = vld [vmem:[%s5890_s28 + $0x88] sm:$0xf0] }
 0x140   :  { %v1077_v53 = vadd.f32 %v4196_v52, %v1075_v49 }
 0x141   :  { %1526 = vmatpush.bf16.msrb.mxu2 %v5962_v16 }
 0x142   :  { %v1079_v38 = vmax.f32 %v1077_v53, 0.0 }
 0x143   :  { %1446 = vmatpush.bf16.msra.mxu1 %v5958_v7  ;;  %1487 = vmatpush.bf16.msra.mxu3 %v3620_v23  ;;  %v5967_v23 = vld [vmem:[#allocation36_spill] sm:$0xff] }
 0x144   :  { %v1080_v17 = vpack.c.bf16 %v1079_v38, %v1078_v3 }
 0x145   :  { %1527 = vmatpush.bf16.msrb.mxu2 %v5964_v15 }
 0x146   :  { %3013 = vmatmul.msk.bf16.vlgmr.msrb.gmra.mxu0 %vm1114_vm0, %v1080_v17  ;;  %v3090_v17 = vld [vmem:[%s5890_s28 + $0x78] sm:$0xf] }
 0x147   :  { %1290 = vmatpush.bf16.msrb.mxu0 %v5957_v6  ;;  %1447 = vmatpush.bf16.msra.mxu1 %v5960_v10  ;;  %v4442_v7 = vor.u32 %v3282_v48, %v3090_v17  ;;  %v4505_v48 = vld [vmem:[%s5870_s29 + $0x20] sm:$0xff] }
 0x148   :  { %1488 = vmatpush.bf16.msra.mxu3 %v3644_v27  ;;  %v5969_v27 = vld [vmem:[#allocation39_spill] sm:$0xff] }
 0x149   :  { %1528 = vmatpush.bf16.msrb.mxu2 %v5965_v19 }
 0x14a   :  { %1448 = vmatmul.bf16.vlgmr.msra.gmra.mxu1 %v4442_v7 }
 0x14b   :  { %1291 = vmatpush.bf16.msrb.mxu0 %v5959_v60  ;;  %1496 = vmatpush.bf16.msrb.mxu1 %v5961_v11 }
 0x14c   :  { %1489 = vmatpush.bf16.msra.mxu3 %v3664_v31  ;;  %v5972_v31 = vld [vmem:[#allocation35_spill] sm:$0xff] }
 0x14d   :  { %1529 = vmatpush.bf16.msrb.mxu2 %v5967_v23 }
 0x14f   :  { %1292 = vmatpush.bf16.msrb.mxu0 %v5962_v16  ;;  %1497 = vmatpush.bf16.msrb.mxu1 %v5963_v14 }
 0x150   :  { %1538 = vmatpush.bf16.msrb.mxu3 %v3712_v43  ;;  %v5973_v43 = vld [vmem:[#allocation38_spill] sm:$0xff] }
 0x151   :  { %1530 = vmatpush.bf16.msrb.mxu2 %v5969_v27 }
 0x153   :  { %1293 = vmatpush.bf16.msrb.mxu0 %v5964_v15  ;;  %1498 = vmatpush.bf16.msrb.mxu1 %v5966_v4  ;;  %v3098_v4 = vld [vmem:[%s5890_s28 + $0x80] sm:$0xf] }
 0x154   :  { %1539 = vmatpush.bf16.msrb.mxu3 %v5916_v1  ;;  %v5974_v1 = vld [vmem:[#allocation41_spill] sm:$0xff] }
 0x155   :  { %1531 = vmatpush.bf16.msrb.mxu2 %v5971_v33 }
 0x156   :  { %1242 = vmatmul.bf16.vlgmr.msra.gmra.mxu0 %v3048_v2 }
 0x157   :  { %1294 = vmatpush.bf16.msrb.mxu0 %v5965_v19  ;;  %1499 = vmatpush.bf16.msrb.mxu1 %v5968_v24 }
 0x158   :  { %1540 = vmatpush.bf16.msrb.mxu3 %v5918_v20  ;;  %v4359_v20 = vld [vmem:[%s5756_s5 + $0x58] sm:$0xff] }
 0x15b   :  { %1295 = vmatpush.bf16.msrb.mxu0 %v5967_v23  ;;  %1500 = vmatpush.bf16.msrb.mxu1 %v5970_v30  ;;  %v3283_v23 = vld [vmem:[%s5890_s28 + $0x90] sm:$0xf0] }
 0x15c   :  { %1541 = vmatpush.bf16.msrb.mxu3 %v5920_v46  ;;  %v4365_v46 = vld [vmem:[%s5756_s5 + $0x50] sm:$0xff]  ;;  %v3099_v30 = vor.u32 %v3283_v23, %v3098_v4  ;;  %v4579_v4 = vld [vmem:[%s5870_s29 + $0x138] sm:$0xff]  ;;  %v4586_v23 = vld [vmem:[%s5870_s29 + $0xa8] sm:$0xff] }
 0x15d   :  { %5979 = vst [vmem:[#allocation10_spill] sm:$0xff] %v4579_v4 }
 0x15e   :  { %1476 = vmatmul.bf16.vlgmr.msra.gmra.mxu2 %v3099_v30 }
 0x15f   :  { %1296 = vmatpush.bf16.msrb.mxu0 %v5969_v27  ;;  %1501 = vmatpush.bf16.msrb.mxu1 %v5972_v31  ;;  %v3100_v31 = vld [vmem:[%s5890_s28 + $0x94] sm:$0xf0] }
 0x160   :  { %1542 = vmatpush.bf16.msrb.mxu3 %v5922_v40  ;;  %v4379_v40 = vld [vmem:[%s5756_s5 + $0x40] sm:$0xff] }
 0x163   :  { %1297 = vmatpush.bf16.msrb.mxu0 %v5971_v33  ;;  %1502 = vmatpush.bf16.msrb.mxu1 %v5973_v43 }
 0x164   :  { %1543 = vmatpush.bf16.msrb.mxu3 %v5924_v50 }
 0x166   :  { %1298 = vmatmul.bf16.vlgmr.msrb.gmra.mxu0 %v4252_v28 }
 0x167   :  { %1503 = vmatpush.bf16.msrb.mxu1 %v5974_v1  ;;  %1395 = vmatpush.bf16.msra.mxu0 %v4359_v20 }
 0x168   :  { %1544 = vmatpush.bf16.msrb.mxu3 %v5926_v42  ;;  %v4371_v42 = vld [vmem:[%s5756_s5 + $0x48] sm:$0xff] }
 0x16b   :  { %1396 = vmatpush.bf16.msra.mxu0 %v4365_v46  ;;  %1552 = vmatpush.bf16.msra.mxu1 %v3907_v55  ;;  %v3281_v55 = vld [vmem:[%s5890_s28 + $0x84] sm:$0xf] }
 0x16c   :  { %1545 = vmatpush.bf16.msrb.mxu3 %v3896_v62 }
 0x16f   :  { %1397 = vmatpush.bf16.msra.mxu0 %v4371_v42  ;;  %1553 = vmatpush.bf16.msra.mxu1 %v3925_v54 }
 0x173   :  { %1398 = vmatpush.bf16.msra.mxu0 %v4379_v40  ;;  %1554 = vmatpush.bf16.msra.mxu1 %v3943_v58  ;;  %v3106_v58 = vld [vmem:[%s5890_s28 + $0x88] sm:$0xf] }
 0x177   :  { %1454 = vmatpush.bf16.msrb.mxu0 %v4385_v34  ;;  %1555 = vmatpush.bf16.msra.mxu1 %v3957_v44  ;;  %v4489_v44 = vld [vmem:[%s5870_s29 + $0x28] sm:$0xff] }
 0x17a   :  { %v1215_v62 = vpop.f32.mrf.mxu2 }
 0x17b   :  { %1455 = vmatpush.bf16.msrb.mxu0 %v4393_v32  ;;  %1556 = vmatpush.bf16.msra.mxu1 %v3971_v47  ;;  %v4514_v47 = vld [vmem:[%s5889_s25 + $0x38] sm:$0xff] }
 0x17d   :  { %v1229_v28 = vpop.f32.mrf.mxu3 }
 0x17e   :  { %v4374_v50 = vpop.f32.mrf.mxu1  ;;  %v1230_v49 = vadd.f32 %v1229_v28, %v1215_v62  ;;  %v3103_v28 = vor.u32 %v3281_v55, %v3100_v31  ;;  %v4618_v55 = vld [vmem:[%s5870_s29 + $0x128] sm:$0xff]  ;;  %v4624_v31 = vld [vmem:[%s5870_s29 + $0x98] sm:$0xff] }
 0x17f   :  { %5975 = vst [vmem:[#allocation6_spill] sm:$0xff] %v4374_v50  ;;  %1456 = vmatpush.bf16.msrb.mxu0 %v4401_v29  ;;  %1557 = vmatpush.bf16.msra.mxu1 %v3985_v9  ;;  %v4528_v9 = vld [vmem:[%s5889_s25 + $0x30] sm:$0xff]  ;;  %v4781_v50 = vld [vmem:[%s5889_s25 + $0x60] sm:$0xff] }
 0x180   :  { %1490 = vmatmul.bf16.vlgmr.msra.gmra.mxu3 %v3103_v28  ;;  %5981 = vst [vmem:[#allocation15_spill] sm:$0xff] %v4618_v55 }
 0x181   :  { %1636 = vmatpush.bf16.msra.mxu3 %v4385_v34 }
 0x182   :  { %v1217_v61 = vpop.f32.mrf.mxu2 }
 0x183   :  { %1457 = vmatpush.bf16.msrb.mxu0 %v4409_v59  ;;  %1558 = vmatpush.bf16.msra.mxu1 %v5951_v5  ;;  %v4542_v5 = vld [vmem:[%s5870_s29 + $0xb8] sm:$0xff] }
 0x185   :  { %v1231_v25 = vpop.f32.mrf.mxu3  ;;  %1637 = vmatpush.bf16.msra.mxu3 %v4393_v32 }
 0x186   :  { %v4396_v51 = vpop.f32.mrf.mxu1  ;;  %v1232_v10 = vadd.f32 %v1231_v25, %v1217_v61  ;;  %v4462_v25 = vld [vmem:[%s5870_s29 + $0x38] sm:$0xff] }
 0x187   :  { %5977 = vst [vmem:[#allocation8_spill] sm:$0xff] %v4396_v51  ;;  %1458 = vmatpush.bf16.msrb.mxu0 %v4415_v45  ;;  %1622 = vmatpush.bf16.msra.mxu2 %v4462_v25  ;;  %v4773_v51 = vld [vmem:[%s5889_s25 + $0xf0] sm:$0xff] }
 0x188   :  { %1559 = vmatpush.bf16.msra.mxu1 %v5953_v37  ;;  %v4554_v37 = vld [vmem:[%s5870_s29 + $0x8] sm:$0xff]  ;;  %5989 = vst [vmem:[#allocation46_spill] sm:$0xff] %v4773_v51 }
 0x189   :  { %1638 = vmatpush.bf16.msra.mxu3 %v4401_v29 }
 0x18b   :  { %v1271_v39 = vpop.f32.mrf.mxu2  ;;  %1459 = vmatpush.bf16.msrb.mxu0 %v4421_v12 }
 0x18d   :  { %v1285_v0 = vpop.f32.mrf.mxu3  ;;  %1639 = vmatpush.bf16.msra.mxu3 %v4409_v59 }
 0x18f   :  { %1460 = vmatpush.bf16.msrb.mxu0 %v4427_v22 }
 0x190   :  { %1546 = vmatmul.bf16.vlgmr.msrb.gmra.mxu3 %v3099_v30  ;;  %v4605_v30 = vld [vmem:[%s5870_s29 + $0xa0] sm:$0xff] }
 0x191   :  { %1640 = vmatpush.bf16.msra.mxu3 %v4415_v45 }
 0x193   :  { %v1273_v21 = vpop.f32.mrf.mxu2  ;;  %1461 = vmatpush.bf16.msrb.mxu0 %v4433_v63 }
 0x195   :  { %v1287_v18 = vpop.f32.mrf.mxu3  ;;  %1641 = vmatpush.bf16.msra.mxu3 %v4421_v12 }
 0x199   :  { %1642 = vmatpush.bf16.msra.mxu3 %v4427_v22 }
 0x19d   :  { %1643 = vmatpush.bf16.msra.mxu3 %v4433_v63 }
 0x1a1   :  { %1692 = vmatpush.bf16.msrb.mxu3 %v4514_v47 }
 0x1a5   :  { %1693 = vmatpush.bf16.msrb.mxu3 %v4528_v9 }
 0x1a7   :  { %v1257_v35 = vpop.f32.mrf.mxu1 }
 0x1ad   :  { %v1327_v38 = vpop.f32.mrf.mxu2 }
 0x1af   :  { %v1259_v13 = vpop.f32.mrf.mxu1 }
 0x1b1   :  { %v1341_v60 = vpop.f32.mrf.mxu3 }
 0x1b5   :  { %v1329_v61 = vpop.f32.mrf.mxu2 }
 0x1b7   :  { %v1313_v2 = vpop.f32.mrf.mxu1 }
 0x1bf   :  { %v1315_v33 = vpop.f32.mrf.mxu1 }
 0x1c3   :  { %v4388_v57 = vpop.f32.mrf.mxu0 }
 0x1c4   :  { %5976 = vst [vmem:[#allocation7_spill] sm:$0xff] %v4388_v57  ;;  %v4787_v57 = vld [vmem:[%s5889_s25 + $0x110] sm:$0xff] }
 0x1c5   :  { %5990 = vst [vmem:[#allocation11_spill] sm:$0xff] %v4787_v57 }
 0x1cb   :  { %v4404_v26 = vpop.f32.mrf.mxu0 }
 0x1cc   :  { %5978 = vst [vmem:[#allocation9_spill] sm:$0xff] %v4404_v26 }
 0x1d3   :  { %v1243_v8 = vpop.f32.mrf.mxu0 }
 0x1d4   :  { %v1244_v41 = vadd.f32 %v1243_v8, %v1230_v49 }
 0x1d6   :  { %v1258_v11 = vadd.f32 %v1257_v35, %v1244_v41  ;;  %v1343_v35 = vpop.f32.mrf.mxu3  ;;  %v3280_v41 = vld [vmem:[%s5890_s28 + $0x7c] sm:$0xf] }
 0x1d8   :  { %v1272_v24 = vadd.f32 %v1271_v39, %v1258_v11  ;;  %v4534_v11 = vld [vmem:[%s5870_s29 + $0x10] sm:$0xff] }
 0x1db   :  { %v1245_v36 = vpop.f32.mrf.mxu0 }
 0x1dc   :  { %v1246_v14 = vadd.f32 %v1245_v36, %v1232_v10  ;;  %v4520_v10 = vld [vmem:[%s5870_s29 + $0x18] sm:$0xff] }
 0x1de   :  { %v1260_v43 = vadd.f32 %v1259_v13, %v1246_v14  ;;  %v4471_v13 = vld [vmem:[%s5870_s29 + $0x30] sm:$0xff] }
 0x1df   :  { %1623 = vmatpush.bf16.msra.mxu2 %v4471_v13  ;;  %v4561_v14 = vld [vmem:[%s5870_s29 + $0xb0] sm:$0xff] }
 0x1e0   :  { %v1274_v39 = vadd.f32 %v1273_v21, %v1260_v43  ;;  %v3284_v21 = vld [vmem:[%s5890_s28 + $0x98] sm:$0xf0]  ;;  %v4630_v43 = vld [vmem:[%s5889_s25 + $0x8] sm:$0xff] }
 0x1e3   :  { %v1299_v53 = vpop.f32.mrf.mxu0  ;;  %1624 = vmatpush.bf16.msra.mxu2 %v4489_v44 }
 0x1e4   :  { %v1300_v3 = vadd.f32 %v1299_v53, %v1285_v0 }
 0x1e6   :  { %v1314_v6 = vadd.f32 %v1313_v2, %v1300_v3  ;;  %v4484_v2 = vor.u32 %v3284_v21, %v3106_v58  ;;  %v3092_v3 = vld [vmem:[%s5890_s28 + $0x8c] sm:$0xf0]  ;;  %v4700_v21 = vld [vmem:[%s5889_s25 + $0x78] sm:$0xff] }
 0x1e7   :  { %1625 = vmatpush.bf16.msra.mxu2 %v4505_v48 }
 0x1e8   :  { %v1328_v16 = vadd.f32 %v1327_v38, %v1314_v6  ;;  %1504 = vmatmul.bf16.vlgmr.msrb.gmra.mxu1 %v4484_v2 }
 0x1e9   :  { %1650 = vmatpush.bf16.msrb.mxu1 %v4542_v5 }
 0x1ea   :  { %v1342_v15 = vadd.f32 %v1341_v60, %v1328_v16  ;;  %v3095_v60 = vor.u32 %v3280_v41, %v3092_v3  ;;  %v4548_v16 = vld [vmem:[%s5889_s25 + $0x28] sm:$0xff]  ;;  %v3118_v41 = vld [vmem:[%s5890_s28 + $0xb4] sm:$0xf0] }
 0x1eb   :  { %v1301_v19 = vpop.f32.mrf.mxu0  ;;  %1626 = vmatpush.bf16.msra.mxu2 %v4520_v10  ;;  %1694 = vmatpush.bf16.msrb.mxu3 %v4548_v16 }
 0x1ec   :  { %v1302_v27 = vadd.f32 %v1301_v19, %v1287_v18  ;;  %v1346_v1 = vmax.f32 %v1272_v24, %v1342_v15  ;;  %1532 = vmatmul.bf16.vlgmr.msrb.gmra.mxu2 %v3095_v60  ;;  %v4567_v15 = vld [vmem:[%s5889_s25 + $0x20] sm:$0xff]  ;;  %v4592_v24 = vld [vmem:[%s5889_s25 + $0x18] sm:$0xff] }
 0x1ed   :  { %1651 = vmatpush.bf16.msrb.mxu1 %v4561_v14  ;;  %v4573_v19 = vld [vmem:[%s5870_s29] sm:$0xff] }
 0x1ee   :  { %v1316_v62 = vadd.f32 %v1315_v33, %v1302_v27  ;;  %v1348_v0 = vmul.f32 %v4189_v56, %v1346_v1  ;;  %v4599_v27 = vld [vmem:[%s5870_s29 + $0x130] sm:$0xff]  ;;  %v4637_v1 = vld [vmem:[%s5870_s29 + $0x120] sm:$0xff] }
 0x1ef   :  { %1627 = vmatpush.bf16.msra.mxu2 %v4534_v11  ;;  %5980 = vst [vmem:[#allocation12_spill] sm:$0xff] %v4599_v27  ;;  %v4611_v33 = vld [vmem:[%s5889_s25 + $0x10] sm:$0xff]  ;;  %1695 = vmatpush.bf16.msrb.mxu3 %v4567_v15 }
 0x1f0   :  { %v1330_v54 = vadd.f32 %v1329_v61, %v1316_v62  ;;  %v1350_v18 = vadd.f32 %v4196_v52, %v1348_v0  ;;  %5982 = vst [vmem:[#allocation18_spill] sm:$0xff] %v4637_v1  ;;  %v4643_v62 = vld [vmem:[%s5870_s29 + $0x90] sm:$0xff]  ;;  %v4656_v61 = vld [vmem:[%s5889_s25 + $0x138] sm:$0xff]  ;;  %v3116_v0 = vld [vmem:[%s5890_s28 + $0xa0] sm:$0xf] }
 0x1f1   :  { %1652 = vmatpush.bf16.msrb.mxu1 %v4586_v23 }
 0x1f2   :  { %v1344_v8 = vadd.f32 %v1343_v35, %v1330_v54  ;;  %v1352_v38 = vmax.f32 %v1350_v18, 0.0  ;;  %v4662_v54 = vld [vmem:[%s5870_s29 + $0x118] sm:$0xff]  ;;  %v4669_v35 = vld [vmem:[%s5870_s29 + $0x88] sm:$0xff] }
 0x1f3   :  { %1628 = vmatpush.bf16.msra.mxu2 %v4554_v37  ;;  %5983 = vst [vmem:[#allocation13_spill] sm:$0xff] %v4662_v54  ;;  %1696 = vmatpush.bf16.msrb.mxu3 %v4592_v24  ;;  %v4707_v18 = vld [vmem:[%s5889_s25 + $0x128] sm:$0xff] }
 0x1f4   :  { %v1347_v36 = vmax.f32 %v1274_v39, %v1344_v8  ;;  %v4676_v39 = vld [vmem:[%s5889_s25 + $0x130] sm:$0xff] }
 0x1f5   :  { %1653 = vmatpush.bf16.msrb.mxu1 %v4605_v30  ;;  %v3287_v8 = vld [vmem:[%s5890_s28 + $0xb0] sm:$0xf0] }
 0x1f6   :  { %v1349_v49 = vmul.f32 %v4189_v56, %v1347_v36  ;;  %v4694_v36 = vld [vmem:[%s5870_s29 + $0x80] sm:$0xff]  ;;  %v3117_v58 = vor.u32 %v3287_v8, %v3116_v0  ;;  %v4753_v0 = vld [vmem:[%s5889_s25 + $0x68] sm:$0xff]  ;;  %v4760_v8 = vld [vmem:[%s5889_s25 + $0x118] sm:$0xff] }
 0x1f7   :  { %1629 = vmatpush.bf16.msra.mxu2 %v4573_v19  ;;  %1697 = vmatpush.bf16.msrb.mxu3 %v4611_v33  ;;  %5988 = vst [vmem:[#allocation45_spill] sm:$0xff] %v4760_v8 }
 0x1f8   :  { %v1351_v53 = vadd.f32 %v4196_v52, %v1349_v49  ;;  %1560 = vmatmul.bf16.vlgmr.msra.gmra.mxu1 %v3103_v28  ;;  %v4649_v28 = vld [vmem:[%s5889_s25] sm:$0xff]  ;;  %v4713_v49 = vld [vmem:[%s5870_s29 + $0x108] sm:$0xff] }
 0x1f9   :  { %1654 = vmatpush.bf16.msrb.mxu1 %v4624_v31  ;;  %5985 = vst [vmem:[#allocation19_spill] sm:$0xff] %v4713_v49 }
 0x1fa   :  { %v1353_v17 = vmax.f32 %v1351_v53, 0.0  ;;  %v3285_v53 = vld [vmem:[%s5890_s28 + $0xa4] sm:$0xf] }
 0x1fb   :  { %1678 = vmatpush.bf16.msrb.mxu2 %v4579_v4  ;;  %v4722_v3 = vor.u32 %v3285_v53, %v3118_v41  ;;  %1698 = vmatpush.bf16.msrb.mxu3 %v4630_v43  ;;  %v3124_v53 = vld [vmem:[%s5890_s28 + $0xa8] sm:$0xf]  ;;  %v3288_v41 = vld [vmem:[%s5890_s28 + $0xb8] sm:$0xf0]  ;;  %v5999_v4 = vld [vmem:[#allocation4_spill] sm:$0xff] }
 0x1fc   :  { %v1354_v6 = vpack.c.bf16 %v1353_v17, %v1352_v38  ;;  %1630 = vmatmul.bf16.vlgmr.msra.gmra.mxu2 %v3117_v58  ;;  %v4727_v38 = vld [vmem:[%s5889_s25 + $0x70] sm:$0xff]  ;;  %v4734_v17 = vld [vmem:[%s5889_s25 + $0x120] sm:$0xff]  ;;  %v4776_v26 = vor.u32 %v3288_v41, %v3124_v53 }
 0x1fd   :  { %1655 = vmatpush.bf16.msrb.mxu1 %v4643_v62  ;;  %1644 = vmatmul.bf16.vlgmr.msra.gmra.mxu3 %v4722_v3  ;;  %v3132_v53 = vld [vmem:[%s5890_s28 + $0xb0] sm:$0xf]  ;;  %v3289_v41 = vld [vmem:[%s5890_s28 + $0xc0] sm:$0xf0] }
 0x1fe   :  { %3081 = vmatmul.msk.bf16.vlgmr.msra.gmra.mxu0 %vm1114_vm0, %v1354_v6  ;;  %v4741_v6 = vld [vmem:[%s5870_s29 + $0x100] sm:$0xff] }
 0x1ff   :  { %1510 = vmatpush.bf16.msra.mxu0 %v4514_v47  ;;  %1679 = vmatpush.bf16.msrb.mxu2 %v4599_v27  ;;  %5986 = vst [vmem:[#allocation43_spill] sm:$0xff] %v4741_v6  ;;  %v5997_v27 = vld [vmem:[#allocation40_spill] sm:$0xff] }
 0x200   :  { %1699 = vmatpush.bf16.msrb.mxu3 %v4649_v28 }
 0x201   :  { %1656 = vmatpush.bf16.msrb.mxu1 %v4669_v35 }
 0x203   :  { %1511 = vmatpush.bf16.msra.mxu0 %v4528_v9  ;;  %1680 = vmatpush.bf16.msrb.mxu2 %v4618_v55  ;;  %v4878_v55 = vld [vmem:[%s5870_s29 + $0xe8] sm:$0xff] }
 0x204   :  { %1748 = vmatpush.bf16.msra.mxu3 %v4656_v61 }
 0x205   :  { %1657 = vmatpush.bf16.msrb.mxu1 %v4694_v36 }
 0x207   :  { %1512 = vmatpush.bf16.msra.mxu0 %v4548_v16  ;;  %1681 = vmatpush.bf16.msrb.mxu2 %v4637_v1  ;;  %v5995_v1 = vld [vmem:[#allocation37_spill] sm:$0xff] }
 0x208   :  { %1749 = vmatpush.bf16.msra.mxu3 %v4676_v39  ;;  %1658 = vmatmul.bf16.vlgmr.msrb.gmra.mxu1 %v4776_v26 }
 0x209   :  { %1706 = vmatpush.bf16.msra.mxu1 %v4700_v21 }
 0x20b   :  { %1513 = vmatpush.bf16.msra.mxu0 %v4567_v15  ;;  %1682 = vmatpush.bf16.msrb.mxu2 %v4662_v54  ;;  %v4858_v54 = vld [vmem:[%s5870_s29 + $0xf0] sm:$0xff] }
 0x20c   :  { %1750 = vmatpush.bf16.msra.mxu3 %v4707_v18 }
 0x20d   :  { %1707 = vmatpush.bf16.msra.mxu1 %v4727_v38  ;;  %1700 = vmatmul.bf16.vlgmr.msrb.gmra.mxu3 %v3117_v58  ;;  %v4852_v58 = vld [vmem:[%s5889_s25 + $0x48] sm:$0xff] }
 0x20e   :  { %1462 = vmatmul.bf16.vlgmr.msrb.gmra.mxu0 %v3095_v60  ;;  %v4747_v60 = vld [vmem:[%s5889_s25 + $0xf8] sm:$0xff] }
 0x20f   :  { %1514 = vmatpush.bf16.msra.mxu0 %v4592_v24  ;;  %5987 = vst [vmem:[#allocation44_spill] sm:$0xff] %v4747_v60 }
 0x210   :  { %1751 = vmatpush.bf16.msra.mxu3 %v4734_v17 }
 0x211   :  { %1708 = vmatpush.bf16.msra.mxu1 %v4753_v0 }
 0x213   :  { %1515 = vmatpush.bf16.msra.mxu0 %v4611_v33 }
 0x214   :  { %1752 = vmatpush.bf16.msra.mxu3 %v4760_v8 }
 0x215   :  { %1709 = vmatpush.bf16.msra.mxu1 %v4781_v50 }
 0x217   :  { %1516 = vmatpush.bf16.msra.mxu0 %v4630_v43 }
 0x218   :  { %1753 = vmatpush.bf16.msra.mxu3 %v4787_v57 }
 0x21b   :  { %1517 = vmatpush.bf16.msra.mxu0 %v4649_v28 }
 0x21e   :  { %1518 = vmatmul.bf16.vlgmr.msra.gmra.mxu0 %v4442_v7  ;;  %v4682_v7 = vld [vmem:[%s5870_s29 + $0x110] sm:$0xff] }
 0x21f   :  { %1566 = vmatpush.bf16.msrb.mxu0 %v4656_v61  ;;  %5984 = vst [vmem:[#allocation16_spill] sm:$0xff] %v4682_v7  ;;  %1683 = vmatpush.bf16.msrb.mxu2 %v4682_v7  ;;  %v4838_v7 = vld [vmem:[%s5870_s29 + $0xf8] sm:$0xff] }
 0x223   :  { %1567 = vmatpush.bf16.msrb.mxu0 %v4676_v39  ;;  %1684 = vmatpush.bf16.msrb.mxu2 %v4713_v49  ;;  %v4813_v49 = vld [vmem:[%s5889_s25 + $0x108] sm:$0xff] }
 0x224   :  { %1754 = vmatpush.bf16.msra.mxu3 %v4813_v49 }
 0x227   :  { %1568 = vmatpush.bf16.msrb.mxu0 %v4707_v18  ;;  %1685 = vmatpush.bf16.msrb.mxu2 %v4741_v6  ;;  %v4807_v6 = vld [vmem:[%s5889_s25 + $0x58] sm:$0xff] }
 0x228   :  { %1710 = vmatpush.bf16.msra.mxu1 %v4807_v6 }
 0x22b   :  { %1569 = vmatpush.bf16.msrb.mxu0 %v4734_v17  ;;  %1734 = vmatpush.bf16.msra.mxu2 %v4747_v60  ;;  %v3133_v60 = vor.u32 %v3289_v41, %v3132_v53  ;;  %v4820_v53 = vld [vmem:[%s5889_s25 + $0xe0] sm:$0xff]  ;;  %v4826_v41 = vld [vmem:[%s5889_s25 + $0x50] sm:$0xff] }
 0x22c   :  { %5992 = vst [vmem:[#allocation22_spill] sm:$0xff] %v4820_v53  ;;  %1711 = vmatpush.bf16.msra.mxu1 %v4826_v41 }
 0x22d   :  { %1686 = vmatmul.bf16.vlgmr.msrb.gmra.mxu2 %v3133_v60 }
 0x22f   :  { %1570 = vmatpush.bf16.msrb.mxu0 %v4760_v8  ;;  %1735 = vmatpush.bf16.msra.mxu2 %v4773_v51  ;;  %v4801_v51 = vld [vmem:[%s5889_s25 + $0xe8] sm:$0xff]  ;;  %v4914_v8 = vld [vmem:[%s5870_s29 + $0xd8] sm:$0xff] }
 0x230   :  { %5991 = vst [vmem:[#allocation14_spill] sm:$0xff] %v4801_v51  ;;  %1712 = vmatpush.bf16.msra.mxu1 %v4852_v58 }
 0x233   :  { %1571 = vmatpush.bf16.msrb.mxu0 %v4787_v57  ;;  %1736 = vmatpush.bf16.msra.mxu2 %v4801_v51  ;;  %v4832_v51 = vld [vmem:[%s5889_s25 + $0x100] sm:$0xff] }
 0x234   :  { %v3126_v57 = vld [vmem:[%s5890_s28 + $0xbc] sm:$0xf0]  ;;  %1755 = vmatpush.bf16.msra.mxu3 %v4832_v51 }
 0x237   :  { %1572 = vmatpush.bf16.msrb.mxu0 %v4813_v49  ;;  %1737 = vmatpush.bf16.msra.mxu2 %v4820_v53  ;;  %v4845_v53 = vld [vmem:[%s5889_s25 + $0xd8] sm:$0xff] }
 0x238   :  { %5993 = vst [vmem:[#allocation17_spill] sm:$0xff] %v4845_v53  ;;  %1866 = vmatpush.bf16.msrb.mxu3 %v4542_v5 }
 0x239   :  { %1756 = vmatmul.bf16.vlgmr.msra.gmra.mxu3 %v3133_v60 }
 0x23b   :  { %1573 = vmatpush.bf16.msrb.mxu0 %v4832_v51  ;;  %1738 = vmatpush.bf16.msra.mxu2 %v4845_v53  ;;  %v4871_v53 = vld [vmem:[%s5889_s25 + $0x40] sm:$0xff] }
 0x23c   :  { %1713 = vmatpush.bf16.msra.mxu1 %v4871_v53  ;;  %1867 = vmatpush.bf16.msrb.mxu3 %v4561_v14 }
 0x23e   :  { %1574 = vmatmul.bf16.vlgmr.msrb.gmra.mxu0 %v4484_v2  ;;  %v4865_v2 = vld [vmem:[%s5889_s25 + $0xd0] sm:$0xff] }
 0x23f   :  { %1664 = vmatpush.bf16.msra.mxu0 %v4838_v7  ;;  %5994 = vst [vmem:[#allocation24_spill] sm:$0xff] %v4865_v2  ;;  %1739 = vmatpush.bf16.msra.mxu2 %v4865_v2  ;;  %v4886_v2 = vld [vmem:[%s5889_s25 + $0xc8] sm:$0xff] }
 0x240   :  { %1778 = vmatpush.bf16.msrb.mxu1 %v5995_v1  ;;  %5996 = vst [vmem:[#allocation20_spill] sm:$0xff] %v4886_v2  ;;  %v4893_v1 = vld [vmem:[%s5870_s29 + $0xe0] sm:$0xff]  ;;  %1868 = vmatpush.bf16.msrb.mxu3 %v4586_v23 }
 0x241   :  { %1714 = vmatmul.bf16.vlgmr.msra.gmra.mxu1 %v4722_v3  ;;  %v3286_v3 = vld [vmem:[%s5890_s28 + $0xac] sm:$0xf] }
 0x243   :  { %1665 = vmatpush.bf16.msra.mxu0 %v4858_v54  ;;  %1740 = vmatpush.bf16.msra.mxu2 %v4886_v2  ;;  %v3129_v2 = vor.u32 %v3286_v3, %v3126_v57  ;;  %v4933_v57 = vld [vmem:[%s5870_s29 + $0xc8] sm:$0xff] }
 0x244   :  { %1779 = vmatpush.bf16.msrb.mxu1 %v5997_v27  ;;  %v4906_v27 = vld [vmem:[%s5889_s25 + $0xc0] sm:$0xff]  ;;  %1869 = vmatpush.bf16.msrb.mxu3 %v4605_v30 }
 0x245   :  { %5998 = vst [vmem:[#allocation21_spill] sm:$0xff] %v4906_v27 }
 0x247   :  { %1666 = vmatpush.bf16.msra.mxu0 %v4878_v55  ;;  %1741 = vmatpush.bf16.msra.mxu2 %v4906_v27  ;;  %v6000_v27 = vld [vmem:[#allocation5_spill] sm:$0xff] }
 0x248   :  { %1780 = vmatpush.bf16.msrb.mxu1 %v5999_v4  ;;  %1870 = vmatpush.bf16.msrb.mxu3 %v4624_v31 }
 0x24a   :  { %1742 = vmatmul.bf16.vlgmr.msra.gmra.mxu2 %v3129_v2 }
 0x24b   :  { %1667 = vmatpush.bf16.msra.mxu0 %v4893_v1  ;;  %1852 = vmatpush.bf16.msrb.mxu2 %v4385_v34  ;;  %v4924_v34 = vld [vmem:[%s5870_s29 + $0xd0] sm:$0xff] }
 0x24c   :  { %1781 = vmatpush.bf16.msrb.mxu1 %v6000_v27  ;;  %1871 = vmatpush.bf16.msrb.mxu3 %v4643_v62 }
 0x24f   :  { %1668 = vmatpush.bf16.msra.mxu0 %v4914_v8  ;;  %1853 = vmatpush.bf16.msrb.mxu2 %v4393_v32  ;;  %v4942_v32 = vld [vmem:[%s5870_s29 + $0xc0] sm:$0xff] }
 0x250   :  { %1838 = vmatpush.bf16.msra.mxu1 %v4462_v25  ;;  %v4976_v25 = vld [vmem:[%s5889_s25 + $0xa0] sm:$0xff]  ;;  %1872 = vmatpush.bf16.msrb.mxu3 %v4669_v35 }
 0x253   :  { %1669 = vmatpush.bf16.msra.mxu0 %v4924_v34  ;;  %1854 = vmatpush.bf16.msrb.mxu2 %v4401_v29  ;;  %v4949_v29 = vld [vmem:[%s5889_s25 + $0xb8] sm:$0xff] }
 0x254   :  { %1839 = vmatpush.bf16.msra.mxu1 %v4471_v13  ;;  %1873 = vmatpush.bf16.msrb.mxu3 %v4694_v36  ;;  %v5012_v13 = vld [vmem:[%s5889_s25 + $0x80] sm:$0xff] }
 0x257   :  { %1670 = vmatpush.bf16.msra.mxu0 %v4933_v57  ;;  %1855 = vmatpush.bf16.msrb.mxu2 %v4409_v59  ;;  %v4958_v59 = vld [vmem:[%s5889_s25 + $0xb0] sm:$0xff] }
 0x258   :  { %1840 = vmatpush.bf16.msra.mxu1 %v4489_v44  ;;  %1922 = vmatpush.bf16.msra.mxu3 %v4700_v21  ;;  %v6001_v44 = vld [vmem:[#allocation25_spill] sm:$0xff] }
 0x25b   :  { %1671 = vmatpush.bf16.msra.mxu0 %v4942_v32  ;;  %1856 = vmatpush.bf16.msrb.mxu2 %v4415_v45  ;;  %v4967_v45 = vld [vmem:[%s5889_s25 + $0xa8] sm:$0xff] }
 0x25c   :  { %1841 = vmatpush.bf16.msra.mxu1 %v4505_v48  ;;  %1923 = vmatpush.bf16.msra.mxu3 %v4727_v38  ;;  %v6002_v48 = vld [vmem:[#allocation28_spill] sm:$0xff] }
 0x25e   :  { %1672 = vmatmul.bf16.vlgmr.msra.gmra.mxu0 %v3129_v2 }
 0x25f   :  { %1720 = vmatpush.bf16.msrb.mxu0 %v4949_v29  ;;  %1857 = vmatpush.bf16.msrb.mxu2 %v4421_v12  ;;  %v4986_v12 = vld [vmem:[%s5889_s25 + $0x98] sm:$0xff] }
 0x260   :  { %1842 = vmatpush.bf16.msra.mxu1 %v4520_v10  ;;  %1924 = vmatpush.bf16.msra.mxu3 %v4753_v0  ;;  %v6004_v10 = vld [vmem:[#allocation34_spill] sm:$0xff] }
 0x263   :  { %1721 = vmatpush.bf16.msrb.mxu0 %v4958_v59  ;;  %1858 = vmatpush.bf16.msrb.mxu2 %v4427_v22  ;;  %v4996_v22 = vld [vmem:[%s5889_s25 + $0x90] sm:$0xff] }
 0x264   :  { %1843 = vmatpush.bf16.msra.mxu1 %v4534_v11  ;;  %1925 = vmatpush.bf16.msra.mxu3 %v4781_v50 }
 0x267   :  { %1722 = vmatpush.bf16.msrb.mxu0 %v4967_v45  ;;  %1859 = vmatpush.bf16.msrb.mxu2 %v4433_v63  ;;  %v5004_v63 = vld [vmem:[%s5889_s25 + $0x88] sm:$0xff] }
 0x268   :  { %1844 = vmatpush.bf16.msra.mxu1 %v4554_v37  ;;  %1926 = vmatpush.bf16.msra.mxu3 %v4807_v6  ;;  %v1491_v37 = vpop.f32.mrf.mxu3 }
 0x26b   :  { %1723 = vmatpush.bf16.msrb.mxu0 %v4976_v25  ;;  %1908 = vmatpush.bf16.msra.mxu2 %v4514_v47  ;;  %v6003_v47 = vld [vmem:[#allocation31_spill] sm:$0xff] }
 0x26c   :  { %1845 = vmatpush.bf16.msra.mxu1 %v4573_v19  ;;  %1927 = vmatpush.bf16.msra.mxu3 %v4826_v41 }
 0x26f   :  { %1724 = vmatpush.bf16.msrb.mxu0 %v4986_v12  ;;  %1909 = vmatpush.bf16.msra.mxu2 %v4528_v9  ;;  %v1449_v9 = vpop.f32.mrf.mxu1 }
 0x270   :  { %1928 = vmatpush.bf16.msra.mxu3 %v4852_v58  ;;  %v1493_v23 = vpop.f32.mrf.mxu3 }
 0x273   :  { %1725 = vmatpush.bf16.msrb.mxu0 %v4996_v22  ;;  %1910 = vmatpush.bf16.msra.mxu2 %v4548_v16  ;;  %v1477_v16 = vpop.f32.mrf.mxu2 }
 0x274   :  { %1929 = vmatpush.bf16.msra.mxu3 %v4871_v53 }
 0x277   :  { %1726 = vmatpush.bf16.msrb.mxu0 %v5004_v63  ;;  %1911 = vmatpush.bf16.msra.mxu2 %v4567_v15  ;;  %v1451_v5 = vpop.f32.mrf.mxu1 }
 0x278   :  { %v1547_v31 = vpop.f32.mrf.mxu3 }
 0x27b   :  { %1727 = vmatpush.bf16.msrb.mxu0 %v5012_v13  ;;  %1912 = vmatpush.bf16.msra.mxu2 %v4592_v24  ;;  %v5027_v50 = vpop.f32.mrf.mxu0  ;;  %v1479_v19 = vpop.f32.mrf.mxu2 }
 0x27e   :  { %1728 = vmatmul.bf16.vlgmr.msrb.gmra.mxu0 %v4776_v26 }
 0x27f   :  { %1795 = vmatpush.bf16.msra.mxu0 %v6001_v44  ;;  %1913 = vmatpush.bf16.msra.mxu2 %v4611_v33  ;;  %v1505_v15 = vpop.f32.mrf.mxu1 }
 0x280   :  { %v1549_v6 = vpop.f32.mrf.mxu3 }
 0x283   :  { %1796 = vmatpush.bf16.msra.mxu0 %v6002_v48  ;;  %1914 = vmatpush.bf16.msra.mxu2 %v4630_v43  ;;  %v5034_v26 = vpop.f32.mrf.mxu0  ;;  %v1533_v30 = vpop.f32.mrf.mxu2 }
 0x287   :  { %1797 = vmatpush.bf16.msra.mxu0 %v6003_v47  ;;  %1915 = vmatpush.bf16.msra.mxu2 %v4649_v28  ;;  %v1507_v24 = vpop.f32.mrf.mxu1 }
 0x28b   :  { %1798 = vmatpush.bf16.msra.mxu0 %v6004_v10  ;;  %v1463_v11 = vpop.f32.mrf.mxu0  ;;  %v1535_v35 = vpop.f32.mrf.mxu2 }
 0x28c   :  { %v1464_v43 = vadd.f32 %v1463_v11, %v1449_v9 }
 0x28f   :  { %1880 = vmatpush.bf16.msrb.mxu0 %v4838_v7  ;;  %v1561_v28 = vpop.f32.mrf.mxu1 }
 0x293   :  { %1881 = vmatpush.bf16.msrb.mxu0 %v4858_v54  ;;  %v1465_v14 = vpop.f32.mrf.mxu0  ;;  %v1478_v54 = vadd.f32 %v1477_v16, %v1464_v43  ;;  %v1631_v16 = vpop.f32.mrf.mxu2 }
 0x294   :  { %v1466_v7 = vadd.f32 %v1465_v14, %v1451_v5 }
 0x295   :  { %v1492_v21 = vadd.f32 %v1491_v37, %v1478_v54  ;;  %v1645_v37 = vpop.f32.mrf.mxu3 }
 0x296   :  { %v1480_v0 = vadd.f32 %v1479_v19, %v1466_v7 }
 0x297   :  { %1882 = vmatpush.bf16.msrb.mxu0 %v4878_v55  ;;  %v1506_v53 = vadd.f32 %v1505_v15, %v1492_v21  ;;  %v1563_v58 = vpop.f32.mrf.mxu1 }
 0x298   :  { %v1494_v2 = vadd.f32 %v1493_v23, %v1480_v0 }
 0x29b   :  { %1883 = vmatpush.bf16.msrb.mxu0 %v4893_v1  ;;  %v1519_v4 = vpop.f32.mrf.mxu0  ;;  %v1633_v14 = vpop.f32.mrf.mxu2 }
 0x29c   :  { %v1534_v33 = vadd.f32 %v1533_v30, %v1519_v4  ;;  %v1646_v30 = vadd.f32 %v1645_v37, %v1631_v16 }
 0x29d   :  { %v1647_v19 = vpop.f32.mrf.mxu3 }
 0x29e   :  { %v1548_v62 = vadd.f32 %v1547_v31, %v1534_v33 }
 0x29f   :  { %1884 = vmatpush.bf16.msrb.mxu0 %v4914_v8  ;;  %v1659_v15 = vpop.f32.mrf.mxu1 }
 0x2a0   :  { %v1562_v36 = vadd.f32 %v1561_v28, %v1548_v62  ;;  %v1660_v33 = vadd.f32 %v1659_v15, %v1646_v30  ;;  %v1648_v62 = vadd.f32 %v1647_v19, %v1633_v14  ;;  %v6006_v15 = vld [vmem:[#allocation10_spill] sm:$0xff]  ;;  %v6007_v19 = vld [vmem:[#allocation11_spill] sm:$0xff] }
 0x2a1   :  { %v6017_v30 = vld [vmem:[#allocation14_spill] sm:$0xff] }
 0x2a3   :  { %1885 = vmatpush.bf16.msrb.mxu0 %v4924_v34  ;;  %v1521_v55 = vpop.f32.mrf.mxu0  ;;  %v1508_v34 = vadd.f32 %v1507_v24, %v1494_v2 }
 0x2a4   :  { %v1536_v38 = vadd.f32 %v1535_v35, %v1521_v55 }
 0x2a5   :  { %v1701_v4 = vpop.f32.mrf.mxu3 }
 0x2a6   :  { %v1550_v41 = vadd.f32 %v1549_v6, %v1536_v38  ;;  %v3152_v6 = vld [vmem:[%s5890_s28 + $0xd0] sm:$0xf] }
 0x2a7   :  { %1886 = vmatpush.bf16.msrb.mxu0 %v4933_v57  ;;  %v1661_v23 = vpop.f32.mrf.mxu1 }
 0x2a8   :  { %v1564_v3 = vadd.f32 %v1563_v58, %v1550_v41 }
 0x2ab   :  { %1887 = vmatpush.bf16.msrb.mxu0 %v4942_v32 }
 0x2bb   :  { %v1575_v60 = vpop.f32.mrf.mxu0 }
 0x2bc   :  { %v1576_v8 = vadd.f32 %v1575_v60, %v1562_v36  ;;  %v1662_v36 = vadd.f32 %v1661_v23, %v1648_v62  ;;  %v3293_v60 = vld [vmem:[%s5890_s28 + $0xe0] sm:$0xf0]  ;;  %v6011_v23 = vld [vmem:[#allocation13_spill] sm:$0xff] }
 0x2be   :  { %v1580_v1 = vmax.f32 %v1506_v53, %v1576_v8  ;;  %v3153_v8 = vor.u32 %v3293_v60, %v3152_v6 }
 0x2c0   :  { %v1582_v57 = vmul.f32 %v4189_v56, %v1580_v1  ;;  %1874 = vmatmul.bf16.vlgmr.msrb.gmra.mxu3 %v3153_v8 }
 0x2c1   :  { %1994 = vmatpush.bf16.msrb.mxu3 %v4359_v20  ;;  %v3154_v20 = vld [vmem:[%s5890_s28 + $0xe4] sm:$0xf0] }
 0x2c2   :  { %v1584_v48 = vadd.f32 %v4196_v52, %v1582_v57 }
 0x2c3   :  { %v1577_v27 = vpop.f32.mrf.mxu0 }
 0x2c4   :  { %v1578_v32 = vadd.f32 %v1577_v27, %v1564_v3  ;;  %v1586_v9 = vmax.f32 %v1584_v48, 0.0 }
 0x2c5   :  { %1995 = vmatpush.bf16.msrb.mxu3 %v4365_v46  ;;  %v3292_v46 = vld [vmem:[%s5890_s28 + $0xd8] sm:$0xf0] }
 0x2c6   :  { %v1581_v44 = vmax.f32 %v1508_v34, %v1578_v32  ;;  %v5071_v34 = vld [vmem:[%s5754_s3] ss:$0 sm:$0xff] }
 0x2c8   :  { %v1583_v47 = vmul.f32 %v4189_v56, %v1581_v44  ;;  %v1687_v56 = vpop.f32.mrf.mxu2 }
 0x2c9   :  { %1996 = vmatpush.bf16.msrb.mxu3 %v4371_v42  ;;  %v6009_v42 = vld [vmem:[#allocation15_spill] sm:$0xff] }
 0x2ca   :  { %v1585_v10 = vadd.f32 %v4196_v52, %v1583_v47  ;;  %v5085_v47 = vld [vmem:[%s5755_s4] ss:$0 sm:$0xff] }
 0x2cc   :  { %v1587_v11 = vmax.f32 %v1585_v10, 0.0 }
 0x2cd   :  { %1997 = vmatpush.bf16.msrb.mxu3 %v4379_v40  ;;  %v3160_v40 = vld [vmem:[%s5890_s28 + $0xd8] sm:$0xf] }
 0x2ce   :  { %v1588_v5 = vpack.c.bf16 %v1587_v11, %v1586_v9  ;;  %v3144_v11 = vld [vmem:[%s5890_s28 + $0xc8] sm:$0xf] }
 0x2cf   :  { %v3145_v37 = vor.u32 %v3292_v46, %v3144_v11 }
 0x2d0   :  { %3135 = vmatmul.msk.bf16.vlgmr.msra.gmra.mxu0 %vm1114_vm0, %v1588_v5 }
 0x2d1   :  { %1936 = vmatpush.bf16.msra.mxu0 %v4949_v29  ;;  %v1689_v29 = vpop.f32.mrf.mxu2 }
 0x2d5   :  { %1937 = vmatpush.bf16.msra.mxu0 %v4958_v59  ;;  %v1703_v59 = vpop.f32.mrf.mxu3 }
 0x2d9   :  { %1938 = vmatpush.bf16.msra.mxu0 %v4967_v45  ;;  %v1715_v45 = vpop.f32.mrf.mxu1 }
 0x2da   :  { %v1716_v55 = vadd.f32 %v1715_v45, %v1701_v4  ;;  %v6016_v45 = vld [vmem:[#allocation46_spill] sm:$0xff] }
 0x2db   :  { %v1673_v52 = vpop.f32.mrf.mxu0 }
 0x2dc   :  { %v1674_v28 = vadd.f32 %v1673_v52, %v1660_v33  ;;  %v6010_v52 = vld [vmem:[#allocation18_spill] sm:$0xff]  ;;  %v6019_v33 = vld [vmem:[#allocation17_spill] sm:$0xff] }
 0x2dd   :  { %1939 = vmatpush.bf16.msra.mxu0 %v4976_v25  ;;  %v1743_v25 = vpop.f32.mrf.mxu2  ;;  %v1757_v43 = vpop.f32.mrf.mxu3 }
 0x2de   :  { %v1688_v21 = vadd.f32 %v1687_v56, %v1674_v28  ;;  %v6008_v56 = vld [vmem:[#allocation12_spill] sm:$0xff] }
 0x2e1   :  { %1940 = vmatpush.bf16.msra.mxu0 %v4986_v12  ;;  %v1717_v35 = vpop.f32.mrf.mxu1 }
 0x2e2   :  { %v1718_v38 = vadd.f32 %v1717_v35, %v1703_v59  ;;  %v6015_v59 = vld [vmem:[#allocation44_spill] sm:$0xff] }
 0x2e3   :  { %v1675_v24 = vpop.f32.mrf.mxu0 }
 0x2e4   :  { %v1676_v53 = vadd.f32 %v1675_v24, %v1662_v36  ;;  %v6014_v24 = vld [vmem:[#allocation43_spill] sm:$0xff] }
 0x2e5   :  { %1941 = vmatpush.bf16.msra.mxu0 %v4996_v22  ;;  %v1745_v2 = vpop.f32.mrf.mxu2  ;;  %v1759_v3 = vpop.f32.mrf.mxu3 }
 0x2e6   :  { %v1690_v27 = vadd.f32 %v1689_v29, %v1676_v53  ;;  %v6013_v29 = vld [vmem:[#allocation19_spill] sm:$0xff] }
 0x2e9   :  { %1942 = vmatpush.bf16.msra.mxu0 %v5004_v63  ;;  %v3290_v63 = vld [vmem:[%s5890_s28 + $0xcc] sm:$0xf] }
 0x2ed   :  { %1943 = vmatpush.bf16.msra.mxu0 %v5012_v13  ;;  %v3146_v13 = vld [vmem:[%s5890_s28 + $0xdc] sm:$0xf0] }
 0x2ee   :  { %v3149_v7 = vor.u32 %v3290_v63, %v3146_v13 }
 0x2f0   :  { %1860 = vmatmul.bf16.vlgmr.msrb.gmra.mxu2 %v3149_v7  ;;  %1930 = vmatmul.bf16.vlgmr.msra.gmra.mxu3 %v3149_v7 }
 0x2f1   :  { %1964 = vmatpush.bf16.msrb.mxu2 %v4656_v61  ;;  %v3291_v61 = vld [vmem:[%s5890_s28 + $0xd4] sm:$0xf] }
 0x2f2   :  { %v3157_v48 = vor.u32 %v3291_v61, %v3154_v20 }
 0x2f4   :  { %1888 = vmatmul.bf16.vlgmr.msrb.gmra.mxu0 %v3157_v48 }
 0x2f5   :  { %1965 = vmatpush.bf16.msrb.mxu2 %v4676_v39 }
 0x2f9   :  { %1966 = vmatpush.bf16.msrb.mxu2 %v4707_v18  ;;  %v6005_v18 = vld [vmem:[#allocation45_spill] sm:$0xff] }
 0x2fb   :  { %v1729_v31 = vpop.f32.mrf.mxu0 }
 0x2fc   :  { %v1730_v12 = vadd.f32 %v1729_v31, %v1716_v55  ;;  %v6020_v55 = vld [vmem:[#allocation24_spill] sm:$0xff]  ;;  %v6022_v31 = vld [vmem:[#allocation21_spill] sm:$0xff] }
 0x2fd   :  { %1967 = vmatpush.bf16.msrb.mxu2 %v4734_v17  ;;  %v3294_v17 = vld [vmem:[%s5890_s28 + $0xe8] sm:$0xf0] }
 0x2fe   :  { %v1744_v54 = vadd.f32 %v1743_v25, %v1730_v12  ;;  %v3161_v4 = vor.u32 %v3294_v17, %v3160_v40  ;;  %v6021_v25 = vld [vmem:[#allocation20_spill] sm:$0xff] }
 0x300   :  { %v1758_v22 = vadd.f32 %v1757_v43, %v1744_v54  ;;  %1916 = vmatmul.bf16.vlgmr.msra.gmra.mxu2 %v3145_v37 }
 0x301   :  { %1968 = vmatpush.bf16.msrb.mxu2 %v6005_v18 }
 0x302   :  { %v1762_v41 = vmax.f32 %v1688_v21, %v1758_v22 }
 0x303   :  { %v1731_v0 = vpop.f32.mrf.mxu0 }
 0x304   :  { %v1732_v58 = vadd.f32 %v1731_v0, %v1718_v38  ;;  %v1764_v57 = vmul.f32 %v5071_v34, %v1762_v41  ;;  %1944 = vmatmul.bf16.vlgmr.msra.gmra.mxu0 %v3153_v8 }
 0x305   :  { %1969 = vmatpush.bf16.msrb.mxu2 %v6007_v19 }
 0x306   :  { %v1746_v1 = vadd.f32 %v1745_v2, %v1732_v58  ;;  %v1766_v10 = vadd.f32 %v5085_v47, %v1764_v57 }
 0x308   :  { %v1760_v32 = vadd.f32 %v1759_v3, %v1746_v1  ;;  %v1768_v5 = vmax.f32 %v1766_v10, 0.0 }
 0x309   :  { %1970 = vmatpush.bf16.msrb.mxu2 %v4813_v49  ;;  %v6012_v49 = vld [vmem:[#allocation16_spill] sm:$0xff] }
 0x30a   :  { %v1763_v44 = vmax.f32 %v1690_v27, %v1760_v32 }
 0x30c   :  { %v1765_v39 = vmul.f32 %v5071_v34, %v1763_v44 }
 0x30d   :  { %1971 = vmatpush.bf16.msrb.mxu2 %v4832_v51  ;;  %v6018_v51 = vld [vmem:[#allocation22_spill] sm:$0xff] }
 0x30e   :  { %v1767_v9 = vadd.f32 %v5085_v47, %v1765_v39 }
 0x310   :  { %v1769_v16 = vmax.f32 %v1767_v9, 0.0  ;;  %1972 = vmatmul.bf16.vlgmr.msrb.gmra.mxu2 %v3161_v4 }
 0x312   :  { %v1770_v14 = vpack.c.bf16 %v1769_v16, %v1768_v5 }
 0x314   :  { %3134 = vmatmul.msk.bf16.vlgmr.msrb.gmra.mxu1 %vm1114_vm0, %v1770_v14 }
 0x315   :  { %1894 = vmatpush.bf16.msrb.mxu1 %v6006_v15 }
 0x319   :  { %1895 = vmatpush.bf16.msrb.mxu1 %v6008_v56 }
 0x31d   :  { %1896 = vmatpush.bf16.msrb.mxu1 %v6009_v42 }
 0x321   :  { %1897 = vmatpush.bf16.msrb.mxu1 %v6010_v52 }
 0x324   :  { %1846 = vmatmul.bf16.vlgmr.msra.gmra.mxu1 %v3145_v37 }
 0x325   :  { %1898 = vmatpush.bf16.msrb.mxu1 %v6011_v23 }
 0x329   :  { %1899 = vmatpush.bf16.msrb.mxu1 %v6012_v49 }
 0x32d   :  { %1900 = vmatpush.bf16.msrb.mxu1 %v6013_v29 }
 0x331   :  { %1901 = vmatpush.bf16.msrb.mxu1 %v6014_v24  ;;  %v6023_v24 = vld [vmem:[#allocation7_spill] sm:$0xff] }
 0x334   :  { %1902 = vmatmul.bf16.vlgmr.msrb.gmra.mxu1 %v3161_v4 }
 0x335   :  { %1950 = vmatpush.bf16.msra.mxu1 %v6015_v59  ;;  %v6024_v59 = vld [vmem:[#allocation6_spill] sm:$0xff] }
 0x339   :  { %1951 = vmatpush.bf16.msra.mxu1 %v6016_v45  ;;  %v1169_v45 = vadd.f32 %v6024_v59, %v6023_v24  ;;  %v2243_v24 = vld [vmem:[%s5759_s8 + $0x3b0] sm:$0xff]  ;;  %v2145_v59 = vld [vmem:[%s5759_s8 + $0xa0] sm:$0xff] }
 0x33d   :  { %1952 = vmatpush.bf16.msra.mxu1 %v6017_v30 }
 0x341   :  { %1953 = vmatpush.bf16.msra.mxu1 %v6018_v51  ;;  %v1405_v51 = vadd.f32 %v5027_v50, %v1169_v45  ;;  %v2177_v45 = vld [vmem:[%s5759_s8 + $0x1a0] sm:$0xff] }
 0x343   :  { %v1875_v13 = vpop.f32.mrf.mxu3 }
 0x345   :  { %1954 = vmatpush.bf16.msra.mxu1 %v6019_v33 }
 0x349   :  { %1955 = vmatpush.bf16.msra.mxu1 %v6020_v55  ;;  %v3298_v55 = vld [vmem:[%s5757_s6] ss:$0 sm:$0xff]  ;;  %s3386_s6 = smov 64  }
 0x34b   :  { %v1877_v38 = vpop.f32.mrf.mxu3 }
 0x34d   :  { %1956 = vmatpush.bf16.msra.mxu1 %v6021_v25  ;;  %v1800_v12 = vpop.f32.mrf.mxu0 }
 0x351   :  { %1957 = vmatpush.bf16.msra.mxu1 %v6022_v31  ;;  %v6025_v31 = vld [vmem:[#allocation9_spill] sm:$0xff] }
 0x354   :  { %1958 = vmatmul.bf16.vlgmr.msra.gmra.mxu1 %v3157_v48 }
 0x355   :  { %v1802_v28 = vpop.f32.mrf.mxu0 }
 0x371   :  { %v1889_v21 = vpop.f32.mrf.mxu0 }
 0x373   :  { %v1861_v63 = vpop.f32.mrf.mxu2  ;;  %v1931_v8 = vpop.f32.mrf.mxu3 }
 0x379   :  { %v1891_v0 = vpop.f32.mrf.mxu0 }
 0x37b   :  { %v1863_v36 = vpop.f32.mrf.mxu2  ;;  %v1933_v57 = vpop.f32.mrf.mxu3 }
 0x381   :  { %v1945_v2 = vpop.f32.mrf.mxu0 }
 0x383   :  { %v1917_v6 = vpop.f32.mrf.mxu2 }
 0x384   :  { %v1932_v1 = vadd.f32 %v1931_v8, %v1917_v6 }
 0x386   :  { %v1946_v27 = vadd.f32 %v1945_v2, %v1932_v1 }
 0x389   :  { %v1947_v9 = vpop.f32.mrf.mxu0 }
 0x38b   :  { %v1919_v53 = vpop.f32.mrf.mxu2 }
 0x38c   :  { %v1934_v10 = vadd.f32 %v1933_v57, %v1919_v53 }
 0x38e   :  { %v1948_v5 = vadd.f32 %v1947_v9, %v1934_v10  ;;  %v2155_v9 = vld [vmem:[%s5759_s8 + $0xf0] sm:$0xff] }
 0x38f   :  { %2269 = vmatpush.msrb.mxu0 %v2155_v9  ;;  %v2157_v9 = vld [vmem:[%s5759_s8 + $0x100] sm:$0xff] }
 0x391   :  { %v1783_v43 = vpop.f32.mrf.mxu1 }
 0x392   :  { %v1801_v62 = vadd.f32 %v1800_v12, %v1783_v43  ;;  %v6026_v12 = vld [vmem:[#allocation8_spill] sm:$0xff] }
 0x393   :  { %v1973_v32 = vpop.f32.mrf.mxu2  ;;  %v1171_v43 = vadd.f32 %v6026_v12, %v6025_v31  ;;  %v2173_v31 = vld [vmem:[%s5759_s8 + $0x180] sm:$0xff] }
 0x394   :  { %v2205_v12 = vld [vmem:[%s5759_s8 + $0x280] sm:$0xff] }
 0x399   :  { %v1785_v54 = vpop.f32.mrf.mxu1 }
 0x39a   :  { %v1803_v35 = vadd.f32 %v1802_v28, %v1785_v54 }
 0x39b   :  { %v1975_v15 = vpop.f32.mrf.mxu2 }
 0x3a1   :  { %v1847_v22 = vpop.f32.mrf.mxu1 }
 0x3a2   :  { %v1862_v58 = vadd.f32 %v1861_v63, %v1847_v22  ;;  %v1406_v22 = vadd.f32 %v5034_v26, %v1171_v43  ;;  %v2237_v43 = vld [vmem:[%s5759_s8 + $0x380] sm:$0xff] }
 0x3a4   :  { %v1876_v3 = vadd.f32 %v1875_v13, %v1862_v58 }
 0x3a6   :  { %v1890_v20 = vadd.f32 %v1889_v21, %v1876_v3 }
 0x3a9   :  { %v1849_v7 = vpop.f32.mrf.mxu1 }
 0x3aa   :  { %v1864_v44 = vadd.f32 %v1863_v36, %v1849_v7 }
 0x3ac   :  { %v1878_v11 = vadd.f32 %v1877_v38, %v1864_v44 }
 0x3ae   :  { %v1892_v14 = vadd.f32 %v1891_v0, %v1878_v11  ;;  %v2187_v11 = vld [vmem:[%s5759_s8 + $0x1f0] sm:$0xff] }
 0x3af   :  { %2289 = vmatpush.msra.mxu3 %v2187_v11  ;;  %v2189_v11 = vld [vmem:[%s5759_s8 + $0x200] sm:$0xff] }
 0x3b1   :  { %v1903_v60 = vpop.f32.mrf.mxu1 }
 0x3b2   :  { %v1904_v46 = vadd.f32 %v1903_v60, %v1890_v20 }
 0x3b9   :  { %v1905_v41 = vpop.f32.mrf.mxu1 }
 0x3ba   :  { %v1906_v19 = vadd.f32 %v1905_v41, %v1892_v14  ;;  %v2217_v14 = vld [vmem:[%s5759_s8 + $0x2e0] sm:$0xff] }
 0x3d1   :  { %v1959_v61 = vpop.f32.mrf.mxu1 }
 0x3d2   :  { %v1960_v48 = vadd.f32 %v1959_v61, %v1946_v27 }
 0x3d4   :  { %v1974_v39 = vadd.f32 %v1973_v32, %v1960_v48 }
 0x3d6   :  { %v1978_v16 = vmax.f32 %v1904_v46, %v1974_v39  ;;  %v2219_v46 = vld [vmem:[%s5759_s8 + $0x2f0] sm:$0xff] }
 0x3d7   :  { %2309 = vmatpush.msrb.mxu1 %v2219_v46  ;;  %v2221_v46 = vld [vmem:[%s5759_s8 + $0x300] sm:$0xff] }
 0x3d8   :  { %v1980_v56 = vmul.f32 %v5071_v34, %v1978_v16  ;;  %v2153_v16 = vld [vmem:[%s5759_s8 + $0xe0] sm:$0xff] }
 0x3d9   :  { %v1961_v37 = vpop.f32.mrf.mxu1  ;;  %2270 = vmatpush.msrb.mxu0 %v2153_v16  ;;  %2310 = vmatpush.msrb.mxu1 %v2217_v14  ;;  %v2188_v16 = vld [vmem:[%s5759_s8 + $0x1f8] sm:$0xff] }
 0x3da   :  { %v1962_v18 = vadd.f32 %v1961_v37, %v1948_v5  ;;  %v1982_v17 = vadd.f32 %v5085_v47, %v1980_v56  ;;  %v2251_v5 = vld [vmem:[%s5759_s8 + $0x3f0] sm:$0xff]  ;;  %v2185_v37 = vld [vmem:[%s5759_s8 + $0x1e0] sm:$0xff]  ;;  %v2252_v14 = vld [vmem:[%s5759_s8 + $0x3f8] sm:$0xff] }
 0x3db   :  { %2329 = vmatpush.msra.mxu2 %v2251_v5  ;;  %2290 = vmatpush.msra.mxu3 %v2185_v37  ;;  %v2215_v56 = vld [vmem:[%s5759_s8 + $0x2d0] sm:$0xff]  ;;  %v2156_v5 = vld [vmem:[%s5759_s8 + $0xf8] sm:$0xff] }
 0x3dc   :  { %v1976_v42 = vadd.f32 %v1975_v15, %v1962_v18  ;;  %v1984_v23 = vmax.f32 %v1982_v17, 0.0  ;;  %v2249_v18 = vld [vmem:[%s5759_s8 + $0x3e0] sm:$0xff]  ;;  %v2151_v15 = vld [vmem:[%s5759_s8 + $0xd0] sm:$0xff]  ;;  %2311 = vmatpush.msrb.mxu1 %v2215_v56  ;;  %v2220_v37 = vld [vmem:[%s5759_s8 + $0x2f8] sm:$0xff] }
 0x3dd   :  { %2330 = vmatpush.msra.mxu2 %v2249_v18  ;;  %v2181_v17 = vld [vmem:[%s5759_s8 + $0x1c0] sm:$0xff]  ;;  %2271 = vmatpush.msrb.mxu0 %v2151_v15  ;;  %v2154_v18 = vld [vmem:[%s5759_s8 + $0xe8] sm:$0xff] }
 0x3de   :  { %v1979_v40 = vmax.f32 %v1906_v19, %v1976_v42  ;;  %v2183_v19 = vld [vmem:[%s5759_s8 + $0x1d0] sm:$0xff]  ;;  %v2186_v15 = vld [vmem:[%s5759_s8 + $0x1e8] sm:$0xff] }
 0x3df   :  { %v2247_v42 = vld [vmem:[%s5759_s8 + $0x3d0] sm:$0xff]  ;;  %2291 = vmatpush.msra.mxu3 %v2183_v19  ;;  %v2218_v19 = vld [vmem:[%s5759_s8 + $0x2e8] sm:$0xff] }
 0x3e0   :  { %v1981_v52 = vmul.f32 %v5071_v34, %v1979_v40  ;;  %v3299_v34 = vld [vmem:[%s5758_s7] ss:$0 sm:$0xff]  ;;  %2331 = vmatpush.msra.mxu2 %v2247_v42  ;;  %v2250_v56 = vld [vmem:[%s5759_s8 + $0x3e8] sm:$0xff]  ;;  %v2152_v42 = vld [vmem:[%s5759_s8 + $0xd8] sm:$0xff] }
 0x3e1   :  { %v2149_v40 = vld [vmem:[%s5759_s8 + $0xc0] sm:$0xff]  ;;  %2292 = vmatpush.msra.mxu3 %v2181_v17  ;;  %v2216_v17 = vld [vmem:[%s5759_s8 + $0x2d8] sm:$0xff] }
 0x3e2   :  { %v1983_v4 = vadd.f32 %v5085_v47, %v1981_v52  ;;  %v2213_v52 = vld [vmem:[%s5759_s8 + $0x2c0] sm:$0xff]  ;;  %2272 = vmatpush.msrb.mxu0 %v2149_v40  ;;  %v2184_v40 = vld [vmem:[%s5759_s8 + $0x1d8] sm:$0xff] }
 0x3e3   :  { %2312 = vmatpush.msrb.mxu1 %v2213_v52  ;;  %v2248_v52 = vld [vmem:[%s5759_s8 + $0x3d8] sm:$0xff] }
 0x3e4   :  { %v1985_v49 = vmax.f32 %v1983_v4, 0.0  ;;  %v2245_v4 = vld [vmem:[%s5759_s8 + $0x3c0] sm:$0xff] }
 0x3e5   :  { %2332 = vmatpush.msra.mxu2 %v2245_v4  ;;  %v2150_v4 = vld [vmem:[%s5759_s8 + $0xc8] sm:$0xff] }
 0x3e6   :  { %v1986_v29 = vpack.c.bf16 %v1985_v49, %v1984_v23  ;;  %v2147_v23 = vld [vmem:[%s5759_s8 + $0xb0] sm:$0xff] }
 0x3e7   :  { %v2179_v49 = vld [vmem:[%s5759_s8 + $0x1b0] sm:$0xff]  ;;  %2273 = vmatpush.msrb.mxu0 %v2147_v23  ;;  %2333 = vmatpush.msra.mxu2 %v2243_v24  ;;  %v2182_v23 = vld [vmem:[%s5759_s8 + $0x1c8] sm:$0xff]  ;;  %v2148_v24 = vld [vmem:[%s5759_s8 + $0xb8] sm:$0xff] }
 0x3e8   :  { %3162 = vmatmul.msk.bf16.vlgmr.msrb.gmra.mxu3 %vm1114_vm0, %v1986_v29  ;;  %v2211_v29 = vld [vmem:[%s5759_s8 + $0x2b0] sm:$0xff] }
 0x3e9   :  { %2293 = vmatpush.msra.mxu3 %v2179_v49  ;;  %2313 = vmatpush.msrb.mxu1 %v2211_v29  ;;  %v2214_v49 = vld [vmem:[%s5759_s8 + $0x2c8] sm:$0xff] }
 0x3ea   :  { %2274 = vmatpush.msrb.mxu0 %v2145_v59  ;;  %v2246_v29 = vld [vmem:[%s5759_s8 + $0x3c8] sm:$0xff]  ;;  %v2180_v59 = vld [vmem:[%s5759_s8 + $0x1b8] sm:$0xff] }
 0x3eb   :  { %2294 = vmatpush.msra.mxu3 %v2177_v45  ;;  %v2212_v45 = vld [vmem:[%s5759_s8 + $0x2b8] sm:$0xff] }
 0x46b   :  { %v1999_v30 = vpop.f32.mrf.mxu3 }
 0x46c   :  { %v2004_v33 = vadd.f32 %v1999_v30, %v1801_v62  ;;  %v2209_v30 = vld [vmem:[%s5759_s8 + $0x2a0] sm:$0xff] }
 0x46d   :  { %2314 = vmatpush.msrb.mxu1 %v2209_v30  ;;  %v2244_v30 = vld [vmem:[%s5759_s8 + $0x3b8] sm:$0xff] }
 0x46e   :  { %v2006_v25 = vmax.f32 %v1405_v51, %v2004_v33  ;;  %v2241_v51 = vld [vmem:[%s5759_s8 + $0x3a0] sm:$0xff]  ;;  %v2143_v33 = vld [vmem:[%s5759_s8 + $0x90] sm:$0xff] }
 0x46f   :  { %2334 = vmatpush.msra.mxu2 %v2241_v51  ;;  %2275 = vmatpush.msrb.mxu0 %v2143_v33  ;;  %v2146_v51 = vld [vmem:[%s5759_s8 + $0xa8] sm:$0xff] }
 0x470   :  { %v2012_v47 = vmul.f32 %v3298_v55, %v2006_v25  ;;  %v2207_v25 = vld [vmem:[%s5759_s8 + $0x290] sm:$0xff]  ;;  %v2178_v33 = vld [vmem:[%s5759_s8 + $0x1a8] sm:$0xff] }
 0x471   :  { %2315 = vmatpush.msrb.mxu1 %v2207_v25  ;;  %v2242_v25 = vld [vmem:[%s5759_s8 + $0x3a8] sm:$0xff] }
 0x472   :  { %v2018_v28 = vadd.f32 %v3299_v34, %v2012_v47  ;;  %v2141_v47 = vld [vmem:[%s5759_s8 + $0x80] sm:$0xff] }
 0x473   :  { %v2001_v54 = vpop.f32.mrf.mxu3  ;;  %2276 = vmatpush.msrb.mxu0 %v2141_v47  ;;  %2316 = vmatpush.msrb.mxu1 %v2205_v12  ;;  %v2176_v47 = vld [vmem:[%s5759_s8 + $0x198] sm:$0xff] }
 0x474   :  { %v2020_v63 = vmax.f32 %v2018_v28, 0.0  ;;  %v2005_v50 = vadd.f32 %v2001_v54, %v1803_v35  ;;  %v2139_v28 = vld [vmem:[%s5759_s8 + $0x70] sm:$0xff]  ;;  %v2240_v12 = vld [vmem:[%s5759_s8 + $0x398] sm:$0xff] }
 0x475   :  { %v2171_v54 = vld [vmem:[%s5759_s8 + $0x170] sm:$0xff]  ;;  %2277 = vmatpush.msrb.mxu0 %v2139_v28  ;;  %v2174_v28 = vld [vmem:[%s5759_s8 + $0x188] sm:$0xff] }
 0x476   :  { %2032 = vst.sshfl [vmem:[#allocation1] sm:$0xff pattern:$0x73625140] %v2020_v63  ;;  %v2007_v62 = vmax.f32 %v1406_v22, %v2005_v50  ;;  %v3163_v13 = vrot.slane %v2020_v63, 9  ;;  %v2235_v50 = vld [vmem:[%s5759_s8 + $0x370] sm:$0xff] }
 0x477   :  { %2023 = vst.msk [vmem:[#allocation2] sm:$0x1] %vm2022_vm1, %v2020_v63 }
 0x478   :  { %v2013_v7 = vmul.f32 %v3298_v55, %v2007_v62  ;;  %2027 = vrot.lane.b32.xlu0 %v3163_v13, %s3386_s6  ;;  %v2175_v55 = vld [vmem:[%s5759_s8 + $0x190] sm:$0xff]  ;;  %v2137_v62 = vld [vmem:[%s5759_s8 + $0x60] sm:$0xff] }
 0x479   :  { %2295 = vmatpush.msra.mxu3 %v2175_v55  ;;  %v2169_v13 = vld [vmem:[%s5759_s8 + $0x160] sm:$0xff]  ;;  %2278 = vmatpush.msrb.mxu0 %v2137_v62  ;;  %v2210_v55 = vld [vmem:[%s5759_s8 + $0x2a8] sm:$0xff]  ;;  %v2204_v62 = vld [vmem:[%s5759_s8 + $0x278] sm:$0xff] }
 0x47a   :  { %v2019_v36 = vadd.f32 %v3299_v34, %v2013_v7  ;;  %v2239_v34 = vld [vmem:[%s5759_s8 + $0x390] sm:$0xff]  ;;  %v2201_v7 = vld [vmem:[%s5759_s8 + $0x260] sm:$0xff] }
 0x47b   :  { %2335 = vmatpush.msra.mxu2 %v2239_v34  ;;  %2296 = vmatpush.msra.mxu3 %v2173_v31  ;;  %v2144_v34 = vld [vmem:[%s5759_s8 + $0x98] sm:$0xff] }
 0x47c   :  { %v2021_v21 = vmax.f32 %v2019_v36, 0.0  ;;  %v2233_v36 = vld [vmem:[%s5759_s8 + $0x360] sm:$0xff]  ;;  %v2208_v31 = vld [vmem:[%s5759_s8 + $0x298] sm:$0xff] }
 0x47d   :  { %v2034_v38 = vld [vmem:[#allocation1 + $0x1] ss:$4 sm:$0xff]  ;;  %2336 = vmatpush.msra.mxu2 %v2237_v43  ;;  %2297 = vmatpush.msra.mxu3 %v2171_v54 }
 0x47e   :  { %2037 = vst.sshfl [vmem:[#allocation1] sm:$0xff pattern:$0x73625140] %v2020_v63  ;;  %v3167_v6 = vrot.slane %v2021_v21, 9  ;;  %v2142_v43 = vld [vmem:[%s5759_s8 + $0x88] sm:$0xff] }
 0x47f   :  { %2074 = vst.msk [vmem:[#allocation2 + $0x1] sm:$0x1] %vm2022_vm1, %v2021_v21  ;;  %2337 = vmatpush.msra.mxu2 %v2235_v50  ;;  %2298 = vmatpush.msra.mxu3 %v2169_v13  ;;  %v2206_v54 = vld [vmem:[%s5759_s8 + $0x288] sm:$0xff]  ;;  %v2172_v50 = vld [vmem:[%s5759_s8 + $0x178] sm:$0xff] }
 0x480   :  { %2078 = vrot.lane.b32.xlu2 %v3167_v6, %s3386_s6  ;;  %2036 = vst.msk [vmem:[#allocation2 + $0x2] sm:$0x1] %vm2022_vm1, %v2034_v38  ;;  %v2167_v38 = vld [vmem:[%s5759_s8 + $0x150] sm:$0xff]  ;;  %v2236_v13 = vld [vmem:[%s5759_s8 + $0x378] sm:$0xff] }
 0x481   :  { %v2199_v6 = vld [vmem:[%s5759_s8 + $0x250] sm:$0xff]  ;;  %2338 = vmatpush.msra.mxu2 %v2233_v36  ;;  %2299 = vmatpush.msra.mxu3 %v2167_v38  ;;  %v2170_v36 = vld [vmem:[%s5759_s8 + $0x168] sm:$0xff] }
 0x482   :  { %v2234_v38 = vld [vmem:[%s5759_s8 + $0x368] sm:$0xff] }
 0x485   :  { %v2039_v26 = vld [vmem:[#allocation1 + $0x1] ss:$4 sm:$0xff] }
 0x486   :  { %v3164_v35 = vrot.slane %v2039_v26, 9  ;;  %2046 = vst.sshfl [vmem:[#allocation1] sm:$0xff pattern:$0x73625140] %v2020_v63  ;;  %v2231_v26 = vld [vmem:[%s5759_s8 + $0x350] sm:$0xff] }
 0x487   :  { %2339 = vmatpush.msra.mxu2 %v2231_v26  ;;  %v2168_v26 = vld [vmem:[%s5759_s8 + $0x158] sm:$0xff] }
 0x488   :  { %2042 = vrot.lane.b32.xlu0 %v3164_v35, %s3386_s6 }
 0x48d   :  { %v2048_v60 = vld [vmem:[#allocation1 + $0x2] ss:$4 sm:$0xff] }
 0x48e   :  { %2051 = vst.sshfl [vmem:[#allocation1] sm:$0xff pattern:$0x73625140] %v2020_v63 }
 0x48f   :  { %2050 = vst.msk [vmem:[#allocation2 + $0x4] sm:$0x1] %vm2022_vm1, %v2048_v60 }
 0x495   :  { %v2053_v0 = vld [vmem:[#allocation1 + $0x2] ss:$4 sm:$0xff] }
 0x496   :  { %v3165_v8 = vrot.slane %v2053_v0, 9  ;;  %2060 = vst.sshfl [vmem:[#allocation1] sm:$0xff pattern:$0x73625140] %v2020_v63  ;;  %v2133_v0 = vld [vmem:[%s5759_s8 + $0x40] sm:$0xff] }
 0x498   :  { %2056 = vrot.lane.b32.xlu1 %v3165_v8, %s3386_s6  ;;  %v2165_v8 = vld [vmem:[%s5759_s8 + $0x140] sm:$0xff] }
 0x499   :  { %2300 = vmatpush.msra.mxu3 %v2165_v8  ;;  %v2166_v8 = vld [vmem:[%s5759_s8 + $0x148] sm:$0xff] }
 0x49d   :  { %v2062_v53 = vld [vmem:[#allocation1 + $0x3] ss:$4 sm:$0xff] }
 0x49e   :  { %2065 = vst.sshfl [vmem:[#allocation1] sm:$0xff pattern:$0x73625140] %v2020_v63  ;;  %v2203_v63 = vld [vmem:[%s5759_s8 + $0x270] sm:$0xff] }
 0x49f   :  { %2064 = vst.msk [vmem:[#allocation2 + $0x6] sm:$0x1] %vm2022_vm1, %v2062_v53  ;;  %2317 = vmatpush.msrb.mxu1 %v2203_v63  ;;  %v2197_v53 = vld [vmem:[%s5759_s8 + $0x240] sm:$0xff]  ;;  %v2140_v63 = vld [vmem:[%s5759_s8 + $0x78] sm:$0xff] }
 0x4a1   :  { %2318 = vmatpush.msrb.mxu1 %v2201_v7  ;;  %v2138_v7 = vld [vmem:[%s5759_s8 + $0x68] sm:$0xff] }
 0x4a3   :  { %2319 = vmatpush.msrb.mxu1 %v2199_v6  ;;  %v2136_v6 = vld [vmem:[%s5759_s8 + $0x58] sm:$0xff] }
 0x4a5   :  { %v2067_v41 = vld [vmem:[#allocation1 + $0x3] ss:$4 sm:$0xff]  ;;  %2320 = vmatpush.msrb.mxu1 %v2197_v53 }
 0x4a6   :  { %v3166_v58 = vrot.slane %v2067_v41, 9  ;;  %2082 = vst.sshfl [vmem:[#allocation1] sm:$0xff pattern:$0x73625140] %v2021_v21  ;;  %v2229_v41 = vld [vmem:[%s5759_s8 + $0x340] sm:$0xff] }
 0x4a7   :  { %2340 = vmatpush.msra.mxu2 %v2229_v41  ;;  %v2198_v41 = vld [vmem:[%s5759_s8 + $0x248] sm:$0xff] }
 0x4a8   :  { %2070 = vrot.lane.b32.xlu1 %v3166_v58, %s3386_s6  ;;  %v2131_v58 = vld [vmem:[%s5759_s8 + $0x30] sm:$0xff] }
 0x4ad   :  { %v2084_v2 = vld [vmem:[#allocation1 + $0x1] ss:$4 sm:$0xff] }
 0x4ae   :  { %2087 = vst.sshfl [vmem:[#allocation1] sm:$0xff pattern:$0x73625140] %v2021_v21 }
 0x4af   :  { %2086 = vst.msk [vmem:[#allocation2 + $0x3] sm:$0x1] %vm2022_vm1, %v2084_v2  ;;  %v2163_v2 = vld [vmem:[%s5759_s8 + $0x130] sm:$0xff] }
 0x4b0   :  { %2301 = vmatpush.msra.mxu3 %v2163_v2  ;;  %v2132_v2 = vld [vmem:[%s5759_s8 + $0x38] sm:$0xff] }
 0x4b5   :  { %v2089_v1 = vld [vmem:[#allocation1 + $0x1] ss:$4 sm:$0xff] }
 0x4b6   :  { %v3168_v3 = vrot.slane %v2089_v1, 9  ;;  %2096 = vst.sshfl [vmem:[#allocation1] sm:$0xff pattern:$0x73625140] %v2021_v21  ;;  %v2195_v1 = vld [vmem:[%s5759_s8 + $0x230] sm:$0xff] }
 0x4b7   :  { %2321 = vmatpush.msrb.mxu1 %v2195_v1  ;;  %v2164_v1 = vld [vmem:[%s5759_s8 + $0x138] sm:$0xff] }
 0x4b8   :  { %2092 = vrot.lane.b32.xlu2 %v3168_v3, %s3386_s6  ;;  %v2227_v3 = vld [vmem:[%s5759_s8 + $0x330] sm:$0xff] }
 0x4b9   :  { %2341 = vmatpush.msra.mxu2 %v2227_v3  ;;  %v2196_v3 = vld [vmem:[%s5759_s8 + $0x238] sm:$0xff] }
 0x4bd   :  { %v2098_v27 = vld [vmem:[#allocation1 + $0x2] ss:$4 sm:$0xff] }
 0x4be   :  { %2101 = vst.sshfl [vmem:[#allocation1] sm:$0xff pattern:$0x73625140] %v2021_v21 }
 0x4bf   :  { %2100 = vst.msk [vmem:[#allocation2 + $0x5] sm:$0x1] %vm2022_vm1, %v2098_v27  ;;  %v2129_v27 = vld [vmem:[%s5759_s8 + $0x20] sm:$0xff] }
 0x4c5   :  { %v2103_v57 = vld [vmem:[#allocation1 + $0x2] ss:$4 sm:$0xff] }
 0x4c6   :  { %v3169_v32 = vrot.slane %v2103_v57, 9  ;;  %2110 = vst.sshfl [vmem:[#allocation1] sm:$0xff pattern:$0x73625140] %v2021_v21  ;;  %v2161_v57 = vld [vmem:[%s5759_s8 + $0x120] sm:$0xff] }
 0x4c7   :  { %2302 = vmatpush.msra.mxu3 %v2161_v57  ;;  %v2130_v57 = vld [vmem:[%s5759_s8 + $0x28] sm:$0xff] }
 0x4c8   :  { %2106 = vrot.lane.b32.xlu0 %v3169_v32, %s3386_s6  ;;  %v2193_v32 = vld [vmem:[%s5759_s8 + $0x220] sm:$0xff] }
 0x4c9   :  { %2322 = vmatpush.msrb.mxu1 %v2193_v32  ;;  %v2162_v32 = vld [vmem:[%s5759_s8 + $0x128] sm:$0xff] }
 0x4cd   :  { %v2112_v61 = vld [vmem:[#allocation1 + $0x3] ss:$4 sm:$0xff] }
 0x4ce   :  { %2115 = vst.sshfl [vmem:[#allocation1] sm:$0xff pattern:$0x73625140] %v2021_v21  ;;  %v2135_v21 = vld [vmem:[%s5759_s8 + $0x50] sm:$0xff] }
 0x4cf   :  { %2114 = vst.msk [vmem:[#allocation2 + $0x7] sm:$0x1] %vm2022_vm1, %v2112_v61  ;;  %2279 = vmatpush.msrb.mxu0 %v2135_v21  ;;  %v2225_v61 = vld [vmem:[%s5759_s8 + $0x320] sm:$0xff]  ;;  %v2202_v21 = vld [vmem:[%s5759_s8 + $0x268] sm:$0xff] }
 0x4d0   :  { %2342 = vmatpush.msra.mxu2 %v2225_v61  ;;  %v2194_v61 = vld [vmem:[%s5759_s8 + $0x228] sm:$0xff] }
 0x4d1   :  { %2280 = vmatpush.msrb.mxu0 %v2133_v0  ;;  %v2134_v0 = vld [vmem:[%s5759_s8 + $0x48] sm:$0xff] }
 0x4d3   :  { %2281 = vmatpush.msrb.mxu0 %v2131_v58  ;;  %v2230_v58 = vld [vmem:[%s5759_s8 + $0x348] sm:$0xff] }
 0x4d5   :  { %v2117_v20 = vld [vmem:[#allocation1 + $0x3] ss:$4 sm:$0xff]  ;;  %2282 = vmatpush.msrb.mxu0 %v2129_v27 }
 0x4d6   :  { %v3170_v44 = vrot.slane %v2117_v20, 9  ;;  %v2127_v20 = vld [vmem:[%s5759_s8 + $0x10] sm:$0xff]  ;;  %v2228_v27 = vld [vmem:[%s5759_s8 + $0x338] sm:$0xff] }
 0x4d7   :  { %2283 = vmatpush.msrb.mxu0 %v2127_v20  ;;  %v2226_v20 = vld [vmem:[%s5759_s8 + $0x328] sm:$0xff] }
 0x4d8   :  { %2120 = vrot.lane.b32.xlu1 %v3170_v44, %s3386_s6  ;;  %v2159_v44 = vld [vmem:[%s5759_s8 + $0x110] sm:$0xff] }
 0x4d9   :  { %2303 = vmatpush.msra.mxu3 %v2159_v44  ;;  %v2128_v44 = vld [vmem:[%s5759_s8 + $0x18] sm:$0xff] }
 0x4da   :  { %v2079_v48 = vpop.permute.xlu2 %2078 }
 0x4db   :  { %2081 = vst.msk [vmem:[#allocation2 + $0x1] sm:$0x1] %vm2030_vm2, %v2079_v48  ;;  %v2191_v48 = vld [vmem:[%s5759_s8 + $0x210] sm:$0xff]  ;;  %2304 = vmatpush.msra.mxu3 %v2157_v9  ;;  %v2126_v9 = vld [vmem:[%s5759_s8 + $0x8] sm:$0xff] }
 0x4dc   :  { %2323 = vmatpush.msrb.mxu1 %v2191_v48  ;;  %v2160_v48 = vld [vmem:[%s5759_s8 + $0x118] sm:$0xff] }
 0x4dd   :  { %2369 = vmatpush.msrb.mxu3 %v2188_v16 }
 0x4de   :  { %2324 = vmatpush.msrb.mxu1 %v2189_v11  ;;  %v2158_v11 = vld [vmem:[%s5759_s8 + $0x108] sm:$0xff] }
 0x4df   :  { %2370 = vmatpush.msrb.mxu3 %v2186_v15 }
 0x4e0   :  { %2389 = vmatpush.msra.mxu1 %v2220_v37 }
 0x4e1   :  { %2371 = vmatpush.msrb.mxu3 %v2184_v40  ;;  %v2445_v40 = vld [vmem:[%s5760_s10 + $0x70] sm:$0xff] }
 0x4e2   :  { %2390 = vmatpush.msra.mxu1 %v2218_v19 }
 0x4e3   :  { %2372 = vmatpush.msrb.mxu3 %v2182_v23  ;;  %v2443_v23 = vld [vmem:[%s5760_s10 + $0x60] sm:$0xff] }
 0x4e4   :  { %2391 = vmatpush.msra.mxu1 %v2216_v17  ;;  %v2461_v17 = vld [vmem:[%s5760_s10 + $0xf0] sm:$0xff] }
 0x4e5   :  { %2373 = vmatpush.msrb.mxu3 %v2180_v59  ;;  %v2440_v59 = vld [vmem:[%s5760_s10 + $0x48] sm:$0xff] }
 0x4e6   :  { %2392 = vmatpush.msra.mxu1 %v2214_v49  ;;  %v2459_v49 = vld [vmem:[%s5760_s10 + $0xe0] sm:$0xff] }
 0x4e7   :  { %2374 = vmatpush.msrb.mxu3 %v2178_v33  ;;  %v2437_v33 = vld [vmem:[%s5760_s10 + $0x30] sm:$0xff] }
 0x4e8   :  { %2393 = vmatpush.msra.mxu1 %v2212_v45  ;;  %v2439_v45 = vld [vmem:[%s5760_s10 + $0x40] sm:$0xff] }
 0x4e9   :  { %2375 = vmatpush.msrb.mxu3 %v2176_v47  ;;  %v2435_v47 = vld [vmem:[%s5760_s10 + $0x20] sm:$0xff] }
 0x4ea   :  { %v2028_v10 = vpop.permute.xlu0 %2027  ;;  %2394 = vmatpush.msra.mxu1 %v2210_v55  ;;  %v2457_v55 = vld [vmem:[%s5760_s10 + $0xd0] sm:$0xff] }
 0x4eb   :  { %2031 = vst.msk [vmem:[#allocation2] sm:$0x1] %vm2030_vm2, %v2028_v10  ;;  %v2223_v10 = vld [vmem:[%s5759_s8 + $0x310] sm:$0xff]  ;;  %2376 = vmatpush.msrb.mxu3 %v2174_v28 }
 0x4ec   :  { %2343 = vmatpush.msra.mxu2 %v2223_v10  ;;  %2395 = vmatpush.msra.mxu1 %v2208_v31  ;;  %v2192_v10 = vld [vmem:[%s5759_s8 + $0x218] sm:$0xff]  ;;  %v2455_v31 = vld [vmem:[%s5760_s10 + $0xc0] sm:$0xff]  ;;  %v2433_v28 = vld [vmem:[%s5760_s10 + $0x10] sm:$0xff] }
 0x4ed   :  { %2377 = vmatpush.msrb.mxu3 %v2172_v50  ;;  %v2431_v50 = vld [vmem:[%s5760_s10] sm:$0xff] }
 0x4ee   :  { %2344 = vmatpush.msra.mxu2 %v2221_v46  ;;  %2396 = vmatpush.msra.mxu1 %v2206_v54  ;;  %v2190_v46 = vld [vmem:[%s5759_s8 + $0x208] sm:$0xff]  ;;  %v2453_v54 = vld [vmem:[%s5760_s10 + $0xb0] sm:$0xff] }
 0x4ef   :  { %2378 = vmatpush.msrb.mxu3 %v2170_v36  ;;  %v2448_v36 = vld [vmem:[%s5760_s10 + $0x88] sm:$0xff] }
 0x4f0   :  { %2409 = vmatpush.msrb.mxu2 %v2252_v14  ;;  %2397 = vmatpush.msra.mxu1 %v2204_v62  ;;  %v2446_v14 = vld [vmem:[%s5760_s10 + $0x78] sm:$0xff]  ;;  %v2451_v62 = vld [vmem:[%s5760_s10 + $0xa0] sm:$0xff] }
 0x4f1   :  { %2379 = vmatpush.msrb.mxu3 %v2168_v26  ;;  %v2521_v26 = vld [vmem:[%s5762_s12 + $0x68] sm:$0xff] }
 0x4f2   :  { %2410 = vmatpush.msrb.mxu2 %v2250_v56  ;;  %2398 = vmatpush.msra.mxu1 %v2202_v21  ;;  %v2447_v21 = vld [vmem:[%s5760_s10 + $0x80] sm:$0xff] }
 0x4f3   :  { %2380 = vmatpush.msrb.mxu3 %v2166_v8  ;;  %v2518_v8 = vld [vmem:[%s5762_s12 + $0x50] sm:$0xff] }
 0x4f4   :  { %2411 = vmatpush.msrb.mxu2 %v2248_v52  ;;  %v2444_v52 = vld [vmem:[%s5760_s10 + $0x68] sm:$0xff] }
 0x4f5   :  { %2381 = vmatpush.msrb.mxu3 %v2164_v1 }
 0x4f6   :  { %2412 = vmatpush.msrb.mxu2 %v2246_v29  ;;  %v2442_v29 = vld [vmem:[%s5760_s10 + $0x58] sm:$0xff] }
 0x4f7   :  { %2382 = vmatpush.msrb.mxu3 %v2162_v32 }
 0x4f8   :  { %2413 = vmatpush.msrb.mxu2 %v2244_v30  ;;  %v2438_v30 = vld [vmem:[%s5760_s10 + $0x38] sm:$0xff] }
 0x4f9   :  { %2383 = vmatpush.msrb.mxu3 %v2160_v48 }
 0x4fa   :  { %v2043_v39 = vpop.permute.xlu0 %2042  ;;  %2414 = vmatpush.msrb.mxu2 %v2242_v25  ;;  %v2436_v25 = vld [vmem:[%s5760_s10 + $0x28] sm:$0xff] }
 0x4fb   :  { %2045 = vst.msk [vmem:[#allocation2 + $0x2] sm:$0x1] %vm2030_vm2, %v2043_v39  ;;  %v2125_v39 = vld [vmem:[%s5759_s8] sm:$0xff]  ;;  %2384 = vmatpush.msrb.mxu3 %v2158_v11 }
 0x4fc   :  { %2284 = vmatpush.msrb.mxu0 %v2125_v39  ;;  %2415 = vmatpush.msrb.mxu2 %v2240_v12  ;;  %v2224_v39 = vld [vmem:[%s5759_s8 + $0x318] sm:$0xff] }
 0x4fd   :  { %v2434_v12 = vld [vmem:[%s5760_s10 + $0x18] sm:$0xff] }
 0x4fe   :  { %2349 = vmatpush.msra.mxu0 %v2156_v5  ;;  %v2222_v5 = vld [vmem:[%s5759_s8 + $0x308] sm:$0xff] }
 0x500   :  { %2350 = vmatpush.msra.mxu0 %v2154_v18  ;;  %v2462_v18 = vld [vmem:[%s5760_s10 + $0xf8] sm:$0xff] }
 0x502   :  { %2351 = vmatpush.msra.mxu0 %v2152_v42 }
 0x504   :  { %2352 = vmatpush.msra.mxu0 %v2150_v4  ;;  %v2460_v4 = vld [vmem:[%s5760_s10 + $0xe8] sm:$0xff] }
 0x506   :  { %2353 = vmatpush.msra.mxu0 %v2148_v24  ;;  %v2441_v24 = vld [vmem:[%s5760_s10 + $0x50] sm:$0xff] }
 0x508   :  { %2354 = vmatpush.msra.mxu0 %v2146_v51  ;;  %v2458_v51 = vld [vmem:[%s5760_s10 + $0xd8] sm:$0xff] }
 0x50a   :  { %v2057_v22 = vpop.permute.xlu1 %2056  ;;  %2355 = vmatpush.msra.mxu0 %v2144_v34  ;;  %v2456_v34 = vld [vmem:[%s5760_s10 + $0xc8] sm:$0xff] }
 0x50b   :  { %2059 = vst.msk [vmem:[#allocation2 + $0x4] sm:$0x1] %vm2030_vm2, %v2057_v22  ;;  %v2238_v22 = vld [vmem:[%s5759_s8 + $0x388] sm:$0xff] }
 0x50c   :  { %2356 = vmatpush.msra.mxu0 %v2142_v43  ;;  %2416 = vmatpush.msrb.mxu2 %v2238_v22  ;;  %v2454_v43 = vld [vmem:[%s5760_s10 + $0xb8] sm:$0xff]  ;;  %v2432_v22 = vld [vmem:[%s5760_s10 + $0x8] sm:$0xff] }
 0x50e   :  { %2357 = vmatpush.msra.mxu0 %v2140_v63  ;;  %2417 = vmatpush.msrb.mxu2 %v2236_v13  ;;  %v2452_v63 = vld [vmem:[%s5760_s10 + $0xa8] sm:$0xff]  ;;  %v2450_v13 = vld [vmem:[%s5760_s10 + $0x98] sm:$0xff] }
 0x510   :  { %2358 = vmatpush.msra.mxu0 %v2138_v7  ;;  %2418 = vmatpush.msrb.mxu2 %v2234_v38  ;;  %v2449_v7 = vld [vmem:[%s5760_s10 + $0x90] sm:$0xff]  ;;  %v2523_v38 = vld [vmem:[%s5762_s12 + $0x78] sm:$0xff] }
 0x512   :  { %v2093_v35 = vpop.permute.xlu2 %2092  ;;  %2359 = vmatpush.msra.mxu0 %v2136_v6  ;;  %v2522_v6 = vld [vmem:[%s5762_s12 + $0x70] sm:$0xff] }
 0x513   :  { %2095 = vst.msk [vmem:[#allocation2 + $0x3] sm:$0x1] %vm2030_vm2, %v2093_v35  ;;  %v2200_v35 = vld [vmem:[%s5759_s8 + $0x258] sm:$0xff] }
 0x514   :  { %2399 = vmatpush.msra.mxu1 %v2200_v35  ;;  %2360 = vmatpush.msra.mxu0 %v2134_v0  ;;  %v2520_v35 = vld [vmem:[%s5762_s12 + $0x60] sm:$0xff] }
 0x515   :  { %v2253_v0 = vld [vmem:[%s5763_s9] sm:$0x3] }
 0x516   :  { %2400 = vmatpush.msra.mxu1 %v2198_v41  ;;  %2361 = vmatpush.msra.mxu0 %v2132_v2  ;;  %v2255_v41 = vperm.slane %v2253_v0, 0  ;;  %v2256_v32 = vperm.slane %v2253_v0, 1 }
 0x518   :  { %2401 = vmatpush.msra.mxu1 %v2196_v3  ;;  %2362 = vmatpush.msra.mxu0 %v2130_v57 }
 0x51a   :  { %v2071_v60 = vpop.permute.xlu1 %2070  ;;  %2402 = vmatpush.msra.mxu1 %v2194_v61  ;;  %2363 = vmatpush.msra.mxu0 %v2128_v44 }
 0x51b   :  { %2073 = vst.msk [vmem:[#allocation2 + $0x6] sm:$0x1] %vm2030_vm2, %v2071_v60  ;;  %v2232_v60 = vld [vmem:[%s5759_s8 + $0x358] sm:$0xff] }
 0x51c   :  { %2419 = vmatpush.msrb.mxu2 %v2232_v60  ;;  %2403 = vmatpush.msra.mxu1 %v2192_v10  ;;  %v2519_v60 = vld [vmem:[%s5762_s12 + $0x58] sm:$0xff] }
 0x51d   :  { %2364 = vmatpush.msra.mxu0 %v2126_v9 }
 0x51e   :  { %2420 = vmatpush.msrb.mxu2 %v2230_v58  ;;  %2404 = vmatpush.msra.mxu1 %v2190_v46 }
 0x520   :  { %2421 = vmatpush.msrb.mxu2 %v2228_v27 }
 0x522   :  { %2422 = vmatpush.msrb.mxu2 %v2226_v20 }
 0x524   :  { %2423 = vmatpush.msrb.mxu2 %v2224_v39 }
 0x526   :  { %2424 = vmatpush.msrb.mxu2 %v2222_v5 }
 0x53a   :  { %v2107_v53 = vpop.permute.xlu0 %2106 }
 0x53b   :  { %2109 = vst.msk [vmem:[#allocation2 + $0x5] sm:$0x1] %vm2030_vm2, %v2107_v53 }
 0x54a   :  { %v2121_v16 = vpop.permute.xlu1 %2120 }
 0x54b   :  { %2123 = vst.msk [vmem:[#allocation2 + $0x7] sm:$0x1] %vm2030_vm2, %v2121_v16 }
 0x552   :  { %v2124_v37 = vld [vmem:[#allocation2] sm:$0xff] }
 0x553   :  { %2260 = vst [vmem:[#allocation1] ss:$4 sm:$0xff] %v2124_v37  ;;  %v2517_v37 = vld [vmem:[%s5762_s12 + $0x48] sm:$0xff] }
 0x55a   :  { %v2261_v15 = vld.sshfl [vmem:[#allocation1] sm:$0xff pattern:$0x73625140]  ;;  %v2262_v19 = vld.sshfl [vmem:[#allocation1 + $0x8] sm:$0xff pattern:$0x73625140] }
 0x55b   :  { %2285 = vmatmul.f32.vlgmr.msrb.gmra.mxu0 %v2261_v15  ;;  %2305 = vmatmul.f32.vlgmr.msra.gmra.mxu3 %v2262_v19  ;;  %v2263_v56 = vld.sshfl [vmem:[#allocation1 + $0x10] sm:$0xff pattern:$0x73625140]  ;;  %v2264_v42 = vld.sshfl [vmem:[#allocation1 + $0x18] sm:$0xff pattern:$0x73625140] }
 0x55c   :  { %2325 = vmatmul.f32.vlgmr.msrb.gmra.mxu1 %v2263_v56  ;;  %2345 = vmatmul.f32.vlgmr.msra.gmra.mxu2 %v2264_v42 }
 0x55d   :  { %2467 = vmatpush.msrb.mxu0 %v2446_v14  ;;  %2487 = vmatpush.msra.mxu3 %v2462_v18  ;;  %v2516_v14 = vld [vmem:[%s5762_s12 + $0x40] sm:$0xff]  ;;  %v2515_v18 = vld [vmem:[%s5762_s12 + $0x38] sm:$0xff] }
 0x55e   :  { %2528 = vmatpush.msrb.mxu1 %v2523_v38 }
 0x55f   :  { %2468 = vmatpush.msrb.mxu0 %v2445_v40  ;;  %2488 = vmatpush.msra.mxu3 %v2461_v17  ;;  %v2510_v40 = vld [vmem:[%s5762_s12 + $0x10] sm:$0xff]  ;;  %v2509_v17 = vld [vmem:[%s5762_s12 + $0x8] sm:$0xff] }
 0x560   :  { %2529 = vmatpush.msrb.mxu1 %v2522_v6 }
 0x561   :  { %2469 = vmatpush.msrb.mxu0 %v2444_v52  ;;  %2489 = vmatpush.msra.mxu3 %v2460_v4  ;;  %v2508_v52 = vld [vmem:[%s5762_s12] sm:$0xff]  ;;  %v2556_v4 = vld [vmem:[%s5765_s14 + $0x38] sm:$0xff] }
 0x562   :  { %2530 = vmatpush.msrb.mxu1 %v2521_v26  ;;  %2572 = vmatpush.msra.mxu2 %v2556_v4 }
 0x563   :  { %2365 = vmatmul.f32.vlgmr.msra.gmra.mxu0 %v2261_v15  ;;  %2385 = vmatmul.f32.vlgmr.msrb.gmra.mxu3 %v2262_v19  ;;  %v2514_v15 = vld [vmem:[%s5762_s12 + $0x30] sm:$0xff]  ;;  %v2513_v19 = vld [vmem:[%s5762_s12 + $0x28] sm:$0xff] }
 0x564   :  { %2405 = vmatmul.f32.vlgmr.msra.gmra.mxu1 %v2263_v56  ;;  %2425 = vmatmul.f32.vlgmr.msrb.gmra.mxu2 %v2264_v42  ;;  %v2512_v56 = vld [vmem:[%s5762_s12 + $0x20] sm:$0xff]  ;;  %v2511_v42 = vld [vmem:[%s5762_s12 + $0x18] sm:$0xff] }
 0x565   :  { %2470 = vmatpush.msrb.mxu0 %v2443_v23  ;;  %2490 = vmatpush.msra.mxu3 %v2459_v49  ;;  %v2555_v23 = vld [vmem:[%s5765_s14 + $0x30] sm:$0xff]  ;;  %v2554_v49 = vld [vmem:[%s5765_s14 + $0x28] sm:$0xff] }
 0x566   :  { %2531 = vmatpush.msrb.mxu1 %v2520_v35  ;;  %2573 = vmatpush.msra.mxu2 %v2555_v23 }
 0x567   :  { %2471 = vmatpush.msrb.mxu0 %v2442_v29  ;;  %2491 = vmatpush.msra.mxu3 %v2458_v51  ;;  %v2553_v29 = vld [vmem:[%s5765_s14 + $0x20] sm:$0xff] }
 0x568   :  { %2532 = vmatpush.msrb.mxu1 %v2519_v60  ;;  %2574 = vmatpush.msra.mxu2 %v2554_v49 }
 0x569   :  { %2472 = vmatpush.msrb.mxu0 %v2441_v24  ;;  %2492 = vmatpush.msra.mxu3 %v2457_v55  ;;  %v2552_v24 = vld [vmem:[%s5765_s14 + $0x18] sm:$0xff] }
 0x56a   :  { %2533 = vmatpush.msrb.mxu1 %v2518_v8  ;;  %2575 = vmatpush.msra.mxu2 %v2553_v29 }
 0x56b   :  { %2473 = vmatpush.msrb.mxu0 %v2440_v59  ;;  %2493 = vmatpush.msra.mxu3 %v2456_v34  ;;  %v3300_v59 = vld [vmem:[%s5761_s11] ss:$0 sm:$0xff]  ;;  %v2550_v34 = vld [vmem:[%s5765_s14 + $0x8] sm:$0xff] }
 0x56c   :  { %2534 = vmatpush.msrb.mxu1 %v2517_v37  ;;  %2576 = vmatpush.msra.mxu2 %v2552_v24 }
 0x56d   :  { %2474 = vmatpush.msrb.mxu0 %v2439_v45  ;;  %2494 = vmatpush.msra.mxu3 %v2455_v31  ;;  %v2588_v31 = vld [vmem:[%s5767_s16 + $0x18] sm:$0xff] }
 0x56e   :  { %2535 = vmatpush.msrb.mxu1 %v2516_v14 }
 0x56f   :  { %2475 = vmatpush.msrb.mxu0 %v2438_v30  ;;  %2495 = vmatpush.msra.mxu3 %v2454_v43  ;;  %v3301_v43 = vld [vmem:[%s5764_s13] ss:$0 sm:$0xff] }
 0x570   :  { %2536 = vmatpush.msrb.mxu1 %v2515_v18 }
 0x571   :  { %2476 = vmatpush.msrb.mxu0 %v2437_v33  ;;  %2496 = vmatpush.msra.mxu3 %v2453_v54 }
 0x572   :  { %2537 = vmatpush.msrb.mxu1 %v2514_v15 }
 0x573   :  { %2477 = vmatpush.msrb.mxu0 %v2436_v25  ;;  %2497 = vmatpush.msra.mxu3 %v2452_v63  ;;  %v2551_v25 = vld [vmem:[%s5765_s14 + $0x10] sm:$0xff]  ;;  %v2586_v63 = vld [vmem:[%s5767_s16 + $0x8] sm:$0xff] }
 0x574   :  { %2538 = vmatpush.msrb.mxu1 %v2513_v19  ;;  %2577 = vmatpush.msra.mxu2 %v2551_v25 }
 0x575   :  { %2478 = vmatpush.msrb.mxu0 %v2435_v47  ;;  %2498 = vmatpush.msra.mxu3 %v2451_v62  ;;  %v2549_v47 = vld [vmem:[%s5765_s14] sm:$0xff]  ;;  %v23_v62 = vstv %s5768_s17 }
 0x576   :  { %2539 = vmatpush.msrb.mxu1 %v2512_v56  ;;  %2578 = vmatpush.msra.mxu2 %v2550_v34  ;;  %24 = vst [vmem:[#allocation3] sm:$0x1] %v23_v62 }
 0x577   :  { %2479 = vmatpush.msrb.mxu0 %v2434_v12  ;;  %2499 = vmatpush.msra.mxu3 %v2450_v13  ;;  %v2587_v12 = vld [vmem:[%s5767_s16 + $0x10] sm:$0xff]  ;;  %v3302_v13 = vld [vmem:[%s5766_s15] ss:$0 sm:$0xff] }
 0x578   :  { %2540 = vmatpush.msrb.mxu1 %v2511_v42  ;;  %2579 = vmatpush.msra.mxu2 %v2549_v47 }
 0x579   :  { %2480 = vmatpush.msrb.mxu0 %v2433_v28  ;;  %2500 = vmatpush.msra.mxu3 %v2449_v7 }
 0x57a   :  { %2541 = vmatpush.msrb.mxu1 %v2510_v40 }
 0x57b   :  { %2481 = vmatpush.msrb.mxu0 %v2432_v22  ;;  %2501 = vmatpush.msra.mxu3 %v2448_v36 }
 0x57c   :  { %2542 = vmatpush.msrb.mxu1 %v2509_v17 }
 0x57d   :  { %2482 = vmatpush.msrb.mxu0 %v2431_v50  ;;  %2502 = vmatpush.msra.mxu3 %v2447_v21  ;;  %v2585_v50 = vld [vmem:[%s5767_s16] sm:$0xff]  ;;  %v3303_v38 = vld [vmem:[#allocation3] ss:$0 sm:$0xff] }
 0x57e   :  { %2543 = vmatpush.msrb.mxu1 %v2508_v52 }
 0x57f   :  { %2609 = vmatpush.msra.mxu0 %v2588_v31 }
 0x581   :  { %2610 = vmatpush.msra.mxu0 %v2587_v12 }
 0x583   :  { %2611 = vmatpush.msra.mxu0 %v2586_v63 }
 0x585   :  { %2612 = vmatpush.msra.mxu0 %v2585_v50 }
 0x5d8   :  { %v2286_v53 = vpop.f32.mrf.mxu0 }
 0x5d9   :  { %v2287_v58 = vadd.f32 %v2286_v53, %v2255_v41  ;;  %v2326_v2 = vpop.f32.mrf.mxu1 }
 0x5de   :  { %v2306_v1 = vpop.f32.mrf.mxu3 }
 0x5df   :  { %v2307_v3 = vadd.f32 %v2306_v1, %v2287_v58  ;;  %v2346_v27 = vpop.f32.mrf.mxu2 }
 0x5e0   :  { %v2366_v61 = vpop.f32.mrf.mxu0 }
 0x5e1   :  { %v2327_v57 = vadd.f32 %v2326_v2, %v2307_v3  ;;  %v2367_v48 = vadd.f32 %v2366_v61, %v2256_v32  ;;  %v2406_v9 = vpop.f32.mrf.mxu1 }
 0x5e3   :  { %v2347_v20 = vadd.f32 %v2346_v27, %v2327_v57 }
 0x5e5   :  { %v2429_v44 = vmax.f32 %v2347_v20, 0.0 }
 0x5e6   :  { %v2386_v10 = vpop.f32.mrf.mxu3 }
 0x5e7   :  { %v2387_v39 = vadd.f32 %v2386_v10, %v2367_v48  ;;  %2483 = vmatmul.f32.vlgmr.msrb.gmra.mxu0 %v2429_v44  ;;  %v2426_v46 = vpop.f32.mrf.mxu2 }
 0x5e9   :  { %v2407_v11 = vadd.f32 %v2406_v9, %v2387_v39 }
 0x5eb   :  { %v2427_v5 = vadd.f32 %v2426_v46, %v2407_v11 }
 0x5ed   :  { %v2430_v16 = vmax.f32 %v2427_v5, 0.0 }
 0x5ef   :  { %2503 = vmatmul.f32.vlgmr.msra.gmra.mxu3 %v2430_v16 }
 0x664   :  { %v2484_v45 = vpop.f32.mrf.mxu0 }
 0x665   :  { %v2485_v30 = vadd.f32 %v3300_v59, %v2484_v45 }
 0x672   :  { %v2504_v51 = vpop.f32.mrf.mxu3 }
 0x673   :  { %v2505_v33 = vadd.f32 %v2504_v51, %v2485_v30 }
 0x675   :  { %v2507_v55 = vmax.f32 %v2505_v33, 0.0 }
 0x677   :  { %2544 = vmatmul.f32.vlgmr.msrb.gmra.mxu1 %v2507_v55 }
 0x6f4   :  { %v2545_v28 = vpop.f32.mrf.mxu1 }
 0x6f5   :  { %v2546_v54 = vadd.f32 %v3301_v43, %v2545_v28 }
 0x6f7   :  { %v2548_v22 = vmax.f32 %v2546_v54, 0.0 }
 0x6f9   :  { %3171 = vmatmul.msk.f32.vlgmr.msra.gmra.mxu2 %vm1114_vm0, %v2548_v22 }
 0x77c   :  { %v2581_v7 = vpop.f32.mrf.mxu2 }
 0x77d   :  { %v2582_v36 = vadd.f32 %v3302_v13, %v2581_v7 }
 0x77f   :  { %v2584_v21 = vmax.f32 %v2582_v36, 0.0 }
 0x781   :  { %3172 = vmatmul.msk.f32.vlgmr.msra.gmra.mxu0 %vm2593_vm3, %v2584_v21 }
 0x7fe   :  { %v2614_v6 = vpop.f32.mrf.mxu0 }
 0x7ff   :  { %v2615_v26 = vadd.f32 %v3303_v38, %v2614_v6 }
 0x801   :  { %2618 = vst.msk [vmem:[%s5769_s18] sm:$0x3] %vm2617_vm4, %v2615_v26 }

</bundles_post_ra>
